<compile_context>
chip_gen: v6e
topology: v6e:2x2x1
jax: 0.10.0
libtpu: 0.0.40
codegen_flags: <defaults>
</compile_context>

<pallas_src>
import functools

import jax
import jax.numpy as jnp
from jax.experimental import pallas as pl
from jax.experimental.pallas import tpu as pltpu

# ----------------------------- model config --------------------------------
NUM_CHANNELS = 3
IMAGE_SIZE = 32
FH = FW = 8                       # patch size
GH = GW = IMAGE_SIZE // FH        # patch grid
NUM_PATCHES = GH * GW             # 16
PATCH_DIM = NUM_CHANNELS * FH * FW  # 192
HIDDEN = 32
NUM_HEADS = 4
HEAD_DIM = HIDDEN // NUM_HEADS
FF_DIM = 64
NUM_LAYERS = 2
NUM_CLASSES = 10
NUM_CLASSES_PAD = 128             # lane-dense padded head output
SEQ_LEN = NUM_PATCHES + 1         # 17 valid tokens (patches + CLS)
S_PAD = 24                        # sequence padded to 3x8 sublanes
CLS_ROW = NUM_PATCHES             # CLS lives at row 16 of each 24-row block
LN_EPS = 1e-6
DTYPE = jnp.float32
WDTYPE = jnp.bfloat16             # matmul-operand dtype


# ----------------------------- kernel helpers -------------------------------
def _layer_norm(x, gamma, beta):
    # x: (rows, D) f32; gamma/beta: (1, D) f32
    mu = jnp.mean(x, axis=-1, keepdims=True)
    var = jnp.mean((x - mu) ** 2, axis=-1, keepdims=True)
    return (x - mu) * jax.lax.rsqrt(var + LN_EPS) * gamma + beta


def _gelu(x):
    # TODO(synk): reference uses exact erf-GELU; tanh approximation used here
    # (EUP-friendly transcendental; numerically very close).
    c = 0.7978845608028654  # sqrt(2/pi)
    return 0.5 * x * (1.0 + jnp.tanh(c * (x + 0.044715 * x * x * x)))


# ----------------------------- fused ViT kernel ------------------------------
def vit_kernel(patches_ref,                       # (IB*S_PAD, P)  bf16
               pw_ref,                            # (P, D)         bf16
               base_ref,                          # (IB*S_PAD, D)  f32
               norms_ref,                         # (L, 4, D)      f32
               wqkv_ref, bqkv_ref,                # (L, D, 3D) bf16, (L,1,3D) f32
               wo_ref, bo_ref,                    # (L, D, D) bf16, (L,1,D) f32
               w1_ref, b1_ref,                    # (L, D, F) bf16, (L,1,F) f32
               w2_ref, b2_ref,                    # (L, F, D) bf16, (L,1,D) f32
               hln_ref,                           # (2, D) f32
               fcw_ref, fcb_ref,                  # (D, 128) bf16, (1, 128) f32
               out_ref,                           # (IB, 128) f32
               *, ib):
    m = ib * S_PAD
    scale = 1.0 / (HEAD_DIM ** 0.5)

    # Additive key mask: columns >= SEQ_LEN within each image block are pad.
    col = jax.lax.broadcasted_iota(jnp.int32, (1, 1, S_PAD), 2)
    kmask = jnp.where(col < SEQ_LEN, 0.0, -1e30).astype(jnp.float32)

    # ---- patch embedding; CLS token + positional embedding + patch bias are
    #      folded into the precomputed base slab (pad rows end up exactly 0).
    x = jnp.dot(patches_ref[...], pw_ref[...],
                preferred_element_type=jnp.float32) + base_ref[...]   # (m, D)

    # ---- transformer layers (stacked resident weights, static unroll L=2) ----
    for l in range(NUM_LAYERS):
        norms = norms_ref[l]                      # (4, D)

        # --- multi-headed self-attention with fused QKV projection ---
        h = _layer_norm(x, norms[0:1, :], norms[1:2, :])
        qkv = jnp.dot(h.astype(WDTYPE), wqkv_ref[l],
                      preferred_element_type=jnp.float32) + bqkv_ref[l]
        qkv3 = qkv.reshape(ib, S_PAD, 3 * HIDDEN)       # per-image view

        heads = []
        for hh in range(NUM_HEADS):               # static unroll (4 heads)
            lo = hh * HEAD_DIM
            qh = qkv3[:, :, lo:lo + HEAD_DIM].astype(WDTYPE)
            kh = qkv3[:, :, HIDDEN + lo:HIDDEN + lo + HEAD_DIM].astype(WDTYPE)
            vh = qkv3[:, :, 2 * HIDDEN + lo:2 * HIDDEN + lo + HEAD_DIM].astype(WDTYPE)
            # per-image batched scores: (IB, S, S)
            s = jax.lax.dot_general(
                qh, kh, (((2,), (2,)), ((0,), (0,))),
                preferred_element_type=jnp.float32) * scale + kmask
            s = s - jnp.max(s, axis=-1, keepdims=True)
            p = jnp.exp(s)
            p = p * pl.reciprocal(jnp.sum(p, axis=-1, keepdims=True),
                                  approx=True)
            heads.append(jax.lax.dot_general(
                p.astype(WDTYPE), vh, (((2,), (1,)), ((0,), (0,))),
                preferred_element_type=jnp.float32))        # (IB, S, Hd)
        attn = jnp.concatenate(heads, axis=-1).reshape(m, HIDDEN)
        x = x + jnp.dot(attn.astype(WDTYPE), wo_ref[l],
                        preferred_element_type=jnp.float32) + bo_ref[l]

        # --- position-wise feed forward ---
        h = _layer_norm(x, norms[2:3, :], norms[3:4, :])
        ff = _gelu(jnp.dot(h.astype(WDTYPE), w1_ref[l],
                           preferred_element_type=jnp.float32) + b1_ref[l])
        x = x + jnp.dot(ff.astype(WDTYPE), w2_ref[l],
                        preferred_element_type=jnp.float32) + b2_ref[l]

    # ---- classification head on the CLS row of each image (8-aligned rows) --
    cls_rows = [x[i * S_PAD + CLS_ROW:i * S_PAD + CLS_ROW + 1, :]
                for i in range(ib)]
    cls_mat = jnp.concatenate(cls_rows, axis=0)            # (IB, D)
    hln = hln_ref[...]
    cls_n = _layer_norm(cls_mat, hln[0:1, :], hln[1:2, :])
    out_ref[...] = (jnp.dot(cls_n.astype(WDTYPE), fcw_ref[...],
                            preferred_element_type=jnp.float32) + fcb_ref[...])


# ----------------------------- pallas_call wrapper ---------------------------
def _const_spec(shape):
    nd = len(shape)

    def imap(g):
        return (0,) * nd

    return pl.BlockSpec(shape, imap)


@jax.jit
def vit_forward(images, params):
    """images: (B, C, H, W) NCHW float32 -> logits (B, NUM_CLASSES)."""
    B, C, H, W = images.shape
    gh, gw = H // FH, W // FW

    # >= 2 grid steps when possible (keeps both v7x TensorCores busy); all
    # IB = B/num_steps images of a step are processed as one row slab.
    num_steps = 2 if (B % 2 == 0 and B >= 2) else 1
    ib = B // num_steps

    # Patch extraction == Conv2d(kernel=(FH,FW), stride=(FH,FW)) unfolded,
    # columns ordered (c, fh, fw) to match patch_w. Pad each image to S_PAD
    # patch rows (pad rows are zero -> their embed output is exactly patch_b,
    # cancelled by the base slab below).
    patches = (images.reshape(B, C, gh, FH, gw, FW)
               .transpose(0, 2, 4, 1, 3, 5)
               .reshape(B, gh * gw, C * FH * FW))
    patches = jnp.pad(patches, ((0, 0), (0, S_PAD - NUM_PATCHES), (0, 0)))
    patches = patches.reshape(num_steps, ib * S_PAD, PATCH_DIM).astype(WDTYPE)

    # Base slab per image block (S_PAD, D):
    #   rows 0..15 : pos[1:17] + patch_b         (patch tokens)
    #   row  16    : class_token + pos[0]        (CLS token)
    #   rows 17..23: 0                            (pad rows stay zero)
    pos = params["pos_embedding"]
    base24 = jnp.concatenate(
        [pos[1:SEQ_LEN] + params["patch_b"],
         params["class_token"] + pos[0:1],
         jnp.zeros((S_PAD - SEQ_LEN, HIDDEN), DTYPE)], axis=0)
    base_slab = jnp.tile(base24, (ib, 1))                   # (ib*S_PAD, D)

    weights = (params["patch_w"], base_slab, params["norms"], params["wqkv"],
               params["bqkv"], params["wo"], params["bo"], params["w1"],
               params["b1"], params["w2"], params["b2"], params["head_ln"],
               params["fc_w_pad"], params["fc_b_pad"])

    kernel = functools.partial(vit_kernel, ib=ib)

    out = pl.pallas_call(
        kernel,
        out_shape=jax.ShapeDtypeStruct((num_steps, ib, NUM_CLASSES_PAD), DTYPE),
        grid_spec=pltpu.PrefetchScalarGridSpec(
            num_scalar_prefetch=0,
            grid=(num_steps,),
            in_specs=[pl.BlockSpec((None, ib * S_PAD, PATCH_DIM),
                                   lambda g: (g, 0, 0))]
                     + [_const_spec(w.shape) for w in weights],
            out_specs=pl.BlockSpec((None, ib, NUM_CLASSES_PAD),
                                   lambda g: (g, 0, 0))),
        compiler_params=pltpu.CompilerParams(
            dimension_semantics=("parallel",)),
    )(patches, *weights)

    return out.reshape(B, NUM_CLASSES_PAD)[:, :NUM_CLASSES]


# ----------------------------- deterministic init ---------------------------
def init_params(key):
    k_pw, k_pb, k_pos, k_fc, k_layers = jax.random.split(key, 5)

    def dense(k, shape, scale=0.02):
        return scale * jax.random.normal(k, shape, DTYPE)

    wq_l, wk_l, wv_l, wo_l, w1_l, w2_l = [], [], [], [], [], []
    layer_keys = jax.random.split(k_layers, NUM_LAYERS)
    for i in range(NUM_LAYERS):
        lk = jax.random.split(layer_keys[i], 6)
        wq_l.append(dense(lk[0], (HIDDEN, HIDDEN)))
        wk_l.append(dense(lk[1], (HIDDEN, HIDDEN)))
        wv_l.append(dense(lk[2], (HIDDEN, HIDDEN)))
        wo_l.append(dense(lk[3], (HIDDEN, HIDDEN)))
        w1_l.append(dense(lk[4], (HIDDEN, FF_DIM)))
        w2_l.append(dense(lk[5], (FF_DIM, HIDDEN)))

    ones = jnp.ones((NUM_LAYERS, 1, HIDDEN), DTYPE)
    zeros = jnp.zeros((NUM_LAYERS, 1, HIDDEN), DTYPE)

    # NOTE: module zero-inits fc; use small deterministic random instead so
    # the output is non-trivial.
    fc_w = dense(k_fc, (HIDDEN, NUM_CLASSES))
    fc_w_pad = jnp.zeros((HIDDEN, NUM_CLASSES_PAD), DTYPE)
    fc_w_pad = fc_w_pad.at[:, :NUM_CLASSES].set(fc_w)

    params = {
        # conv weight (D, C, FH, FW) pre-flattened to (C*FH*FW, D), bf16
        "patch_w": dense(k_pw, (PATCH_DIM, HIDDEN)).astype(WDTYPE),
        "patch_b": dense(k_pb, (1, HIDDEN), scale=1e-6),
        "class_token": jnp.zeros((1, HIDDEN), DTYPE),            # init 0
        "pos_embedding": dense(k_pos, (SEQ_LEN, HIDDEN)),        # std 0.02
        # per-layer LN params packed as (L, 4, D): [ln1g, ln1b, ln2g, ln2b]
        "norms": jnp.concatenate([ones, zeros, ones, zeros], axis=1),
        # fused QKV weights (bf16) / biases (f32)
        "wqkv": jnp.stack([jnp.concatenate([q, k, v], axis=-1)
                           for q, k, v in zip(wq_l, wk_l, wv_l)]).astype(WDTYPE),
        "bqkv": jnp.zeros((NUM_LAYERS, 1, 3 * HIDDEN), DTYPE),
        "wo": jnp.stack(wo_l).astype(WDTYPE),
        "bo": jnp.zeros((NUM_LAYERS, 1, HIDDEN), DTYPE),
        "w1": jnp.stack(w1_l).astype(WDTYPE),
        "b1": jnp.zeros((NUM_LAYERS, 1, FF_DIM), DTYPE),
        "w2": jnp.stack(w2_l).astype(WDTYPE),
        "b2": jnp.zeros((NUM_LAYERS, 1, HIDDEN), DTYPE),
        # head LayerNorm (gamma, beta) and lane-padded fc
        "head_ln": jnp.stack([jnp.ones((HIDDEN,), DTYPE),
                              jnp.zeros((HIDDEN,), DTYPE)]),
        "fc_w_pad": fc_w_pad.astype(WDTYPE),
        "fc_b_pad": jnp.zeros((1, NUM_CLASSES_PAD), DTYPE),
    }
    return params


# ----------------------------- main ------------------------------------------
if __name__ == "__main__":
    B = 8
    key = jax.random.PRNGKey(0)
    k_img, k_param = jax.random.split(key)
    images = jax.random.normal(k_img, (B, NUM_CHANNELS, IMAGE_SIZE, IMAGE_SIZE),
                               DTYPE)
    params = init_params(k_param)

    logits = vit_forward(images, params)
    logits = jax.block_until_ready(logits)

    assert logits.shape == (B, NUM_CLASSES), logits.shape
    assert logits.dtype == DTYPE
    assert bool(jnp.all(jnp.isfinite(logits)))
    print("KERNEL_OK")
</pallas_src>

<mosaic_0001>
module attributes {stable_mosaic.version = 11 : i64} {
  func.func @vit_kernel(%arg0: i32, %arg1: memref<1x96x192xbf16, #tpu.memory_space<vmem>>, %arg2: memref<192x32xbf16, #tpu.memory_space<vmem>>, %arg3: memref<96x32xf32, #tpu.memory_space<vmem>>, %arg4: memref<2x4x32xf32, #tpu.memory_space<vmem>>, %arg5: memref<2x32x96xbf16, #tpu.memory_space<vmem>>, %arg6: memref<2x1x96xf32, #tpu.memory_space<vmem>>, %arg7: memref<2x32x32xbf16, #tpu.memory_space<vmem>>, %arg8: memref<2x1x32xf32, #tpu.memory_space<vmem>>, %arg9: memref<2x32x64xbf16, #tpu.memory_space<vmem>>, %arg10: memref<2x1x64xf32, #tpu.memory_space<vmem>>, %arg11: memref<2x64x32xbf16, #tpu.memory_space<vmem>>, %arg12: memref<2x1x32xf32, #tpu.memory_space<vmem>>, %arg13: memref<2x32xf32, #tpu.memory_space<vmem>>, %arg14: memref<32x128xbf16, #tpu.memory_space<vmem>>, %arg15: memref<1x128xf32, #tpu.memory_space<vmem>>, %arg16: memref<1x4x128xf32, #tpu.memory_space<vmem>>) attributes {dimension_semantics = [#tpu.dimension_semantics<parallel>], iteration_bounds = array<i64: 2>, scalar_prefetch = 0 : i64, scratch_operands = 0 : i64, tpu.core_type = #tpu.core_type<tc>, window_params = [{transform_indices = @transform_0, window_bounds = array<i64: 1, 96, 192>}, {pipeline_mode = #tpu.pipeline_mode<synchronous>, transform_indices = @transform_1, window_bounds = array<i64: 192, 32>}, {pipeline_mode = #tpu.pipeline_mode<synchronous>, transform_indices = @transform_2, window_bounds = array<i64: 96, 32>}, {pipeline_mode = #tpu.pipeline_mode<synchronous>, transform_indices = @transform_3, window_bounds = array<i64: 2, 4, 32>}, {pipeline_mode = #tpu.pipeline_mode<synchronous>, transform_indices = @transform_4, window_bounds = array<i64: 2, 32, 96>}, {pipeline_mode = #tpu.pipeline_mode<synchronous>, transform_indices = @transform_5, window_bounds = array<i64: 2, 1, 96>}, {pipeline_mode = #tpu.pipeline_mode<synchronous>, transform_indices = @transform_6, window_bounds = array<i64: 2, 32, 32>}, {pipeline_mode = #tpu.pipeline_mode<synchronous>, transform_indices = @transform_7, window_bounds = array<i64: 2, 1, 32>}, {pipeline_mode = #tpu.pipeline_mode<synchronous>, transform_indices = @transform_8, window_bounds = array<i64: 2, 32, 64>}, {pipeline_mode = #tpu.pipeline_mode<synchronous>, transform_indices = @transform_9, window_bounds = array<i64: 2, 1, 64>}, {pipeline_mode = #tpu.pipeline_mode<synchronous>, transform_indices = @transform_10, window_bounds = array<i64: 2, 64, 32>}, {pipeline_mode = #tpu.pipeline_mode<synchronous>, transform_indices = @transform_11, window_bounds = array<i64: 2, 1, 32>}, {pipeline_mode = #tpu.pipeline_mode<synchronous>, transform_indices = @transform_12, window_bounds = array<i64: 2, 32>}, {pipeline_mode = #tpu.pipeline_mode<synchronous>, transform_indices = @transform_13, window_bounds = array<i64: 32, 128>}, {pipeline_mode = #tpu.pipeline_mode<synchronous>, transform_indices = @transform_14, window_bounds = array<i64: 1, 128>}, {transform_indices = @transform_15, window_bounds = array<i64: 1, 4, 128>}]} {
    %0 = tpu.iota {dimensions = array<i32: 2>} : vector<1x1x24xi32>
    %c17_i32 = arith.constant 17 : i32
    %1 = vector.broadcast %c17_i32 : i32 to vector<1x1x24xi32>
    %2 = arith.cmpi slt, %0, %1 : vector<1x1x24xi32>
    %cst = arith.constant 0.000000e+00 : f32
    %cst_0 = arith.constant -1.000000e+30 : f32
    %3 = vector.broadcast %cst : f32 to vector<1x1x24xf32>
    %4 = vector.broadcast %cst_0 : f32 to vector<1x1x24xf32>
    %5 = arith.select %2, %3, %4 : vector<1x1x24xi1>, vector<1x1x24xf32>
    %c0 = arith.constant 0 : index
    %c0_1 = arith.constant 0 : index
    %c0_2 = arith.constant 0 : index
    %6 = vector.load %arg1[%c0, %c0_1, %c0_2] : memref<1x96x192xbf16, #tpu.memory_space<vmem>>, vector<1x96x192xbf16>
    %7 = vector.shape_cast %6 : vector<1x96x192xbf16> to vector<96x192xbf16>
    %c0_3 = arith.constant 0 : index
    %c0_4 = arith.constant 0 : index
    %8 = vector.load %arg2[%c0_3, %c0_4] : memref<192x32xbf16, #tpu.memory_space<vmem>>, vector<192x32xbf16>
    %cst_5 = arith.constant dense<0.000000e+00> : vector<96x32xf32>
    %9 = tpu.matmul %7, %8, %cst_5 {dimension_numbers = #tpu.dot_dimension_numbers<[1], [0], [0], [1], [0, 0, 1, 1], [], []>} : vector<96x192xbf16>, vector<192x32xbf16>, vector<96x32xf32> -> vector<96x32xf32>
    %c0_6 = arith.constant 0 : index
    %c0_7 = arith.constant 0 : index
    %10 = vector.load %arg3[%c0_6, %c0_7] : memref<96x32xf32, #tpu.memory_space<vmem>>, vector<96x32xf32>
    %11 = arith.addf %9, %10 : vector<96x32xf32>
    %c0_8 = arith.constant 0 : index
    %c0_9 = arith.constant 0 : index
    %c0_10 = arith.constant 0 : index
    %12 = vector.load %arg4[%c0_8, %c0_9, %c0_10] : memref<2x4x32xf32, #tpu.memory_space<vmem>>, vector<1x4x32xf32>
    %13 = vector.shape_cast %12 : vector<1x4x32xf32> to vector<4x32xf32>
    %14 = vector.extract_strided_slice %13 {offsets = [0, 0], sizes = [1, 32], strides = [1, 1]} : vector<4x32xf32> to vector<1x32xf32>
    %15 = vector.extract_strided_slice %13 {offsets = [1, 0], sizes = [1, 32], strides = [1, 1]} : vector<4x32xf32> to vector<1x32xf32>
    %cst_11 = arith.constant dense<0.000000e+00> : vector<96xf32>
    %16 = vector.multi_reduction <add>, %11, %cst_11 [1] : vector<96x32xf32> to vector<96xf32>
    %17 = vector.shape_cast %16 : vector<96xf32> to vector<96x1xf32>
    %cst_12 = arith.constant 3.200000e+01 : f32
    %18 = vector.broadcast %cst_12 : f32 to vector<96x1xf32>
    %19 = arith.divf %17, %18 : vector<96x1xf32>
    %20 = vector.broadcast %19 : vector<96x1xf32> to vector<96x32xf32>
    %21 = arith.subf %11, %20 : vector<96x32xf32>
    %22 = arith.mulf %21, %21 : vector<96x32xf32>
    %cst_13 = arith.constant dense<0.000000e+00> : vector<96xf32>
    %23 = vector.multi_reduction <add>, %22, %cst_13 [1] : vector<96x32xf32> to vector<96xf32>
    %24 = vector.shape_cast %23 : vector<96xf32> to vector<96x1xf32>
    %cst_14 = arith.constant 3.200000e+01 : f32
    %25 = vector.broadcast %cst_14 : f32 to vector<96x1xf32>
    %26 = arith.divf %24, %25 : vector<96x1xf32>
    %27 = vector.broadcast %19 : vector<96x1xf32> to vector<96x32xf32>
    %28 = arith.subf %11, %27 : vector<96x32xf32>
    %cst_15 = arith.constant 9.99999997E-7 : f32
    %29 = vector.broadcast %cst_15 : f32 to vector<96x1xf32>
    %30 = arith.addf %26, %29 : vector<96x1xf32>
    %31 = math.rsqrt %30 : vector<96x1xf32>
    %32 = vector.broadcast %31 : vector<96x1xf32> to vector<96x32xf32>
    %33 = arith.mulf %28, %32 : vector<96x32xf32>
    %34 = vector.broadcast %14 : vector<1x32xf32> to vector<96x32xf32>
    %35 = arith.mulf %33, %34 : vector<96x32xf32>
    %36 = vector.broadcast %15 : vector<1x32xf32> to vector<96x32xf32>
    %37 = arith.addf %35, %36 : vector<96x32xf32>
    %38 = arith.truncf %37 : vector<96x32xf32> to vector<96x32xbf16>
    %c0_16 = arith.constant 0 : index
    %c0_17 = arith.constant 0 : index
    %c0_18 = arith.constant 0 : index
    %39 = vector.load %arg5[%c0_16, %c0_17, %c0_18] : memref<2x32x96xbf16, #tpu.memory_space<vmem>>, vector<1x32x96xbf16>
    %40 = vector.shape_cast %39 : vector<1x32x96xbf16> to vector<32x96xbf16>
    %cst_19 = arith.constant dense<0.000000e+00> : vector<96x96xf32>
    %41 = tpu.matmul %38, %40, %cst_19 {dimension_numbers = #tpu.dot_dimension_numbers<[1], [0], [0], [1], [0, 0, 1, 1], [], []>} : vector<96x32xbf16>, vector<32x96xbf16>, vector<96x96xf32> -> vector<96x96xf32>
    %c0_20 = arith.constant 0 : index
    %c0_21 = arith.constant 0 : index
    %c0_22 = arith.constant 0 : index
    %42 = vector.load %arg6[%c0_20, %c0_21, %c0_22] : memref<2x1x96xf32, #tpu.memory_space<vmem>>, vector<1x1x96xf32>
    %43 = vector.shape_cast %42 : vector<1x1x96xf32> to vector<1x96xf32>
    %44 = vector.broadcast %43 : vector<1x96xf32> to vector<96x96xf32>
    %45 = arith.addf %41, %44 : vector<96x96xf32>
    %46 = vector.shape_cast %45 : vector<96x96xf32> to vector<4x24x96xf32>
    %47 = vector.extract_strided_slice %46 {offsets = [0, 0, 0], sizes = [4, 24, 8], strides = [1, 1, 1]} : vector<4x24x96xf32> to vector<4x24x8xf32>
    %48 = arith.truncf %47 : vector<4x24x8xf32> to vector<4x24x8xbf16>
    %49 = vector.extract_strided_slice %46 {offsets = [0, 0, 32], sizes = [4, 24, 8], strides = [1, 1, 1]} : vector<4x24x96xf32> to vector<4x24x8xf32>
    %50 = arith.truncf %49 : vector<4x24x8xf32> to vector<4x24x8xbf16>
    %51 = vector.extract_strided_slice %46 {offsets = [0, 0, 64], sizes = [4, 24, 8], strides = [1, 1, 1]} : vector<4x24x96xf32> to vector<4x24x8xf32>
    %52 = arith.truncf %51 : vector<4x24x8xf32> to vector<4x24x8xbf16>
    %cst_23 = arith.constant dense<0.000000e+00> : vector<4x24x24xf32>
    %53 = tpu.matmul %48, %50, %cst_23 {dimension_numbers = #tpu.dot_dimension_numbers<[2], [2], [1], [1], [0, 0, 0, 1, 1, 1], [0], [0]>} : vector<4x24x8xbf16>, vector<4x24x8xbf16>, vector<4x24x24xf32> -> vector<4x24x24xf32>
    %cst_24 = arith.constant 0.353553385 : f32
    %54 = vector.broadcast %cst_24 : f32 to vector<4x24x24xf32>
    %55 = arith.mulf %53, %54 : vector<4x24x24xf32>
    %56 = vector.broadcast %5 : vector<1x1x24xf32> to vector<4x24x24xf32>
    %57 = arith.addf %55, %56 : vector<4x24x24xf32>
    %cst_25 = arith.constant dense<0xFF800000> : vector<4x24xf32>
    %58 = vector.multi_reduction <maximumf>, %57, %cst_25 [2] : vector<4x24x24xf32> to vector<4x24xf32>
    %59 = vector.shape_cast %58 : vector<4x24xf32> to vector<4x24x1xf32>
    %60 = vector.broadcast %59 : vector<4x24x1xf32> to vector<4x24x24xf32>
    %61 = arith.subf %57, %60 : vector<4x24x24xf32>
    %62 = math.exp %61 : vector<4x24x24xf32>
    %cst_26 = arith.constant dense<0.000000e+00> : vector<4x24xf32>
    %63 = vector.multi_reduction <add>, %62, %cst_26 [2] : vector<4x24x24xf32> to vector<4x24xf32>
    %64 = vector.shape_cast %63 : vector<4x24xf32> to vector<4x24x1xf32>
    %65 = tpu.reciprocal %64 {approx = true} : vector<4x24x1xf32> -> vector<4x24x1xf32>
    %66 = vector.broadcast %65 : vector<4x24x1xf32> to vector<4x24x24xf32>
    %67 = arith.mulf %62, %66 : vector<4x24x24xf32>
    %68 = arith.truncf %67 : vector<4x24x24xf32> to vector<4x24x24xbf16>
    %cst_27 = arith.constant dense<0.000000e+00> : vector<4x24x8xf32>
    %69 = tpu.matmul %68, %52, %cst_27 {dimension_numbers = #tpu.dot_dimension_numbers<[2], [1], [1], [2], [0, 0, 0, 1, 1, 2], [0], [0]>} : vector<4x24x24xbf16>, vector<4x24x8xbf16>, vector<4x24x8xf32> -> vector<4x24x8xf32>
    %70 = vector.extract_strided_slice %46 {offsets = [0, 0, 8], sizes = [4, 24, 8], strides = [1, 1, 1]} : vector<4x24x96xf32> to vector<4x24x8xf32>
    %71 = arith.truncf %70 : vector<4x24x8xf32> to vector<4x24x8xbf16>
    %72 = vector.extract_strided_slice %46 {offsets = [0, 0, 40], sizes = [4, 24, 8], strides = [1, 1, 1]} : vector<4x24x96xf32> to vector<4x24x8xf32>
    %73 = arith.truncf %72 : vector<4x24x8xf32> to vector<4x24x8xbf16>
    %74 = vector.extract_strided_slice %46 {offsets = [0, 0, 72], sizes = [4, 24, 8], strides = [1, 1, 1]} : vector<4x24x96xf32> to vector<4x24x8xf32>
    %75 = arith.truncf %74 : vector<4x24x8xf32> to vector<4x24x8xbf16>
    %cst_28 = arith.constant dense<0.000000e+00> : vector<4x24x24xf32>
    %76 = tpu.matmul %71, %73, %cst_28 {dimension_numbers = #tpu.dot_dimension_numbers<[2], [2], [1], [1], [0, 0, 0, 1, 1, 1], [0], [0]>} : vector<4x24x8xbf16>, vector<4x24x8xbf16>, vector<4x24x24xf32> -> vector<4x24x24xf32>
    %cst_29 = arith.constant 0.353553385 : f32
    %77 = vector.broadcast %cst_29 : f32 to vector<4x24x24xf32>
    %78 = arith.mulf %76, %77 : vector<4x24x24xf32>
    %79 = vector.broadcast %5 : vector<1x1x24xf32> to vector<4x24x24xf32>
    %80 = arith.addf %78, %79 : vector<4x24x24xf32>
    %cst_30 = arith.constant dense<0xFF800000> : vector<4x24xf32>
    %81 = vector.multi_reduction <maximumf>, %80, %cst_30 [2] : vector<4x24x24xf32> to vector<4x24xf32>
    %82 = vector.shape_cast %81 : vector<4x24xf32> to vector<4x24x1xf32>
    %83 = vector.broadcast %82 : vector<4x24x1xf32> to vector<4x24x24xf32>
    %84 = arith.subf %80, %83 : vector<4x24x24xf32>
    %85 = math.exp %84 : vector<4x24x24xf32>
    %cst_31 = arith.constant dense<0.000000e+00> : vector<4x24xf32>
    %86 = vector.multi_reduction <add>, %85, %cst_31 [2] : vector<4x24x24xf32> to vector<4x24xf32>
    %87 = vector.shape_cast %86 : vector<4x24xf32> to vector<4x24x1xf32>
    %88 = tpu.reciprocal %87 {approx = true} : vector<4x24x1xf32> -> vector<4x24x1xf32>
    %89 = vector.broadcast %88 : vector<4x24x1xf32> to vector<4x24x24xf32>
    %90 = arith.mulf %85, %89 : vector<4x24x24xf32>
    %91 = arith.truncf %90 : vector<4x24x24xf32> to vector<4x24x24xbf16>
    %cst_32 = arith.constant dense<0.000000e+00> : vector<4x24x8xf32>
    %92 = tpu.matmul %91, %75, %cst_32 {dimension_numbers = #tpu.dot_dimension_numbers<[2], [1], [1], [2], [0, 0, 0, 1, 1, 2], [0], [0]>} : vector<4x24x24xbf16>, vector<4x24x8xbf16>, vector<4x24x8xf32> -> vector<4x24x8xf32>
    %93 = vector.extract_strided_slice %46 {offsets = [0, 0, 16], sizes = [4, 24, 8], strides = [1, 1, 1]} : vector<4x24x96xf32> to vector<4x24x8xf32>
    %94 = arith.truncf %93 : vector<4x24x8xf32> to vector<4x24x8xbf16>
    %95 = vector.extract_strided_slice %46 {offsets = [0, 0, 48], sizes = [4, 24, 8], strides = [1, 1, 1]} : vector<4x24x96xf32> to vector<4x24x8xf32>
    %96 = arith.truncf %95 : vector<4x24x8xf32> to vector<4x24x8xbf16>
    %97 = vector.extract_strided_slice %46 {offsets = [0, 0, 80], sizes = [4, 24, 8], strides = [1, 1, 1]} : vector<4x24x96xf32> to vector<4x24x8xf32>
    %98 = arith.truncf %97 : vector<4x24x8xf32> to vector<4x24x8xbf16>
    %cst_33 = arith.constant dense<0.000000e+00> : vector<4x24x24xf32>
    %99 = tpu.matmul %94, %96, %cst_33 {dimension_numbers = #tpu.dot_dimension_numbers<[2], [2], [1], [1], [0, 0, 0, 1, 1, 1], [0], [0]>} : vector<4x24x8xbf16>, vector<4x24x8xbf16>, vector<4x24x24xf32> -> vector<4x24x24xf32>
    %cst_34 = arith.constant 0.353553385 : f32
    %100 = vector.broadcast %cst_34 : f32 to vector<4x24x24xf32>
    %101 = arith.mulf %99, %100 : vector<4x24x24xf32>
    %102 = vector.broadcast %5 : vector<1x1x24xf32> to vector<4x24x24xf32>
    %103 = arith.addf %101, %102 : vector<4x24x24xf32>
    %cst_35 = arith.constant dense<0xFF800000> : vector<4x24xf32>
    %104 = vector.multi_reduction <maximumf>, %103, %cst_35 [2] : vector<4x24x24xf32> to vector<4x24xf32>
    %105 = vector.shape_cast %104 : vector<4x24xf32> to vector<4x24x1xf32>
    %106 = vector.broadcast %105 : vector<4x24x1xf32> to vector<4x24x24xf32>
    %107 = arith.subf %103, %106 : vector<4x24x24xf32>
    %108 = math.exp %107 : vector<4x24x24xf32>
    %cst_36 = arith.constant dense<0.000000e+00> : vector<4x24xf32>
    %109 = vector.multi_reduction <add>, %108, %cst_36 [2] : vector<4x24x24xf32> to vector<4x24xf32>
    %110 = vector.shape_cast %109 : vector<4x24xf32> to vector<4x24x1xf32>
    %111 = tpu.reciprocal %110 {approx = true} : vector<4x24x1xf32> -> vector<4x24x1xf32>
    %112 = vector.broadcast %111 : vector<4x24x1xf32> to vector<4x24x24xf32>
    %113 = arith.mulf %108, %112 : vector<4x24x24xf32>
    %114 = arith.truncf %113 : vector<4x24x24xf32> to vector<4x24x24xbf16>
    %cst_37 = arith.constant dense<0.000000e+00> : vector<4x24x8xf32>
    %115 = tpu.matmul %114, %98, %cst_37 {dimension_numbers = #tpu.dot_dimension_numbers<[2], [1], [1], [2], [0, 0, 0, 1, 1, 2], [0], [0]>} : vector<4x24x24xbf16>, vector<4x24x8xbf16>, vector<4x24x8xf32> -> vector<4x24x8xf32>
    %116 = vector.extract_strided_slice %46 {offsets = [0, 0, 24], sizes = [4, 24, 8], strides = [1, 1, 1]} : vector<4x24x96xf32> to vector<4x24x8xf32>
    %117 = arith.truncf %116 : vector<4x24x8xf32> to vector<4x24x8xbf16>
    %118 = vector.extract_strided_slice %46 {offsets = [0, 0, 56], sizes = [4, 24, 8], strides = [1, 1, 1]} : vector<4x24x96xf32> to vector<4x24x8xf32>
    %119 = arith.truncf %118 : vector<4x24x8xf32> to vector<4x24x8xbf16>
    %120 = vector.extract_strided_slice %46 {offsets = [0, 0, 88], sizes = [4, 24, 8], strides = [1, 1, 1]} : vector<4x24x96xf32> to vector<4x24x8xf32>
    %121 = arith.truncf %120 : vector<4x24x8xf32> to vector<4x24x8xbf16>
    %cst_38 = arith.constant dense<0.000000e+00> : vector<4x24x24xf32>
    %122 = tpu.matmul %117, %119, %cst_38 {dimension_numbers = #tpu.dot_dimension_numbers<[2], [2], [1], [1], [0, 0, 0, 1, 1, 1], [0], [0]>} : vector<4x24x8xbf16>, vector<4x24x8xbf16>, vector<4x24x24xf32> -> vector<4x24x24xf32>
    %cst_39 = arith.constant 0.353553385 : f32
    %123 = vector.broadcast %cst_39 : f32 to vector<4x24x24xf32>
    %124 = arith.mulf %122, %123 : vector<4x24x24xf32>
    %125 = vector.broadcast %5 : vector<1x1x24xf32> to vector<4x24x24xf32>
    %126 = arith.addf %124, %125 : vector<4x24x24xf32>
    %cst_40 = arith.constant dense<0xFF800000> : vector<4x24xf32>
    %127 = vector.multi_reduction <maximumf>, %126, %cst_40 [2] : vector<4x24x24xf32> to vector<4x24xf32>
    %128 = vector.shape_cast %127 : vector<4x24xf32> to vector<4x24x1xf32>
    %129 = vector.broadcast %128 : vector<4x24x1xf32> to vector<4x24x24xf32>
    %130 = arith.subf %126, %129 : vector<4x24x24xf32>
    %131 = math.exp %130 : vector<4x24x24xf32>
    %cst_41 = arith.constant dense<0.000000e+00> : vector<4x24xf32>
    %132 = vector.multi_reduction <add>, %131, %cst_41 [2] : vector<4x24x24xf32> to vector<4x24xf32>
    %133 = vector.shape_cast %132 : vector<4x24xf32> to vector<4x24x1xf32>
    %134 = tpu.reciprocal %133 {approx = true} : vector<4x24x1xf32> -> vector<4x24x1xf32>
    %135 = vector.broadcast %134 : vector<4x24x1xf32> to vector<4x24x24xf32>
    %136 = arith.mulf %131, %135 : vector<4x24x24xf32>
    %137 = arith.truncf %136 : vector<4x24x24xf32> to vector<4x24x24xbf16>
    %cst_42 = arith.constant dense<0.000000e+00> : vector<4x24x8xf32>
    %138 = tpu.matmul %137, %121, %cst_42 {dimension_numbers = #tpu.dot_dimension_numbers<[2], [1], [1], [2], [0, 0, 0, 1, 1, 2], [0], [0]>} : vector<4x24x24xbf16>, vector<4x24x8xbf16>, vector<4x24x8xf32> -> vector<4x24x8xf32>
    %139 = tpu.concatenate %69, %92, %115, %138 in 2 : vector<4x24x8xf32>, vector<4x24x8xf32>, vector<4x24x8xf32>, vector<4x24x8xf32> -> vector<4x24x32xf32>
    %140 = vector.shape_cast %139 : vector<4x24x32xf32> to vector<96x32xf32>
    %141 = arith.truncf %140 : vector<96x32xf32> to vector<96x32xbf16>
    %c0_43 = arith.constant 0 : index
    %c0_44 = arith.constant 0 : index
    %c0_45 = arith.constant 0 : index
    %142 = vector.load %arg7[%c0_43, %c0_44, %c0_45] : memref<2x32x32xbf16, #tpu.memory_space<vmem>>, vector<1x32x32xbf16>
    %143 = vector.shape_cast %142 : vector<1x32x32xbf16> to vector<32x32xbf16>
    %cst_46 = arith.constant dense<0.000000e+00> : vector<96x32xf32>
    %144 = tpu.matmul %141, %143, %cst_46 {dimension_numbers = #tpu.dot_dimension_numbers<[1], [0], [0], [1], [0, 0, 1, 1], [], []>} : vector<96x32xbf16>, vector<32x32xbf16>, vector<96x32xf32> -> vector<96x32xf32>
    %145 = arith.addf %11, %144 : vector<96x32xf32>
    %c0_47 = arith.constant 0 : index
    %c0_48 = arith.constant 0 : index
    %c0_49 = arith.constant 0 : index
    %146 = vector.load %arg8[%c0_47, %c0_48, %c0_49] : memref<2x1x32xf32, #tpu.memory_space<vmem>>, vector<1x1x32xf32>
    %147 = vector.shape_cast %146 : vector<1x1x32xf32> to vector<1x32xf32>
    %148 = vector.broadcast %147 : vector<1x32xf32> to vector<96x32xf32>
    %149 = arith.addf %145, %148 : vector<96x32xf32>
    %150 = vector.extract_strided_slice %13 {offsets = [2, 0], sizes = [1, 32], strides = [1, 1]} : vector<4x32xf32> to vector<1x32xf32>
    %151 = vector.extract_strided_slice %13 {offsets = [3, 0], sizes = [1, 32], strides = [1, 1]} : vector<4x32xf32> to vector<1x32xf32>
    %cst_50 = arith.constant dense<0.000000e+00> : vector<96xf32>
    %152 = vector.multi_reduction <add>, %149, %cst_50 [1] : vector<96x32xf32> to vector<96xf32>
    %153 = vector.shape_cast %152 : vector<96xf32> to vector<96x1xf32>
    %cst_51 = arith.constant 3.200000e+01 : f32
    %154 = vector.broadcast %cst_51 : f32 to vector<96x1xf32>
    %155 = arith.divf %153, %154 : vector<96x1xf32>
    %156 = vector.broadcast %155 : vector<96x1xf32> to vector<96x32xf32>
    %157 = arith.subf %149, %156 : vector<96x32xf32>
    %158 = arith.mulf %157, %157 : vector<96x32xf32>
    %cst_52 = arith.constant dense<0.000000e+00> : vector<96xf32>
    %159 = vector.multi_reduction <add>, %158, %cst_52 [1] : vector<96x32xf32> to vector<96xf32>
    %160 = vector.shape_cast %159 : vector<96xf32> to vector<96x1xf32>
    %cst_53 = arith.constant 3.200000e+01 : f32
    %161 = vector.broadcast %cst_53 : f32 to vector<96x1xf32>
    %162 = arith.divf %160, %161 : vector<96x1xf32>
    %163 = vector.broadcast %155 : vector<96x1xf32> to vector<96x32xf32>
    %164 = arith.subf %149, %163 : vector<96x32xf32>
    %cst_54 = arith.constant 9.99999997E-7 : f32
    %165 = vector.broadcast %cst_54 : f32 to vector<96x1xf32>
    %166 = arith.addf %162, %165 : vector<96x1xf32>
    %167 = math.rsqrt %166 : vector<96x1xf32>
    %168 = vector.broadcast %167 : vector<96x1xf32> to vector<96x32xf32>
    %169 = arith.mulf %164, %168 : vector<96x32xf32>
    %170 = vector.broadcast %150 : vector<1x32xf32> to vector<96x32xf32>
    %171 = arith.mulf %169, %170 : vector<96x32xf32>
    %172 = vector.broadcast %151 : vector<1x32xf32> to vector<96x32xf32>
    %173 = arith.addf %171, %172 : vector<96x32xf32>
    %174 = arith.truncf %173 : vector<96x32xf32> to vector<96x32xbf16>
    %c0_55 = arith.constant 0 : index
    %c0_56 = arith.constant 0 : index
    %c0_57 = arith.constant 0 : index
    %175 = vector.load %arg9[%c0_55, %c0_56, %c0_57] : memref<2x32x64xbf16, #tpu.memory_space<vmem>>, vector<1x32x64xbf16>
    %176 = vector.shape_cast %175 : vector<1x32x64xbf16> to vector<32x64xbf16>
    %cst_58 = arith.constant dense<0.000000e+00> : vector<96x64xf32>
    %177 = tpu.matmul %174, %176, %cst_58 {dimension_numbers = #tpu.dot_dimension_numbers<[1], [0], [0], [1], [0, 0, 1, 1], [], []>} : vector<96x32xbf16>, vector<32x64xbf16>, vector<96x64xf32> -> vector<96x64xf32>
    %c0_59 = arith.constant 0 : index
    %c0_60 = arith.constant 0 : index
    %c0_61 = arith.constant 0 : index
    %178 = vector.load %arg10[%c0_59, %c0_60, %c0_61] : memref<2x1x64xf32, #tpu.memory_space<vmem>>, vector<1x1x64xf32>
    %179 = vector.shape_cast %178 : vector<1x1x64xf32> to vector<1x64xf32>
    %180 = vector.broadcast %179 : vector<1x64xf32> to vector<96x64xf32>
    %181 = arith.addf %177, %180 : vector<96x64xf32>
    %cst_62 = arith.constant 5.000000e-01 : f32
    %182 = vector.broadcast %cst_62 : f32 to vector<96x64xf32>
    %183 = arith.mulf %182, %181 : vector<96x64xf32>
    %cst_63 = arith.constant 4.471500e-02 : f32
    %184 = vector.broadcast %cst_63 : f32 to vector<96x64xf32>
    %185 = arith.mulf %184, %181 : vector<96x64xf32>
    %186 = arith.mulf %185, %181 : vector<96x64xf32>
    %187 = arith.mulf %186, %181 : vector<96x64xf32>
    %188 = arith.addf %181, %187 : vector<96x64xf32>
    %cst_64 = arith.constant 0.797884583 : f32
    %189 = vector.broadcast %cst_64 : f32 to vector<96x64xf32>
    %190 = arith.mulf %189, %188 : vector<96x64xf32>
    %191 = math.tanh %190 : vector<96x64xf32>
    %cst_65 = arith.constant 1.000000e+00 : f32
    %192 = vector.broadcast %cst_65 : f32 to vector<96x64xf32>
    %193 = arith.addf %192, %191 : vector<96x64xf32>
    %194 = arith.mulf %183, %193 : vector<96x64xf32>
    %195 = arith.truncf %194 : vector<96x64xf32> to vector<96x64xbf16>
    %c0_66 = arith.constant 0 : index
    %c0_67 = arith.constant 0 : index
    %c0_68 = arith.constant 0 : index
    %196 = vector.load %arg11[%c0_66, %c0_67, %c0_68] : memref<2x64x32xbf16, #tpu.memory_space<vmem>>, vector<1x64x32xbf16>
    %197 = vector.shape_cast %196 : vector<1x64x32xbf16> to vector<64x32xbf16>
    %cst_69 = arith.constant dense<0.000000e+00> : vector<96x32xf32>
    %198 = tpu.matmul %195, %197, %cst_69 {dimension_numbers = #tpu.dot_dimension_numbers<[1], [0], [0], [1], [0, 0, 1, 1], [], []>} : vector<96x64xbf16>, vector<64x32xbf16>, vector<96x32xf32> -> vector<96x32xf32>
    %199 = arith.addf %149, %198 : vector<96x32xf32>
    %c0_70 = arith.constant 0 : index
    %c0_71 = arith.constant 0 : index
    %c0_72 = arith.constant 0 : index
    %200 = vector.load %arg12[%c0_70, %c0_71, %c0_72] : memref<2x1x32xf32, #tpu.memory_space<vmem>>, vector<1x1x32xf32>
    %201 = vector.shape_cast %200 : vector<1x1x32xf32> to vector<1x32xf32>
    %202 = vector.broadcast %201 : vector<1x32xf32> to vector<96x32xf32>
    %203 = arith.addf %199, %202 : vector<96x32xf32>
    %c1 = arith.constant 1 : index
    %c0_73 = arith.constant 0 : index
    %c0_74 = arith.constant 0 : index
    %204 = vector.load %arg4[%c1, %c0_73, %c0_74] : memref<2x4x32xf32, #tpu.memory_space<vmem>>, vector<1x4x32xf32>
    %205 = vector.shape_cast %204 : vector<1x4x32xf32> to vector<4x32xf32>
    %206 = vector.extract_strided_slice %205 {offsets = [0, 0], sizes = [1, 32], strides = [1, 1]} : vector<4x32xf32> to vector<1x32xf32>
    %207 = vector.extract_strided_slice %205 {offsets = [1, 0], sizes = [1, 32], strides = [1, 1]} : vector<4x32xf32> to vector<1x32xf32>
    %cst_75 = arith.constant dense<0.000000e+00> : vector<96xf32>
    %208 = vector.multi_reduction <add>, %203, %cst_75 [1] : vector<96x32xf32> to vector<96xf32>
    %209 = vector.shape_cast %208 : vector<96xf32> to vector<96x1xf32>
    %cst_76 = arith.constant 3.200000e+01 : f32
    %210 = vector.broadcast %cst_76 : f32 to vector<96x1xf32>
    %211 = arith.divf %209, %210 : vector<96x1xf32>
    %212 = vector.broadcast %211 : vector<96x1xf32> to vector<96x32xf32>
    %213 = arith.subf %203, %212 : vector<96x32xf32>
    %214 = arith.mulf %213, %213 : vector<96x32xf32>
    %cst_77 = arith.constant dense<0.000000e+00> : vector<96xf32>
    %215 = vector.multi_reduction <add>, %214, %cst_77 [1] : vector<96x32xf32> to vector<96xf32>
    %216 = vector.shape_cast %215 : vector<96xf32> to vector<96x1xf32>
    %cst_78 = arith.constant 3.200000e+01 : f32
    %217 = vector.broadcast %cst_78 : f32 to vector<96x1xf32>
    %218 = arith.divf %216, %217 : vector<96x1xf32>
    %219 = vector.broadcast %211 : vector<96x1xf32> to vector<96x32xf32>
    %220 = arith.subf %203, %219 : vector<96x32xf32>
    %cst_79 = arith.constant 9.99999997E-7 : f32
    %221 = vector.broadcast %cst_79 : f32 to vector<96x1xf32>
    %222 = arith.addf %218, %221 : vector<96x1xf32>
    %223 = math.rsqrt %222 : vector<96x1xf32>
    %224 = vector.broadcast %223 : vector<96x1xf32> to vector<96x32xf32>
    %225 = arith.mulf %220, %224 : vector<96x32xf32>
    %226 = vector.broadcast %206 : vector<1x32xf32> to vector<96x32xf32>
    %227 = arith.mulf %225, %226 : vector<96x32xf32>
    %228 = vector.broadcast %207 : vector<1x32xf32> to vector<96x32xf32>
    %229 = arith.addf %227, %228 : vector<96x32xf32>
    %230 = arith.truncf %229 : vector<96x32xf32> to vector<96x32xbf16>
    %c1_80 = arith.constant 1 : index
    %c0_81 = arith.constant 0 : index
    %c0_82 = arith.constant 0 : index
    %231 = vector.load %arg5[%c1_80, %c0_81, %c0_82] : memref<2x32x96xbf16, #tpu.memory_space<vmem>>, vector<1x32x96xbf16>
    %232 = vector.shape_cast %231 : vector<1x32x96xbf16> to vector<32x96xbf16>
    %cst_83 = arith.constant dense<0.000000e+00> : vector<96x96xf32>
    %233 = tpu.matmul %230, %232, %cst_83 {dimension_numbers = #tpu.dot_dimension_numbers<[1], [0], [0], [1], [0, 0, 1, 1], [], []>} : vector<96x32xbf16>, vector<32x96xbf16>, vector<96x96xf32> -> vector<96x96xf32>
    %c1_84 = arith.constant 1 : index
    %c0_85 = arith.constant 0 : index
    %c0_86 = arith.constant 0 : index
    %234 = vector.load %arg6[%c1_84, %c0_85, %c0_86] : memref<2x1x96xf32, #tpu.memory_space<vmem>>, vector<1x1x96xf32>
    %235 = vector.shape_cast %234 : vector<1x1x96xf32> to vector<1x96xf32>
    %236 = vector.broadcast %235 : vector<1x96xf32> to vector<96x96xf32>
    %237 = arith.addf %233, %236 : vector<96x96xf32>
    %238 = vector.shape_cast %237 : vector<96x96xf32> to vector<4x24x96xf32>
    %239 = vector.extract_strided_slice %238 {offsets = [0, 0, 0], sizes = [4, 24, 8], strides = [1, 1, 1]} : vector<4x24x96xf32> to vector<4x24x8xf32>
    %240 = arith.truncf %239 : vector<4x24x8xf32> to vector<4x24x8xbf16>
    %241 = vector.extract_strided_slice %238 {offsets = [0, 0, 32], sizes = [4, 24, 8], strides = [1, 1, 1]} : vector<4x24x96xf32> to vector<4x24x8xf32>
    %242 = arith.truncf %241 : vector<4x24x8xf32> to vector<4x24x8xbf16>
    %243 = vector.extract_strided_slice %238 {offsets = [0, 0, 64], sizes = [4, 24, 8], strides = [1, 1, 1]} : vector<4x24x96xf32> to vector<4x24x8xf32>
    %244 = arith.truncf %243 : vector<4x24x8xf32> to vector<4x24x8xbf16>
    %cst_87 = arith.constant dense<0.000000e+00> : vector<4x24x24xf32>
    %245 = tpu.matmul %240, %242, %cst_87 {dimension_numbers = #tpu.dot_dimension_numbers<[2], [2], [1], [1], [0, 0, 0, 1, 1, 1], [0], [0]>} : vector<4x24x8xbf16>, vector<4x24x8xbf16>, vector<4x24x24xf32> -> vector<4x24x24xf32>
    %cst_88 = arith.constant 0.353553385 : f32
    %246 = vector.broadcast %cst_88 : f32 to vector<4x24x24xf32>
    %247 = arith.mulf %245, %246 : vector<4x24x24xf32>
    %248 = vector.broadcast %5 : vector<1x1x24xf32> to vector<4x24x24xf32>
    %249 = arith.addf %247, %248 : vector<4x24x24xf32>
    %cst_89 = arith.constant dense<0xFF800000> : vector<4x24xf32>
    %250 = vector.multi_reduction <maximumf>, %249, %cst_89 [2] : vector<4x24x24xf32> to vector<4x24xf32>
    %251 = vector.shape_cast %250 : vector<4x24xf32> to vector<4x24x1xf32>
    %252 = vector.broadcast %251 : vector<4x24x1xf32> to vector<4x24x24xf32>
    %253 = arith.subf %249, %252 : vector<4x24x24xf32>
    %254 = math.exp %253 : vector<4x24x24xf32>
    %cst_90 = arith.constant dense<0.000000e+00> : vector<4x24xf32>
    %255 = vector.multi_reduction <add>, %254, %cst_90 [2] : vector<4x24x24xf32> to vector<4x24xf32>
    %256 = vector.shape_cast %255 : vector<4x24xf32> to vector<4x24x1xf32>
    %257 = tpu.reciprocal %256 {approx = true} : vector<4x24x1xf32> -> vector<4x24x1xf32>
    %258 = vector.broadcast %257 : vector<4x24x1xf32> to vector<4x24x24xf32>
    %259 = arith.mulf %254, %258 : vector<4x24x24xf32>
    %260 = arith.truncf %259 : vector<4x24x24xf32> to vector<4x24x24xbf16>
    %cst_91 = arith.constant dense<0.000000e+00> : vector<4x24x8xf32>
    %261 = tpu.matmul %260, %244, %cst_91 {dimension_numbers = #tpu.dot_dimension_numbers<[2], [1], [1], [2], [0, 0, 0, 1, 1, 2], [0], [0]>} : vector<4x24x24xbf16>, vector<4x24x8xbf16>, vector<4x24x8xf32> -> vector<4x24x8xf32>
    %262 = vector.extract_strided_slice %238 {offsets = [0, 0, 8], sizes = [4, 24, 8], strides = [1, 1, 1]} : vector<4x24x96xf32> to vector<4x24x8xf32>
    %263 = arith.truncf %262 : vector<4x24x8xf32> to vector<4x24x8xbf16>
    %264 = vector.extract_strided_slice %238 {offsets = [0, 0, 40], sizes = [4, 24, 8], strides = [1, 1, 1]} : vector<4x24x96xf32> to vector<4x24x8xf32>
    %265 = arith.truncf %264 : vector<4x24x8xf32> to vector<4x24x8xbf16>
    %266 = vector.extract_strided_slice %238 {offsets = [0, 0, 72], sizes = [4, 24, 8], strides = [1, 1, 1]} : vector<4x24x96xf32> to vector<4x24x8xf32>
    %267 = arith.truncf %266 : vector<4x24x8xf32> to vector<4x24x8xbf16>
    %cst_92 = arith.constant dense<0.000000e+00> : vector<4x24x24xf32>
    %268 = tpu.matmul %263, %265, %cst_92 {dimension_numbers = #tpu.dot_dimension_numbers<[2], [2], [1], [1], [0, 0, 0, 1, 1, 1], [0], [0]>} : vector<4x24x8xbf16>, vector<4x24x8xbf16>, vector<4x24x24xf32> -> vector<4x24x24xf32>
    %cst_93 = arith.constant 0.353553385 : f32
    %269 = vector.broadcast %cst_93 : f32 to vector<4x24x24xf32>
    %270 = arith.mulf %268, %269 : vector<4x24x24xf32>
    %271 = vector.broadcast %5 : vector<1x1x24xf32> to vector<4x24x24xf32>
    %272 = arith.addf %270, %271 : vector<4x24x24xf32>
    %cst_94 = arith.constant dense<0xFF800000> : vector<4x24xf32>
    %273 = vector.multi_reduction <maximumf>, %272, %cst_94 [2] : vector<4x24x24xf32> to vector<4x24xf32>
    %274 = vector.shape_cast %273 : vector<4x24xf32> to vector<4x24x1xf32>
    %275 = vector.broadcast %274 : vector<4x24x1xf32> to vector<4x24x24xf32>
    %276 = arith.subf %272, %275 : vector<4x24x24xf32>
    %277 = math.exp %276 : vector<4x24x24xf32>
    %cst_95 = arith.constant dense<0.000000e+00> : vector<4x24xf32>
    %278 = vector.multi_reduction <add>, %277, %cst_95 [2] : vector<4x24x24xf32> to vector<4x24xf32>
    %279 = vector.shape_cast %278 : vector<4x24xf32> to vector<4x24x1xf32>
    %280 = tpu.reciprocal %279 {approx = true} : vector<4x24x1xf32> -> vector<4x24x1xf32>
    %281 = vector.broadcast %280 : vector<4x24x1xf32> to vector<4x24x24xf32>
    %282 = arith.mulf %277, %281 : vector<4x24x24xf32>
    %283 = arith.truncf %282 : vector<4x24x24xf32> to vector<4x24x24xbf16>
    %cst_96 = arith.constant dense<0.000000e+00> : vector<4x24x8xf32>
    %284 = tpu.matmul %283, %267, %cst_96 {dimension_numbers = #tpu.dot_dimension_numbers<[2], [1], [1], [2], [0, 0, 0, 1, 1, 2], [0], [0]>} : vector<4x24x24xbf16>, vector<4x24x8xbf16>, vector<4x24x8xf32> -> vector<4x24x8xf32>
    %285 = vector.extract_strided_slice %238 {offsets = [0, 0, 16], sizes = [4, 24, 8], strides = [1, 1, 1]} : vector<4x24x96xf32> to vector<4x24x8xf32>
    %286 = arith.truncf %285 : vector<4x24x8xf32> to vector<4x24x8xbf16>
    %287 = vector.extract_strided_slice %238 {offsets = [0, 0, 48], sizes = [4, 24, 8], strides = [1, 1, 1]} : vector<4x24x96xf32> to vector<4x24x8xf32>
    %288 = arith.truncf %287 : vector<4x24x8xf32> to vector<4x24x8xbf16>
    %289 = vector.extract_strided_slice %238 {offsets = [0, 0, 80], sizes = [4, 24, 8], strides = [1, 1, 1]} : vector<4x24x96xf32> to vector<4x24x8xf32>
    %290 = arith.truncf %289 : vector<4x24x8xf32> to vector<4x24x8xbf16>
    %cst_97 = arith.constant dense<0.000000e+00> : vector<4x24x24xf32>
    %291 = tpu.matmul %286, %288, %cst_97 {dimension_numbers = #tpu.dot_dimension_numbers<[2], [2], [1], [1], [0, 0, 0, 1, 1, 1], [0], [0]>} : vector<4x24x8xbf16>, vector<4x24x8xbf16>, vector<4x24x24xf32> -> vector<4x24x24xf32>
    %cst_98 = arith.constant 0.353553385 : f32
    %292 = vector.broadcast %cst_98 : f32 to vector<4x24x24xf32>
    %293 = arith.mulf %291, %292 : vector<4x24x24xf32>
    %294 = vector.broadcast %5 : vector<1x1x24xf32> to vector<4x24x24xf32>
    %295 = arith.addf %293, %294 : vector<4x24x24xf32>
    %cst_99 = arith.constant dense<0xFF800000> : vector<4x24xf32>
    %296 = vector.multi_reduction <maximumf>, %295, %cst_99 [2] : vector<4x24x24xf32> to vector<4x24xf32>
    %297 = vector.shape_cast %296 : vector<4x24xf32> to vector<4x24x1xf32>
    %298 = vector.broadcast %297 : vector<4x24x1xf32> to vector<4x24x24xf32>
    %299 = arith.subf %295, %298 : vector<4x24x24xf32>
    %300 = math.exp %299 : vector<4x24x24xf32>
    %cst_100 = arith.constant dense<0.000000e+00> : vector<4x24xf32>
    %301 = vector.multi_reduction <add>, %300, %cst_100 [2] : vector<4x24x24xf32> to vector<4x24xf32>
    %302 = vector.shape_cast %301 : vector<4x24xf32> to vector<4x24x1xf32>
    %303 = tpu.reciprocal %302 {approx = true} : vector<4x24x1xf32> -> vector<4x24x1xf32>
    %304 = vector.broadcast %303 : vector<4x24x1xf32> to vector<4x24x24xf32>
    %305 = arith.mulf %300, %304 : vector<4x24x24xf32>
    %306 = arith.truncf %305 : vector<4x24x24xf32> to vector<4x24x24xbf16>
    %cst_101 = arith.constant dense<0.000000e+00> : vector<4x24x8xf32>
    %307 = tpu.matmul %306, %290, %cst_101 {dimension_numbers = #tpu.dot_dimension_numbers<[2], [1], [1], [2], [0, 0, 0, 1, 1, 2], [0], [0]>} : vector<4x24x24xbf16>, vector<4x24x8xbf16>, vector<4x24x8xf32> -> vector<4x24x8xf32>
    %308 = vector.extract_strided_slice %238 {offsets = [0, 0, 24], sizes = [4, 24, 8], strides = [1, 1, 1]} : vector<4x24x96xf32> to vector<4x24x8xf32>
    %309 = arith.truncf %308 : vector<4x24x8xf32> to vector<4x24x8xbf16>
    %310 = vector.extract_strided_slice %238 {offsets = [0, 0, 56], sizes = [4, 24, 8], strides = [1, 1, 1]} : vector<4x24x96xf32> to vector<4x24x8xf32>
    %311 = arith.truncf %310 : vector<4x24x8xf32> to vector<4x24x8xbf16>
    %312 = vector.extract_strided_slice %238 {offsets = [0, 0, 88], sizes = [4, 24, 8], strides = [1, 1, 1]} : vector<4x24x96xf32> to vector<4x24x8xf32>
    %313 = arith.truncf %312 : vector<4x24x8xf32> to vector<4x24x8xbf16>
    %cst_102 = arith.constant dense<0.000000e+00> : vector<4x24x24xf32>
    %314 = tpu.matmul %309, %311, %cst_102 {dimension_numbers = #tpu.dot_dimension_numbers<[2], [2], [1], [1], [0, 0, 0, 1, 1, 1], [0], [0]>} : vector<4x24x8xbf16>, vector<4x24x8xbf16>, vector<4x24x24xf32> -> vector<4x24x24xf32>
    %cst_103 = arith.constant 0.353553385 : f32
    %315 = vector.broadcast %cst_103 : f32 to vector<4x24x24xf32>
    %316 = arith.mulf %314, %315 : vector<4x24x24xf32>
    %317 = vector.broadcast %5 : vector<1x1x24xf32> to vector<4x24x24xf32>
    %318 = arith.addf %316, %317 : vector<4x24x24xf32>
    %cst_104 = arith.constant dense<0xFF800000> : vector<4x24xf32>
    %319 = vector.multi_reduction <maximumf>, %318, %cst_104 [2] : vector<4x24x24xf32> to vector<4x24xf32>
    %320 = vector.shape_cast %319 : vector<4x24xf32> to vector<4x24x1xf32>
    %321 = vector.broadcast %320 : vector<4x24x1xf32> to vector<4x24x24xf32>
    %322 = arith.subf %318, %321 : vector<4x24x24xf32>
    %323 = math.exp %322 : vector<4x24x24xf32>
    %cst_105 = arith.constant dense<0.000000e+00> : vector<4x24xf32>
    %324 = vector.multi_reduction <add>, %323, %cst_105 [2] : vector<4x24x24xf32> to vector<4x24xf32>
    %325 = vector.shape_cast %324 : vector<4x24xf32> to vector<4x24x1xf32>
    %326 = tpu.reciprocal %325 {approx = true} : vector<4x24x1xf32> -> vector<4x24x1xf32>
    %327 = vector.broadcast %326 : vector<4x24x1xf32> to vector<4x24x24xf32>
    %328 = arith.mulf %323, %327 : vector<4x24x24xf32>
    %329 = arith.truncf %328 : vector<4x24x24xf32> to vector<4x24x24xbf16>
    %cst_106 = arith.constant dense<0.000000e+00> : vector<4x24x8xf32>
    %330 = tpu.matmul %329, %313, %cst_106 {dimension_numbers = #tpu.dot_dimension_numbers<[2], [1], [1], [2], [0, 0, 0, 1, 1, 2], [0], [0]>} : vector<4x24x24xbf16>, vector<4x24x8xbf16>, vector<4x24x8xf32> -> vector<4x24x8xf32>
    %331 = tpu.concatenate %261, %284, %307, %330 in 2 : vector<4x24x8xf32>, vector<4x24x8xf32>, vector<4x24x8xf32>, vector<4x24x8xf32> -> vector<4x24x32xf32>
    %332 = vector.shape_cast %331 : vector<4x24x32xf32> to vector<96x32xf32>
    %333 = arith.truncf %332 : vector<96x32xf32> to vector<96x32xbf16>
    %c1_107 = arith.constant 1 : index
    %c0_108 = arith.constant 0 : index
    %c0_109 = arith.constant 0 : index
    %334 = vector.load %arg7[%c1_107, %c0_108, %c0_109] : memref<2x32x32xbf16, #tpu.memory_space<vmem>>, vector<1x32x32xbf16>
    %335 = vector.shape_cast %334 : vector<1x32x32xbf16> to vector<32x32xbf16>
    %cst_110 = arith.constant dense<0.000000e+00> : vector<96x32xf32>
    %336 = tpu.matmul %333, %335, %cst_110 {dimension_numbers = #tpu.dot_dimension_numbers<[1], [0], [0], [1], [0, 0, 1, 1], [], []>} : vector<96x32xbf16>, vector<32x32xbf16>, vector<96x32xf32> -> vector<96x32xf32>
    %337 = arith.addf %203, %336 : vector<96x32xf32>
    %c1_111 = arith.constant 1 : index
    %c0_112 = arith.constant 0 : index
    %c0_113 = arith.constant 0 : index
    %338 = vector.load %arg8[%c1_111, %c0_112, %c0_113] : memref<2x1x32xf32, #tpu.memory_space<vmem>>, vector<1x1x32xf32>
    %339 = vector.shape_cast %338 : vector<1x1x32xf32> to vector<1x32xf32>
    %340 = vector.broadcast %339 : vector<1x32xf32> to vector<96x32xf32>
    %341 = arith.addf %337, %340 : vector<96x32xf32>
    %342 = vector.extract_strided_slice %205 {offsets = [2, 0], sizes = [1, 32], strides = [1, 1]} : vector<4x32xf32> to vector<1x32xf32>
    %343 = vector.extract_strided_slice %205 {offsets = [3, 0], sizes = [1, 32], strides = [1, 1]} : vector<4x32xf32> to vector<1x32xf32>
    %cst_114 = arith.constant dense<0.000000e+00> : vector<96xf32>
    %344 = vector.multi_reduction <add>, %341, %cst_114 [1] : vector<96x32xf32> to vector<96xf32>
    %345 = vector.shape_cast %344 : vector<96xf32> to vector<96x1xf32>
    %cst_115 = arith.constant 3.200000e+01 : f32
    %346 = vector.broadcast %cst_115 : f32 to vector<96x1xf32>
    %347 = arith.divf %345, %346 : vector<96x1xf32>
    %348 = vector.broadcast %347 : vector<96x1xf32> to vector<96x32xf32>
    %349 = arith.subf %341, %348 : vector<96x32xf32>
    %350 = arith.mulf %349, %349 : vector<96x32xf32>
    %cst_116 = arith.constant dense<0.000000e+00> : vector<96xf32>
    %351 = vector.multi_reduction <add>, %350, %cst_116 [1] : vector<96x32xf32> to vector<96xf32>
    %352 = vector.shape_cast %351 : vector<96xf32> to vector<96x1xf32>
    %cst_117 = arith.constant 3.200000e+01 : f32
    %353 = vector.broadcast %cst_117 : f32 to vector<96x1xf32>
    %354 = arith.divf %352, %353 : vector<96x1xf32>
    %355 = vector.broadcast %347 : vector<96x1xf32> to vector<96x32xf32>
    %356 = arith.subf %341, %355 : vector<96x32xf32>
    %cst_118 = arith.constant 9.99999997E-7 : f32
    %357 = vector.broadcast %cst_118 : f32 to vector<96x1xf32>
    %358 = arith.addf %354, %357 : vector<96x1xf32>
    %359 = math.rsqrt %358 : vector<96x1xf32>
    %360 = vector.broadcast %359 : vector<96x1xf32> to vector<96x32xf32>
    %361 = arith.mulf %356, %360 : vector<96x32xf32>
    %362 = vector.broadcast %342 : vector<1x32xf32> to vector<96x32xf32>
    %363 = arith.mulf %361, %362 : vector<96x32xf32>
    %364 = vector.broadcast %343 : vector<1x32xf32> to vector<96x32xf32>
    %365 = arith.addf %363, %364 : vector<96x32xf32>
    %366 = arith.truncf %365 : vector<96x32xf32> to vector<96x32xbf16>
    %c1_119 = arith.constant 1 : index
    %c0_120 = arith.constant 0 : index
    %c0_121 = arith.constant 0 : index
    %367 = vector.load %arg9[%c1_119, %c0_120, %c0_121] : memref<2x32x64xbf16, #tpu.memory_space<vmem>>, vector<1x32x64xbf16>
    %368 = vector.shape_cast %367 : vector<1x32x64xbf16> to vector<32x64xbf16>
    %cst_122 = arith.constant dense<0.000000e+00> : vector<96x64xf32>
    %369 = tpu.matmul %366, %368, %cst_122 {dimension_numbers = #tpu.dot_dimension_numbers<[1], [0], [0], [1], [0, 0, 1, 1], [], []>} : vector<96x32xbf16>, vector<32x64xbf16>, vector<96x64xf32> -> vector<96x64xf32>
    %c1_123 = arith.constant 1 : index
    %c0_124 = arith.constant 0 : index
    %c0_125 = arith.constant 0 : index
    %370 = vector.load %arg10[%c1_123, %c0_124, %c0_125] : memref<2x1x64xf32, #tpu.memory_space<vmem>>, vector<1x1x64xf32>
    %371 = vector.shape_cast %370 : vector<1x1x64xf32> to vector<1x64xf32>
    %372 = vector.broadcast %371 : vector<1x64xf32> to vector<96x64xf32>
    %373 = arith.addf %369, %372 : vector<96x64xf32>
    %cst_126 = arith.constant 5.000000e-01 : f32
    %374 = vector.broadcast %cst_126 : f32 to vector<96x64xf32>
    %375 = arith.mulf %374, %373 : vector<96x64xf32>
    %cst_127 = arith.constant 4.471500e-02 : f32
    %376 = vector.broadcast %cst_127 : f32 to vector<96x64xf32>
    %377 = arith.mulf %376, %373 : vector<96x64xf32>
    %378 = arith.mulf %377, %373 : vector<96x64xf32>
    %379 = arith.mulf %378, %373 : vector<96x64xf32>
    %380 = arith.addf %373, %379 : vector<96x64xf32>
    %cst_128 = arith.constant 0.797884583 : f32
    %381 = vector.broadcast %cst_128 : f32 to vector<96x64xf32>
    %382 = arith.mulf %381, %380 : vector<96x64xf32>
    %383 = math.tanh %382 : vector<96x64xf32>
    %cst_129 = arith.constant 1.000000e+00 : f32
    %384 = vector.broadcast %cst_129 : f32 to vector<96x64xf32>
    %385 = arith.addf %384, %383 : vector<96x64xf32>
    %386 = arith.mulf %375, %385 : vector<96x64xf32>
    %387 = arith.truncf %386 : vector<96x64xf32> to vector<96x64xbf16>
    %c1_130 = arith.constant 1 : index
    %c0_131 = arith.constant 0 : index
    %c0_132 = arith.constant 0 : index
    %388 = vector.load %arg11[%c1_130, %c0_131, %c0_132] : memref<2x64x32xbf16, #tpu.memory_space<vmem>>, vector<1x64x32xbf16>
    %389 = vector.shape_cast %388 : vector<1x64x32xbf16> to vector<64x32xbf16>
    %cst_133 = arith.constant dense<0.000000e+00> : vector<96x32xf32>
    %390 = tpu.matmul %387, %389, %cst_133 {dimension_numbers = #tpu.dot_dimension_numbers<[1], [0], [0], [1], [0, 0, 1, 1], [], []>} : vector<96x64xbf16>, vector<64x32xbf16>, vector<96x32xf32> -> vector<96x32xf32>
    %391 = arith.addf %341, %390 : vector<96x32xf32>
    %c1_134 = arith.constant 1 : index
    %c0_135 = arith.constant 0 : index
    %c0_136 = arith.constant 0 : index
    %392 = vector.load %arg12[%c1_134, %c0_135, %c0_136] : memref<2x1x32xf32, #tpu.memory_space<vmem>>, vector<1x1x32xf32>
    %393 = vector.shape_cast %392 : vector<1x1x32xf32> to vector<1x32xf32>
    %394 = vector.broadcast %393 : vector<1x32xf32> to vector<96x32xf32>
    %395 = arith.addf %391, %394 : vector<96x32xf32>
    %396 = vector.extract_strided_slice %395 {offsets = [16, 0], sizes = [1, 32], strides = [1, 1]} : vector<96x32xf32> to vector<1x32xf32>
    %397 = vector.extract_strided_slice %395 {offsets = [40, 0], sizes = [1, 32], strides = [1, 1]} : vector<96x32xf32> to vector<1x32xf32>
    %398 = vector.extract_strided_slice %395 {offsets = [64, 0], sizes = [1, 32], strides = [1, 1]} : vector<96x32xf32> to vector<1x32xf32>
    %399 = vector.extract_strided_slice %395 {offsets = [88, 0], sizes = [1, 32], strides = [1, 1]} : vector<96x32xf32> to vector<1x32xf32>
    %400 = tpu.concatenate %396, %397, %398, %399 in 0 : vector<1x32xf32>, vector<1x32xf32>, vector<1x32xf32>, vector<1x32xf32> -> vector<4x32xf32>
    %c0_137 = arith.constant 0 : index
    %c0_138 = arith.constant 0 : index
    %401 = vector.load %arg13[%c0_137, %c0_138] : memref<2x32xf32, #tpu.memory_space<vmem>>, vector<2x32xf32>
    %402 = vector.extract_strided_slice %401 {offsets = [0, 0], sizes = [1, 32], strides = [1, 1]} : vector<2x32xf32> to vector<1x32xf32>
    %403 = vector.extract_strided_slice %401 {offsets = [1, 0], sizes = [1, 32], strides = [1, 1]} : vector<2x32xf32> to vector<1x32xf32>
    %cst_139 = arith.constant dense<0.000000e+00> : vector<4xf32>
    %404 = vector.multi_reduction <add>, %400, %cst_139 [1] : vector<4x32xf32> to vector<4xf32>
    %405 = vector.shape_cast %404 : vector<4xf32> to vector<4x1xf32>
    %cst_140 = arith.constant 3.200000e+01 : f32
    %406 = vector.broadcast %cst_140 : f32 to vector<4x1xf32>
    %407 = arith.divf %405, %406 : vector<4x1xf32>
    %408 = vector.broadcast %407 : vector<4x1xf32> to vector<4x32xf32>
    %409 = arith.subf %400, %408 : vector<4x32xf32>
    %410 = arith.mulf %409, %409 : vector<4x32xf32>
    %cst_141 = arith.constant dense<0.000000e+00> : vector<4xf32>
    %411 = vector.multi_reduction <add>, %410, %cst_141 [1] : vector<4x32xf32> to vector<4xf32>
    %412 = vector.shape_cast %411 : vector<4xf32> to vector<4x1xf32>
    %cst_142 = arith.constant 3.200000e+01 : f32
    %413 = vector.broadcast %cst_142 : f32 to vector<4x1xf32>
    %414 = arith.divf %412, %413 : vector<4x1xf32>
    %415 = vector.broadcast %407 : vector<4x1xf32> to vector<4x32xf32>
    %416 = arith.subf %400, %415 : vector<4x32xf32>
    %cst_143 = arith.constant 9.99999997E-7 : f32
    %417 = vector.broadcast %cst_143 : f32 to vector<4x1xf32>
    %418 = arith.addf %414, %417 : vector<4x1xf32>
    %419 = math.rsqrt %418 : vector<4x1xf32>
    %420 = vector.broadcast %419 : vector<4x1xf32> to vector<4x32xf32>
    %421 = arith.mulf %416, %420 : vector<4x32xf32>
    %422 = vector.broadcast %402 : vector<1x32xf32> to vector<4x32xf32>
    %423 = arith.mulf %421, %422 : vector<4x32xf32>
    %424 = vector.broadcast %403 : vector<1x32xf32> to vector<4x32xf32>
    %425 = arith.addf %423, %424 : vector<4x32xf32>
    %426 = arith.truncf %425 : vector<4x32xf32> to vector<4x32xbf16>
    %c0_144 = arith.constant 0 : index
    %c0_145 = arith.constant 0 : index
    %427 = vector.load %arg14[%c0_144, %c0_145] : memref<32x128xbf16, #tpu.memory_space<vmem>>, vector<32x128xbf16>
    %cst_146 = arith.constant dense<0.000000e+00> : vector<4x128xf32>
    %428 = tpu.matmul %426, %427, %cst_146 {dimension_numbers = #tpu.dot_dimension_numbers<[1], [0], [0], [1], [0, 0, 1, 1], [], []>} : vector<4x32xbf16>, vector<32x128xbf16>, vector<4x128xf32> -> vector<4x128xf32>
    %c0_147 = arith.constant 0 : index
    %c0_148 = arith.constant 0 : index
    %429 = vector.load %arg15[%c0_147, %c0_148] : memref<1x128xf32, #tpu.memory_space<vmem>>, vector<1x128xf32>
    %430 = vector.broadcast %429 : vector<1x128xf32> to vector<4x128xf32>
    %431 = arith.addf %428, %430 : vector<4x128xf32>
    %c0_149 = arith.constant 0 : index
    %c0_150 = arith.constant 0 : index
    %c0_151 = arith.constant 0 : index
    %432 = vector.load %arg16[%c0_149, %c0_150, %c0_151] : memref<1x4x128xf32, #tpu.memory_space<vmem>>, vector<1x4x128xf32>
    %433 = vector.shape_cast %432 : vector<1x4x128xf32> to vector<4x128xf32>
    %434 = vector.shape_cast %431 : vector<4x128xf32> to vector<1x4x128xf32>
    tpu.vector_store %arg16[%c0_149, %c0_150, %c0_151], %434 {strides = array<i32>} : memref<1x4x128xf32, #tpu.memory_space<vmem>>, vector<1x4x128xf32>,
    return
  }
  func.func @transform_0(%arg0: i32) -> (i32, i32, i32) {
    %c0_i32 = arith.constant 0 : i32
    %c0_i32_0 = arith.constant 0 : i32
    %c0_i32_1 = arith.constant 0 : i32
    return %arg0, %c0_i32, %c0_i32_0 : i32, i32, i32
  }
  func.func @transform_1(%arg0: i32) -> (i32, i32) {
    %c0_i32 = arith.constant 0 : i32
    %c0_i32_0 = arith.constant 0 : i32
    %c0_i32_1 = arith.constant 0 : i32
    return %c0_i32, %c0_i32_0 : i32, i32
  }
  func.func @transform_2(%arg0: i32) -> (i32, i32) {
    %c0_i32 = arith.constant 0 : i32
    %c0_i32_0 = arith.constant 0 : i32
    %c0_i32_1 = arith.constant 0 : i32
    return %c0_i32, %c0_i32_0 : i32, i32
  }
  func.func @transform_3(%arg0: i32) -> (i32, i32, i32) {
    %c0_i32 = arith.constant 0 : i32
    %c0_i32_0 = arith.constant 0 : i32
    %c0_i32_1 = arith.constant 0 : i32
    %c0_i32_2 = arith.constant 0 : i32
    return %c0_i32, %c0_i32_0, %c0_i32_1 : i32, i32, i32
  }
  func.func @transform_4(%arg0: i32) -> (i32, i32, i32) {
    %c0_i32 = arith.constant 0 : i32
    %c0_i32_0 = arith.constant 0 : i32
    %c0_i32_1 = arith.constant 0 : i32
    %c0_i32_2 = arith.constant 0 : i32
    return %c0_i32, %c0_i32_0, %c0_i32_1 : i32, i32, i32
  }
  func.func @transform_5(%arg0: i32) -> (i32, i32, i32) {
    %c0_i32 = arith.constant 0 : i32
    %c0_i32_0 = arith.constant 0 : i32
    %c0_i32_1 = arith.constant 0 : i32
    %c0_i32_2 = arith.constant 0 : i32
    return %c0_i32, %c0_i32_0, %c0_i32_1 : i32, i32, i32
  }
  func.func @transform_6(%arg0: i32) -> (i32, i32, i32) {
    %c0_i32 = arith.constant 0 : i32
    %c0_i32_0 = arith.constant 0 : i32
    %c0_i32_1 = arith.constant 0 : i32
    %c0_i32_2 = arith.constant 0 : i32
    return %c0_i32, %c0_i32_0, %c0_i32_1 : i32, i32, i32
  }
  func.func @transform_7(%arg0: i32) -> (i32, i32, i32) {
    %c0_i32 = arith.constant 0 : i32
    %c0_i32_0 = arith.constant 0 : i32
    %c0_i32_1 = arith.constant 0 : i32
    %c0_i32_2 = arith.constant 0 : i32
    return %c0_i32, %c0_i32_0, %c0_i32_1 : i32, i32, i32
  }
  func.func @transform_8(%arg0: i32) -> (i32, i32, i32) {
    %c0_i32 = arith.constant 0 : i32
    %c0_i32_0 = arith.constant 0 : i32
    %c0_i32_1 = arith.constant 0 : i32
    %c0_i32_2 = arith.constant 0 : i32
    return %c0_i32, %c0_i32_0, %c0_i32_1 : i32, i32, i32
  }
  func.func @transform_9(%arg0: i32) -> (i32, i32, i32) {
    %c0_i32 = arith.constant 0 : i32
    %c0_i32_0 = arith.constant 0 : i32
    %c0_i32_1 = arith.constant 0 : i32
    %c0_i32_2 = arith.constant 0 : i32
    return %c0_i32, %c0_i32_0, %c0_i32_1 : i32, i32, i32
  }
  func.func @transform_10(%arg0: i32) -> (i32, i32, i32) {
    %c0_i32 = arith.constant 0 : i32
    %c0_i32_0 = arith.constant 0 : i32
    %c0_i32_1 = arith.constant 0 : i32
    %c0_i32_2 = arith.constant 0 : i32
    return %c0_i32, %c0_i32_0, %c0_i32_1 : i32, i32, i32
  }
  func.func @transform_11(%arg0: i32) -> (i32, i32, i32) {
    %c0_i32 = arith.constant 0 : i32
    %c0_i32_0 = arith.constant 0 : i32
    %c0_i32_1 = arith.constant 0 : i32
    %c0_i32_2 = arith.constant 0 : i32
    return %c0_i32, %c0_i32_0, %c0_i32_1 : i32, i32, i32
  }
  func.func @transform_12(%arg0: i32) -> (i32, i32) {
    %c0_i32 = arith.constant 0 : i32
    %c0_i32_0 = arith.constant 0 : i32
    %c0_i32_1 = arith.constant 0 : i32
    return %c0_i32, %c0_i32_0 : i32, i32
  }
  func.func @transform_13(%arg0: i32) -> (i32, i32) {
    %c0_i32 = arith.constant 0 : i32
    %c0_i32_0 = arith.constant 0 : i32
    %c0_i32_1 = arith.constant 0 : i32
    return %c0_i32, %c0_i32_0 : i32, i32
  }
  func.func @transform_14(%arg0: i32) -> (i32, i32) {
    %c0_i32 = arith.constant 0 : i32
    %c0_i32_0 = arith.constant 0 : i32
    %c0_i32_1 = arith.constant 0 : i32
    return %c0_i32, %c0_i32_0 : i32, i32
  }
  func.func @transform_15(%arg0: i32) -> (i32, i32, i32) {
    %c0_i32 = arith.constant 0 : i32
    %c0_i32_0 = arith.constant 0 : i32
    %c0_i32_1 = arith.constant 0 : i32
    return %arg0, %c0_i32, %c0_i32_0 : i32, i32, i32
  }
}

</mosaic_0001>

<bundles_post_ra>
// kernel: vit_forward.1
= control target key start
LH: loop header
LB: loop body
LE: loop exit
PB: predicated region body
PF: predicated region fallthrough
CT: control target
= control target key end

     0   :  { %20 = vsyncpa [#allocation3], 0  ;;  %s14604_s0 = inlined_call_operand.vmem [shape: bf16[2,96,192], index: 0, kind: input, shape index: {}]   ;;  %s14605_s1 = inlined_call_operand.vmem [shape: bf16[192,32], index: 1, kind: input, shape index: {}]   ;;  %s14606_s2 = inlined_call_operand.vmem [shape: f32[96,32], index: 2, kind: input, shape index: {}]   ;;  %s14607_s3 = inlined_call_operand.vmem [shape: f32[2,4,32], index: 3, kind: input, shape index: {}]   ;;  %s14608_s4 = inlined_call_operand.vmem [shape: bf16[2,32,96], index: 4, kind: input, shape index: {}]   ;;  %s14609_s5 = inlined_call_operand.vmem [shape: f32[2,1,96], index: 5, kind: input, shape index: {}]   ;;  %s14610_s6 = inlined_call_operand.vmem [shape: bf16[2,32,32], index: 6, kind: input, shape index: {}]   ;;  %s14611_s7 = inlined_call_operand.vmem [shape: f32[2,1,32], index: 7, kind: input, shape index: {}]   ;;  %s14612_s8 = inlined_call_operand.vmem [shape: bf16[2,32,64], index: 8, kind: input, shape index: {}]   ;;  %s14613_s9 = inlined_call_operand.vmem [shape: f32[2,1,64], index: 9, kind: input, shape index: {}]   ;;  %s14614_s10 = inlined_call_operand.vmem [shape: bf16[2,64,32], index: 10, kind: input, shape index: {}]   ;;  %s14615_s11 = inlined_call_operand.vmem [shape: f32[2,1,32], index: 11, kind: input, shape index: {}]   ;;  %s14616_s12 = inlined_call_operand.vmem [shape: f32[2,32], index: 12, kind: input, shape index: {}]   ;;  %s14617_s13 = inlined_call_operand.vmem [shape: bf16[32,128], index: 13, kind: input, shape index: {}]   ;;  %s14618_s14 = inlined_call_operand.vmem [shape: f32[1,128], index: 14, kind: input, shape index: {}]   ;;  %s14619_s15 = inlined_call_operand.hbm [shape: f32[2,4,128], index: 15, kind: output, shape index: {}]  }
   0x1   :  { %22 = vsyncpa [#allocation3 + $0x1], 0  ;;  %s11233_s18 = smov 0   ;;  %s11235_s19 = smov 0  }
   0x2   :  { %s11237_s20 = smov 0   ;;  %s11239_s21 = smov 0  }
   0x3 LB: > { %14682 = sst [smem:[#allocation5_spill]] %s11120_s18  ;;  %s11254_s22 = sadd.s32 4294967295, %s11132_s21   ;;  %s11132_s21 = sphi %s11239_s21, %s14781_s21   ;;  %s11128_s20 = sphi %s11237_s20, %s14783_s20   ;;  %s11124_s19 = sphi %s11235_s19, %s14785_s19   ;;  %s11120_s18 = sphi %s11233_s18, %s14784_s18  }
   0x4   : > { %14683 = sst [smem:[#allocation6_spill]] %s11128_s20  ;;  %s8898_s23 = sadd.s32 4294967294, %s11132_s21  }
   0x5   : > { %s11258_s24 = sadd.s32 1, %s11132_s21   ;;  %s355_s25 = sadd.s32 1, %s11128_s20 }
   0x6   : > { %14684 = sst [smem:[#allocation7_spill]] %s11258_s24  ;;  %s352_s26 = ssub.s32 %s11132_s21, %s11258_s24 }
   0x7   : > { %p365_p0 = scmp.ne.s32.totalorder %s11128_s20, %s11124_s19  ;;  %p353_p1 = scmp.eq.s32.totalorder %s352_s26, 0 }
   0x8   : > { %p366_p2 = scmp.eq.s32.totalorder %s11254_s22, 1  ;;  %p371_p3 = scmp.ne.s32.totalorder %s11124_s19, %s11120_s18 }
   0x9   : > { %p372_p4 = scmp.eq.s32.totalorder %s8898_s23, 1  ;;  %p8901_p7 = scmp.ge.s32.totalorder %s11132_s21, 1 }
   0xa   : > { %s11269_s27 = scalar_select %p353_p1, %s11128_s20, %s355_s25  }
   0xb   : > { %p11271_p5 = por %p366_p2, %p365_p0  ;;  %p11275_p6 = por %p372_p4, %p371_p3 }
   0xc   : > { %14685 = sst [smem:[#allocation8_spill]] %s11269_s27  ;;  %p440_p8 = scmp.lt.s32.totalorder %s11132_s21, 3 }
   0xd   : > { %s14687_s29 = scalar_select %p11275_p6, 1, 0 }
   0xe   : > { %p441_p9 = pnand %p8901_p7, %p440_p8 }
   0xf   : > { %14688 = sst [smem:[#allocation9_spill]] %s14687_s29 }
  0x10   : > { %444 = sbr.rel (%p441_p9) target bundleno = 9338 (0x247a), region = 80 }
  0x15   : > { %v10488_v0 = vld [vmem:[%s14605_s1 + $0x38] sm:$0xff]   ;;  %v11134_v1 = vmov 0   ;;  %p488_p10 = scmp.lt.s32.totalorder %s11254_s22, 1  ;;  %v10489_v2 = vld [vmem:[%s14605_s1 + $0x30] sm:$0xff]   ;;  %v10490_v3 = vld [vmem:[%s14605_s1 + $0x28] sm:$0xff]   ;;  %vm672_vm0 = vcmask 523264  }
  0x16   : > { %691 = vmatprep.subr.bf16.mxu0 %v11134_v1  ;;  %v10491_v4 = vld [vmem:[%s14605_s1 + $0x20] sm:$0xff]   ;;  %v10492_v6 = vld [vmem:[%s14605_s1 + $0x18] sm:$0xff]   ;;  %v10493_v7 = vld [vmem:[%s14605_s1 + $0x10] sm:$0xff]   ;;  %vm773_vm1 = vcmask 261120   ;;  %s11135_s24 = smov 96   ;;  %vm1105_vm2 = vcmask 64512  }
  0x17   : > { %692 = vmatpush1.bf16.msra.mxu0 %v10488_v0  ;;  %s489_s25 = scalar_select %p488_p10, %s11254_s22, 1  ;;  %v10494_v8 = vld [vmem:[%s14605_s1 + $0x8] sm:$0xff]   ;;  %v10495_v9 = vld [vmem:[%s14605_s1] sm:$0xff]   ;;  %v10496_v10 = vld [vmem:[%s14605_s1 + $0x58] sm:$0xff]   ;;  %vm1540_vm3 = vcmask 1043456   ;;  %vm1388_vm5 = vcmask 195584  }
  0x18   : > { %693 = vmatprep.subr.bf16.mxu0 %v11134_v1  ;;  %v10497_v11 = vld [vmem:[%s14605_s1 + $0x50] sm:$0xff]   ;;  %v10498_v12 = vld [vmem:[%s14605_s1 + $0x48] sm:$0xff]   ;;  %v10499_v13 = vld [vmem:[%s14605_s1 + $0x40] sm:$0xff]   ;;  %s11136_s29 = smov 64   ;;  %s11138_s26 = smov 88   ;;  %vm3986_vm6 = vcmask 130048  }
  0x19   : > { %s10250_s20 = smul.u32 96, %s489_s25  ;;  %v534_v25 = vld [vmem:[%s14606_s2] sm:$0xff]  ;;  %v535_v29 = vld [vmem:[%s14606_s2 + $0x8] sm:$0xff]  ;;  %v536_v34 = vld [vmem:[%s14606_s2 + $0x10] sm:$0xff]  ;;  %s14665_s30 = smov 120   ;;  %vm8726_vm7 = vcmask 1040384  }
  0x1a   : > { %v537_v39 = vld [vmem:[%s14606_s2 + $0x18] sm:$0xff]  ;;  %v538_v44 = vld [vmem:[%s14606_s2 + $0x20] sm:$0xff]  ;;  %v539_v49 = vld [vmem:[%s14606_s2 + $0x28] sm:$0xff]  ;;  %s14657_s16 = smov 56   ;;  %s14653_s17 = smov 112   ;;  %vm8728_vm8 = vcmask 1041408  }
  0x1b   : > { %694 = vmatpush1.bf16.msra.mxu0 %v10489_v2  ;;  %s11298_s18 = scalar_lea.vmem %s14604_s0, %s10250_s20  ;;  %v540_v54 = vld [vmem:[%s14606_s2 + $0x30] sm:$0xff]  ;;  %v541_v59 = vld [vmem:[%s14606_s2 + $0x38] sm:$0xff]  ;;  %v542_v0 = vld [vmem:[%s14606_s2 + $0x40] sm:$0xff]  ;;  %s14651_s27 = smov 48   ;;  %vm8730_vm9 = vcmask 1042432   ;;  %vm8733_vm10 = vcmask 257024  }
  0x1c   : > { %695 = vmatprep.subr.bf16.mxu0 %v11134_v1  ;;  %v10502_v5 = vld [vmem:[%s11298_s18 + $0x4] ss:$8 sps:$4 sm:$0xff]   ;;  %v10500_v14 = vld [vmem:[%s11298_s18] ss:$8 sps:$4 sm:$0xff]   ;;  %v10503_v15 = vld [vmem:[%s11298_s18 + $0x14] ss:$8 sps:$4 sm:$0xff]  }
  0x1d   : > { %8928 = vmatprep.mubr.msk.bf16.mxu0 %vm672_vm0, %v10502_v5  ;;  %v10505_v16 = vld [vmem:[%s11298_s18 + $0x10] ss:$8 sps:$4 sm:$0xff]   ;;  %v10506_v17 = vld [vmem:[%s11298_s18 + $0x24] ss:$8 sps:$4 sm:$0xff]   ;;  %v10508_v18 = vld [vmem:[%s11298_s18 + $0x20] ss:$8 sps:$4 sm:$0xff]  }
  0x1e   : > { %v10509_v19 = vld [vmem:[%s11298_s18 + $0x34] ss:$8 sps:$4 sm:$0xff]   ;;  %v10511_v20 = vld [vmem:[%s11298_s18 + $0x30] ss:$8 sps:$4 sm:$0xff]   ;;  %v10512_v21 = vld [vmem:[%s11298_s18 + $0x44] ss:$8 sps:$4 sm:$0xff]  }
  0x1f   : > { %696 = vmatpush1.bf16.msra.mxu0 %v10490_v3  ;;  %v10514_v22 = vld [vmem:[%s11298_s18 + $0x40] ss:$8 sps:$4 sm:$0xff]   ;;  %v10515_v23 = vld [vmem:[%s11298_s18 + $0x54] ss:$8 sps:$4 sm:$0xff]   ;;  %v10517_v24 = vld [vmem:[%s11298_s18 + $0x50] ss:$8 sps:$4 sm:$0xff]  }
  0x20   : > { %697 = vmatprep.subr.bf16.mxu0 %v11134_v1  ;;  %v543_v5 = vld [vmem:[%s14606_s2 + $0x48] sm:$0xff]  ;;  %s14655_s18 = smov 80   ;;  %s14647_s23 = smov 72   ;;  %vm11151_vm11 = vmmov 0  }
  0x21   : > { %s14645_s25 = smov 104   ;;  %s14649_s20 = smov 40  }
  0x23   : > { %698 = vmatpush1.bf16.msra.mxu0 %v10491_v4 }
  0x24   : > { %699 = vmatprep.subr.bf16.mxu0 %v11134_v1 }
  0x27   : > { %700 = vmatpush1.bf16.msra.mxu0 %v10492_v6 }
  0x28   : > { %701 = vmatprep.subr.bf16.mxu0 %v11134_v1 }
  0x2b   : > { %702 = vmatpush1.bf16.msra.mxu0 %v10493_v7 }
  0x2c   : > { %703 = vmatprep.subr.bf16.mxu0 %v11134_v1 }
  0x2f   : > { %704 = vmatpush1.bf16.msra.mxu0 %v10494_v8 }
  0x30   : > { %705 = vmatprep.subr.bf16.mxu0 %v11134_v1 }
  0x33   : > { %706 = vmatpush1.bf16.msra.mxu0 %v10495_v9 }
  0x34   : > { %715 = vmatprep.subr.bf16.mxu0 %v11134_v1 }
  0x37   : > { %716 = vmatpush2.bf16.msra.mxu0 %v10496_v10  ;;  %v544_v10 = vld [vmem:[%s14606_s2 + $0x50] sm:$0xff] }
  0x38   : > { %717 = vmatprep.subr.bf16.mxu0 %v11134_v1 }
  0x3b   : > { %718 = vmatpush2.bf16.msra.mxu0 %v10497_v11 }
  0x3c   : > { %719 = vmatprep.subr.bf16.mxu0 %v11134_v1 }
  0x3f   : > { %720 = vmatpush2.bf16.msra.mxu0 %v10498_v12 }
  0x40   : > { %721 = vmatprep.subr.bf16.mxu0 %v11134_v1 }
  0x43   : > { %722 = vmatpush2.bf16.msra.mxu0 %v10499_v13 }
  0x46   : > { %724 = vmatmul.mubr.bf16.vlgmr.msra.gmra.mxu0 %v10500_v14 }
  0x47   : > { %8929 = vmatprep.mubr.msk.bf16.mxu0 %vm672_vm0, %v10503_v15  ;;  %v545_v15 = vld [vmem:[%s14606_s2 + $0x58] sm:$0xff] }
  0x4e   : > { %732 = vmatmul.mubr.bf16.gmra.mxu0 %v10505_v16 }
  0x4f   : > { %8930 = vmatprep.mubr.msk.bf16.mxu0 %vm672_vm0, %v10506_v17 }
  0x56   : > { %740 = vmatmul.mubr.bf16.gmra.mxu0 %v10508_v18 }
  0x57   : > { %8931 = vmatprep.mubr.msk.bf16.mxu0 %vm672_vm0, %v10509_v19 }
  0x5e   : > { %748 = vmatmul.mubr.bf16.gmra.mxu0 %v10511_v20 }
  0x5f   : > { %8932 = vmatprep.mubr.msk.bf16.mxu0 %vm672_vm0, %v10512_v21 }
  0x66   : > { %756 = vmatmul.mubr.bf16.gmra.mxu0 %v10514_v22 }
  0x67   : > { %8933 = vmatprep.mubr.msk.bf16.mxu0 %vm672_vm0, %v10515_v23 }
  0x6e   : > { %764 = vmatmul.mubr.bf16.gmra.mxu0 %v10517_v24 }
 0x106   : > { %v725_v26 = vpop.f32.mrf.mxu0 }
 0x107   : > { %v11345_v27 = vadd.f32 %v725_v26, %v534_v25 }
 0x108   : > { %v727_v28 = vpop.f32.mrf.mxu0 }
 0x109   : > { %14689 = vst [vmem:[#allocation10_spill] sm:$0xff] %v11345_v27  ;;  %v774_v30 = vsel %vm773_vm1, %v11345_v27, 0.0 }
 0x10a   : > { %v728_v31 = vpop.f32.mrf.mxu0  ;;  %775 = vadd.xlane.f32.xlu0 %v774_v30 }
 0x10b   : > { %v11352_v32 = vadd.f32 %v728_v31, %v535_v29 }
 0x10c   : > { %v730_v33 = vpop.f32.mrf.mxu0 }
 0x10d   : > { %14690 = vst [vmem:[#allocation11_spill] sm:$0xff] %v11352_v32  ;;  %v777_v35 = vsel %vm773_vm1, %v11352_v32, 0.0 }
 0x10e   : > { %v733_v36 = vpop.f32.mrf.mxu0  ;;  %778 = vadd.xlane.f32.xlu0 %v777_v35 }
 0x10f   : > { %v11359_v37 = vadd.f32 %v733_v36, %v536_v34 }
 0x110   : > { %v735_v38 = vpop.f32.mrf.mxu0 }
 0x111   : > { %14691 = vst [vmem:[#allocation12_spill] sm:$0xff] %v11359_v37  ;;  %v780_v40 = vsel %vm773_vm1, %v11359_v37, 0.0 }
 0x112   : > { %v736_v41 = vpop.f32.mrf.mxu0  ;;  %781 = vadd.xlane.f32.xlu1 %v780_v40 }
 0x113   : > { %v11366_v42 = vadd.f32 %v736_v41, %v537_v39 }
 0x114   : > { %v738_v43 = vpop.f32.mrf.mxu0 }
 0x115   : > { %14692 = vst [vmem:[#allocation13_spill] sm:$0xff] %v11366_v42  ;;  %v783_v45 = vsel %vm773_vm1, %v11366_v42, 0.0 }
 0x116   : > { %v741_v46 = vpop.f32.mrf.mxu0  ;;  %784 = vadd.xlane.f32.xlu1 %v783_v45 }
 0x117   : > { %v11373_v47 = vadd.f32 %v741_v46, %v538_v44 }
 0x118   : > { %v743_v48 = vpop.f32.mrf.mxu0 }
 0x119   : > { %14693 = vst [vmem:[#allocation14_spill] sm:$0xff] %v11373_v47  ;;  %v786_v50 = vsel %vm773_vm1, %v11373_v47, 0.0 }
 0x11a   : > { %v744_v51 = vpop.f32.mrf.mxu0  ;;  %787 = vadd.xlane.f32.xlu0 %v786_v50 }
 0x11b   : > { %v11380_v52 = vadd.f32 %v744_v51, %v539_v49 }
 0x11c   : > { %v746_v53 = vpop.f32.mrf.mxu0 }
 0x11d   : > { %14694 = vst [vmem:[#allocation15_spill] sm:$0xff] %v11380_v52  ;;  %v789_v55 = vsel %vm773_vm1, %v11380_v52, 0.0 }
 0x11e   : > { %v749_v56 = vpop.f32.mrf.mxu0  ;;  %790 = vadd.xlane.f32.xlu1 %v789_v55 }
 0x11f   : > { %v11387_v57 = vadd.f32 %v749_v56, %v540_v54 }
 0x120   : > { %v751_v58 = vpop.f32.mrf.mxu0 }
 0x121   : > { %14695 = vst [vmem:[#allocation16_spill] sm:$0xff] %v11387_v57  ;;  %v792_v60 = vsel %vm773_vm1, %v11387_v57, 0.0 }
 0x122   : > { %v752_v61 = vpop.f32.mrf.mxu0  ;;  %793 = vadd.xlane.f32.xlu0 %v792_v60 }
 0x123   : > { %v11394_v62 = vadd.f32 %v752_v61, %v541_v59 }
 0x124   : > { %v754_v63 = vpop.f32.mrf.mxu0 }
 0x125   : > { %14696 = vst [vmem:[#allocation17_spill] sm:$0xff] %v11394_v62  ;;  %v795_v1 = vsel %vm773_vm1, %v11394_v62, 0.0 }
 0x126   : > { %v757_v2 = vpop.f32.mrf.mxu0  ;;  %796 = vadd.xlane.f32.xlu1 %v795_v1 }
 0x127   : > { %v11401_v3 = vadd.f32 %v757_v2, %v542_v0 }
 0x128   : > { %v759_v4 = vpop.f32.mrf.mxu0 }
 0x129   : > { %14697 = vst [vmem:[#allocation18_spill] sm:$0xff] %v11401_v3  ;;  %v798_v6 = vsel %vm773_vm1, %v11401_v3, 0.0 }
 0x12a   : > { %v760_v7 = vpop.f32.mrf.mxu0  ;;  %799 = vadd.xlane.f32.xlu0 %v798_v6 }
 0x12b   : > { %v11408_v8 = vadd.f32 %v760_v7, %v543_v5 }
 0x12c   : > { %v762_v9 = vpop.f32.mrf.mxu0 }
 0x12d   : > { %14698 = vst [vmem:[#allocation19_spill] sm:$0xff] %v11408_v8  ;;  %v801_v11 = vsel %vm773_vm1, %v11408_v8, 0.0 }
 0x12e   : > { %v765_v12 = vpop.f32.mrf.mxu0  ;;  %802 = vadd.xlane.f32.xlu1 %v801_v11 }
 0x12f   : > { %v11415_v13 = vadd.f32 %v765_v12, %v544_v10 }
 0x130   : > { %v767_v14 = vpop.f32.mrf.mxu0 }
 0x131   : > { %14699 = vst [vmem:[#allocation20_spill] sm:$0xff] %v11415_v13  ;;  %v804_v16 = vsel %vm773_vm1, %v11415_v13, 0.0 }
 0x132   : > { %v768_v17 = vpop.f32.mrf.mxu0  ;;  %805 = vadd.xlane.f32.xlu0 %v804_v16 }
 0x133   : > { %v11422_v18 = vadd.f32 %v768_v17, %v545_v15 }
 0x134   : > { %v770_v19 = vpop.f32.mrf.mxu0 }
 0x135   : > { %14700 = vst [vmem:[#allocation21_spill] sm:$0xff] %v11422_v18  ;;  %v807_v20 = vsel %vm773_vm1, %v11422_v18, 0.0 }
 0x136   : > { %808 = vadd.xlane.f32.xlu1 %v807_v20 }
 0x193   : > { %v776_v21 = vpop.xlane.xlu0 %775 }
 0x194   : > { %v811_v22 = vmul.f32 0.03125, %v776_v21 }
 0x196   : > { %v11427_v23 = vsub.f32 %v11345_v27, %v811_v22 }
 0x197   : > { %v779_v24 = vpop.xlane.xlu0 %778 }
 0x198   : > { %v812_v25 = vmul.f32 0.03125, %v779_v24  ;;  %v835_v26 = vmul.f32 %v11427_v23, %v11427_v23 }
 0x19a   : > { %v11432_v28 = vsub.f32 %v11352_v32, %v812_v25  ;;  %v847_v29 = vsel %vm773_vm1, %v835_v26, 0.0  ;;  %v10518_v26 = vld [vmem:[%s14608_s4 + $0x8] sm:$0xff]  }
 0x19b   : > { %v782_v30 = vpop.xlane.xlu1 %781  ;;  %848 = vadd.xlane.f32.xlu0 %v847_v29  ;;  %9498 = vmatprep.subr.bf16.mxu1 %v10518_v26 }
 0x19c   : > { %v813_v31 = vmul.f32 0.03125, %v782_v30  ;;  %v836_v33 = vmul.f32 %v11432_v28, %v11432_v28  ;;  %9499 = vmatpush3.bf16.msra.mxu1 %v10518_v26 }
 0x19e   : > { %v11438_v34 = vsub.f32 %v11359_v37, %v813_v31  ;;  %v850_v35 = vsel %vm773_vm1, %v836_v33, 0.0  ;;  %v10519_v33 = vld [vmem:[%s14608_s4] sm:$0xff]  }
 0x19f   : > { %v785_v36 = vpop.xlane.xlu1 %784  ;;  %851 = vadd.xlane.f32.xlu1 %v850_v35  ;;  %9500 = vmatprep.subr.bf16.mxu1 %v10519_v33 }
 0x1a0   : > { %v814_v38 = vmul.f32 0.03125, %v785_v36  ;;  %v837_v39 = vmul.f32 %v11438_v34, %v11438_v34  ;;  %9501 = vmatpush3.bf16.msra.mxu1 %v10519_v33 }
 0x1a2   : > { %v11444_v40 = vsub.f32 %v11366_v42, %v814_v38  ;;  %v853_v41 = vsel %vm773_vm1, %v837_v39, 0.0 }
 0x1a3   : > { %854 = vadd.xlane.f32.xlu0 %v853_v41  ;;  %v788_v43 = vpop.xlane.xlu0 %787 }
 0x1a4   : > { %v815_v44 = vmul.f32 0.03125, %v788_v43  ;;  %v838_v45 = vmul.f32 %v11444_v40, %v11444_v40 }
 0x1a6   : > { %v11450_v46 = vsub.f32 %v11373_v47, %v815_v44  ;;  %v856_v48 = vsel %vm773_vm1, %v838_v45, 0.0  ;;  %v494_v45 = vlaneseq }
 0x1a7   : > { %v791_v49 = vpop.xlane.xlu1 %790  ;;  %857 = vadd.xlane.f32.xlu1 %v856_v48 }
 0x1a8   : > { %v816_v50 = vmul.f32 0.03125, %v791_v49  ;;  %v839_v51 = vmul.f32 %v11450_v46, %v11450_v46 }
 0x1aa   : > { %v11456_v53 = vsub.f32 %v11380_v52, %v816_v50  ;;  %v859_v54 = vsel %vm773_vm1, %v839_v51, 0.0  ;;  %v11505_v51 = vshrl.u32 %v494_v45, 7 }
 0x1ab   : > { %860 = vadd.xlane.f32.xlu0 %v859_v54  ;;  %v794_v55 = vpop.xlane.xlu0 %793 }
 0x1ac   : > { %v817_v56 = vmul.f32 0.03125, %v794_v55  ;;  %v840_v58 = vmul.f32 %v11456_v53, %v11456_v53  ;;  %14701 = vst [vmem:[#allocation22_spill] sm:$0xff] %v11505_v51 }
 0x1ae   : > { %v11462_v59 = vsub.f32 %v11387_v57, %v817_v56  ;;  %v862_v60 = vsel %vm773_vm1, %v840_v58, 0.0  ;;  %v11508_v58 = vsub.s32 0, %v11505_v51 }
 0x1af   : > { %v797_v61 = vpop.xlane.xlu1 %796  ;;  %863 = vadd.xlane.f32.xlu1 %v862_v60 }
 0x1b0   : > { %v818_v63 = vmul.f32 0.03125, %v797_v61  ;;  %v841_v0 = vmul.f32 %v11462_v59, %v11462_v59  ;;  %14702 = vst [vmem:[#allocation23_spill] sm:$0xff] %v11508_v58  ;;  %v772_v61 = vld [vmem:[%s14607_s3] sm:$0xf] }
 0x1b2   : > { %v11468_v1 = vsub.f32 %v11394_v62, %v818_v63  ;;  %v865_v2 = vsel %vm773_vm1, %v841_v0, 0.0 }
 0x1b3   : > { %866 = vadd.xlane.f32.xlu0 %v865_v2  ;;  %v800_v4 = vpop.xlane.xlu0 %799 }
 0x1b4   : > { %v819_v5 = vmul.f32 0.03125, %v800_v4  ;;  %v842_v6 = vmul.f32 %v11468_v1, %v11468_v1 }
 0x1b6   : > { %v11474_v7 = vsub.f32 %v11401_v3, %v819_v5  ;;  %v868_v9 = vsel %vm773_vm1, %v842_v6, 0.0  ;;  %v11515_v5 = vrot.slane %v772_v61, %v11508_v58  ;;  %v11518_v6 = vsub.s32 1, %v11505_v51 }
 0x1b7   : > { %v803_v10 = vpop.xlane.xlu1 %802  ;;  %869 = vadd.xlane.f32.xlu1 %v868_v9 }
 0x1b8   : > { %v820_v11 = vmul.f32 0.03125, %v803_v10  ;;  %v843_v12 = vmul.f32 %v11474_v7, %v11474_v7  ;;  %14703 = vst [vmem:[#allocation24_spill] sm:$0xff] %v11518_v6 }
 0x1ba   : > { %v11480_v14 = vsub.f32 %v11408_v8, %v820_v11  ;;  %v871_v15 = vsel %vm773_vm1, %v843_v12, 0.0 }
 0x1bb   : > { %872 = vadd.xlane.f32.xlu0 %v871_v15  ;;  %v806_v16 = vpop.xlane.xlu0 %805 }
 0x1bc   : > { %v821_v17 = vmul.f32 0.03125, %v806_v16  ;;  %v844_v19 = vmul.f32 %v11480_v14, %v11480_v14 }
 0x1be   : > { %v11486_v20 = vsub.f32 %v11415_v13, %v821_v17  ;;  %v874_v21 = vsel %vm773_vm1, %v844_v19, 0.0  ;;  %v11523_v17 = vrot.slane %v772_v61, %v11518_v6 }
 0x1bf   : > { %v809_v22 = vpop.xlane.xlu1 %808  ;;  %875 = vadd.xlane.f32.xlu1 %v874_v21 }
 0x1c0   : > { %v822_v24 = vmul.f32 0.03125, %v809_v22  ;;  %v845_v25 = vmul.f32 %v11486_v20, %v11486_v20 }
 0x1c2   : > { %v11495_v29 = vsub.f32 %v11422_v18, %v822_v24  ;;  %v877_v30 = vsel %vm773_vm1, %v845_v25, 0.0 }
 0x1c3   : > { %878 = vadd.xlane.f32.xlu0 %v877_v30 }
 0x1c4   : > { %v846_v31 = vmul.f32 %v11495_v29, %v11495_v29 }
 0x1c6   : > { %v880_v35 = vsel %vm773_vm1, %v846_v31, 0.0 }
 0x1c7   : > { %881 = vadd.xlane.f32.xlu1 %v880_v35 }
 0x224   : > { %v849_v36 = vpop.xlane.xlu0 %848 }
 0x225   : > { %v883_v38 = vmul.f32 0.03125, %v849_v36 }
 0x227   : > { %v895_v39 = vadd.f32 1e-06, %v883_v38 }
 0x228   : > { %v852_v41 = vpop.xlane.xlu1 %851 }
 0x229   : > { %10540 = vrsqrt.f32 %v895_v39  ;;  %v884_v43 = vmul.f32 0.03125, %v852_v41 }
 0x22b   : > { %v896_v44 = vadd.f32 1e-06, %v884_v43 }
 0x22c   : > { %v855_v48 = vpop.xlane.xlu0 %854 }
 0x22d   : > { %10542 = vrsqrt.f32 %v896_v44  ;;  %v885_v49 = vmul.f32 0.03125, %v855_v48 }
 0x22f   : > { %v897_v50 = vadd.f32 1e-06, %v885_v49 }
 0x230   : > { %v858_v54 = vpop.xlane.xlu1 %857 }
 0x231   : > { %10544 = vrsqrt.f32 %v897_v50  ;;  %v886_v55 = vmul.f32 0.03125, %v858_v54 }
 0x233   : > { %v898_v56 = vadd.f32 1e-06, %v886_v55 }
 0x234   : > { %v861_v60 = vpop.xlane.xlu0 %860 }
 0x235   : > { %10546 = vrsqrt.f32 %v898_v56  ;;  %v887_v63 = vmul.f32 0.03125, %v861_v60 }
 0x236   : > { %v10541_v0 = vpop.eup %10540 }
 0x237   : > { %v899_v2 = vadd.f32 1e-06, %v887_v63  ;;  %v919_v4 = vmul.f32 %v10541_v0, %v11427_v23 }
 0x238   : > { %v864_v9 = vpop.xlane.xlu1 %863 }
 0x239   : > { %10548 = vrsqrt.f32 %v899_v2  ;;  %v888_v10 = vmul.f32 0.03125, %v864_v9  ;;  %v935_v16 = vmul.f32 %v11515_v5, %v919_v4 }
 0x23a   : > { %v10543_v11 = vpop.eup %10542 }
 0x23b   : > { %v900_v12 = vadd.f32 1e-06, %v888_v10  ;;  %v920_v15 = vmul.f32 %v10543_v11, %v11432_v28  ;;  %v951_v25 = vadd.f32 %v11523_v17, %v935_v16 }
 0x23c   : > { %v867_v19 = vpop.xlane.xlu0 %866 }
 0x23d   : > { %10550 = vrsqrt.f32 %v900_v12  ;;  %v889_v23 = vmul.f32 0.03125, %v867_v19  ;;  %v936_v21 = vmul.f32 %v11515_v5, %v920_v15 }
 0x23e   : > { %v10545_v22 = vpop.eup %10544 }
 0x23f   : > { %v901_v24 = vadd.f32 1e-06, %v889_v23  ;;  %v952_v26 = vadd.f32 %v11523_v17, %v936_v21  ;;  %v921_v30 = vmul.f32 %v10545_v22, %v11438_v34 }
 0x240   : > { %v870_v31 = vpop.xlane.xlu1 %869 }
 0x241   : > { %10552 = vrsqrt.f32 %v901_v24  ;;  %v890_v28 = vmul.f32 0.03125, %v870_v31  ;;  %v963_v33 = vpack.c.bf16 %v952_v26, %v951_v25  ;;  %v937_v39 = vmul.f32 %v11515_v5, %v921_v30 }
 0x242   : > { %v10547_v35 = vpop.eup %10546 }
 0x243   : > { %v902_v36 = vadd.f32 1e-06, %v890_v28  ;;  %9502 = vmatprep.mubr.msk.bf16.mxu1 %vm773_vm1, %v963_v33  ;;  %v922_v38 = vmul.f32 %v10547_v35, %v11444_v40  ;;  %v953_v34 = vadd.f32 %v11523_v17, %v937_v39 }
 0x244   : > { %v873_v41 = vpop.xlane.xlu0 %872 }
 0x245   : > { %10554 = vrsqrt.f32 %v902_v36  ;;  %v891_v43 = vmul.f32 0.03125, %v873_v41  ;;  %v938_v44 = vmul.f32 %v11515_v5, %v922_v38 }
 0x246   : > { %v10549_v48 = vpop.eup %10548 }
 0x247   : > { %v903_v49 = vadd.f32 1e-06, %v891_v43  ;;  %v954_v50 = vadd.f32 %v11523_v17, %v938_v44  ;;  %v923_v54 = vmul.f32 %v10549_v48, %v11450_v46 }
 0x248   : > { %v876_v55 = vpop.xlane.xlu1 %875 }
 0x249   : > { %10556 = vrsqrt.f32 %v903_v49  ;;  %v892_v56 = vmul.f32 0.03125, %v876_v55  ;;  %v964_v60 = vpack.c.bf16 %v954_v50, %v953_v34  ;;  %v939_v0 = vmul.f32 %v11515_v5, %v923_v54 }
 0x24a   : > { %v10551_v40 = vpop.eup %10550 }
 0x24b   : > { %v904_v61 = vadd.f32 1e-06, %v892_v56  ;;  %9503 = vmatmul.mubr.msk.bf16.vlgmr.msra.gmra.mxu1 %vm773_vm1, %v964_v60  ;;  %v924_v63 = vmul.f32 %v10551_v40, %v11456_v53  ;;  %v955_v46 = vadd.f32 %v11523_v17, %v939_v0 }
 0x24c   : > { %v879_v2 = vpop.xlane.xlu0 %878 }
 0x24d   : > { %10558 = vrsqrt.f32 %v904_v61  ;;  %v893_v4 = vmul.f32 0.03125, %v879_v2  ;;  %v940_v9 = vmul.f32 %v11515_v5, %v924_v63 }
 0x24e   : > { %v10553_v10 = vpop.eup %10552 }
 0x24f   : > { %v905_v11 = vadd.f32 1e-06, %v893_v4  ;;  %v956_v12 = vadd.f32 %v11523_v17, %v940_v9  ;;  %v925_v15 = vmul.f32 %v10553_v10, %v11462_v59 }
 0x250   : > { %v882_v16 = vpop.xlane.xlu1 %881 }
 0x251   : > { %10560 = vrsqrt.f32 %v905_v11  ;;  %v894_v19 = vmul.f32 0.03125, %v882_v16  ;;  %v965_v23 = vpack.c.bf16 %v956_v12, %v955_v46  ;;  %v941_v24 = vmul.f32 %v11515_v5, %v925_v15 }
 0x252   : > { %v10555_v53 = vpop.eup %10554 }
 0x253   : > { %v906_v21 = vadd.f32 1e-06, %v894_v19  ;;  %9506 = vmatprep.mubr.msk.bf16.mxu1 %vm773_vm1, %v965_v23  ;;  %v926_v22 = vmul.f32 %v10555_v53, %v11468_v1  ;;  %v957_v30 = vadd.f32 %v11523_v17, %v941_v24 }
 0x255   : > { %10562 = vrsqrt.f32 %v906_v21  ;;  %v942_v25 = vmul.f32 %v11515_v5, %v926_v22 }
 0x256   : > { %v10557_v26 = vpop.eup %10556 }
 0x257   : > { %v958_v59 = vadd.f32 %v11523_v17, %v942_v25  ;;  %v927_v31 = vmul.f32 %v10557_v26, %v11474_v7 }
 0x259   : > { %v966_v28 = vpack.c.bf16 %v958_v59, %v957_v30  ;;  %v943_v1 = vmul.f32 %v11515_v5, %v927_v31 }
 0x25a   : > { %v10559_v33 = vpop.eup %10558 }
 0x25b   : > { %9507 = vmatmul.mubr.msk.bf16.gmra.mxu1 %vm773_vm1, %v966_v28  ;;  %v928_v35 = vmul.f32 %v10559_v33, %v11480_v14  ;;  %v959_v39 = vadd.f32 %v11523_v17, %v943_v1 }
 0x25d   : > { %v944_v36 = vmul.f32 %v11515_v5, %v928_v35 }
 0x25e   : > { %v10561_v38 = vpop.eup %10560 }
 0x25f   : > { %v960_v41 = vadd.f32 %v11523_v17, %v944_v36  ;;  %v929_v43 = vmul.f32 %v10561_v38, %v11486_v20  ;;  %v8934_v20 = vld [vmem:[%s14609_s5] ss:$0 sm:$0xff] }
 0x261   : > { %v967_v44 = vpack.c.bf16 %v960_v41, %v959_v39  ;;  %v945_v49 = vmul.f32 %v11515_v5, %v929_v43 }
 0x262   : > { %v10563_v48 = vpop.eup %10562 }
 0x263   : > { %9510 = vmatprep.mubr.msk.bf16.mxu1 %vm773_vm1, %v967_v44  ;;  %v930_v7 = vmul.f32 %v10563_v48, %v11495_v29  ;;  %v961_v34 = vadd.f32 %v11523_v17, %v945_v49 }
 0x265   : > { %v946_v14 = vmul.f32 %v11515_v5, %v930_v7 }
 0x267   : > { %v962_v50 = vadd.f32 %v11523_v17, %v946_v14 }
 0x269   : > { %v968_v54 = vpack.c.bf16 %v962_v50, %v961_v34 }
 0x26b   : > { %9511 = vmatmul.mubr.msk.bf16.gmra.mxu1 %vm773_vm1, %v968_v54 }
 0x30b   : > { %v9504_v55 = vpop.f32.mrf.mxu1 }
 0x30c   : > { %v1053_v56 = vadd.f32 %v9504_v55, %v8934_v20 }
 0x30d   : > { %v1044_v60 = vpop.f32.mrf.mxu1 }
 0x30e   : > { %v11567_v40 = vpack.c.bf16 %v1053_v56, %v1053_v56  ;;  %v1045_v61 = vadd.f32 %v8934_v20, %v1044_v60 }
 0x30f   : > { %v9505_v29 = vpop.f32.mrf.mxu1 }
 0x310   : > { %1103 = vrot.lane.b32.xlu0 %v11567_v40, %s11135_s24  ;;  %v1056_v12 = vadd.f32 %v9505_v29, %v8934_v20 }
 0x311   : > { %v1047_v5 = vpop.f32.mrf.mxu1 }
 0x312   : > { %v1048_v17 = vadd.f32 %v8934_v20, %v1047_v5 }
 0x314   : > { %v11571_v63 = vpack.c.bf16 %v1048_v17, %v1045_v61 }
 0x316   : > { %1101 = vrot.lane.b32.xlu1 %v11571_v63, %s11135_s24  ;;  %9518 = vmatprep.mubr.msk.bf16.mxu1 %vm1105_vm2, %v11571_v63 }
 0x31b   : > { %v9508_v0 = vpop.f32.mrf.mxu1 }
 0x31c   : > { %v1069_v19 = vadd.f32 %v9508_v0, %v8934_v20  ;;  %v495_v0 = vand.u32 127, %v494_v45 }
 0x31d   : > { %v1060_v2 = vpop.f32.mrf.mxu1 }
 0x31e   : > { %v1061_v11 = vadd.f32 %v8934_v20, %v1060_v2  ;;  %vm496_vm4 = vcmp.lt.s32.totalorder %v495_v0, 17  ;;  %v11137_v2 = vmov -1e+30  }
 0x31f   : > { %v9509_v4 = vpop.f32.mrf.mxu1 }
 0x320   : > { %v11581_v15 = vpack.c.bf16 %v1061_v11, %v1056_v12  ;;  %v1072_v16 = vadd.f32 %v9509_v4, %v8934_v20  ;;  %v11652_v4 = vsel %vm496_vm4, 0.0, %v11137_v2 }
 0x321   : > { %v1063_v9 = vpop.f32.mrf.mxu1  ;;  %14704 = vst [vmem:[#allocation25_spill] sm:$0xff] %v11652_v4 }
 0x322   : > { %v1064_v10 = vadd.f32 %v8934_v20, %v1063_v9  ;;  %v11585_v53 = vpack.c.bf16 %v1072_v16, %v1069_v19 }
 0x324   : > { %v11577_v46 = vpack.c.bf16 %v1064_v10, %v1064_v10 }
 0x326   : > { %1170 = vrot.lane.b32.xlu1 %v11577_v46, %s11135_s24 }
 0x32a   : > { %1168 = vrot.lane.b32.xlu1 %v11581_v15, %s11135_s24 }
 0x32b   : > { %v9512_v23 = vpop.f32.mrf.mxu1 }
 0x32c   : > { %v1085_v59 = vadd.f32 %v9512_v23, %v8934_v20 }
 0x32d   : > { %v1076_v21 = vpop.f32.mrf.mxu1 }
 0x32e   : > { %v1077_v22 = vadd.f32 %v8934_v20, %v1076_v21  ;;  %1234 = vrot.lane.b32.xlu1 %v11585_v53, %s11135_s24 }
 0x32f   : > { %v9513_v24 = vpop.f32.mrf.mxu1 }
 0x330   : > { %v11589_v25 = vpack.c.bf16 %v1077_v22, %v1077_v22  ;;  %v1088_v26 = vadd.f32 %v9513_v24, %v8934_v20 }
 0x331   : > { %v1079_v30 = vpop.f32.mrf.mxu1 }
 0x332   : > { %v1080_v31 = vadd.f32 %v8934_v20, %v1079_v30  ;;  %1236 = vrot.lane.b32.xlu0 %v11589_v25, %s11135_s24  ;;  %v11593_v28 = vpack.c.bf16 %v1088_v26, %v1088_v26 }
 0x334   : > { %v11595_v33 = vpack.c.bf16 %v1085_v59, %v1080_v31 }
 0x336   : > { %1300 = vrot.lane.b32.xlu1 %v11595_v33, %s11135_s24  ;;  %1302 = vrot.lane.b32.xlu0 %v11593_v28, %s11135_s24 }
 0x33a   : > { %1529 = vrot.lane.b32.xlu1 %v11571_v63, %s11136_s29  ;;  %1531 = vrot.lane.b32.xlu0 %v11567_v40, %s11136_s29 }
 0x33e   : > { %1656 = vrot.lane.b32.xlu1 %v11589_v25, %s11136_s29  ;;  %1654 = vrot.lane.b32.xlu0 %v11585_v53, %s11136_s29 }
 0x342   : > { %1594 = vrot.lane.b32.xlu1 %v11577_v46, %s11136_s29 }
 0x346   : > { %1592 = vrot.lane.b32.xlu1 %v11581_v15, %s11136_s29 }
 0x382   : > { %v1104_v35 = vpop.permute.xlu0 %1103 }
 0x383   : > { %10154 = vmatprep.subr.msk.bf16.mxu1 %vm1105_vm2, %v1104_v35  ;;  %v1116_v1 = vsel %vm1105_vm2, %v1104_v35, 0 }
 0x384   : > { %9515 = vmatpush3.bf16.xpose.msra.mxu1 %v1116_v1 }
 0x388   : > { %v1102_v36 = vpop.permute.xlu1 %1101 }
 0x389   : > { %10155 = vmatprep.subr.msk.bf16.mxu1 %vm1105_vm2, %v1102_v36  ;;  %v1113_v38 = vsel %vm1105_vm2, %v1102_v36, 0 }
 0x38c   : > { %9517 = vmatpush3.bf16.xpose.msra.mxu1 %v1113_v38 }
 0x393   : > { %9519 = vmatmul.mubr.msk.bf16.vlgmr.msra.gmra.mxu1 %vm1105_vm2, %v11567_v40 }
 0x394   : > { %9526 = vmatprep.mubr.msk.bf16.mxu1 %vm1105_vm2, %v11581_v15 }
 0x398   : > { %v1171_v39 = vpop.permute.xlu1 %1170 }
 0x399   : > { %10156 = vmatprep.subr.msk.bf16.mxu1 %vm1105_vm2, %v1171_v39  ;;  %v1182_v41 = vsel %vm1105_vm2, %v1171_v39, 0 }
 0x39a   : > { %9523 = vmatpush3.bf16.xpose.msra.mxu1 %v1182_v41 }
 0x39c   : > { %v1169_v43 = vpop.permute.xlu1 %1168 }
 0x39d   : > { %10157 = vmatprep.subr.msk.bf16.mxu1 %vm1105_vm2, %v1169_v43  ;;  %v1179_v44 = vsel %vm1105_vm2, %v1169_v43, 0 }
 0x3a0   : > { %v1235_v48 = vpop.permute.xlu1 %1234 }
 0x3a1   : > { %v1245_v54 = vsel %vm1105_vm2, %v1235_v48, 0 }
 0x3a2   : > { %9525 = vmatpush3.bf16.xpose.msra.mxu1 %v1179_v44 }
 0x3a4   : > { %v1237_v7 = vpop.permute.xlu0 %1236 }
 0x3a5   : > { %10158 = vmatprep.subr.msk.bf16.mxu1 %vm1105_vm2, %v1237_v7  ;;  %v1248_v14 = vsel %vm1105_vm2, %v1237_v7, 0 }
 0x3a8   : > { %v1301_v49 = vpop.permute.xlu1 %1300  ;;  %v1303_v20 = vpop.permute.xlu0 %1302 }
 0x3a9   : > { %9527 = vmatmul.mubr.msk.bf16.vlgmr.msra.gmra.mxu1 %vm1105_vm2, %v11577_v46  ;;  %v1314_v29 = vsel %vm1105_vm2, %v1303_v20, 0  ;;  %v1311_v5 = vsel %vm1105_vm2, %v1301_v49, 0 }
 0x3aa   : > { %9531 = vmatpush3.bf16.xpose.msra.mxu1 %v1248_v14  ;;  %9534 = vmatprep.mubr.msk.bf16.mxu1 %vm1105_vm2, %v11585_v53 }
 0x3ab   : > { %10159 = vmatprep.subr.msk.bf16.mxu1 %vm1105_vm2, %v1235_v48 }
 0x3ac   : > { %v1530_v34 = vpop.permute.xlu1 %1529  ;;  %v1532_v61 = vpop.permute.xlu0 %1531 }
 0x3ad   : > { %v1542_v17 = vsel %vm1540_vm3, %v1532_v61, 0 }
 0x3b0   : > { %v11632_v50 = vpop.permute.xlu1 %1656 }
 0x3b2   : > { %9533 = vmatpush3.bf16.xpose.msra.mxu1 %v1245_v54 }
 0x3b3   : > { %10160 = vmatprep.subr.msk.bf16.mxu1 %vm1105_vm2, %v1303_v20 }
 0x3b4   : > { %v1595_v55 = vpop.permute.xlu1 %1594 }
 0x3b5   : > { %10163 = vmatprep.subr.msk.bf16.mxu0 %vm1540_vm3, %v1595_v55  ;;  %v1604_v56 = vsel %vm1540_vm3, %v1595_v55, 0 }
 0x3b6   : > { %9555 = vmatpush3.bf16.msra.mxu0 %v1604_v56 }
 0x3b8   : > { %v1593_v60 = vpop.permute.xlu1 %1592 }
 0x3b9   : > { %9535 = vmatmul.mubr.msk.bf16.vlgmr.msra.gmra.mxu1 %vm1105_vm2, %v11589_v25  ;;  %9556 = vmatprep.subr.bf16.mxu0 %v1593_v60 }
 0x3ba   : > { %9539 = vmatpush3.bf16.xpose.msra.mxu1 %v1314_v29  ;;  %9542 = vmatprep.mubr.msk.bf16.mxu1 %vm1105_vm2, %v11595_v33 }
 0x3bb   : > { %9557 = vmatpush3.bf16.msra.mxu0 %v1593_v60  ;;  %10161 = vmatprep.subr.msk.bf16.mxu1 %vm1105_vm2, %v1301_v49 }
 0x3c2   : > { %9541 = vmatpush3.bf16.xpose.msra.mxu1 %v1311_v5 }
 0x3c3   : > { %10162 = vmatprep.subr.msk.bf16.mxu1 %vm1540_vm3, %v1532_v61 }
 0x3c9   : > { %9543 = vmatmul.mubr.msk.bf16.vlgmr.msra.gmra.mxu1 %vm1105_vm2, %v11593_v28 }
 0x3ca   : > { %9547 = vmatpush3.bf16.msra.mxu1 %v1542_v17 }
 0x3cb   : > { %9548 = vmatprep.subr.bf16.mxu1 %v1530_v34 }
 0x3ce   : > { %9549 = vmatpush3.bf16.msra.mxu1 %v1530_v34 }
 0x3cf   : > { %10164 = vmatprep.subr.msk.bf16.mxu1 %vm1540_vm3, %v11632_v50 }
 0x453   : > { %v9520_v9 = vpop.f32.mrf.mxu1 }
 0x454   : > { %v1366_v10 = vmul.f32 0.35355338, %v9520_v9 }
 0x455   : > { %v1152_v11 = vpop.f32.mrf.mxu1 }
 0x456   : > { %v1364_v12 = vmul.f32 0.35355338, %v1152_v11  ;;  %v11655_v16 = vadd.f32 %v1366_v10, %v11652_v4 }
 0x457   : > { %v9521_v19 = vpop.f32.mrf.mxu1 }
 0x458   : > { %v1395_v23 = vsel %vm1388_vm5, %v11655_v16, -inf  ;;  %v11660_v21 = vadd.f32 %v1364_v12, %v11652_v4 }
 0x459   : > { %1396 = vmax.xlane.f32.xlu0 %v1395_v23  ;;  %v1155_v45 = vpop.f32.mrf.mxu1 }
 0x45a   : > { %v1365_v22 = vmul.f32 0.35355338, %v1155_v45  ;;  %v1389_v24 = vsel %vm1388_vm5, %v11660_v21, -inf }
 0x45c   : > { %v11665_v26 = vadd.f32 %v1365_v22, %v11652_v4 }
 0x45d   : > { %1390 = vmax.xlane.f32.xlu0 %v1389_v24 }
 0x45e   : > { %v1392_v30 = vsel %vm1388_vm5, %v11665_v26, -inf }
 0x45f   : > { %1393 = vmax.xlane.f32.xlu1 %v1392_v30 }
 0x469   : > { %v9528_v59 = vpop.f32.mrf.mxu1 }
 0x46a   : > { %v1369_v31 = vmul.f32 0.35355338, %v9528_v59 }
 0x46b   : > { %v1218_v35 = vpop.f32.mrf.mxu1 }
 0x46c   : > { %v1367_v1 = vmul.f32 0.35355338, %v1218_v35  ;;  %v11670_v36 = vadd.f32 %v1369_v31, %v11652_v4 }
 0x46d   : > { %v9529_v38 = vpop.f32.mrf.mxu1 }
 0x46e   : > { %v1404_v39 = vsel %vm1388_vm5, %v11670_v36, -inf  ;;  %v11675_v41 = vadd.f32 %v1367_v1, %v11652_v4  ;;  %v11718_v1 = vpop.permute.xlu0 %1654 }
 0x46f   : > { %1405 = vmax.xlane.f32.xlu0 %v1404_v39  ;;  %v1221_v43 = vpop.f32.mrf.mxu1 }
 0x470   : > { %v1368_v44 = vmul.f32 0.35355338, %v1221_v43  ;;  %v1398_v48 = vsel %vm1388_vm5, %v11675_v41, -inf }
 0x472   : > { %v11680_v7 = vadd.f32 %v1368_v44, %v11652_v4 }
 0x473   : > { %1399 = vmax.xlane.f32.xlu0 %v1398_v48 }
 0x474   : > { %v1401_v49 = vsel %vm1388_vm5, %v11680_v7, -inf }
 0x475   : > { %1402 = vmax.xlane.f32.xlu1 %v1401_v49 }
 0x479   : > { %v9536_v14 = vpop.f32.mrf.mxu1 }
 0x47a   : > { %v1372_v34 = vmul.f32 0.35355338, %v9536_v14 }
 0x47b   : > { %v1284_v54 = vpop.f32.mrf.mxu1 }
 0x47c   : > { %v1370_v20 = vmul.f32 0.35355338, %v1284_v54  ;;  %v11685_v55 = vadd.f32 %v1372_v34, %v11652_v4 }
 0x47d   : > { %v9537_v56 = vpop.f32.mrf.mxu1 }
 0x47e   : > { %v1413_v60 = vsel %vm1388_vm5, %v11685_v55, -inf  ;;  %v11690_v29 = vadd.f32 %v1370_v20, %v11652_v4 }
 0x47f   : > { %1414 = vmax.xlane.f32.xlu1 %v1413_v60  ;;  %v1287_v5 = vpop.f32.mrf.mxu1 }
 0x480   : > { %v1371_v61 = vmul.f32 0.35355338, %v1287_v5  ;;  %v1407_v17 = vsel %vm1388_vm5, %v11690_v29, -inf }
 0x481   : > { %1408 = vmax.xlane.f32.xlu0 %v1407_v17 }
 0x482   : > { %v11695_v0 = vadd.f32 %v1371_v61, %v11652_v4 }
 0x484   : > { %v1410_v2 = vsel %vm1388_vm5, %v11695_v0, -inf }
 0x485   : > { %1411 = vmax.xlane.f32.xlu0 %v1410_v2 }
 0x489   : > { %v9544_v9 = vpop.f32.mrf.mxu1 }
 0x48a   : > { %v1375_v10 = vmul.f32 0.35355338, %v9544_v9 }
 0x48b   : > { %v1350_v11 = vpop.f32.mrf.mxu1 }
 0x48c   : > { %v1373_v12 = vmul.f32 0.35355338, %v1350_v11  ;;  %v11700_v19 = vadd.f32 %v1375_v10, %v11652_v4 }
 0x48d   : > { %v9545_v23 = vpop.f32.mrf.mxu1 }
 0x48e   : > { %v1422_v45 = vsel %vm1388_vm5, %v11700_v19, -inf  ;;  %v11705_v22 = vadd.f32 %v1373_v12, %v11652_v4 }
 0x48f   : > { %1423 = vmax.xlane.f32.xlu1 %v1422_v45  ;;  %v1353_v24 = vpop.f32.mrf.mxu1 }
 0x490   : > { %v1374_v30 = vmul.f32 0.35355338, %v1353_v24  ;;  %v1416_v59 = vsel %vm1388_vm5, %v11705_v22, -inf }
 0x492   : > { %v11710_v31 = vadd.f32 %v1374_v30, %v11652_v4 }
 0x493   : > { %1417 = vmax.xlane.f32.xlu1 %v1416_v59 }
 0x494   : > { %v1419_v35 = vsel %vm1388_vm5, %v11710_v31, -inf }
 0x495   : > { %1420 = vmax.xlane.f32.xlu0 %v1419_v35 }
 0x4a4   : > { %1718 = vrot.lane.b32.xlu1 %v11593_v28, %s11136_s29 }
 0x4ab   : > { %1784 = vrot.lane.b32.xlu0 %v11567_v40, %s11138_s26 }
 0x4e2   : > { %v1397_v38 = vpop.xlane.xlu0 %1396 }
 0x4e3   : > { %v1427_v39 = vsub.f32 %v11655_v16, %v1397_v38 }
 0x4e5   : > { %v1441_v43 = vmul.f32 1.442695, %v1427_v39 }
 0x4e6   : > { %v1391_v44 = vpop.xlane.xlu0 %1390 }
 0x4e7   : > { %10564 = vpow2.f32 %v1441_v43  ;;  %v1425_v48 = vsub.f32 %v11660_v21, %v1391_v44 }
 0x4e8   : > { %v1394_v49 = vpop.xlane.xlu1 %1393 }
 0x4e9   : > { %v1437_v14 = vmul.f32 1.442695, %v1425_v48  ;;  %v1426_v34 = vsub.f32 %v11665_v26, %v1394_v49 }
 0x4eb   : > { %10566 = vpow2.f32 %v1437_v14  ;;  %v1439_v54 = vmul.f32 1.442695, %v1426_v34 }
 0x4ed   : > { %10568 = vpow2.f32 %v1439_v54 }
 0x4f4   : > { %v11723_v20 = vpop.eup %10564 }
 0x4f5   : > { %v1467_v56 = vsel %vm1388_vm5, %v11723_v20, 0.0 }
 0x4f6   : > { %1468 = vadd.xlane.f32.xlu0 %v1467_v56 }
 0x4f8   : > { %v11727_v60 = vpop.eup %10566  ;;  %v1406_v16 = vpop.xlane.xlu0 %1405 }
 0x4f9   : > { %v1430_v5 = vsub.f32 %v11670_v36, %v1406_v16  ;;  %v1461_v21 = vsel %vm1388_vm5, %v11727_v60, 0.0 }
 0x4fa   : > { %v11732_v61 = vpop.eup %10568  ;;  %1462 = vadd.xlane.f32.xlu0 %v1461_v21 }
 0x4fb   : > { %v1447_v26 = vmul.f32 1.442695, %v1430_v5  ;;  %v1464_v17 = vsel %vm1388_vm5, %v11732_v61, 0.0 }
 0x4fc   : > { %1465 = vadd.xlane.f32.xlu1 %v1464_v17  ;;  %v1400_v2 = vpop.xlane.xlu0 %1399 }
 0x4fd   : > { %10570 = vpow2.f32 %v1447_v26  ;;  %v1428_v9 = vsub.f32 %v11675_v41, %v1400_v2 }
 0x4fe   : > { %v1403_v10 = vpop.xlane.xlu1 %1402 }
 0x4ff   : > { %v1443_v11 = vmul.f32 1.442695, %v1428_v9  ;;  %v1429_v12 = vsub.f32 %v11680_v7, %v1403_v10 }
 0x501   : > { %10572 = vpow2.f32 %v1443_v11  ;;  %v1445_v36 = vmul.f32 1.442695, %v1429_v12 }
 0x503   : > { %10574 = vpow2.f32 %v1445_v36 }
 0x508   : > { %v1415_v23 = vpop.xlane.xlu1 %1414 }
 0x509   : > { %v1433_v45 = vsub.f32 %v11685_v55, %v1415_v23 }
 0x50a   : > { %v11739_v24 = vpop.eup %10570  ;;  %v1409_v30 = vpop.xlane.xlu0 %1408 }
 0x50b   : > { %v1453_v59 = vmul.f32 1.442695, %v1433_v45  ;;  %v1431_v35 = vsub.f32 %v11690_v29, %v1409_v30  ;;  %v1476_v38 = vsel %vm1388_vm5, %v11739_v24, 0.0 }
 0x50c   : > { %1477 = vadd.xlane.f32.xlu0 %v1476_v38 }
 0x50d   : > { %10576 = vpow2.f32 %v1453_v59  ;;  %v1449_v41 = vmul.f32 1.442695, %v1431_v35 }
 0x50e   : > { %v11744_v39 = vpop.eup %10572  ;;  %v1412_v7 = vpop.xlane.xlu0 %1411 }
 0x50f   : > { %10578 = vpow2.f32 %v1449_v41  ;;  %v1432_v43 = vsub.f32 %v11695_v0, %v1412_v7  ;;  %v1470_v55 = vsel %vm1388_vm5, %v11744_v39, 0.0 }
 0x510   : > { %v11749_v44 = vpop.eup %10574  ;;  %1471 = vadd.xlane.f32.xlu0 %v1470_v55 }
 0x511   : > { %v1451_v48 = vmul.f32 1.442695, %v1432_v43  ;;  %v1473_v29 = vsel %vm1388_vm5, %v11749_v44, 0.0 }
 0x512   : > { %1474 = vadd.xlane.f32.xlu1 %v1473_v29 }
 0x513   : > { %10580 = vpow2.f32 %v1451_v48 }
 0x518   : > { %v1424_v49 = vpop.xlane.xlu1 %1423 }
 0x519   : > { %v1436_v17 = vsub.f32 %v11700_v19, %v1424_v49 }
 0x51a   : > { %v11753_v14 = vpop.eup %10576 }
 0x51b   : > { %v1485_v34 = vsel %vm1388_vm5, %v11753_v14, 0.0  ;;  %v1459_v9 = vmul.f32 1.442695, %v1436_v17 }
 0x51c   : > { %v11757_v54 = vpop.eup %10578  ;;  %1486 = vadd.xlane.f32.xlu1 %v1485_v34  ;;  %v1418_v0 = vpop.xlane.xlu1 %1417 }
 0x51d   : > { %v1479_v56 = vsel %vm1388_vm5, %v11757_v54, 0.0  ;;  %v1434_v10 = vsub.f32 %v11705_v22, %v1418_v0  ;;  %10582 = vpow2.f32 %v1459_v9 }
 0x51e   : > { %v1421_v26 = vpop.xlane.xlu0 %1420 }
 0x51f   : > { %v1435_v2 = vsub.f32 %v11710_v31, %v1421_v26  ;;  %v1455_v12 = vmul.f32 1.442695, %v1434_v10 }
 0x520   : > { %v11761_v16 = vpop.eup %10580  ;;  %v11763_v5 = vpop.permute.xlu1 %1718  ;;  %1480 = vadd.xlane.f32.xlu1 %v1479_v56  ;;  %v1666_v56 = vsel %vm1540_vm3, %v11632_v50, 0 }
 0x521   : > { %10165 = vmatprep.subr.msk.bf16.mxu0 %vm1540_vm3, %v11763_v5  ;;  %v1482_v21 = vsel %vm1388_vm5, %v11761_v16, 0.0  ;;  %v1457_v11 = vmul.f32 1.442695, %v1435_v2 }
 0x522   : > { %1483 = vadd.xlane.f32.xlu0 %v1482_v21  ;;  %v11806_v31 = vpop.permute.xlu0 %1784 }
 0x523   : > { %10584 = vpow2.f32 %v1457_v11 }
 0x524   : > { %10586 = vpow2.f32 %v1455_v12 }
 0x52a   : > { %v11776_v36 = vpop.eup %10582 }
 0x52b   : > { %v1494_v45 = vsel %vm1388_vm5, %v11776_v36, 0.0 }
 0x530   : > { %v11778_v23 = vpop.eup %10584 }
 0x531   : > { %1782 = vrot.lane.b32.xlu1 %v11571_v63, %s11138_s26  ;;  %v11782_v30 = vpop.eup %10586  ;;  %v1491_v19 = vsel %vm1388_vm5, %v11778_v23, 0.0 }
 0x532   : > { %v1488_v22 = vsel %vm1388_vm5, %v11782_v30, 0.0 }
 0x538   : > { %1716 = vrot.lane.b32.xlu0 %v11595_v33, %s11136_s29 }
 0x555   : > { %1495 = vadd.xlane.f32.xlu1 %v1494_v45  ;;  %v1728_v45 = vsel %vm1540_vm3, %v11763_v5, 0  ;;  %v1796_v5 = vsel %vm1105_vm2, %v11806_v31, 0 }
 0x557   : > { %1492 = vadd.xlane.f32.xlu0 %v1491_v19 }
 0x559   : > { %1489 = vadd.xlane.f32.xlu1 %v1488_v22 }
 0x56a   : > { %1778 = vrot.lane.b32.xlu1 %v11571_v63, %s14665_s30 }
 0x56d   : > { %1852 = vrot.lane.b32.xlu0 %v11577_v46, %s11138_s26 }
 0x56e   : > { %1780 = vrot.lane.b32.xlu1 %v11567_v40, %s14665_s30 }
 0x571   : > { %1920 = vrot.lane.b32.xlu0 %v11589_v25, %s11138_s26 }
 0x572   : > { %1918 = vrot.lane.b32.xlu1 %v11585_v53, %s11138_s26 }
 0x575   : > { %1850 = vrot.lane.b32.xlu0 %v11581_v15, %s11138_s26 }
 0x576   : > { %1988 = vrot.lane.b32.xlu1 %v11593_v28, %s11138_s26 }
 0x579   : > { %1846 = vrot.lane.b32.xlu0 %v11581_v15, %s14665_s30 }
 0x57a   : > { %1914 = vrot.lane.b32.xlu1 %v11585_v53, %s14665_s30 }
 0x57d   : > { %1848 = vrot.lane.b32.xlu0 %v11577_v46, %s14665_s30 }
 0x57e   : > { %1986 = vrot.lane.b32.xlu1 %v11595_v33, %s11138_s26 }
 0x57f   : > { %v1469_v59 = vpop.xlane.xlu0 %1468 }
 0x580   : > { %10588 = vrcp.f32 %v1469_v59 }
 0x581   : > { %1916 = vrot.lane.b32.xlu0 %v11589_v25, %s14665_s30 }
 0x582   : > { %1984 = vrot.lane.b32.xlu1 %v11593_v28, %s14665_s30 }
 0x583   : > { %v1463_v35 = vpop.xlane.xlu0 %1462 }
 0x584   : > { %10590 = vrcp.f32 %v1463_v35 }
 0x585   : > { %v1466_v38 = vpop.xlane.xlu1 %1465  ;;  %1982 = vrot.lane.b32.xlu0 %v11595_v33, %s14665_s30  ;;  %s14749_s30 = smov 16  }
 0x586   : > { %10592 = vrcp.f32 %v1466_v38  ;;  %2214 = vrot.lane.b32.xlu1 %v11571_v63, %s14657_s16 }
 0x589   : > { %2216 = vrot.lane.b32.xlu0 %v11567_v40, %s14657_s16 }
 0x58a   : > { %2340 = vrot.lane.b32.xlu1 %v11589_v25, %s14657_s16 }
 0x58d   : > { %2338 = vrot.lane.b32.xlu0 %v11585_v53, %s14657_s16  ;;  %v10589_v41 = vpop.eup %10588 }
 0x58e   : > { %2278 = vrot.lane.b32.xlu1 %v11577_v46, %s14657_s16  ;;  %v1511_v55 = vmul.f32 %v10589_v41, %v11723_v20 }
 0x590   : > { %v1522_v0 = vpack.c.bf16 %v1511_v55, %v1511_v55 }
 0x591   : > { %v10591_v7 = vpop.eup %10590 }
 0x592   : > { %2276 = vrot.lane.b32.xlu1 %v11581_v15, %s14657_s16  ;;  %v1509_v48 = vmul.f32 %v10591_v7, %v11727_v60 }
 0x593   : > { %v10593_v43 = vpop.eup %10592 }
 0x594   : > { %v1510_v29 = vmul.f32 %v10593_v43, %v11732_v61 }
 0x595   : > { %v1478_v49 = vpop.xlane.xlu0 %1477 }
 0x596   : > { %v1521_v34 = vpack.c.bf16 %v1510_v29, %v1509_v48  ;;  %10594 = vrcp.f32 %v1478_v49 }
 0x598   : > { %9550 = vmatprep.mubr.msk.bf16.mxu1 %vm1388_vm5, %v1521_v34 }
 0x599   : > { %9551 = vmatmul.mubr.msk.bf16.vlgmr.msra.gmra.mxu1 %vm1388_vm5, %v1522_v0  ;;  %v1472_v21 = vpop.xlane.xlu0 %1471 }
 0x59a   : > { %9563 = vmatpush3.bf16.msra.mxu1 %v1666_v56  ;;  %10596 = vrcp.f32 %v1472_v21 }
 0x59b   : > { %9564 = vmatprep.subr.bf16.mxu1 %v11718_v1  ;;  %v1475_v20 = vpop.xlane.xlu1 %1474 }
 0x59c   : > { %10598 = vrcp.f32 %v1475_v20 }
 0x59e   : > { %9565 = vmatpush3.bf16.msra.mxu1 %v11718_v1 }
 0x59f   : > { %10166 = vmatprep.subr.msk.bf16.mxu1 %vm1105_vm2, %v11806_v31 }
 0x5a3   : > { %v10595_v61 = vpop.eup %10594 }
 0x5a4   : > { %v1514_v2 = vmul.f32 %v10595_v61, %v11739_v24 }
 0x5a5   : > { %v1487_v60 = vpop.xlane.xlu1 %1486 }
 0x5a6   : > { %10600 = vrcp.f32 %v1487_v60  ;;  %v1524_v1 = vpack.c.bf16 %v1514_v2, %v1514_v2 }
 0x5a7   : > { %v10597_v26 = vpop.eup %10596 }
 0x5a8   : > { %v1512_v9 = vmul.f32 %v10597_v26, %v11744_v39 }
 0x5a9   : > { %v10599_v17 = vpop.eup %10598  ;;  %v1481_v50 = vpop.xlane.xlu1 %1480 }
 0x5aa   : > { %10602 = vrcp.f32 %v1481_v50  ;;  %v1513_v10 = vmul.f32 %v10599_v17, %v11749_v44 }
 0x5ab   : > { %v1484_v11 = vpop.xlane.xlu0 %1483 }
 0x5ac   : > { %10604 = vrcp.f32 %v1484_v11  ;;  %v1523_v12 = vpack.c.bf16 %v1513_v10, %v1512_v9 }
 0x5ad   : > { %v1783_v7 = vpop.permute.xlu1 %1782 }
 0x5ae   : > { %9558 = vmatprep.mubr.msk.bf16.mxu0 %vm1388_vm5, %v1523_v12  ;;  %v1793_v43 = vsel %vm1105_vm2, %v1783_v7, 0 }
 0x5af   : > { %9559 = vmatmul.mubr.msk.bf16.vlgmr.msra.gmra.mxu0 %vm1388_vm5, %v1524_v1  ;;  %v1717_v19 = vpop.permute.xlu0 %1716 }
 0x5b0   : > { %9571 = vmatpush3.bf16.msra.mxu0 %v1728_v45 }
 0x5b1   : > { %9572 = vmatprep.subr.bf16.mxu0 %v1717_v19 }
 0x5b3   : > { %v10601_v24 = vpop.eup %10600 }
 0x5b4   : > { %9573 = vmatpush3.bf16.msra.mxu0 %v1717_v19  ;;  %v1517_v44 = vmul.f32 %v10601_v24, %v11753_v14 }
 0x5b6   : > { %v1526_v41 = vpack.c.bf16 %v1517_v44, %v1517_v44 }
 0x5b7   : > { %v10603_v22 = vpop.eup %10602 }
 0x5b8   : > { %v1515_v59 = vmul.f32 %v10603_v22, %v11757_v54 }
 0x5b9   : > { %v10605_v39 = vpop.eup %10604 }
 0x5ba   : > { %v1516_v35 = vmul.f32 %v10605_v39, %v11761_v16 }
 0x5bc   : > { %v1525_v38 = vpack.c.bf16 %v1516_v35, %v1515_v59 }
 0x5be   : > { %9566 = vmatprep.mubr.msk.bf16.mxu1 %vm1388_vm5, %v1525_v38 }
 0x5bf   : > { %9567 = vmatmul.mubr.msk.bf16.vlgmr.msra.gmra.mxu1 %vm1388_vm5, %v1526_v41 }
 0x5c0   : > { %9579 = vmatpush3.bf16.xpose.msra.mxu1 %v1796_v5 }
 0x5c1   : > { %10167 = vmatprep.subr.msk.bf16.mxu1 %vm1105_vm2, %v1783_v7 }
 0x5c8   : > { %9581 = vmatpush3.bf16.xpose.msra.mxu1 %v1793_v43 }
 0x5de   : > { %v1496_v14 = vpop.xlane.xlu1 %1495 }
 0x5df   : > { %10606 = vrcp.f32 %v1496_v14 }
 0x5e0   : > { %v1493_v54 = vpop.xlane.xlu0 %1492 }
 0x5e1   : > { %10608 = vrcp.f32 %v1493_v54 }
 0x5e2   : > { %v1490_v16 = vpop.xlane.xlu1 %1489 }
 0x5e3   : > { %10610 = vrcp.f32 %v1490_v16 }
 0x5e4   : > { %v1853_v55 = vpop.permute.xlu0 %1852 }
 0x5e5   : > { %10168 = vmatprep.subr.msk.bf16.mxu0 %vm1105_vm2, %v1853_v55  ;;  %v1864_v1 = vsel %vm1105_vm2, %v1853_v55, 0 }
 0x5e6   : > { %v1779_v48 = vpop.permute.xlu1 %1778 }
 0x5e7   : > { %9582 = vmatprep.mubr.msk.bf16.mxu1 %vm1105_vm2, %v1779_v48 }
 0x5e8   : > { %v1921_v31 = vpop.permute.xlu0 %1920 }
 0x5e9   : > { %10170 = vmatprep.subr.msk.bf16.mxu1 %vm1105_vm2, %v1921_v31  ;;  %v1932_v29 = vsel %vm1105_vm2, %v1921_v31, 0 }
 0x5ea   : > { %v1781_v49 = vpop.permute.xlu1 %1780 }
 0x5eb   : > { %9583 = vmatmul.mubr.msk.bf16.vlgmr.msra.gmra.mxu1 %vm1105_vm2, %v1781_v49 }
 0x5ec   : > { %9595 = vmatpush3.bf16.xpose.msra.mxu1 %v1932_v29  ;;  %v1851_v34 = vpop.permute.xlu0 %1850  ;;  %v10607_v0 = vpop.eup %10606 }
 0x5ed   : > { %v1520_v61 = vmul.f32 %v10607_v0, %v11776_v36  ;;  %v1861_v19 = vsel %vm1105_vm2, %v1851_v34, 0 }
 0x5ee   : > { %v10609_v56 = vpop.eup %10608  ;;  %v1919_v21 = vpop.permute.xlu1 %1918 }
 0x5ef   : > { %10171 = vmatprep.subr.msk.bf16.mxu1 %vm1105_vm2, %v1919_v21  ;;  %v1519_v17 = vmul.f32 %v10609_v56, %v11778_v23  ;;  %v1929_v50 = vsel %vm1105_vm2, %v1919_v21, 0  ;;  %v1528_v11 = vpack.c.bf16 %v1520_v61, %v1520_v61 }
 0x5f0   : > { %v10611_v20 = vpop.eup %10610  ;;  %v1847_v60 = vpop.permute.xlu0 %1846 }
 0x5f1   : > { %v1518_v26 = vmul.f32 %v10611_v20, %v11782_v30 }
 0x5f2   : > { %v1989_v2 = vpop.permute.xlu1 %1988 }
 0x5f3   : > { %v1527_v9 = vpack.c.bf16 %v1519_v17, %v1518_v26  ;;  %v2000_v59 = vsel %vm1105_vm2, %v1989_v2, 0 }
 0x5f4   : > { %9597 = vmatpush3.bf16.xpose.msra.mxu1 %v1929_v50  ;;  %v1849_v10 = vpop.permute.xlu0 %1848 }
 0x5f5   : > { %9574 = vmatprep.mubr.msk.bf16.mxu0 %vm1388_vm5, %v1527_v9 }
 0x5f6   : > { %v1915_v12 = vpop.permute.xlu1 %1914  ;;  %9575 = vmatmul.mubr.msk.bf16.vlgmr.msra.gmra.mxu0 %vm1388_vm5, %v1528_v11 }
 0x5f7   : > { %9587 = vmatpush3.bf16.xpose.msra.mxu0 %v1864_v1  ;;  %9590 = vmatprep.mubr.msk.bf16.mxu0 %vm1105_vm2, %v1847_v60 }
 0x5f8   : > { %10169 = vmatprep.subr.msk.bf16.mxu0 %vm1105_vm2, %v1851_v34  ;;  %9598 = vmatprep.mubr.msk.bf16.mxu1 %vm1105_vm2, %v1915_v12  ;;  %v1917_v36 = vpop.permute.xlu0 %1916 }
 0x5fa   : > { %v1987_v23 = vpop.permute.xlu1 %1986 }
 0x5fb   : > { %9599 = vmatmul.mubr.msk.bf16.vlgmr.msra.gmra.mxu1 %vm1105_vm2, %v1917_v36  ;;  %v1997_v35 = vsel %vm1105_vm2, %v1987_v23, 0 }
 0x5fc   : > { %v1983_v30 = vpop.permute.xlu0 %1982 }
 0x5fe   : > { %v1985_v45 = vpop.permute.xlu1 %1984 }
 0x5ff   : > { %9589 = vmatpush3.bf16.xpose.msra.mxu0 %v1861_v19 }
 0x600   : > { %10172 = vmatprep.subr.msk.bf16.mxu0 %vm1105_vm2, %v1989_v2  ;;  %v2217_v24 = vpop.permute.xlu0 %2216 }
 0x601   : > { %10174 = vmatprep.subr.msk.bf16.mxu1 %vm1540_vm3, %v2217_v24  ;;  %v2226_v22 = vsel %vm1540_vm3, %v2217_v24, 0 }
 0x602   : > { %v2215_v39 = vpop.permute.xlu1 %2214  ;;  %9611 = vmatpush3.bf16.msra.mxu1 %v2226_v22 }
 0x603   : > { %9612 = vmatprep.subr.bf16.mxu1 %v2215_v39 }
 0x606   : > { %9591 = vmatmul.mubr.msk.bf16.vlgmr.msra.gmra.mxu0 %vm1105_vm2, %v1849_v10  ;;  %v11879_v44 = vpop.permute.xlu1 %2340  ;;  %9613 = vmatpush3.bf16.msra.mxu1 %v2215_v39 }
 0x607   : > { %9603 = vmatpush3.bf16.xpose.msra.mxu0 %v2000_v59  ;;  %9606 = vmatprep.mubr.msk.bf16.mxu0 %vm1105_vm2, %v1983_v30 }
 0x608   : > { %10173 = vmatprep.subr.msk.bf16.mxu0 %vm1105_vm2, %v1987_v23  ;;  %10176 = vmatprep.subr.msk.bf16.mxu1 %vm1540_vm3, %v11879_v44 }
 0x60a   : > { %v2279_v38 = vpop.permute.xlu1 %2278 }
 0x60b   : > { %v2288_v41 = vsel %vm1540_vm3, %v2279_v38, 0 }
 0x60e   : > { %v2277_v5 = vpop.permute.xlu1 %2276 }
 0x60f   : > { %9605 = vmatpush3.bf16.xpose.msra.mxu0 %v1997_v35 }
 0x610   : > { %10175 = vmatprep.subr.msk.bf16.mxu0 %vm1540_vm3, %v2279_v38 }
 0x616   : > { %9607 = vmatmul.mubr.msk.bf16.vlgmr.msra.gmra.mxu0 %vm1105_vm2, %v1985_v45 }
 0x617   : > { %9619 = vmatpush3.bf16.msra.mxu0 %v2288_v41 }
 0x618   : > { %9620 = vmatprep.subr.bf16.mxu0 %v2277_v5 }
 0x61b   : > { %9621 = vmatpush3.bf16.msra.mxu0 %v2277_v5 }
 0x659   : > { %v11890_v7 = vpop.f32.mrf.mxu1 }
 0x65b   : > { %v11892_v43 = vpop.f32.mrf.mxu1 }
 0x65d   : > { %v9553_v14 = vpop.f32.mrf.mxu1 }
 0x65f   : > { %v11898_v48 = vpop.f32.mrf.mxu1 }
 0x66f   : > { %v11894_v54 = vpop.f32.mrf.mxu0 }
 0x671   : > { %v11896_v16 = vpop.f32.mrf.mxu0 }
 0x673   : > { %v9561_v55 = vpop.f32.mrf.mxu0 }
 0x675   : > { %v11914_v9 = vpop.f32.mrf.mxu0 }
 0x67f   : > { %v11900_v31 = vpop.f32.mrf.mxu1 }
 0x681   : > { %v11902_v29 = vpop.f32.mrf.mxu1 }
 0x683   : > { %v9569_v49 = vpop.f32.mrf.mxu1 }
 0x685   : > { %v11904_v34 = vpop.f32.mrf.mxu1 }
 0x6ab   : > { %v9584_v0 = vpop.f32.mrf.mxu1 }
 0x6ac   : > { %v2052_v56 = vmul.f32 0.35355338, %v9584_v0 }
 0x6ad   : > { %v1832_v21 = vpop.f32.mrf.mxu1 }
 0x6ae   : > { %v2050_v20 = vmul.f32 0.35355338, %v1832_v21  ;;  %v11907_v60 = vadd.f32 %v2052_v56, %v11652_v4 }
 0x6af   : > { %v9585_v61 = vpop.f32.mrf.mxu1 }
 0x6b0   : > { %v2080_v26 = vsel %vm1388_vm5, %v11907_v60, -inf  ;;  %v11912_v17 = vadd.f32 %v2050_v20, %v11652_v4 }
 0x6b1   : > { %2081 = vmax.xlane.f32.xlu0 %v2080_v26  ;;  %v1835_v2 = vpop.f32.mrf.mxu1 }
 0x6b2   : > { %v2051_v50 = vmul.f32 0.35355338, %v1835_v2  ;;  %v2074_v10 = vsel %vm1388_vm5, %v11912_v17, -inf }
 0x6b4   : > { %v11919_v11 = vadd.f32 %v2051_v50, %v11652_v4 }
 0x6b5   : > { %2075 = vmax.xlane.f32.xlu0 %v2074_v10 }
 0x6b6   : > { %v11921_v12 = vpop.f32.mrf.mxu0  ;;  %v2077_v1 = vsel %vm1388_vm5, %v11919_v11, -inf }
 0x6b7   : > { %2078 = vmax.xlane.f32.xlu1 %v2077_v1 }
 0x6b8   : > { %v11925_v36 = vpop.f32.mrf.mxu0 }
 0x6ba   : > { %v9577_v23 = vpop.f32.mrf.mxu0 }
 0x6bb   : > { %v9600_v30 = vpop.f32.mrf.mxu1 }
 0x6bc   : > { %v2058_v45 = vmul.f32 0.35355338, %v9600_v30  ;;  %v11932_v59 = vpop.f32.mrf.mxu0 }
 0x6bd   : > { %v1968_v19 = vpop.f32.mrf.mxu1  ;;  %14705 = vst [vmem:[#allocation26_spill] sm:$0xff] %v11932_v59 }
 0x6be   : > { %v11928_v24 = vadd.f32 %v2058_v45, %v11652_v4  ;;  %v2056_v38 = vmul.f32 0.35355338, %v1968_v19 }
 0x6bf   : > { %v9601_v22 = vpop.f32.mrf.mxu1 }
 0x6c0   : > { %v2098_v39 = vsel %vm1388_vm5, %v11928_v24, -inf  ;;  %v11940_v56 = vadd.f32 %v2056_v38, %v11652_v4 }
 0x6c1   : > { %2099 = vmax.xlane.f32.xlu1 %v2098_v39  ;;  %v1971_v21 = vpop.f32.mrf.mxu1 }
 0x6c2   : > { %v2057_v26 = vmul.f32 0.35355338, %v1971_v21  ;;  %v2092_v2 = vsel %vm1388_vm5, %v11940_v56, -inf }
 0x6c4   : > { %v11955_v30 = vadd.f32 %v2057_v26, %v11652_v4  ;;  %v11978_v26 = vpop.permute.xlu0 %2338 }
 0x6c6   : > { %v9592_v35 = vpop.f32.mrf.mxu0  ;;  %v2095_v22 = vsel %vm1388_vm5, %v11955_v30, -inf }
 0x6c7   : > { %v2055_v41 = vmul.f32 0.35355338, %v9592_v35 }
 0x6c8   : > { %v1900_v5 = vpop.f32.mrf.mxu0 }
 0x6c9   : > { %v11935_v14 = vadd.f32 %v2055_v41, %v11652_v4  ;;  %v2053_v49 = vmul.f32 0.35355338, %v1900_v5 }
 0x6ca   : > { %v9593_v55 = vpop.f32.mrf.mxu0 }
 0x6cb   : > { %v2089_v0 = vsel %vm1388_vm5, %v11935_v14, -inf  ;;  %v11948_v10 = vadd.f32 %v2053_v49, %v11652_v4 }
 0x6cc   : > { %2090 = vmax.xlane.f32.xlu0 %v2089_v0  ;;  %v1903_v20 = vpop.f32.mrf.mxu0 }
 0x6cd   : > { %v2054_v61 = vmul.f32 0.35355338, %v1903_v20  ;;  %v2083_v23 = vsel %vm1388_vm5, %v11948_v10, -inf }
 0x6cf   : > { %v11945_v50 = vadd.f32 %v2054_v61, %v11652_v4 }
 0x6d0   : > { %2093 = vmax.xlane.f32.xlu0 %v2092_v2 }
 0x6d1   : > { %v2086_v1 = vsel %vm1388_vm5, %v11945_v50, -inf }
 0x6d2   : > { %2087 = vmax.xlane.f32.xlu1 %v2086_v1 }
 0x6d4   : > { %2084 = vmax.xlane.f32.xlu0 %v2083_v23 }
 0x6d6   : > { %v9608_v45 = vpop.f32.mrf.mxu0 }
 0x6d7   : > { %v2061_v19 = vmul.f32 0.35355338, %v9608_v45 }
 0x6d8   : > { %2096 = vmax.xlane.f32.xlu0 %v2095_v22  ;;  %v2036_v39 = vpop.f32.mrf.mxu0 }
 0x6d9   : > { %v2059_v35 = vmul.f32 0.35355338, %v2036_v39  ;;  %v11960_v38 = vadd.f32 %v2061_v19, %v11652_v4 }
 0x6da   : > { %v9609_v41 = vpop.f32.mrf.mxu0 }
 0x6db   : > { %v11963_v5 = vadd.f32 %v2059_v35, %v11652_v4  ;;  %v2107_v55 = vsel %vm1388_vm5, %v11960_v38, -inf }
 0x6dc   : > { %2108 = vmax.xlane.f32.xlu1 %v2107_v55  ;;  %v2039_v49 = vpop.f32.mrf.mxu0 }
 0x6dd   : > { %v2060_v0 = vmul.f32 0.35355338, %v2039_v49  ;;  %v2101_v21 = vsel %vm1388_vm5, %v11963_v5, -inf }
 0x6df   : > { %v11970_v20 = vadd.f32 %v2060_v0, %v11652_v4 }
 0x6e0   : > { %2102 = vmax.xlane.f32.xlu1 %v2101_v21 }
 0x6e1   : > { %v2104_v61 = vsel %vm1388_vm5, %v11970_v20, -inf }
 0x6e2   : > { %2105 = vmax.xlane.f32.xlu0 %v2104_v61 }
 0x6f1   : > { %2402 = vrot.lane.b32.xlu1 %v11593_v28, %s14657_s16 }
 0x6f8   : > { %2468 = vrot.lane.b32.xlu0 %v11567_v40, %s14655_s18 }
 0x73a   : > { %v2082_v2 = vpop.xlane.xlu0 %2081 }
 0x73b   : > { %v2112_v1 = vsub.f32 %v11907_v60, %v2082_v2 }
 0x73d   : > { %v2126_v23 = vmul.f32 1.442695, %v2112_v1 }
 0x73e   : > { %v2076_v45 = vpop.xlane.xlu0 %2075 }
 0x73f   : > { %10612 = vpow2.f32 %v2126_v23  ;;  %v2110_v19 = vsub.f32 %v11912_v17, %v2076_v45 }
 0x740   : > { %v2079_v22 = vpop.xlane.xlu1 %2078 }
 0x741   : > { %v2122_v39 = vmul.f32 1.442695, %v2110_v19  ;;  %v2111_v35 = vsub.f32 %v11919_v11, %v2079_v22 }
 0x743   : > { %10614 = vpow2.f32 %v2122_v39  ;;  %v2124_v41 = vmul.f32 1.442695, %v2111_v35 }
 0x745   : > { %10616 = vpow2.f32 %v2124_v41 }
 0x74a   : > { %v2100_v55 = vpop.xlane.xlu1 %2099 }
 0x74b   : > { %v2118_v49 = vsub.f32 %v11928_v24, %v2100_v55 }
 0x74c   : > { %v11984_v0 = vpop.eup %10612 }
 0x74d   : > { %v2138_v21 = vmul.f32 1.442695, %v2118_v49  ;;  %v2152_v60 = vsel %vm1388_vm5, %v11984_v0, 0.0 }
 0x74e   : > { %2153 = vadd.xlane.f32.xlu0 %v2152_v60 }
 0x74f   : > { %10618 = vpow2.f32 %v2138_v21 }
 0x750   : > { %v11988_v61 = vpop.eup %10614 }
 0x751   : > { %v2146_v17 = vsel %vm1388_vm5, %v11988_v61, 0.0 }
 0x752   : > { %v11992_v11 = vpop.eup %10616  ;;  %2147 = vadd.xlane.f32.xlu0 %v2146_v17 }
 0x753   : > { %v2149_v2 = vsel %vm1388_vm5, %v11992_v11, 0.0 }
 0x754   : > { %2150 = vadd.xlane.f32.xlu1 %v2149_v2 }
 0x755   : > { %v2091_v24 = vpop.xlane.xlu0 %2090 }
 0x756   : > { %v2115_v1 = vsub.f32 %v11935_v14, %v2091_v24 }
 0x758   : > { %v2132_v23 = vmul.f32 1.442695, %v2115_v1 }
 0x759   : > { %v2094_v45 = vpop.xlane.xlu0 %2093 }
 0x75a   : > { %10620 = vpow2.f32 %v2132_v23  ;;  %v2116_v19 = vsub.f32 %v11940_v56, %v2094_v45 }
 0x75b   : > { %v2088_v21 = vpop.xlane.xlu1 %2087 }
 0x75c   : > { %v11998_v22 = vpop.eup %10618  ;;  %v2134_v39 = vmul.f32 1.442695, %v2116_v19 }
 0x75d   : > { %v2085_v35 = vpop.xlane.xlu0 %2084  ;;  %v2170_v41 = vsel %vm1388_vm5, %v11998_v22, 0.0 }
 0x75e   : > { %10622 = vpow2.f32 %v2134_v39  ;;  %v2113_v55 = vsub.f32 %v11948_v10, %v2085_v35  ;;  %2171 = vadd.xlane.f32.xlu1 %v2170_v41  ;;  %v2114_v41 = vsub.f32 %v11945_v50, %v2088_v21 }
 0x760   : > { %v2128_v49 = vmul.f32 1.442695, %v2113_v55  ;;  %v2130_v55 = vmul.f32 1.442695, %v2114_v41 }
 0x761   : > { %v2097_v60 = vpop.xlane.xlu0 %2096 }
 0x762   : > { %10624 = vpow2.f32 %v2128_v49  ;;  %v2117_v14 = vsub.f32 %v11955_v30, %v2097_v60 }
 0x764   : > { %v2136_v17 = vmul.f32 1.442695, %v2117_v14 }
 0x765   : > { %v2109_v2 = vpop.xlane.xlu1 %2108 }
 0x766   : > { %10626 = vpow2.f32 %v2136_v17  ;;  %v2121_v49 = vsub.f32 %v11960_v38, %v2109_v2 }
 0x767   : > { %v12004_v56 = vpop.eup %10620  ;;  %10628 = vpow2.f32 %v2130_v55 }
 0x768   : > { %v2161_v24 = vsel %vm1388_vm5, %v12004_v56, 0.0  ;;  %v2144_v17 = vmul.f32 1.442695, %v2121_v49 }
 0x769   : > { %v2103_v1 = vpop.xlane.xlu1 %2102  ;;  %2162 = vadd.xlane.f32.xlu0 %v2161_v24 }
 0x76a   : > { %v2119_v14 = vsub.f32 %v11963_v5, %v2103_v1  ;;  %10630 = vpow2.f32 %v2144_v17 }
 0x76b   : > { %v12008_v23 = vpop.eup %10622  ;;  %v2106_v60 = vpop.xlane.xlu0 %2105 }
 0x76c   : > { %v2164_v10 = vsel %vm1388_vm5, %v12008_v23, 0.0  ;;  %v2120_v24 = vsub.f32 %v11970_v20, %v2106_v60 }
 0x76d   : > { %v12012_v45 = vpop.permute.xlu1 %2402  ;;  %2165 = vadd.xlane.f32.xlu1 %v2164_v10  ;;  %v2140_v10 = vmul.f32 1.442695, %v2119_v14 }
 0x76e   : > { %10177 = vmatprep.subr.msk.bf16.mxu0 %vm1540_vm3, %v12012_v45 }
 0x76f   : > { %v12016_v30 = vpop.eup %10624  ;;  %10632 = vpow2.f32 %v2140_v10  ;;  %v2469_v41 = vpop.permute.xlu0 %2468 }
 0x770   : > { %v2155_v19 = vsel %vm1388_vm5, %v12016_v30, 0.0 }
 0x771   : > { %2156 = vadd.xlane.f32.xlu0 %v2155_v19  ;;  %v2142_v19 = vmul.f32 1.442695, %v2120_v24 }
 0x773   : > { %v12020_v39 = vpop.eup %10626  ;;  %10634 = vpow2.f32 %v2142_v19 }
 0x774   : > { %v2167_v35 = vsel %vm1388_vm5, %v12020_v39, 0.0 }
 0x775   : > { %2168 = vadd.xlane.f32.xlu0 %v2167_v35  ;;  %v12032_v35 = vpop.eup %10628 }
 0x776   : > { %v2158_v50 = vsel %vm1388_vm5, %v12032_v35, 0.0 }
 0x777   : > { %v12036_v21 = vpop.eup %10630 }
 0x778   : > { %v2179_v5 = vsel %vm1388_vm5, %v12036_v21, 0.0 }
 0x77c   : > { %v12038_v38 = vpop.eup %10632 }
 0x77d   : > { %v2173_v20 = vsel %vm1388_vm5, %v12038_v38, 0.0 }
 0x77e   : > { %2466 = vrot.lane.b32.xlu1 %v11571_v63, %s14655_s18 }
 0x780   : > { %v12042_v2 = vpop.eup %10634 }
 0x781   : > { %v2176_v1 = vsel %vm1388_vm5, %v12042_v2, 0.0 }
 0x78b   : > { %2400 = vrot.lane.b32.xlu0 %v11595_v33, %s14657_s16  ;;  %s14745_s16 = smov 40  }
 0x7a2   : > { %2159 = vadd.xlane.f32.xlu1 %v2158_v50 }
 0x7a6   : > { %2180 = vadd.xlane.f32.xlu1 %v2179_v5 }
 0x7aa   : > { %2174 = vadd.xlane.f32.xlu1 %v2173_v20  ;;  %2177 = vadd.xlane.f32.xlu0 %v2176_v1  ;;  %v2350_v1 = vsel %vm1540_vm3, %v11879_v44, 0 }
 0x7bb   : > { %2462 = vrot.lane.b32.xlu1 %v11571_v63, %s14653_s17 }
 0x7bf   : > { %2464 = vrot.lane.b32.xlu1 %v11567_v40, %s14653_s17 }
 0x7c0   : > { %2536 = vrot.lane.b32.xlu0 %v11577_v46, %s14655_s18 }
 0x7c3   : > { %2602 = vrot.lane.b32.xlu1 %v11585_v53, %s14655_s18 }
 0x7c4   : > { %2604 = vrot.lane.b32.xlu0 %v11589_v25, %s14655_s18 }
 0x7c7   : > { %2672 = vrot.lane.b32.xlu1 %v11593_v28, %s14655_s18 }
 0x7c8   : > { %2534 = vrot.lane.b32.xlu0 %v11581_v15, %s14655_s18 }
 0x7cb   : > { %2598 = vrot.lane.b32.xlu1 %v11585_v53, %s14653_s17 }
 0x7cc   : > { %2530 = vrot.lane.b32.xlu0 %v11581_v15, %s14653_s17 }
 0x7cf   : > { %2670 = vrot.lane.b32.xlu1 %v11595_v33, %s14655_s18  ;;  %s14746_s18 = smov 8  }
 0x7d0   : > { %2532 = vrot.lane.b32.xlu0 %v11577_v46, %s14653_s17 }
 0x7d3   : > { %2668 = vrot.lane.b32.xlu1 %v11593_v28, %s14653_s17 }
 0x7d4   : > { %2600 = vrot.lane.b32.xlu0 %v11589_v25, %s14653_s17 }
 0x7d7   : > { %2898 = vrot.lane.b32.xlu1 %v11571_v63, %s14651_s27  ;;  %v2154_v55 = vpop.xlane.xlu0 %2153 }
 0x7d8   : > { %2666 = vrot.lane.b32.xlu0 %v11595_v33, %s14653_s17  ;;  %10636 = vrcp.f32 %v2154_v55  ;;  %s14659_s17 = smov 24  }
 0x7db   : > { %3024 = vrot.lane.b32.xlu1 %v11589_v25, %s14651_s27  ;;  %v2148_v49 = vpop.xlane.xlu0 %2147 }
 0x7dc   : > { %2900 = vrot.lane.b32.xlu0 %v11567_v40, %s14651_s27  ;;  %10638 = vrcp.f32 %v2148_v49 }
 0x7dd   : > { %v2151_v60 = vpop.xlane.xlu1 %2150 }
 0x7de   : > { %10640 = vrcp.f32 %v2151_v60 }
 0x7df   : > { %2962 = vrot.lane.b32.xlu1 %v11577_v46, %s14651_s27 }
 0x7e0   : > { %3022 = vrot.lane.b32.xlu0 %v11585_v53, %s14651_s27 }
 0x7e3   : > { %2960 = vrot.lane.b32.xlu1 %v11581_v15, %s14651_s27 }
 0x7e5   : > { %v10637_v14 = vpop.eup %10636 }
 0x7e6   : > { %v2196_v10 = vmul.f32 %v10637_v14, %v11984_v0 }
 0x7e7   : > { %v2172_v55 = vpop.xlane.xlu1 %2171 }
 0x7e8   : > { %v2207_v20 = vpack.c.bf16 %v2196_v10, %v2196_v10  ;;  %10642 = vrcp.f32 %v2172_v55 }
 0x7e9   : > { %v10639_v17 = vpop.eup %10638 }
 0x7ea   : > { %v2194_v19 = vmul.f32 %v10639_v17, %v11988_v61 }
 0x7eb   : > { %v10641_v24 = vpop.eup %10640 }
 0x7ec   : > { %v2195_v50 = vmul.f32 %v10641_v24, %v11992_v11 }
 0x7ee   : > { %v2206_v5 = vpack.c.bf16 %v2195_v50, %v2194_v19 }
 0x7f0   : > { %9614 = vmatprep.mubr.msk.bf16.mxu1 %vm1388_vm5, %v2206_v5 }
 0x7f1   : > { %9615 = vmatmul.mubr.msk.bf16.vlgmr.msra.gmra.mxu1 %vm1388_vm5, %v2207_v20 }
 0x7f2   : > { %9627 = vmatpush3.bf16.msra.mxu1 %v2350_v1  ;;  %v2163_v49 = vpop.xlane.xlu0 %2162 }
 0x7f3   : > { %9628 = vmatprep.subr.bf16.mxu1 %v11978_v26 }
 0x7f5   : > { %v10643_v60 = vpop.eup %10642 }
 0x7f6   : > { %9629 = vmatpush3.bf16.msra.mxu1 %v11978_v26  ;;  %v2166_v0 = vpop.xlane.xlu1 %2165  ;;  %v2202_v44 = vmul.f32 %v10643_v60, %v11998_v22  ;;  %v2480_v26 = vsel %vm1105_vm2, %v2469_v41, 0 }
 0x7f7   : > { %10178 = vmatprep.subr.msk.bf16.mxu1 %vm1105_vm2, %v2469_v41  ;;  %10644 = vrcp.f32 %v2166_v0 }
 0x7f8   : > { %v2211_v50 = vpack.c.bf16 %v2202_v44, %v2202_v44 }
 0x7fa   : > { %v2157_v61 = vpop.xlane.xlu0 %2156  ;;  %v2467_v5 = vpop.permute.xlu1 %2466 }
 0x7fb   : > { %v2477_v20 = vsel %vm1105_vm2, %v2467_v5, 0 }
 0x7fe   : > { %v2169_v11 = vpop.xlane.xlu0 %2168 }
 0x7ff   : > { %10646 = vrcp.f32 %v2169_v11 }
 0x800   : > { %10648 = vrcp.f32 %v2163_v49 }
 0x801   : > { %10650 = vrcp.f32 %v2157_v61 }
 0x804   : > { %v10645_v14 = vpop.eup %10644 }
 0x805   : > { %v2200_v24 = vmul.f32 %v10645_v14, %v12008_v23  ;;  %v2401_v23 = vpop.permute.xlu0 %2400 }
 0x80c   : > { %v10647_v17 = vpop.eup %10646 }
 0x80d   : > { %v2201_v10 = vmul.f32 %v10647_v17, %v12020_v39  ;;  %v10649_v0 = vpop.eup %10648 }
 0x80e   : > { %v10651_v41 = vpop.eup %10650  ;;  %v2199_v17 = vmul.f32 %v10649_v0, %v12004_v56  ;;  %v2412_v56 = vsel %vm1540_vm3, %v12012_v45, 0 }
 0x80f   : > { %v2210_v19 = vpack.c.bf16 %v2201_v10, %v2200_v24  ;;  %v2197_v49 = vmul.f32 %v10651_v41, %v12016_v30 }
 0x811   : > { %9630 = vmatprep.mubr.msk.bf16.mxu1 %vm1388_vm5, %v2210_v19 }
 0x812   : > { %9631 = vmatmul.mubr.msk.bf16.vlgmr.msra.gmra.mxu1 %vm1388_vm5, %v2211_v50  ;;  %v2209_v50 = vpack.c.bf16 %v2199_v17, %v2199_v17 }
 0x813   : > { %9643 = vmatpush3.bf16.xpose.msra.mxu1 %v2480_v26 }
 0x814   : > { %10179 = vmatprep.subr.msk.bf16.mxu1 %vm1105_vm2, %v2467_v5 }
 0x81b   : > { %9645 = vmatpush3.bf16.xpose.msra.mxu1 %v2477_v20 }
 0x82b   : > { %v2160_v22 = vpop.xlane.xlu1 %2159 }
 0x82c   : > { %10652 = vrcp.f32 %v2160_v22 }
 0x82f   : > { %v2181_v39 = vpop.xlane.xlu1 %2180 }
 0x830   : > { %10654 = vrcp.f32 %v2181_v39 }
 0x833   : > { %v2175_v1 = vpop.xlane.xlu1 %2174  ;;  %v2178_v55 = vpop.xlane.xlu0 %2177 }
 0x834   : > { %10656 = vrcp.f32 %v2175_v1 }
 0x835   : > { %10658 = vrcp.f32 %v2178_v55 }
 0x837   : > { %v2463_v11 = vpop.permute.xlu1 %2462  ;;  %v2537_v60 = vpop.permute.xlu0 %2536 }
 0x838   : > { %9646 = vmatprep.mubr.msk.bf16.mxu1 %vm1105_vm2, %v2463_v11 }
 0x839   : > { %v10653_v14 = vpop.eup %10652 }
 0x83a   : > { %v2198_v61 = vmul.f32 %v10653_v14, %v12032_v35 }
 0x83b   : > { %v2465_v44 = vpop.permute.xlu1 %2464  ;;  %v2605_v24 = vpop.permute.xlu0 %2604 }
 0x83c   : > { %9647 = vmatmul.mubr.msk.bf16.vlgmr.msra.gmra.mxu1 %vm1105_vm2, %v2465_v44  ;;  %10182 = vmatprep.subr.msk.bf16.mxu1 %vm1105_vm2, %v2605_v24  ;;  %v2616_v10 = vsel %vm1105_vm2, %v2605_v24, 0  ;;  %v2208_v19 = vpack.c.bf16 %v2198_v61, %v2197_v49 }
 0x83d   : > { %9659 = vmatpush3.bf16.xpose.msra.mxu1 %v2616_v10  ;;  %v10655_v26 = vpop.eup %10654 }
 0x83e   : > { %9622 = vmatprep.mubr.msk.bf16.mxu0 %vm1388_vm5, %v2208_v19  ;;  %v2205_v39 = vmul.f32 %v10655_v26, %v12036_v21  ;;  %v2548_v21 = vsel %vm1105_vm2, %v2537_v60, 0 }
 0x83f   : > { %v2603_v5 = vpop.permute.xlu1 %2602  ;;  %9623 = vmatmul.mubr.msk.bf16.vlgmr.msra.gmra.mxu0 %vm1388_vm5, %v2209_v50  ;;  %v2535_v30 = vpop.permute.xlu0 %2534 }
 0x840   : > { %9635 = vmatpush3.bf16.msra.mxu0 %v2412_v56  ;;  %10183 = vmatprep.subr.msk.bf16.mxu1 %vm1105_vm2, %v2603_v5  ;;  %v2613_v41 = vsel %vm1105_vm2, %v2603_v5, 0  ;;  %v2213_v11 = vpack.c.bf16 %v2205_v39, %v2205_v39  ;;  %v2545_v61 = vsel %vm1105_vm2, %v2535_v30, 0 }
 0x841   : > { %v10657_v35 = vpop.eup %10656  ;;  %9636 = vmatprep.subr.bf16.mxu0 %v2401_v23 }
 0x842   : > { %v10659_v20 = vpop.eup %10658  ;;  %v2203_v22 = vmul.f32 %v10657_v35, %v12038_v38 }
 0x843   : > { %v2673_v1 = vpop.permute.xlu1 %2672  ;;  %v2531_v55 = vpop.permute.xlu0 %2530  ;;  %v2204_v0 = vmul.f32 %v10659_v20, %v12042_v2 }
 0x844   : > { %9637 = vmatpush3.bf16.msra.mxu0 %v2401_v23  ;;  %v2684_v10 = vsel %vm1105_vm2, %v2673_v1, 0 }
 0x845   : > { %10180 = vmatprep.subr.msk.bf16.mxu0 %vm1105_vm2, %v2537_v60  ;;  %9661 = vmatpush3.bf16.xpose.msra.mxu1 %v2613_v41  ;;  %v2212_v45 = vpack.c.bf16 %v2204_v0, %v2203_v22 }
 0x847   : > { %9638 = vmatprep.mubr.msk.bf16.mxu0 %vm1388_vm5, %v2212_v45  ;;  %v2599_v14 = vpop.permute.xlu1 %2598  ;;  %v2533_v17 = vpop.permute.xlu0 %2532 }
 0x848   : > { %9639 = vmatmul.mubr.msk.bf16.vlgmr.msra.gmra.mxu0 %vm1388_vm5, %v2213_v11  ;;  %9662 = vmatprep.mubr.msk.bf16.mxu1 %vm1105_vm2, %v2599_v14 }
 0x849   : > { %9651 = vmatpush3.bf16.xpose.msra.mxu0 %v2548_v21  ;;  %9654 = vmatprep.mubr.msk.bf16.mxu0 %vm1105_vm2, %v2531_v55 }
 0x84a   : > { %10181 = vmatprep.subr.msk.bf16.mxu0 %vm1105_vm2, %v2535_v30 }
 0x84b   : > { %v2671_v38 = vpop.permute.xlu1 %2670  ;;  %v2601_v2 = vpop.permute.xlu0 %2600 }
 0x84c   : > { %9663 = vmatmul.mubr.msk.bf16.vlgmr.msra.gmra.mxu1 %vm1105_vm2, %v2601_v2  ;;  %v2681_v50 = vsel %vm1105_vm2, %v2671_v38, 0 }
 0x84f   : > { %v2669_v23 = vpop.permute.xlu1 %2668  ;;  %v2667_v49 = vpop.permute.xlu0 %2666 }
 0x851   : > { %9653 = vmatpush3.bf16.xpose.msra.mxu0 %v2545_v61 }
 0x852   : > { %10184 = vmatprep.subr.msk.bf16.mxu0 %vm1105_vm2, %v2673_v1 }
 0x853   : > { %v2901_v44 = vpop.permute.xlu0 %2900  ;;  %v2899_v60 = vpop.permute.xlu1 %2898 }
 0x854   : > { %10186 = vmatprep.subr.msk.bf16.mxu1 %vm1540_vm3, %v2901_v44  ;;  %v2910_v24 = vsel %vm1540_vm3, %v2901_v44, 0 }
 0x855   : > { %9675 = vmatpush3.bf16.msra.mxu1 %v2910_v24 }
 0x856   : > { %9676 = vmatprep.subr.bf16.mxu1 %v2899_v60 }
 0x857   : > { %v12137_v19 = vpop.permute.xlu1 %3024 }
 0x858   : > { %9655 = vmatmul.mubr.msk.bf16.vlgmr.msra.gmra.mxu0 %vm1105_vm2, %v2533_v17 }
 0x859   : > { %9667 = vmatpush3.bf16.xpose.msra.mxu0 %v2684_v10  ;;  %9670 = vmatprep.mubr.msk.bf16.mxu0 %vm1105_vm2, %v2667_v49 }
 0x85a   : > { %10185 = vmatprep.subr.msk.bf16.mxu0 %vm1105_vm2, %v2671_v38  ;;  %9677 = vmatpush3.bf16.msra.mxu1 %v2899_v60 }
 0x85b   : > { %10188 = vmatprep.subr.msk.bf16.mxu1 %vm1540_vm3, %v12137_v19  ;;  %v2963_v26 = vpop.permute.xlu1 %2962 }
 0x85c   : > { %v2972_v5 = vsel %vm1540_vm3, %v2963_v26, 0 }
 0x85f   : > { %v2961_v56 = vpop.permute.xlu1 %2960 }
 0x861   : > { %9669 = vmatpush3.bf16.xpose.msra.mxu0 %v2681_v50 }
 0x862   : > { %10187 = vmatprep.subr.msk.bf16.mxu0 %vm1540_vm3, %v2963_v26 }
 0x868   : > { %9671 = vmatmul.mubr.msk.bf16.vlgmr.msra.gmra.mxu0 %vm1105_vm2, %v2669_v23 }
 0x869   : > { %9683 = vmatpush3.bf16.msra.mxu0 %v2972_v5 }
 0x86a   : > { %9684 = vmatprep.subr.bf16.mxu0 %v2961_v56 }
 0x86d   : > { %9685 = vmatpush3.bf16.msra.mxu0 %v2961_v56 }
 0x8b1   : > { %v12146_v30 = vpop.f32.mrf.mxu1 }
 0x8b3   : > { %v12148_v35 = vpop.f32.mrf.mxu1 }
 0x8b5   : > { %v9617_v20 = vpop.f32.mrf.mxu1 }
 0x8b7   : > { %v12150_v22 = vpop.f32.mrf.mxu1 }
 0x8d2   : > { %v12152_v39 = vpop.f32.mrf.mxu1 }
 0x8d4   : > { %v12154_v1 = vpop.f32.mrf.mxu1 }
 0x8d6   : > { %v9633_v55 = vpop.f32.mrf.mxu1 }
 0x8d8   : > { %v12156_v0 = vpop.f32.mrf.mxu1 }
 0x8fc   : > { %v9648_v41 = vpop.f32.mrf.mxu1 }
 0x8fd   : > { %v2736_v45 = vmul.f32 0.35355338, %v9648_v41 }
 0x8fe   : > { %v2516_v11 = vpop.f32.mrf.mxu1 }
 0x8ff   : > { %v12159_v14 = vadd.f32 %v2736_v45, %v11652_v4  ;;  %v2734_v17 = vmul.f32 0.35355338, %v2516_v11  ;;  %v12161_v21 = vpop.f32.mrf.mxu0 }
 0x900   : > { %v9649_v38 = vpop.f32.mrf.mxu1 }
 0x901   : > { %v12164_v2 = vadd.f32 %v2734_v17, %v11652_v4  ;;  %v12166_v23 = vpop.f32.mrf.mxu0  ;;  %v2764_v49 = vsel %vm1388_vm5, %v12159_v14, -inf }
 0x902   : > { %2765 = vmax.xlane.f32.xlu0 %v2764_v49  ;;  %v2519_v61 = vpop.f32.mrf.mxu1 }
 0x903   : > { %v2735_v44 = vmul.f32 0.35355338, %v2519_v61  ;;  %v9625_v60 = vpop.f32.mrf.mxu0  ;;  %v2758_v10 = vsel %vm1388_vm5, %v12164_v2, -inf }
 0x905   : > { %v12170_v24 = vpop.f32.mrf.mxu0  ;;  %v12175_v50 = vadd.f32 %v2735_v44, %v11652_v4 }
 0x906   : > { %2759 = vmax.xlane.f32.xlu0 %v2758_v10 }
 0x907   : > { %v2761_v26 = vsel %vm1388_vm5, %v12175_v50, -inf }
 0x908   : > { %v12179_v5 = vpop.f32.mrf.mxu0  ;;  %2762 = vmax.xlane.f32.xlu1 %v2761_v26 }
 0x90a   : > { %v12181_v56 = vpop.f32.mrf.mxu0 }
 0x90c   : > { %v9641_v55 = vpop.f32.mrf.mxu0  ;;  %v9664_v41 = vpop.f32.mrf.mxu1 }
 0x90d   : > { %v2742_v45 = vmul.f32 0.35355338, %v9664_v41 }
 0x90e   : > { %v2652_v11 = vpop.f32.mrf.mxu1  ;;  %v12190_v61 = vpop.f32.mrf.mxu0 }
 0x90f   : > { %v12186_v17 = vadd.f32 %v2742_v45, %v11652_v4  ;;  %v2740_v60 = vmul.f32 0.35355338, %v2652_v11 }
 0x910   : > { %v9665_v38 = vpop.f32.mrf.mxu1 }
 0x911   : > { %v2782_v49 = vsel %vm1388_vm5, %v12186_v17, -inf  ;;  %v12196_v41 = vadd.f32 %v2740_v60, %v11652_v4 }
 0x912   : > { %2783 = vmax.xlane.f32.xlu1 %v2782_v49  ;;  %v2655_v6 = vpop.f32.mrf.mxu1 }
 0x913   : > { %v2741_v51 = vmul.f32 0.35355338, %v2655_v6 }
 0x918   : > { %v9656_v44 = vpop.f32.mrf.mxu0 }
 0x919   : > { %v2739_v10 = vmul.f32 0.35355338, %v9656_v44  ;;  %v2776_v44 = vsel %vm1388_vm5, %v12196_v41, -inf }
 0x91a   : > { %v2584_v26 = vpop.f32.mrf.mxu0 }
 0x91b   : > { %v12193_v20 = vadd.f32 %v2739_v10, %v11652_v4  ;;  %v2737_v45 = vmul.f32 0.35355338, %v2584_v26 }
 0x91c   : > { %v9657_v55 = vpop.f32.mrf.mxu0 }
 0x91d   : > { %v2773_v38 = vsel %vm1388_vm5, %v12193_v20, -inf  ;;  %v12201_v11 = vadd.f32 %v2737_v45, %v11652_v4  ;;  %v12213_v55 = vadd.f32 %v2741_v51, %v11652_v4 }
 0x91e   : > { %2774 = vmax.xlane.f32.xlu0 %v2773_v38  ;;  %v2587_v49 = vpop.f32.mrf.mxu0 }
 0x91f   : > { %v2738_v58 = vmul.f32 0.35355338, %v2587_v49  ;;  %v2767_v26 = vsel %vm1388_vm5, %v12201_v11, -inf  ;;  %v2779_v38 = vsel %vm1388_vm5, %v12213_v55, -inf }
 0x921   : > { %v12206_v10 = vadd.f32 %v2738_v58, %v11652_v4 }
 0x922   : > { %2777 = vmax.xlane.f32.xlu0 %v2776_v44 }
 0x923   : > { %v2770_v60 = vsel %vm1388_vm5, %v12206_v10, -inf }
 0x924   : > { %2771 = vmax.xlane.f32.xlu1 %v2770_v60 }
 0x926   : > { %2768 = vmax.xlane.f32.xlu0 %v2767_v26 }
 0x928   : > { %v9672_v6 = vpop.f32.mrf.mxu0 }
 0x929   : > { %v2745_v45 = vmul.f32 0.35355338, %v9672_v6 }
 0x92a   : > { %2780 = vmax.xlane.f32.xlu0 %v2779_v38  ;;  %v2720_v58 = vpop.f32.mrf.mxu0 }
 0x92b   : > { %v12218_v49 = vadd.f32 %v2745_v45, %v11652_v4  ;;  %v2743_v44 = vmul.f32 0.35355338, %v2720_v58 }
 0x92c   : > { %v9673_v8 = vpop.f32.mrf.mxu0 }
 0x92d   : > { %v12221_v60 = vadd.f32 %v2743_v44, %v11652_v4  ;;  %v2791_v51 = vsel %vm1388_vm5, %v12218_v49, -inf  ;;  %v12236_v8 = vpop.permute.xlu0 %3022 }
 0x92e   : > { %2792 = vmax.xlane.f32.xlu1 %v2791_v51  ;;  %v2723_v26 = vpop.f32.mrf.mxu0 }
 0x92f   : > { %v2744_v18 = vmul.f32 0.35355338, %v2723_v26  ;;  %v2785_v6 = vsel %vm1388_vm5, %v12221_v60, -inf }
 0x931   : > { %v12228_v38 = vadd.f32 %v2744_v18, %v11652_v4 }
 0x932   : > { %2786 = vmax.xlane.f32.xlu1 %v2785_v6 }
 0x933   : > { %v2788_v45 = vsel %vm1388_vm5, %v12228_v38, -inf }
 0x934   : > { %2789 = vmax.xlane.f32.xlu0 %v2788_v45 }
 0x943   : > { %3086 = vrot.lane.b32.xlu1 %v11593_v28, %s14651_s27 }
 0x94a   : > { %3152 = vrot.lane.b32.xlu0 %v11567_v40, %s14647_s23 }
 0x98b   : > { %v2766_v58 = vpop.xlane.xlu0 %2765 }
 0x98c   : > { %v2796_v44 = vsub.f32 %v12159_v14, %v2766_v58 }
 0x98e   : > { %v2810_v51 = vmul.f32 1.442695, %v2796_v44 }
 0x98f   : > { %v2760_v18 = vpop.xlane.xlu0 %2759 }
 0x990   : > { %10660 = vpow2.f32 %v2810_v51  ;;  %v2794_v26 = vsub.f32 %v12164_v2, %v2760_v18 }
 0x991   : > { %v2763_v6 = vpop.xlane.xlu1 %2762 }
 0x992   : > { %v2806_v3 = vmul.f32 1.442695, %v2794_v26  ;;  %v2795_v45 = vsub.f32 %v12175_v50, %v2763_v6 }
 0x994   : > { %10662 = vpow2.f32 %v2806_v3  ;;  %v2808_v13 = vmul.f32 1.442695, %v2795_v45 }
 0x996   : > { %10664 = vpow2.f32 %v2808_v13 }
 0x99b   : > { %v2784_v52 = vpop.xlane.xlu1 %2783 }
 0x99c   : > { %v2802_v62 = vsub.f32 %v12186_v17, %v2784_v52 }
 0x99d   : > { %v12242_v47 = vpop.eup %10660 }
 0x99e   : > { %v2822_v57 = vmul.f32 1.442695, %v2802_v62  ;;  %v2836_v14 = vsel %vm1388_vm5, %v12242_v47, 0.0 }
 0x99f   : > { %2837 = vadd.xlane.f32.xlu0 %v2836_v14 }
 0x9a0   : > { %10666 = vpow2.f32 %v2822_v57 }
 0x9a1   : > { %v12246_v58 = vpop.eup %10662 }
 0x9a2   : > { %v2830_v2 = vsel %vm1388_vm5, %v12246_v58, 0.0 }
 0x9a3   : > { %v12250_v50 = vpop.eup %10664  ;;  %2831 = vadd.xlane.f32.xlu0 %v2830_v2 }
 0x9a4   : > { %v2833_v3 = vsel %vm1388_vm5, %v12250_v50, 0.0 }
 0x9a5   : > { %2834 = vadd.xlane.f32.xlu1 %v2833_v3 }
 0x9a7   : > { %v2775_v52 = vpop.xlane.xlu0 %2774 }
 0x9a8   : > { %v2799_v62 = vsub.f32 %v12193_v20, %v2775_v52 }
 0x9aa   : > { %v2816_v13 = vmul.f32 1.442695, %v2799_v62 }
 0x9ab   : > { %v2778_v17 = vpop.xlane.xlu0 %2777 }
 0x9ac   : > { %10668 = vpow2.f32 %v2816_v13  ;;  %v2800_v57 = vsub.f32 %v12196_v41, %v2778_v17 }
 0x9ad   : > { %v12256_v44 = vpop.eup %10666  ;;  %v2772_v14 = vpop.xlane.xlu1 %2771 }
 0x9ae   : > { %v2818_v51 = vmul.f32 1.442695, %v2800_v57  ;;  %v2854_v18 = vsel %vm1388_vm5, %v12256_v44, 0.0 }
 0x9af   : > { %v2769_v26 = vpop.xlane.xlu0 %2768  ;;  %2855 = vadd.xlane.f32.xlu1 %v2854_v18 }
 0x9b0   : > { %10670 = vpow2.f32 %v2818_v51  ;;  %v2797_v6 = vsub.f32 %v12201_v11, %v2769_v26 }
 0x9b2   : > { %v2812_v45 = vmul.f32 1.442695, %v2797_v6  ;;  %v2798_v6 = vsub.f32 %v12206_v10, %v2772_v14 }
 0x9b3   : > { %v2781_v2 = vpop.xlane.xlu0 %2780 }
 0x9b4   : > { %10672 = vpow2.f32 %v2812_v45  ;;  %v2801_v20 = vsub.f32 %v12213_v55, %v2781_v2  ;;  %v2814_v45 = vmul.f32 1.442695, %v2798_v6 }
 0x9b6   : > { %v2820_v3 = vmul.f32 1.442695, %v2801_v20 }
 0x9b7   : > { %v2793_v52 = vpop.xlane.xlu1 %2792 }
 0x9b8   : > { %10674 = vpow2.f32 %v2820_v3  ;;  %v2805_v2 = vsub.f32 %v12218_v49, %v2793_v52 }
 0x9b9   : > { %v12262_v41 = vpop.eup %10668  ;;  %10676 = vpow2.f32 %v2814_v45 }
 0x9ba   : > { %v2845_v62 = vsel %vm1388_vm5, %v12262_v41, 0.0 }
 0x9bb   : > { %v2787_v13 = vpop.xlane.xlu1 %2786  ;;  %2846 = vadd.xlane.f32.xlu0 %v2845_v62  ;;  %v2828_v62 = vmul.f32 1.442695, %v2805_v2 }
 0x9bc   : > { %v2803_v3 = vsub.f32 %v12221_v60, %v2787_v13 }
 0x9bd   : > { %v12266_v17 = vpop.eup %10670  ;;  %v2790_v20 = vpop.xlane.xlu0 %2789  ;;  %10678 = vpow2.f32 %v2828_v62 }
 0x9be   : > { %v2848_v11 = vsel %vm1388_vm5, %v12266_v17, 0.0 }
 0x9bf   : > { %v12270_v57 = vpop.permute.xlu1 %3086  ;;  %2849 = vadd.xlane.f32.xlu1 %v2848_v11  ;;  %v2804_v11 = vsub.f32 %v12228_v38, %v2790_v20 }
 0x9c0   : > { %10189 = vmatprep.subr.msk.bf16.mxu0 %vm1540_vm3, %v12270_v57 }
 0x9c1   : > { %v12274_v55 = vpop.eup %10672  ;;  %v3153_v6 = vpop.permute.xlu0 %3152 }
 0x9c2   : > { %v2839_v51 = vsel %vm1388_vm5, %v12274_v55, 0.0 }
 0x9c3   : > { %2840 = vadd.xlane.f32.xlu0 %v2839_v51  ;;  %v2824_v51 = vmul.f32 1.442695, %v2803_v3 }
 0x9c5   : > { %v12278_v18 = vpop.eup %10674  ;;  %10680 = vpow2.f32 %v2824_v51 }
 0x9c6   : > { %v2851_v26 = vsel %vm1388_vm5, %v12278_v18, 0.0  ;;  %v12290_v32 = vpop.eup %10676 }
 0x9c7   : > { %2852 = vadd.xlane.f32.xlu0 %v2851_v26  ;;  %v2826_v26 = vmul.f32 1.442695, %v2804_v11  ;;  %v2842_v10 = vsel %vm1388_vm5, %v12290_v32, 0.0 }
 0x9c9   : > { %10682 = vpow2.f32 %v2826_v26 }
 0x9ca   : > { %v12294_v14 = vpop.eup %10678 }
 0x9cb   : > { %v2863_v60 = vsel %vm1388_vm5, %v12294_v14, 0.0 }
 0x9d0   : > { %3150 = vrot.lane.b32.xlu1 %v11571_v63, %s14647_s23 }
 0x9d2   : > { %v12296_v49 = vpop.eup %10680 }
 0x9d3   : > { %v2857_v38 = vsel %vm1388_vm5, %v12296_v49, 0.0 }
 0x9d6   : > { %v12300_v52 = vpop.eup %10682 }
 0x9d7   : > { %v2860_v13 = vsel %vm1388_vm5, %v12300_v52, 0.0 }
 0x9dd   : > { %3084 = vrot.lane.b32.xlu0 %v11595_v33, %s14651_s27  ;;  %s14743_s27 = smov 72  }
 0x9f4   : > { %2843 = vadd.xlane.f32.xlu1 %v2842_v10 }
 0x9f8   : > { %2864 = vadd.xlane.f32.xlu1 %v2863_v60 }
 0x9fc   : > { %2858 = vadd.xlane.f32.xlu1 %v2857_v38  ;;  %2861 = vadd.xlane.f32.xlu0 %v2860_v13  ;;  %v3034_v13 = vsel %vm1540_vm3, %v12137_v19, 0 }
 0xa0d   : > { %3146 = vrot.lane.b32.xlu1 %v11571_v63, %s14645_s25 }
 0xa11   : > { %3148 = vrot.lane.b32.xlu1 %v11567_v40, %s14645_s25 }
 0xa12   : > { %3220 = vrot.lane.b32.xlu0 %v11577_v46, %s14647_s23 }
 0xa15   : > { %3286 = vrot.lane.b32.xlu1 %v11585_v53, %s14647_s23 }
 0xa16   : > { %3288 = vrot.lane.b32.xlu0 %v11589_v25, %s14647_s23 }
 0xa19   : > { %3216 = vrot.lane.b32.xlu1 %v11577_v46, %s14645_s25 }
 0xa1a   : > { %3218 = vrot.lane.b32.xlu0 %v11581_v15, %s14647_s23 }
 0xa1d   : > { %3282 = vrot.lane.b32.xlu1 %v11585_v53, %s14645_s25 }
 0xa1e   : > { %3214 = vrot.lane.b32.xlu0 %v11581_v15, %s14645_s25 }
 0xa21   : > { %3354 = vrot.lane.b32.xlu1 %v11595_v33, %s14647_s23 }
 0xa22   : > { %3356 = vrot.lane.b32.xlu0 %v11593_v28, %s14647_s23  ;;  %s14661_s23 = smov 16  }
 0xa25   : > { %3352 = vrot.lane.b32.xlu1 %v11593_v28, %s14645_s25 }
 0xa26   : > { %3284 = vrot.lane.b32.xlu0 %v11589_v25, %s14645_s25 }
 0xa28   : > { %v2838_v45 = vpop.xlane.xlu0 %2837 }
 0xa29   : > { %10684 = vrcp.f32 %v2838_v45 }
 0xa2a   : > { %3350 = vrot.lane.b32.xlu0 %v11595_v33, %s14645_s25  ;;  %s14663_s25 = smov 8  }
 0xa2c   : > { %v2832_v2 = vpop.xlane.xlu0 %2831 }
 0xa2d   : > { %10686 = vrcp.f32 %v2832_v2 }
 0xa2e   : > { %v2835_v20 = vpop.xlane.xlu1 %2834 }
 0xa2f   : > { %10688 = vrcp.f32 %v2835_v20 }
 0xa36   : > { %v10685_v3 = vpop.eup %10684 }
 0xa37   : > { %v2880_v51 = vmul.f32 %v10685_v3, %v12242_v47 }
 0xa38   : > { %v2856_v45 = vpop.xlane.xlu1 %2855 }
 0xa39   : > { %v2891_v38 = vpack.c.bf16 %v2880_v51, %v2880_v51  ;;  %10690 = vrcp.f32 %v2856_v45 }
 0xa3a   : > { %v10687_v62 = vpop.eup %10686 }
 0xa3b   : > { %v2878_v26 = vmul.f32 %v10687_v62, %v12246_v58 }
 0xa3c   : > { %v10689_v11 = vpop.eup %10688 }
 0xa3d   : > { %v2879_v10 = vmul.f32 %v10689_v11, %v12250_v50 }
 0xa3f   : > { %v2890_v60 = vpack.c.bf16 %v2879_v10, %v2878_v26  ;;  %v3164_v10 = vsel %vm1105_vm2, %v3153_v6, 0 }
 0xa41   : > { %9678 = vmatprep.mubr.msk.bf16.mxu1 %vm1388_vm5, %v2890_v60 }
 0xa42   : > { %9679 = vmatmul.mubr.msk.bf16.vlgmr.msra.gmra.mxu1 %vm1388_vm5, %v2891_v38 }
 0xa43   : > { %9691 = vmatpush3.bf16.msra.mxu1 %v3034_v13 }
 0xa44   : > { %9692 = vmatprep.subr.bf16.mxu1 %v12236_v8  ;;  %v2847_v47 = vpop.xlane.xlu0 %2846 }
 0xa46   : > { %v10691_v20 = vpop.eup %10690 }
 0xa47   : > { %9693 = vmatpush3.bf16.msra.mxu1 %v12236_v8  ;;  %v2886_v19 = vmul.f32 %v10691_v20, %v12256_v44 }
 0xa48   : > { %10190 = vmatprep.subr.msk.bf16.mxu1 %vm1105_vm2, %v3153_v6  ;;  %v2850_v58 = vpop.xlane.xlu1 %2849 }
 0xa49   : > { %10692 = vrcp.f32 %v2850_v58  ;;  %v2895_v26 = vpack.c.bf16 %v2886_v19, %v2886_v19 }
 0xa4c   : > { %v2841_v50 = vpop.xlane.xlu0 %2840  ;;  %v3151_v60 = vpop.permute.xlu1 %3150 }
 0xa4d   : > { %v3161_v38 = vsel %vm1105_vm2, %v3151_v60, 0 }
 0xa50   : > { %v2853_v2 = vpop.xlane.xlu0 %2852 }
 0xa51   : > { %10694 = vrcp.f32 %v2853_v2 }
 0xa52   : > { %10696 = vrcp.f32 %v2847_v47 }
 0xa53   : > { %10698 = vrcp.f32 %v2841_v50 }
 0xa56   : > { %v10693_v3 = vpop.eup %10692 }
 0xa57   : > { %v2884_v11 = vmul.f32 %v10693_v3, %v12266_v17  ;;  %v3085_v17 = vpop.permute.xlu0 %3084 }
 0xa5e   : > { %v10695_v62 = vpop.eup %10694 }
 0xa5f   : > { %v2885_v51 = vmul.f32 %v10695_v62, %v12278_v18  ;;  %v10697_v58 = vpop.eup %10696 }
 0xa60   : > { %v10699_v6 = vpop.eup %10698  ;;  %v2883_v62 = vmul.f32 %v10697_v58, %v12262_v41 }
 0xa61   : > { %v2894_v8 = vpack.c.bf16 %v2885_v51, %v2884_v11  ;;  %v2881_v47 = vmul.f32 %v10699_v6, %v12274_v55 }
 0xa63   : > { %9694 = vmatprep.mubr.msk.bf16.mxu1 %vm1388_vm5, %v2894_v8 }
 0xa64   : > { %9695 = vmatmul.mubr.msk.bf16.vlgmr.msra.gmra.mxu1 %vm1388_vm5, %v2895_v26  ;;  %v2893_v26 = vpack.c.bf16 %v2883_v62, %v2883_v62 }
 0xa65   : > { %9707 = vmatpush3.bf16.xpose.msra.mxu1 %v3164_v10 }
 0xa66   : > { %10191 = vmatprep.subr.msk.bf16.mxu1 %vm1105_vm2, %v3151_v60 }
 0xa6d   : > { %9709 = vmatpush3.bf16.xpose.msra.mxu1 %v3161_v38 }
 0xa7d   : > { %v2844_v44 = vpop.xlane.xlu1 %2843 }
 0xa7e   : > { %10700 = vrcp.f32 %v2844_v44 }
 0xa81   : > { %v2865_v18 = vpop.xlane.xlu1 %2864 }
 0xa82   : > { %10702 = vrcp.f32 %v2865_v18 }
 0xa85   : > { %v2859_v13 = vpop.xlane.xlu1 %2858  ;;  %v2862_v45 = vpop.xlane.xlu0 %2861 }
 0xa86   : > { %10704 = vrcp.f32 %v2859_v13 }
 0xa87   : > { %10706 = vrcp.f32 %v2862_v45 }
 0xa89   : > { %v3147_v2 = vpop.permute.xlu1 %3146  ;;  %v3221_v20 = vpop.permute.xlu0 %3220 }
 0xa8a   : > { %9710 = vmatprep.mubr.msk.bf16.mxu1 %vm1105_vm2, %v3147_v2 }
 0xa8b   : > { %v10701_v3 = vpop.eup %10700 }
 0xa8c   : > { %v2882_v50 = vmul.f32 %v10701_v3, %v12290_v32  ;;  %v3096_v32 = vsel %vm1540_vm3, %v12270_v57, 0 }
 0xa8d   : > { %v3149_v19 = vpop.permute.xlu1 %3148  ;;  %v3289_v11 = vpop.permute.xlu0 %3288 }
 0xa8e   : > { %9711 = vmatmul.mubr.msk.bf16.vlgmr.msra.gmra.mxu1 %vm1105_vm2, %v3149_v19  ;;  %10194 = vmatprep.subr.msk.bf16.mxu1 %vm1105_vm2, %v3289_v11  ;;  %v3300_v51 = vsel %vm1105_vm2, %v3289_v11, 0  ;;  %v2892_v8 = vpack.c.bf16 %v2882_v50, %v2881_v47 }
 0xa8f   : > { %9723 = vmatpush3.bf16.xpose.msra.mxu1 %v3300_v51  ;;  %v10703_v10 = vpop.eup %10702 }
 0xa90   : > { %9686 = vmatprep.mubr.msk.bf16.mxu0 %vm1388_vm5, %v2892_v8  ;;  %v2889_v18 = vmul.f32 %v10703_v10, %v12294_v14  ;;  %v3232_v14 = vsel %vm1105_vm2, %v3221_v20, 0 }
 0xa91   : > { %v3287_v60 = vpop.permute.xlu1 %3286  ;;  %9687 = vmatmul.mubr.msk.bf16.vlgmr.msra.gmra.mxu0 %vm1388_vm5, %v2893_v26  ;;  %v3219_v41 = vpop.permute.xlu0 %3218 }
 0xa92   : > { %9699 = vmatpush3.bf16.msra.mxu0 %v3096_v32  ;;  %10195 = vmatprep.subr.msk.bf16.mxu1 %vm1105_vm2, %v3287_v60  ;;  %v3297_v6 = vsel %vm1105_vm2, %v3287_v60, 0  ;;  %v2897_v2 = vpack.c.bf16 %v2889_v18, %v2889_v18 }
 0xa93   : > { %v10705_v55 = vpop.eup %10704  ;;  %9700 = vmatprep.subr.bf16.mxu0 %v3085_v17 }
 0xa94   : > { %v10707_v38 = vpop.eup %10706  ;;  %v2887_v44 = vmul.f32 %v10705_v55, %v12296_v49 }
 0xa95   : > { %v3217_v13 = vpop.permute.xlu1 %3216  ;;  %v3215_v45 = vpop.permute.xlu0 %3214  ;;  %v2888_v58 = vmul.f32 %v10707_v38, %v12300_v52  ;;  %v3229_v52 = vsel %vm1105_vm2, %v3219_v41, 0 }
 0xa96   : > { %9701 = vmatpush3.bf16.msra.mxu0 %v3085_v17 }
 0xa97   : > { %10192 = vmatprep.subr.msk.bf16.mxu0 %vm1105_vm2, %v3221_v20  ;;  %9725 = vmatpush3.bf16.xpose.msra.mxu1 %v3297_v6  ;;  %v2896_v57 = vpack.c.bf16 %v2888_v58, %v2887_v44 }
 0xa99   : > { %9702 = vmatprep.mubr.msk.bf16.mxu0 %vm1388_vm5, %v2896_v57  ;;  %v3283_v3 = vpop.permute.xlu1 %3282  ;;  %v3357_v62 = vpop.permute.xlu0 %3356 }
 0xa9a   : > { %9703 = vmatmul.mubr.msk.bf16.vlgmr.msra.gmra.mxu0 %vm1388_vm5, %v2897_v2  ;;  %9726 = vmatprep.mubr.msk.bf16.mxu1 %vm1105_vm2, %v3283_v3  ;;  %v3368_v20 = vsel %vm1105_vm2, %v3357_v62, 0 }
 0xa9b   : > { %9715 = vmatpush3.bf16.xpose.msra.mxu0 %v3232_v14  ;;  %9718 = vmatprep.mubr.msk.bf16.mxu0 %vm1105_vm2, %v3215_v45 }
 0xa9c   : > { %10193 = vmatprep.subr.msk.bf16.mxu0 %vm1105_vm2, %v3219_v41 }
 0xa9d   : > { %v3285_v49 = vpop.permute.xlu0 %3284  ;;  %v3355_v47 = vpop.permute.xlu1 %3354 }
 0xa9e   : > { %9727 = vmatmul.mubr.msk.bf16.vlgmr.msra.gmra.mxu1 %vm1105_vm2, %v3285_v49  ;;  %v3365_v50 = vsel %vm1105_vm2, %v3355_v47, 0 }
 0xaa1   : > { %v3351_v17 = vpop.permute.xlu0 %3350  ;;  %v3353_v19 = vpop.permute.xlu1 %3352 }
 0xaa3   : > { %9717 = vmatpush3.bf16.xpose.msra.mxu0 %v3229_v52 }
 0xaa4   : > { %10196 = vmatprep.subr.msk.bf16.mxu0 %vm1105_vm2, %v3357_v62 }
 0xaaa   : > { %9719 = vmatmul.mubr.msk.bf16.vlgmr.msra.gmra.mxu0 %vm1105_vm2, %v3217_v13 }
 0xaab   : > { %9731 = vmatpush3.bf16.xpose.msra.mxu0 %v3368_v20  ;;  %9734 = vmatprep.mubr.msk.bf16.mxu0 %vm1105_vm2, %v3351_v17 }
 0xaac   : > { %10197 = vmatprep.subr.msk.bf16.mxu0 %vm1105_vm2, %v3355_v47 }
 0xab3   : > { %9733 = vmatpush3.bf16.xpose.msra.mxu0 %v3365_v50 }
 0xaba   : > { %9735 = vmatmul.mubr.msk.bf16.vlgmr.msra.gmra.mxu0 %vm1105_vm2, %v3353_v19 }
 0xb02   : > { %v12384_v11 = vpop.f32.mrf.mxu1 }
 0xb04   : > { %v12386_v51 = vpop.f32.mrf.mxu1 }
 0xb06   : > { %v9681_v8 = vpop.f32.mrf.mxu1 }
 0xb08   : > { %v12388_v26 = vpop.f32.mrf.mxu1 }
 0xb24   : > { %v12390_v10 = vpop.f32.mrf.mxu1 }
 0xb26   : > { %v12392_v60 = vpop.f32.mrf.mxu1 }
 0xb28   : > { %v9697_v32 = vpop.f32.mrf.mxu1 }
 0xb2a   : > { %v12394_v41 = vpop.f32.mrf.mxu1 }
 0xb4e   : > { %v9712_v55 = vpop.f32.mrf.mxu1 }
 0xb4f   : > { %v3420_v38 = vmul.f32 0.35355338, %v9712_v55 }
 0xb50   : > { %v3200_v44 = vpop.f32.mrf.mxu1 }
 0xb51   : > { %v12397_v18 = vadd.f32 %v3420_v38, %v11652_v4  ;;  %v3418_v13 = vmul.f32 0.35355338, %v3200_v44  ;;  %v12399_v45 = vpop.f32.mrf.mxu0 }
 0xb52   : > { %v9713_v58 = vpop.f32.mrf.mxu1 }
 0xb53   : > { %v12402_v6 = vadd.f32 %v3418_v13, %v11652_v4  ;;  %v12404_v57 = vpop.f32.mrf.mxu0  ;;  %v3448_v2 = vsel %vm1388_vm5, %v12397_v18, -inf }
 0xb54   : > { %3449 = vmax.xlane.f32.xlu0 %v3448_v2  ;;  %v3203_v3 = vpop.f32.mrf.mxu1 }
 0xb55   : > { %v3419_v62 = vmul.f32 0.35355338, %v3203_v3  ;;  %v9689_v14 = vpop.f32.mrf.mxu0  ;;  %v3442_v52 = vsel %vm1388_vm5, %v12402_v6, -inf }
 0xb57   : > { %v12408_v49 = vpop.f32.mrf.mxu0  ;;  %v12413_v17 = vadd.f32 %v3419_v62, %v11652_v4 }
 0xb58   : > { %3443 = vmax.xlane.f32.xlu0 %v3442_v52 }
 0xb59   : > { %v3445_v20 = vsel %vm1388_vm5, %v12413_v17, -inf }
 0xb5a   : > { %v12417_v47 = vpop.f32.mrf.mxu0  ;;  %3446 = vmax.xlane.f32.xlu1 %v3445_v20 }
 0xb5c   : > { %v12419_v50 = vpop.f32.mrf.mxu0 }
 0xb5e   : > { %v9705_v8 = vpop.f32.mrf.mxu0  ;;  %v9728_v32 = vpop.f32.mrf.mxu1 }
 0xb5f   : > { %v3426_v55 = vmul.f32 0.35355338, %v9728_v32 }
 0xb60   : > { %v3336_v38 = vpop.f32.mrf.mxu1  ;;  %v12428_v2 = vpop.f32.mrf.mxu0 }
 0xb61   : > { %v12424_v44 = vadd.f32 %v3426_v55, %v11652_v4  ;;  %v3424_v19 = vmul.f32 0.35355338, %v3336_v38 }
 0xb62   : > { %v9729_v13 = vpop.f32.mrf.mxu1 }
 0xb63   : > { %v3466_v58 = vsel %vm1388_vm5, %v12424_v44, -inf }
 0xb64   : > { %3467 = vmax.xlane.f32.xlu0 %v3466_v58  ;;  %v3339_v3 = vpop.f32.mrf.mxu1 }
 0xb65   : > { %v3425_v14 = vmul.f32 0.35355338, %v3339_v3  ;;  %v12442_v3 = vadd.f32 %v3424_v19, %v11652_v4 }
 0xb67   : > { %v12439_v58 = vadd.f32 %v3425_v14, %v11652_v4 }
 0xb6a   : > { %v9720_v62 = vpop.f32.mrf.mxu0 }
 0xb6b   : > { %v3423_v52 = vmul.f32 0.35355338, %v9720_v62 }
 0xb6c   : > { %v3268_v20 = vpop.f32.mrf.mxu0 }
 0xb6d   : > { %v12431_v8 = vadd.f32 %v3423_v52, %v11652_v4  ;;  %v3421_v32 = vmul.f32 0.35355338, %v3268_v20  ;;  %v3460_v52 = vsel %vm1388_vm5, %v12442_v3, -inf }
 0xb6e   : > { %v9721_v42 = vpop.f32.mrf.mxu0 }
 0xb6f   : > { %v12434_v55 = vadd.f32 %v3421_v32, %v11652_v4  ;;  %v3457_v13 = vsel %vm1388_vm5, %v12431_v8, -inf  ;;  %v3463_v42 = vsel %vm1388_vm5, %v12439_v58, -inf }
 0xb70   : > { %3458 = vmax.xlane.f32.xlu1 %v3457_v13  ;;  %v3271_v27 = vpop.f32.mrf.mxu0 }
 0xb71   : > { %v3422_v38 = vmul.f32 0.35355338, %v3271_v27  ;;  %v3451_v62 = vsel %vm1388_vm5, %v12434_v55, -inf }
 0xb72   : > { %3452 = vmax.xlane.f32.xlu0 %v3451_v62 }
 0xb73   : > { %v12451_v14 = vadd.f32 %v3422_v38, %v11652_v4 }
 0xb74   : > { %3464 = vmax.xlane.f32.xlu1 %v3463_v42 }
 0xb75   : > { %v3454_v19 = vsel %vm1388_vm5, %v12451_v14, -inf }
 0xb76   : > { %3461 = vmax.xlane.f32.xlu0 %v3460_v52 }
 0xb7a   : > { %3455 = vmax.xlane.f32.xlu0 %v3454_v19  ;;  %v9736_v27 = vpop.f32.mrf.mxu0 }
 0xb7b   : > { %v3429_v20 = vmul.f32 0.35355338, %v9736_v27 }
 0xb7c   : > { %v3404_v32 = vpop.f32.mrf.mxu0 }
 0xb7d   : > { %v12456_v13 = vadd.f32 %v3429_v20, %v11652_v4  ;;  %v3427_v62 = vmul.f32 0.35355338, %v3404_v32 }
 0xb7e   : > { %v9737_v37 = vpop.f32.mrf.mxu0 }
 0xb7f   : > { %v12459_v42 = vadd.f32 %v3427_v62, %v11652_v4  ;;  %v3475_v38 = vsel %vm1388_vm5, %v12456_v13, -inf }
 0xb80   : > { %3476 = vmax.xlane.f32.xlu1 %v3475_v38  ;;  %v3407_v52 = vpop.f32.mrf.mxu0 }
 0xb81   : > { %v3428_v59 = vmul.f32 0.35355338, %v3407_v52  ;;  %v3469_v19 = vsel %vm1388_vm5, %v12459_v42, -inf }
 0xb83   : > { %v12466_v27 = vadd.f32 %v3428_v59, %v11652_v4 }
 0xb84   : > { %3470 = vmax.xlane.f32.xlu1 %v3469_v19 }
 0xb85   : > { %v3472_v20 = vsel %vm1388_vm5, %v12466_v27, -inf }
 0xb86   : > { %3473 = vmax.xlane.f32.xlu0 %v3472_v20 }
 0xb95   : > { %3582 = vrot.lane.b32.xlu1 %v11571_v63, %s14649_s20 }
 0xb99   : > { %3646 = vrot.lane.b32.xlu1 %v11577_v46, %s14649_s20 }
 0xb9c   : > { %3584 = vrot.lane.b32.xlu0 %v11567_v40, %s14649_s20 }
 0xb9d   : > { %3644 = vrot.lane.b32.xlu1 %v11581_v15, %s14649_s20 }
 0xbdd   : > { %v3450_v37 = vpop.xlane.xlu0 %3449 }
 0xbde   : > { %v3480_v59 = vsub.f32 %v12397_v18, %v3450_v37 }
 0xbe0   : > { %v3494_v32 = vmul.f32 1.442695, %v3480_v59 }
 0xbe1   : > { %v3444_v62 = vpop.xlane.xlu0 %3443 }
 0xbe2   : > { %10708 = vpow2.f32 %v3494_v32  ;;  %v3478_v38 = vsub.f32 %v12402_v6, %v3444_v62 }
 0xbe3   : > { %v3447_v52 = vpop.xlane.xlu1 %3446 }
 0xbe4   : > { %v3490_v19 = vmul.f32 1.442695, %v3478_v38  ;;  %v3479_v63 = vsub.f32 %v12413_v17, %v3447_v52 }
 0xbe6   : > { %10710 = vpow2.f32 %v3490_v19  ;;  %v3492_v46 = vmul.f32 1.442695, %v3479_v63 }
 0xbe8   : > { %10712 = vpow2.f32 %v3492_v46 }
 0xbed   : > { %v3468_v20 = vpop.xlane.xlu0 %3467 }
 0xbee   : > { %v3486_v40 = vsub.f32 %v12424_v44, %v3468_v20 }
 0xbef   : > { %v12482_v4 = vpop.eup %10708 }
 0xbf0   : > { %v3506_v15 = vmul.f32 1.442695, %v3486_v40  ;;  %v3520_v18 = vsel %vm1388_vm5, %v12482_v4, 0.0 }
 0xbf1   : > { %3521 = vadd.xlane.f32.xlu0 %v3520_v18 }
 0xbf2   : > { %10714 = vpow2.f32 %v3506_v15 }
 0xbf3   : > { %v12486_v37 = vpop.eup %10710 }
 0xbf4   : > { %v3514_v6 = vsel %vm1388_vm5, %v12486_v37, 0.0 }
 0xbf5   : > { %v12490_v17 = vpop.eup %10712  ;;  %3515 = vadd.xlane.f32.xlu0 %v3514_v6 }
 0xbf6   : > { %v3517_v59 = vsel %vm1388_vm5, %v12490_v17, 0.0 }
 0xbf7   : > { %3518 = vadd.xlane.f32.xlu1 %v3517_v59 }
 0xbf9   : > { %v3459_v44 = vpop.xlane.xlu1 %3458 }
 0xbfa   : > { %v3483_v32 = vsub.f32 %v12431_v8, %v3459_v44 }
 0xbfb   : > { %v3453_v62 = vpop.xlane.xlu0 %3452 }
 0xbfc   : > { %v3500_v38 = vmul.f32 1.442695, %v3483_v32  ;;  %v3481_v52 = vsub.f32 %v12434_v55, %v3453_v62 }
 0xbfd   : > { %v3465_v6 = vpop.xlane.xlu1 %3464 }
 0xbfe   : > { %10716 = vpow2.f32 %v3500_v38  ;;  %v3496_v19 = vmul.f32 1.442695, %v3481_v52 }
 0xbff   : > { %v12496_v63 = vpop.eup %10714  ;;  %v3462_v46 = vpop.xlane.xlu0 %3461 }
 0xc00   : > { %10718 = vpow2.f32 %v3496_v19  ;;  %v3484_v20 = vsub.f32 %v12442_v3, %v3462_v46  ;;  %v3538_v40 = vsel %vm1388_vm5, %v12496_v63, 0.0 }
 0xc01   : > { %3539 = vadd.xlane.f32.xlu0 %v3538_v40 }
 0xc02   : > { %v3502_v15 = vmul.f32 1.442695, %v3484_v20 }
 0xc03   : > { %v3456_v18 = vpop.xlane.xlu0 %3455 }
 0xc04   : > { %10720 = vpow2.f32 %v3502_v15  ;;  %v3482_v8 = vsub.f32 %v12451_v14, %v3456_v18 }
 0xc06   : > { %v3498_v59 = vmul.f32 1.442695, %v3482_v8 }
 0xc08   : > { %10722 = vpow2.f32 %v3498_v59 }
 0xc09   : > { %v3477_v55 = vpop.xlane.xlu1 %3476 }
 0xc0b   : > { %v12502_v44 = vpop.eup %10716 }
 0xc0c   : > { %v3529_v32 = vsel %vm1388_vm5, %v12502_v44, 0.0 }
 0xc0d   : > { %v12506_v62 = vpop.eup %10718  ;;  %3530 = vadd.xlane.f32.xlu1 %v3529_v32  ;;  %v3471_v3 = vpop.xlane.xlu1 %3470 }
 0xc0e   : > { %v3523_v52 = vsel %vm1388_vm5, %v12506_v62, 0.0 }
 0xc0f   : > { %v3474_v38 = vpop.xlane.xlu0 %3473 }
 0xc11   : > { %v12510_v19 = vpop.eup %10720  ;;  %v3583_v14 = vpop.permute.xlu1 %3582  ;;  %3524 = vadd.xlane.f32.xlu1 %v3523_v52  ;;  %v3485_v52 = vsub.f32 %v12439_v58, %v3465_v6 }
 0xc12   : > { %v3532_v46 = vsel %vm1388_vm5, %v12510_v19, 0.0 }
 0xc13   : > { %3533 = vadd.xlane.f32.xlu0 %v3532_v46  ;;  %v3585_v20 = vpop.permute.xlu0 %3584  ;;  %v3504_v46 = vmul.f32 1.442695, %v3485_v52 }
 0xc14   : > { %10198 = vmatprep.subr.msk.bf16.mxu1 %vm1540_vm3, %v3585_v20  ;;  %v3594_v40 = vsel %vm1540_vm3, %v3585_v20, 0  ;;  %v3489_v20 = vsub.f32 %v12456_v13, %v3477_v55 }
 0xc15   : > { %v12516_v15 = vpop.eup %10722  ;;  %v3647_v18 = vpop.permute.xlu1 %3646  ;;  %9739 = vmatpush3.bf16.msra.mxu1 %v3594_v40  ;;  %v3488_v40 = vsub.f32 %v12466_v27, %v3474_v38  ;;  %10724 = vpow2.f32 %v3504_v46  ;;  %v10308_v38 = vpack.i.bf16 %v12150_v22, %v12148_v35 }
 0xc16   : > { %9740 = vmatprep.subr.bf16.mxu1 %v3583_v14  ;;  %10199 = vmatprep.subr.msk.bf16.mxu0 %vm1540_vm3, %v3647_v18  ;;  %v3656_v8 = vsel %vm1540_vm3, %v3647_v18, 0  ;;  %v3526_v59 = vsel %vm1388_vm5, %v12516_v15, 0.0  ;;  %v3512_v18 = vmul.f32 1.442695, %v3489_v20 }
 0xc17   : > { %9747 = vmatpush3.bf16.msra.mxu0 %v3656_v8  ;;  %3527 = vadd.xlane.f32.xlu0 %v3526_v59  ;;  %v3487_v8 = vsub.f32 %v12459_v42, %v3471_v3  ;;  %v10313_v3 = vpack.i.bf16 %v12166_v23, %v12146_v30  ;;  %v10328_v30 = vpack.i.bf16 %v12161_v21, %v12170_v24 }
 0xc18   : > { %10726 = vpow2.f32 %v3512_v18 }
 0xc19   : > { %v3645_v32 = vpop.permute.xlu1 %3644  ;;  %9741 = vmatpush3.bf16.msra.mxu1 %v3583_v14  ;;  %v3510_v14 = vmul.f32 1.442695, %v3488_v40  ;;  %v3508_v59 = vmul.f32 1.442695, %v3487_v8 }
 0xc1a   : > { %9748 = vmatprep.subr.bf16.mxu0 %v3645_v32 }
 0xc1b   : > { %9749 = vmatpush3.bf16.msra.mxu0 %v3645_v32  ;;  %10728 = vpow2.f32 %v3510_v14  ;;  %v10323_v32 = vpack.i.bf16 %v12404_v57, %v12384_v11 }
 0xc1c   : > { %10730 = vpow2.f32 %v3508_v59 }
 0xc22   : > { %3706 = vrot.lane.b32.xlu1 %v11585_v53, %s14649_s20  ;;  %v12530_v53 = vpop.eup %10724 }
 0xc23   : > { %v3535_v58 = vsel %vm1388_vm5, %v12530_v53, 0.0 }
 0xc2d   : > { %3708 = vrot.lane.b32.xlu0 %v11589_v25, %s14649_s20  ;;  %v12534_v25 = vpop.eup %10726 }
 0xc2e   : > { %v12536_v13 = vpop.eup %10728  ;;  %v3547_v27 = vsel %vm1388_vm5, %v12534_v25, 0.0 }
 0xc2f   : > { %v12540_v6 = vpop.eup %10730  ;;  %v3544_v42 = vsel %vm1388_vm5, %v12536_v13, 0.0 }
 0xc30   : > { %v3541_v55 = vsel %vm1388_vm5, %v12540_v6, 0.0 }
 0xc46   : > { %3536 = vadd.xlane.f32.xlu1 %v3535_v58 }
 0xc4a   : > { %3548 = vadd.xlane.f32.xlu1 %v3547_v27 }
 0xc4c   : > { %3545 = vadd.xlane.f32.xlu0 %v3544_v42 }
 0xc4e   : > { %3542 = vadd.xlane.f32.xlu1 %v3541_v55 }
 0xc5f   : > { %3768 = vrot.lane.b32.xlu1 %v11595_v33, %s14649_s20  ;;  %v10318_v33 = vpack.i.bf16 %v12388_v26, %v12386_v51 }
 0xc62   : > { %3770 = vrot.lane.b32.xlu0 %v11593_v28, %s14649_s20  ;;  %v10333_v28 = vpack.i.bf16 %v12156_v0, %v12154_v1  ;;  %s14744_s20 = smov 104  }
 0xc63   : > { %10314 = vrot.lane.b32.xlu1 %v10313_v3, %s14663_s25 }
 0xc66   : > { %10309 = vrot.lane.b32.xlu0 %v10308_v38, %s14663_s25 }
 0xc67   : > { %10324 = vrot.lane.b32.xlu1 %v10323_v32, %s14661_s23 }
 0xc6a   : > { %10319 = vrot.lane.b32.xlu0 %v10318_v33, %s14661_s23 }
 0xc6b   : > { %10334 = vrot.lane.b32.xlu1 %v10333_v28, %s14663_s25 }
 0xc6e   : > { %10329 = vrot.lane.b32.xlu0 %v10328_v30, %s14663_s25 }
 0xc7a   : > { %v3522_v35 = vpop.xlane.xlu0 %3521 }
 0xc7b   : > { %10732 = vrcp.f32 %v3522_v35 }
 0xc7e   : > { %v3516_v22 = vpop.xlane.xlu0 %3515 }
 0xc7f   : > { %10734 = vrcp.f32 %v3516_v22 }
 0xc80   : > { %v3519_v23 = vpop.xlane.xlu1 %3518 }
 0xc81   : > { %10736 = vrcp.f32 %v3519_v23 }
 0xc88   : > { %v10733_v11 = vpop.eup %10732 }
 0xc89   : > { %v3564_v1 = vmul.f32 %v10733_v11, %v12482_v4 }
 0xc8a   : > { %v3540_v24 = vpop.xlane.xlu0 %3539 }
 0xc8b   : > { %v3575_v46 = vpack.c.bf16 %v3564_v1, %v3564_v1 }
 0xc8c   : > { %v10735_v51 = vpop.eup %10734 }
 0xc8d   : > { %v3562_v0 = vmul.f32 %v10735_v51, %v12486_v37 }
 0xc8e   : > { %v10737_v26 = vpop.eup %10736 }
 0xc8f   : > { %v3563_v57 = vmul.f32 %v10737_v26, %v12490_v17 }
 0xc91   : > { %v3574_v52 = vpack.c.bf16 %v3563_v57, %v3562_v0 }
 0xc93   : > { %9742 = vmatprep.mubr.msk.bf16.mxu1 %vm1388_vm5, %v3574_v52 }
 0xc94   : > { %9743 = vmatmul.mubr.msk.bf16.vlgmr.msra.gmra.mxu1 %vm1388_vm5, %v3575_v46 }
 0xc96   : > { %v3531_v21 = vpop.xlane.xlu1 %3530 }
 0xc97   : > { %10738 = vrcp.f32 %v3531_v21 }
 0xc9a   : > { %v3525_v20 = vpop.xlane.xlu1 %3524 }
 0xc9b   : > { %10740 = vrcp.f32 %v3525_v20 }
 0xc9c   : > { %v3534_v40 = vpop.xlane.xlu0 %3533 }
 0xc9e   : > { %v3707_v37 = vpop.permute.xlu1 %3706 }
 0xca0   : > { %v3528_v18 = vpop.xlane.xlu0 %3527 }
 0xca1   : > { %10742 = vrcp.f32 %v3528_v18 }
 0xca2   : > { %10744 = vrcp.f32 %v3540_v24 }
 0xca3   : > { %10746 = vrcp.f32 %v3534_v40  ;;  %v10520_v40 = vld [vmem:[%s14610_s6 + $0x8] sm:$0xff]  }
 0xca4   : > { %v3709_v8 = vpop.permute.xlu0 %3708  ;;  %v10739_v17 = vpop.eup %10738 }
 0xca5   : > { %10200 = vmatprep.subr.msk.bf16.mxu1 %vm1540_vm3, %v3709_v8  ;;  %v3718_v4 = vsel %vm1540_vm3, %v3709_v8, 0  ;;  %v3567_v58 = vmul.f32 %v10739_v17, %v12502_v44 }
 0xca6   : > { %9755 = vmatpush3.bf16.msra.mxu1 %v3718_v4 }
 0xca7   : > { %9756 = vmatprep.subr.bf16.mxu1 %v3707_v37  ;;  %v3577_v3 = vpack.c.bf16 %v3567_v58, %v3567_v58  ;;  %v10353_v58 = vpack.i.bf16 %v12394_v41, %v12392_v60 }
 0xca8   : > { %v10741_v14 = vpop.eup %10740 }
 0xca9   : > { %v3565_v27 = vmul.f32 %v10741_v14, %v12506_v62 }
 0xcaa   : > { %9757 = vmatpush3.bf16.msra.mxu1 %v3707_v37 }
 0xcab   : > { %9770 = vmatprep.subr.bf16.mxu1 %v10520_v40 }
 0xcae   : > { %v10743_v59 = vpop.eup %10742 }
 0xcaf   : > { %v3566_v42 = vmul.f32 %v10743_v59, %v12516_v15  ;;  %v10745_v15 = vpop.eup %10744 }
 0xcb0   : > { %v10747_v35 = vpop.eup %10746  ;;  %v3570_v11 = vmul.f32 %v10745_v15, %v12496_v63 }
 0xcb1   : > { %v3576_v55 = vpack.c.bf16 %v3566_v42, %v3565_v27  ;;  %v3568_v51 = vmul.f32 %v10747_v35, %v12510_v19 }
 0xcb2   : > { %v3579_v1 = vpack.c.bf16 %v3570_v11, %v3570_v11 }
 0xcb3   : > { %9750 = vmatprep.mubr.msk.bf16.mxu0 %vm1388_vm5, %v3576_v55 }
 0xcb4   : > { %9751 = vmatmul.mubr.msk.bf16.vlgmr.msra.gmra.mxu0 %vm1388_vm5, %v3577_v3 }
 0xccf   : > { %v3537_v38 = vpop.xlane.xlu1 %3536 }
 0xcd0   : > { %10748 = vrcp.f32 %v3537_v38 }
 0xcd3   : > { %v3549_v32 = vpop.xlane.xlu1 %3548 }
 0xcd4   : > { %10750 = vrcp.f32 %v3549_v32 }
 0xcd5   : > { %v3546_v33 = vpop.xlane.xlu0 %3545 }
 0xcd6   : > { %10752 = vrcp.f32 %v3546_v33  ;;  %v10373_v33 = vpack.i.bf16 %v12179_v5, %v12190_v61 }
 0xcd7   : > { %v3543_v28 = vpop.xlane.xlu1 %3542 }
 0xcd8   : > { %10754 = vrcp.f32 %v3543_v28 }
 0xcd9   : > { %v3771_v44 = vpop.permute.xlu0 %3770 }
 0xcda   : > { %10201 = vmatprep.subr.msk.bf16.mxu0 %vm1540_vm3, %v3771_v44  ;;  %v3780_v62 = vsel %vm1540_vm3, %v3771_v44, 0 }
 0xcdb   : > { %v3769_v30 = vpop.permute.xlu1 %3768  ;;  %9763 = vmatpush3.bf16.msra.mxu0 %v3780_v62 }
 0xcdc   : > { %9764 = vmatprep.subr.bf16.mxu0 %v3769_v30 }
 0xcdd   : > { %v10749_v22 = vpop.eup %10748  ;;  %v10310_v44 = vpop.permute.xlu0 %10309 }
 0xcde   : > { %v3569_v23 = vmul.f32 %v10749_v22, %v12530_v53  ;;  %v10311_v5 = vunpack.i.l.bf16 %v10310_v44 }
 0xcdf   : > { %9765 = vmatpush3.bf16.msra.mxu0 %v3769_v30  ;;  %v10312_v30 = vunpack.i.h.bf16 %v10310_v44 }
 0xce0   : > { %v3578_v26 = vpack.c.bf16 %v3569_v23, %v3568_v51 }
 0xce1   : > { %v10751_v0 = vpop.eup %10750  ;;  %v10320_v62 = vpop.permute.xlu0 %10319  ;;  %v3975_v23 = vsel %vm1105_vm2, %v11898_v48, %v10312_v30 }
 0xce2   : > { %9758 = vmatprep.mubr.msk.bf16.mxu1 %vm1388_vm5, %v3578_v26  ;;  %v3573_v46 = vmul.f32 %v10751_v0, %v12534_v25  ;;  %v10322_v61 = vunpack.i.h.bf16 %v10320_v62  ;;  %v10321_v35 = vunpack.i.l.bf16 %v10320_v62 }
 0xce3   : > { %v10753_v57 = vpop.eup %10752  ;;  %9759 = vmatmul.mubr.msk.bf16.vlgmr.msra.gmra.mxu1 %vm1388_vm5, %v3579_v1 }
 0xce4   : > { %v3572_v53 = vmul.f32 %v10753_v57, %v12536_v13  ;;  %v3581_v63 = vpack.c.bf16 %v3573_v46, %v3573_v46  ;;  %9771 = vmatpush3.bf16.msra.mxu1 %v10520_v40  ;;  %v10343_v13 = vpack.i.bf16 %v12399_v45, %v12408_v49  ;;  %v14706_v45 = vpack.i.bf16 %v12181_v56, %v12152_v39 }
 0xce5   : > { %v10755_v52 = vpop.eup %10754  ;;  %v14707_v49 = vpack.i.bf16 %v12419_v50, %v12390_v10  ;;  %v10383_v56 = vpack.i.bf16 %v12417_v47, %v12428_v2  ;;  %v10330_v15 = vpop.permute.xlu0 %10329  ;;  %v3974_v47 = vsel %vm1105_vm2, %v11892_v43, %v10311_v5  ;;  %v3988_v26 = vsel %vm3986_vm6, %v3975_v23, %v10322_v61 }
 0xce6   : > { %v3571_v21 = vmul.f32 %v10755_v52, %v12540_v6  ;;  %v10521_v6 = vld [vmem:[%s14610_s6] sm:$0xff]   ;;  %v3987_v51 = vsel %vm3986_vm6, %v3974_v47, %v10321_v35  ;;  %v10315_v52 = vpop.permute.xlu1 %10314 }
 0xce7   : > { %9772 = vmatprep.subr.bf16.mxu1 %v10521_v6  ;;  %v10316_v48 = vunpack.i.l.bf16 %v10315_v52 }
 0xce8   : > { %v3580_v24 = vpack.c.bf16 %v3572_v53, %v3571_v21  ;;  %9773 = vmatpush3.bf16.msra.mxu1 %v10521_v6  ;;  %v10317_v21 = vunpack.i.h.bf16 %v10315_v52 }
 0xcea   : > { %9766 = vmatprep.mubr.msk.bf16.mxu0 %vm1388_vm5, %v3580_v24  ;;  %v10325_v46 = vpop.permute.xlu1 %10324 }
 0xceb   : > { %9767 = vmatmul.mubr.msk.bf16.vlgmr.msra.gmra.mxu0 %vm1388_vm5, %v3581_v63  ;;  %v10327_v24 = vunpack.i.h.bf16 %v10325_v46  ;;  %v10326_v43 = vunpack.i.l.bf16 %v10325_v46 }
 0xcee   : > { %v10335_v53 = vpop.permute.xlu1 %10334 }
 0xd54   : > { %v9744_v19 = vpop.f32.mrf.mxu1 }
 0xd56   : > { %v3630_v20 = vpop.f32.mrf.mxu1 }
 0xd58   : > { %v9745_v18 = vpop.f32.mrf.mxu1 }
 0xd59   : > { %v10332_v18 = vunpack.i.h.bf16 %v10330_v15 }
 0xd5a   : > { %v3633_v25 = vpop.f32.mrf.mxu1 }
 0xd5b   : > { %v10338_v8 = vpack.i.bf16 %v3633_v25, %v3630_v20  ;;  %v3976_v20 = vsel %vm1105_vm2, %v11890_v7, %v10316_v48  ;;  %v10331_v25 = vunpack.i.l.bf16 %v10330_v15  ;;  %v3979_v7 = vsel %vm1105_vm2, %v11894_v54, %v10332_v18 }
 0xd5c   : > { %v3989_v6 = vsel %vm3986_vm6, %v3976_v20, %v10326_v43 }
 0xd5d   : > { %10339 = vrot.lane.b32.xlu0 %v10338_v8, %s14659_s17 }
 0xd61   : > { %10344 = vrot.lane.b32.xlu0 %v10343_v13, %s14661_s23 }
 0xd74   : > { %v9752_v4 = vpop.f32.mrf.mxu0 }
 0xd76   : > { %v3692_v37 = vpop.f32.mrf.mxu0 }
 0xd77   : > { %v10348_v17 = vpack.i.bf16 %v3692_v37, %v9744_v19  ;;  %v3977_v19 = vsel %vm1105_vm2, %v11896_v16, %v10317_v21 }
 0xd78   : > { %v9753_v14 = vpop.f32.mrf.mxu0 }
 0xd79   : > { %10349 = vrot.lane.b32.xlu1 %v10348_v17, %s14659_s17 }
 0xd7a   : > { %v3695_v59 = vpop.f32.mrf.mxu0 }
 0xd7b   : > { %v10358_v27 = vpack.i.bf16 %v9752_v4, %v3695_v59  ;;  %v3990_v4 = vsel %vm3986_vm6, %v3977_v19, %v10327_v24  ;;  %v14708_v19 = vld [vmem:[#allocation26_spill] sm:$0xff] }
 0xd7d   : > { %10354 = vrot.lane.b32.xlu1 %v10353_v58, %s14661_s23  ;;  %10359 = vrot.lane.b32.xlu0 %v10358_v27, %s14659_s17  ;;  %v3978_v27 = vsel %vm1105_vm2, %v11914_v9, %v10331_v25 }
 0xd81   : > { %10364 = vrot.lane.b32.xlu0 %v14706_v45, %s14663_s25 }
 0xd85   : > { %10379 = vrot.lane.b32.xlu0 %v14707_v49, %s14661_s23 }
 0xda3   : > { %v9760_v42 = vpop.f32.mrf.mxu1 }
 0xda5   : > { %v3754_v55 = vpop.f32.mrf.mxu1 }
 0xda7   : > { %v9761_v3 = vpop.f32.mrf.mxu1 }
 0xda9   : > { %v3757_v38 = vpop.f32.mrf.mxu1 }
 0xdaa   : > { %v10368_v60 = vpack.i.bf16 %v3757_v38, %v3754_v55 }
 0xdab   : > { %v9768_v41 = vpop.f32.mrf.mxu0 }
 0xdac   : > { %10369 = vrot.lane.b32.xlu1 %v10368_v60, %s14659_s17 }
 0xdad   : > { %v3816_v32 = vpop.f32.mrf.mxu0 }
 0xdae   : > { %v10388_v28 = vpack.i.bf16 %v3816_v32, %v9760_v42  ;;  %v10337_v32 = vunpack.i.h.bf16 %v10335_v53 }
 0xdaf   : > { %v9769_v39 = vpop.f32.mrf.mxu0 }
 0xdb0   : > { %10374 = vrot.lane.b32.xlu1 %v10373_v33, %s14663_s25  ;;  %10389 = vrot.lane.b32.xlu0 %v10388_v28, %s14659_s17  ;;  %v10336_v33 = vunpack.i.l.bf16 %v10335_v53  ;;  %s14742_s25 = smov 48  }
 0xdb1   : > { %v3819_v10 = vpop.f32.mrf.mxu0 }
 0xdb2   : > { %v10393_v50 = vpack.i.bf16 %v9768_v41, %v3819_v10  ;;  %v3980_v10 = vsel %vm1105_vm2, %v11902_v29, %v10336_v33 }
 0xdb4   : > { %10384 = vrot.lane.b32.xlu1 %v10383_v56, %s14661_s23  ;;  %v3981_v56 = vsel %vm1105_vm2, %v11904_v34, %v10337_v32  ;;  %s14741_s23 = smov 112  }
 0xdb8   : > { %10394 = vrot.lane.b32.xlu1 %v10393_v50, %s14659_s17 }
 0xdcf   : > { %v10340_v22 = vpop.permute.xlu0 %10339 }
 0xdd0   : > { %v10342_v2 = vunpack.i.h.bf16 %v10340_v22  ;;  %v10341_v11 = vunpack.i.l.bf16 %v10340_v22 }
 0xdd2   : > { %v3999_v1 = vsel %vm1388_vm5, %v3987_v51, %v10341_v11  ;;  %v4000_v0 = vsel %vm1388_vm5, %v3988_v26, %v10342_v2 }
 0xdd3   : > { %v4011_v57 = vpack.c.bf16 %v4000_v0, %v3999_v1  ;;  %v10345_v63 = vpop.permute.xlu0 %10344 }
 0xdd4   : > { %v10347_v37 = vunpack.i.h.bf16 %v10345_v63  ;;  %v10346_v17 = vunpack.i.l.bf16 %v10345_v63 }
 0xdd5   : > { %9774 = vmatprep.mubr.msk.bf16.mxu1 %vm773_vm1, %v4011_v57 }
 0xdd6   : > { %v3991_v42 = vsel %vm3986_vm6, %v3978_v27, %v10346_v17  ;;  %v3992_v55 = vsel %vm3986_vm6, %v3979_v7, %v10347_v37 }
 0xdeb   : > { %v10350_v40 = vpop.permute.xlu1 %10349 }
 0xdec   : > { %v10352_v8 = vunpack.i.h.bf16 %v10350_v40  ;;  %v10351_v13 = vunpack.i.l.bf16 %v10350_v40 }
 0xdee   : > { %v4002_v14 = vsel %vm1388_vm5, %v3990_v4, %v10352_v8  ;;  %v4001_v59 = vsel %vm1388_vm5, %v3989_v6, %v10351_v13 }
 0xdef   : > { %v4012_v58 = vpack.c.bf16 %v4002_v14, %v4001_v59  ;;  %v10360_v16 = vpop.permute.xlu0 %10359  ;;  %v10355_v54 = vpop.permute.xlu1 %10354  ;;  %v14709_v14 = vld [vmem:[#allocation12_spill] sm:$0xff]  ;;  %v14710_v59 = vld [vmem:[#allocation10_spill] sm:$0xff] }
 0xdf0   : > { %v10362_v45 = vunpack.i.h.bf16 %v10360_v16  ;;  %v10361_v49 = vunpack.i.l.bf16 %v10360_v16  ;;  %v10357_v9 = vunpack.i.h.bf16 %v10355_v54  ;;  %v10356_v28 = vunpack.i.l.bf16 %v10355_v54  ;;  %v9015_v16 = vld [vmem:[%s14611_s7] ss:$0 sm:$0xff] }
 0xdf1   : > { %9775 = vmatmul.mubr.msk.bf16.vlgmr.msra.gmra.mxu1 %vm773_vm1, %v4012_v58 }
 0xdf2   : > { %v4003_v3 = vsel %vm1388_vm5, %v3991_v42, %v10361_v49  ;;  %v4004_v38 = vsel %vm1388_vm5, %v3992_v55, %v10362_v45  ;;  %v3994_v5 = vsel %vm3986_vm6, %v3981_v56, %v10357_v9  ;;  %v3993_v61 = vsel %vm3986_vm6, %v3980_v10, %v10356_v28  ;;  %v14711_v42 = vld [vmem:[#allocation13_spill] sm:$0xff]  ;;  %v14713_v56 = vld [vmem:[#allocation16_spill] sm:$0xff] }
 0xdf3   : > { %v4013_v60 = vpack.c.bf16 %v4004_v38, %v4003_v3  ;;  %v10365_v41 = vpop.permute.xlu0 %10364  ;;  %v14712_v3 = vld [vmem:[#allocation11_spill] sm:$0xff] }
 0xdf4   : > { %v10367_v44 = vunpack.i.h.bf16 %v10365_v41  ;;  %v10366_v62 = vunpack.i.l.bf16 %v10365_v41 }
 0xdf5   : > { %9778 = vmatprep.mubr.msk.bf16.mxu1 %vm773_vm1, %v4013_v60 }
 0xdf6   : > { %v3983_v29 = vsel %vm1105_vm2, %v11925_v36, %v10367_v44  ;;  %v3982_v51 = vsel %vm1105_vm2, %v11900_v31, %v10366_v62 }
 0xdf7   : > { %v10380_v39 = vpop.permute.xlu0 %10379 }
 0xdf8   : > { %v10382_v35 = vunpack.i.h.bf16 %v10380_v39  ;;  %v10381_v22 = vunpack.i.l.bf16 %v10380_v39 }
 0xdfa   : > { %v3995_v0 = vsel %vm3986_vm6, %v3982_v51, %v10381_v22  ;;  %v3996_v57 = vsel %vm3986_vm6, %v3983_v29, %v10382_v35  ;;  %v14716_v22 = vld [vmem:[#allocation15_spill] sm:$0xff] }
 0xe1e   : > { %v10370_v50 = vpop.permute.xlu1 %10369 }
 0xe1f   : > { %v10372_v15 = vunpack.i.h.bf16 %v10370_v50  ;;  %v10371_v30 = vunpack.i.l.bf16 %v10370_v50  ;;  %v14714_v50 = vld [vmem:[#allocation14_spill] sm:$0xff] }
 0xe21   : > { %v4006_v23 = vsel %vm1388_vm5, %v3994_v5, %v10372_v15  ;;  %v4005_v47 = vsel %vm1388_vm5, %v3993_v61, %v10371_v30  ;;  %v14715_v61 = vld [vmem:[#allocation17_spill] sm:$0xff] }
 0xe22   : > { %v10375_v2 = vpop.permute.xlu1 %10374  ;;  %v10390_v34 = vpop.permute.xlu0 %10389  ;;  %v4014_v11 = vpack.c.bf16 %v4006_v23, %v4005_v47 }
 0xe23   : > { %v10392_v26 = vunpack.i.h.bf16 %v10390_v34  ;;  %v10391_v1 = vunpack.i.l.bf16 %v10390_v34  ;;  %v10377_v53 = vunpack.i.h.bf16 %v10375_v2  ;;  %v10376_v24 = vunpack.i.l.bf16 %v10375_v2 }
 0xe24   : > { %9779 = vmatmul.mubr.msk.bf16.gmra.mxu1 %vm773_vm1, %v4014_v11 }
 0xe25   : > { %v4007_v52 = vsel %vm1388_vm5, %v3995_v0, %v10391_v1  ;;  %v4008_v46 = vsel %vm1388_vm5, %v3996_v57, %v10392_v26  ;;  %v3985_v63 = vsel %vm1105_vm2, %v11921_v12, %v10377_v53  ;;  %v3984_v20 = vsel %vm1105_vm2, %v14708_v19, %v10376_v24  ;;  %v14717_v1 = vld [vmem:[#allocation20_spill] sm:$0xff]  ;;  %v14718_v57 = vld [vmem:[#allocation18_spill] sm:$0xff] }
 0xe26   : > { %v10385_v21 = vpop.permute.xlu1 %10384  ;;  %v4015_v48 = vpack.c.bf16 %v4008_v46, %v4007_v52 }
 0xe27   : > { %v10387_v36 = vunpack.i.h.bf16 %v10385_v21  ;;  %v10386_v43 = vunpack.i.l.bf16 %v10385_v21 }
 0xe28   : > { %9782 = vmatprep.mubr.msk.bf16.mxu1 %vm773_vm1, %v4015_v48 }
 0xe29   : > { %v3997_v25 = vsel %vm3986_vm6, %v3984_v20, %v10386_v43  ;;  %v3998_v8 = vsel %vm3986_vm6, %v3985_v63, %v10387_v36  ;;  %v14719_v36 = vld [vmem:[#allocation21_spill] sm:$0xff] }
 0xe2a   : > { %v10395_v31 = vpop.permute.xlu1 %10394 }
 0xe2b   : > { %v10397_v40 = vunpack.i.h.bf16 %v10395_v31  ;;  %v10396_v18 = vunpack.i.l.bf16 %v10395_v31  ;;  %v14720_v31 = vld [vmem:[#allocation19_spill] sm:$0xff] }
 0xe2d   : > { %v4010_v13 = vsel %vm1388_vm5, %v3998_v8, %v10397_v40  ;;  %v4009_v6 = vsel %vm1388_vm5, %v3997_v25, %v10396_v18 }
 0xe2e   : > { %v4016_v4 = vpack.c.bf16 %v4010_v13, %v4009_v6 }
 0xe30   : > { %9783 = vmatmul.mubr.msk.bf16.gmra.mxu1 %vm773_vm1, %v4016_v4 }
 0xeb1   : > { %v9776_v37 = vpop.f32.mrf.mxu1 }
 0xeb2   : > { %v4134_v12 = vadd.f32 %v9776_v37, %v14709_v14 }
 0xeb3   : > { %v4085_v17 = vpop.f32.mrf.mxu1 }
 0xeb4   : > { %v4132_v58 = vadd.f32 %v4085_v17, %v14710_v59  ;;  %v12685_v49 = vadd.f32 %v9015_v16, %v4134_v12 }
 0xeb5   : > { %v9777_v7 = vpop.f32.mrf.mxu1 }
 0xeb6   : > { %v12683_v27 = vadd.f32 %v9015_v16, %v4132_v58  ;;  %v4135_v55 = vadd.f32 %v9777_v7, %v14711_v42  ;;  %v4169_v32 = vsel %vm773_vm1, %v12685_v49, 0.0 }
 0xeb7   : > { %v4088_v45 = vpop.f32.mrf.mxu1 }
 0xeb8   : > { %v4133_v38 = vadd.f32 %v4088_v45, %v14712_v3  ;;  %v4163_v60 = vsel %vm773_vm1, %v12683_v27, 0.0  ;;  %v12693_v54 = vadd.f32 %v9015_v16, %v4135_v55 }
 0xeb9   : > { %4164 = vadd.xlane.f32.xlu0 %v4163_v60 }
 0xeba   : > { %v12691_v41 = vadd.f32 %v9015_v16, %v4133_v38  ;;  %v4172_v9 = vsel %vm773_vm1, %v12693_v54, 0.0 }
 0xebc   : > { %v4166_v33 = vsel %vm773_vm1, %v12691_v41, 0.0 }
 0xebd   : > { %4170 = vadd.xlane.f32.xlu0 %v4169_v32  ;;  %4167 = vadd.xlane.f32.xlu1 %v4166_v33 }
 0xec1   : > { %4173 = vadd.xlane.f32.xlu0 %v4172_v9 }
 0xee4   : > { %v9780_v28 = vpop.f32.mrf.mxu1 }
 0xee5   : > { %v4138_v10 = vadd.f32 %v9780_v28, %v14713_v56  ;;  %v10522_v28 = vld [vmem:[%s14612_s8 + $0x8] sm:$0xff]  }
 0xee6   : > { %v4101_v39 = vpop.f32.mrf.mxu1  ;;  %9786 = vmatprep.subr.bf16.mxu0 %v10522_v28 }
 0xee7   : > { %v4136_v44 = vadd.f32 %v4101_v39, %v14714_v50  ;;  %v12705_v5 = vadd.f32 %v9015_v16, %v4138_v10  ;;  %v10523_v39 = vld [vmem:[%s14612_s8] sm:$0xff]   ;;  %9787 = vmatpush3.bf16.msra.mxu0 %v10522_v28 }
 0xee8   : > { %v9781_v62 = vpop.f32.mrf.mxu1  ;;  %9788 = vmatprep.subr.bf16.mxu0 %v10523_v39 }
 0xee9   : > { %v12703_v15 = vadd.f32 %v9015_v16, %v4136_v44  ;;  %v4139_v35 = vadd.f32 %v9781_v62, %v14715_v61  ;;  %v4181_v11 = vsel %vm773_vm1, %v12705_v5, 0.0 }
 0xeea   : > { %v4104_v30 = vpop.f32.mrf.mxu1 }
 0xeeb   : > { %v4137_v23 = vadd.f32 %v4104_v30, %v14716_v22  ;;  %v4175_v47 = vsel %vm773_vm1, %v12703_v15, 0.0  ;;  %v12713_v34 = vadd.f32 %v9015_v16, %v4139_v35  ;;  %9789 = vmatpush3.bf16.msra.mxu0 %v10523_v39 }
 0xeec   : > { %4176 = vadd.xlane.f32.xlu0 %v4175_v47 }
 0xeed   : > { %v12711_v2 = vadd.f32 %v9015_v16, %v4137_v23  ;;  %v4184_v46 = vsel %vm773_vm1, %v12713_v34, 0.0 }
 0xeef   : > { %v4178_v29 = vsel %vm773_vm1, %v12711_v2, 0.0 }
 0xef0   : > { %4182 = vadd.xlane.f32.xlu0 %v4181_v11  ;;  %4179 = vadd.xlane.f32.xlu1 %v4178_v29  ;;  %v9784_v51 = vpop.f32.mrf.mxu1 }
 0xef1   : > { %v4142_v0 = vadd.f32 %v9784_v51, %v14717_v1 }
 0xef2   : > { %v4117_v26 = vpop.f32.mrf.mxu1 }
 0xef3   : > { %v4140_v52 = vadd.f32 %v4117_v26, %v14718_v57  ;;  %v12725_v24 = vadd.f32 %v9015_v16, %v4142_v0 }
 0xef4   : > { %4185 = vadd.xlane.f32.xlu1 %v4184_v46  ;;  %v9785_v21 = vpop.f32.mrf.mxu1 }
 0xef5   : > { %v12723_v48 = vadd.f32 %v9015_v16, %v4140_v52  ;;  %v4143_v43 = vadd.f32 %v9785_v21, %v14719_v36  ;;  %v4193_v18 = vsel %vm773_vm1, %v12725_v24, 0.0 }
 0xef6   : > { %v4120_v53 = vpop.f32.mrf.mxu1 }
 0xef7   : > { %v4141_v63 = vadd.f32 %v4120_v53, %v14720_v31  ;;  %v4187_v19 = vsel %vm773_vm1, %v12723_v48, 0.0  ;;  %v12733_v40 = vadd.f32 %v9015_v16, %v4143_v43 }
 0xef8   : > { %4188 = vadd.xlane.f32.xlu0 %v4187_v19 }
 0xef9   : > { %v12731_v20 = vadd.f32 %v9015_v16, %v4141_v63  ;;  %v4196_v8 = vsel %vm773_vm1, %v12733_v40, 0.0 }
 0xefb   : > { %v4190_v25 = vsel %vm773_vm1, %v12731_v20, 0.0 }
 0xefc   : > { %4194 = vadd.xlane.f32.xlu0 %v4193_v18  ;;  %4191 = vadd.xlane.f32.xlu1 %v4190_v25 }
 0xf00   : > { %4197 = vadd.xlane.f32.xlu1 %v4196_v8 }
 0xf42   : > { %v4165_v13 = vpop.xlane.xlu0 %4164 }
 0xf43   : > { %v4199_v6 = vmul.f32 0.03125, %v4165_v13 }
 0xf45   : > { %v12742_v4 = vsub.f32 %v12683_v27, %v4199_v6 }
 0xf46   : > { %v4171_v37 = vpop.xlane.xlu0 %4170  ;;  %v4168_v17 = vpop.xlane.xlu1 %4167 }
 0xf47   : > { %v4201_v14 = vmul.f32 0.03125, %v4171_v37  ;;  %v4200_v12 = vmul.f32 0.03125, %v4168_v17  ;;  %v4223_v59 = vmul.f32 %v12742_v4, %v12742_v4 }
 0xf49   : > { %v12747_v58 = vsub.f32 %v12685_v49, %v4201_v14  ;;  %v12750_v16 = vsub.f32 %v12691_v41, %v4200_v12  ;;  %v4235_v7 = vsel %vm773_vm1, %v4223_v59, 0.0 }
 0xf4a   : > { %v4174_v45 = vpop.xlane.xlu0 %4173  ;;  %4236 = vadd.xlane.f32.xlu0 %v4235_v7 }
 0xf4b   : > { %v4202_v42 = vmul.f32 0.03125, %v4174_v45  ;;  %v4225_v55 = vmul.f32 %v12747_v58, %v12747_v58  ;;  %v4224_v3 = vmul.f32 %v12750_v16, %v12750_v16 }
 0xf4d   : > { %v12758_v38 = vsub.f32 %v12693_v54, %v4202_v42  ;;  %v4241_v60 = vsel %vm773_vm1, %v4225_v55, 0.0  ;;  %v4238_v32 = vsel %vm773_vm1, %v4224_v3, 0.0 }
 0xf4e   : > { %4242 = vadd.xlane.f32.xlu0 %v4241_v60  ;;  %4239 = vadd.xlane.f32.xlu1 %v4238_v32 }
 0xf4f   : > { %v4226_v33 = vmul.f32 %v12758_v38, %v12758_v38 }
 0xf51   : > { %v4244_v9 = vsel %vm773_vm1, %v4226_v33, 0.0 }
 0xf52   : > { %4245 = vadd.xlane.f32.xlu1 %v4244_v9 }
 0xf75   : > { %v4177_v56 = vpop.xlane.xlu0 %4176 }
 0xf76   : > { %v4203_v10 = vmul.f32 0.03125, %v4177_v56 }
 0xf78   : > { %v12772_v50 = vsub.f32 %v12703_v15, %v4203_v10 }
 0xf79   : > { %v4183_v44 = vpop.xlane.xlu0 %4182  ;;  %v4180_v62 = vpop.xlane.xlu1 %4179 }
 0xf7a   : > { %v4205_v30 = vmul.f32 0.03125, %v4183_v44  ;;  %v4204_v61 = vmul.f32 0.03125, %v4180_v62  ;;  %v4227_v35 = vmul.f32 %v12772_v50, %v12772_v50 }
 0xf7c   : > { %v12777_v22 = vsub.f32 %v12705_v5, %v4205_v30  ;;  %v12780_v23 = vsub.f32 %v12711_v2, %v4204_v61  ;;  %v4247_v47 = vsel %vm773_vm1, %v4227_v35, 0.0  ;;  %v14721_v30 = vld [vmem:[#allocation22_spill] sm:$0xff] }
 0xf7d   : > { %v4186_v11 = vpop.xlane.xlu1 %4185  ;;  %4248 = vadd.xlane.f32.xlu0 %v4247_v47  ;;  %v14668_v61 = vsub.s32 2, %v14721_v30 }
 0xf7e   : > { %v4206_v29 = vmul.f32 0.03125, %v4186_v11  ;;  %v4229_v51 = vmul.f32 %v12777_v22, %v12777_v22  ;;  %v4228_v26 = vmul.f32 %v12780_v23, %v12780_v23  ;;  %v11070_v11 = vld [vmem:[%s14607_s3] sm:$0xf] }
 0xf80   : > { %v12788_v1 = vsub.f32 %v12713_v34, %v4206_v29  ;;  %v4253_v0 = vsel %vm773_vm1, %v4229_v51, 0.0  ;;  %v4250_v57 = vsel %vm773_vm1, %v4228_v26, 0.0  ;;  %v12826_v29 = vrot.slane %v11070_v11, %v14668_v61 }
 0xf81   : > { %4254 = vadd.xlane.f32.xlu0 %v4253_v0  ;;  %v4189_v52 = vpop.xlane.xlu0 %4188  ;;  %4251 = vadd.xlane.f32.xlu1 %v4250_v57  ;;  %v14667_v51 = vsub.s32 3, %v14721_v30 }
 0xf82   : > { %v4207_v46 = vmul.f32 0.03125, %v4189_v52  ;;  %v4230_v21 = vmul.f32 %v12788_v1, %v12788_v1 }
 0xf84   : > { %v12795_v53 = vsub.f32 %v12723_v48, %v4207_v46  ;;  %v4256_v36 = vsel %vm773_vm1, %v4230_v21, 0.0 }
 0xf85   : > { %v4195_v43 = vpop.xlane.xlu0 %4194  ;;  %4257 = vadd.xlane.f32.xlu1 %v4256_v36  ;;  %v4192_v31 = vpop.xlane.xlu1 %4191 }
 0xf86   : > { %v4209_v63 = vmul.f32 0.03125, %v4195_v43  ;;  %v4208_v19 = vmul.f32 0.03125, %v4192_v31  ;;  %v4231_v18 = vmul.f32 %v12795_v53, %v12795_v53 }
 0xf88   : > { %v12801_v25 = vsub.f32 %v12725_v24, %v4209_v63  ;;  %v12804_v8 = vsub.f32 %v12731_v20, %v4208_v19  ;;  %v4259_v13 = vsel %vm773_vm1, %v4231_v18, 0.0 }
 0xf89   : > { %4260 = vadd.xlane.f32.xlu0 %v4259_v13  ;;  %v4198_v6 = vpop.xlane.xlu1 %4197 }
 0xf8a   : > { %v4210_v37 = vmul.f32 0.03125, %v4198_v6  ;;  %v4233_v17 = vmul.f32 %v12801_v25, %v12801_v25  ;;  %v4232_v14 = vmul.f32 %v12804_v8, %v12804_v8 }
 0xf8c   : > { %v12812_v12 = vsub.f32 %v12733_v40, %v4210_v37  ;;  %v4265_v59 = vsel %vm773_vm1, %v4233_v17, 0.0  ;;  %v4262_v7 = vsel %vm773_vm1, %v4232_v14, 0.0 }
 0xf8d   : > { %4266 = vadd.xlane.f32.xlu0 %v4265_v59  ;;  %4263 = vadd.xlane.f32.xlu1 %v4262_v7 }
 0xf8e   : > { %v4234_v45 = vmul.f32 %v12812_v12, %v12812_v12 }
 0xf90   : > { %v4268_v42 = vsel %vm773_vm1, %v4234_v45, 0.0 }
 0xf91   : > { %4269 = vadd.xlane.f32.xlu1 %v4268_v42 }
 0xfd3   : > { %v4237_v55 = vpop.xlane.xlu0 %4236 }
 0xfd4   : > { %v4271_v3 = vmul.f32 0.03125, %v4237_v55 }
 0xfd6   : > { %v4283_v60 = vadd.f32 1e-06, %v4271_v3 }
 0xfd7   : > { %v4243_v32 = vpop.xlane.xlu0 %4242  ;;  %v4240_v33 = vpop.xlane.xlu1 %4239 }
 0xfd8   : > { %10756 = vrsqrt.f32 %v4283_v60  ;;  %v4273_v9 = vmul.f32 0.03125, %v4243_v32  ;;  %v4272_v28 = vmul.f32 0.03125, %v4240_v33 }
 0xfda   : > { %v4285_v39 = vadd.f32 1e-06, %v4273_v9  ;;  %v4284_v56 = vadd.f32 1e-06, %v4272_v28 }
 0xfdb   : > { %v4246_v10 = vpop.xlane.xlu1 %4245 }
 0xfdc   : > { %10758 = vrsqrt.f32 %v4285_v39  ;;  %v4274_v44 = vmul.f32 0.03125, %v4246_v10 }
 0xfdd   : > { %10760 = vrsqrt.f32 %v4284_v56 }
 0xfde   : > { %v4286_v62 = vadd.f32 1e-06, %v4274_v44 }
 0xfe0   : > { %10762 = vrsqrt.f32 %v4286_v62 }
 0xfe5   : > { %v10757_v35 = vpop.eup %10756 }
 0xfe6   : > { %v4307_v47 = vmul.f32 %v10757_v35, %v12742_v4  ;;  %v12834_v4 = vrot.slane %v11070_v11, %v14667_v51 }
 0xfe8   : > { %v4323_v46 = vmul.f32 %v12826_v29, %v4307_v47 }
 0xfe9   : > { %v10759_v26 = vpop.eup %10758 }
 0xfea   : > { %v10761_v0 = vpop.eup %10760  ;;  %v4309_v57 = vmul.f32 %v10759_v26, %v12747_v58  ;;  %v4339_v63 = vadd.f32 %v12834_v4, %v4323_v46 }
 0xfeb   : > { %v4308_v52 = vmul.f32 %v10761_v0, %v12750_v16 }
 0xfec   : > { %v4325_v31 = vmul.f32 %v12826_v29, %v4309_v57 }
 0xfed   : > { %v10763_v21 = vpop.eup %10762  ;;  %v4324_v36 = vmul.f32 %v12826_v29, %v4308_v52 }
 0xfee   : > { %v4310_v43 = vmul.f32 %v10763_v21, %v12758_v38  ;;  %v4341_v18 = vadd.f32 %v12834_v4, %v4325_v31 }
 0xfef   : > { %v4340_v19 = vadd.f32 %v12834_v4, %v4324_v36 }
 0xff0   : > { %v4326_v58 = vmul.f32 %v12826_v29, %v4310_v43 }
 0xff1   : > { %v4351_v16 = vpack.c.bf16 %v4340_v19, %v4339_v63 }
 0xff2   : > { %v4342_v13 = vadd.f32 %v12834_v4, %v4326_v58 }
 0xff3   : > { %9790 = vmatprep.mubr.msk.bf16.mxu0 %vm773_vm1, %v4351_v16 }
 0xff4   : > { %v4352_v6 = vpack.c.bf16 %v4342_v13, %v4341_v18 }
 0xff6   : > { %9791 = vmatmul.mubr.msk.bf16.vlgmr.msra.gmra.mxu0 %vm773_vm1, %v4352_v6 }
0x1006   : > { %v4249_v37 = vpop.xlane.xlu0 %4248 }
0x1007   : > { %v4275_v38 = vmul.f32 0.03125, %v4249_v37 }
0x1009   : > { %v4287_v17 = vadd.f32 1e-06, %v4275_v38 }
0x100a   : > { %v4255_v14 = vpop.xlane.xlu0 %4254  ;;  %v4252_v59 = vpop.xlane.xlu1 %4251 }
0x100b   : > { %10764 = vrsqrt.f32 %v4287_v17  ;;  %v4277_v7 = vmul.f32 0.03125, %v4255_v14  ;;  %v4276_v45 = vmul.f32 0.03125, %v4252_v59 }
0x100d   : > { %v4289_v42 = vadd.f32 1e-06, %v4277_v7  ;;  %v4288_v55 = vadd.f32 1e-06, %v4276_v45 }
0x100e   : > { %v4258_v3 = vpop.xlane.xlu1 %4257 }
0x100f   : > { %10766 = vrsqrt.f32 %v4289_v42  ;;  %v4278_v60 = vmul.f32 0.03125, %v4258_v3 }
0x1010   : > { %10768 = vrsqrt.f32 %v4288_v55 }
0x1011   : > { %v4290_v32 = vadd.f32 1e-06, %v4278_v60 }
0x1012   : > { %v4261_v33 = vpop.xlane.xlu0 %4260 }
0x1013   : > { %10770 = vrsqrt.f32 %v4290_v32  ;;  %v4279_v9 = vmul.f32 0.03125, %v4261_v33 }
0x1015   : > { %v4291_v28 = vadd.f32 1e-06, %v4279_v9 }
0x1016   : > { %v4267_v39 = vpop.xlane.xlu0 %4266  ;;  %v4264_v56 = vpop.xlane.xlu1 %4263 }
0x1017   : > { %10772 = vrsqrt.f32 %v4291_v28  ;;  %v4281_v10 = vmul.f32 0.03125, %v4267_v39  ;;  %v4280_v44 = vmul.f32 0.03125, %v4264_v56  ;;  %v10527_v28 = vld [vmem:[%s14614_s10] sm:$0xff]  }
0x1018   : > { %v10765_v62 = vpop.eup %10764  ;;  %v12889_v39 = vld [vmem:[%s14613_s9] ss:$0 sm:$0xff] }
0x1019   : > { %v4293_v35 = vadd.f32 1e-06, %v4281_v10  ;;  %v4292_v47 = vadd.f32 1e-06, %v4280_v44  ;;  %v4311_v26 = vmul.f32 %v10765_v62, %v12772_v50 }
0x101a   : > { %v4270_v11 = vpop.xlane.xlu1 %4269 }
0x101b   : > { %10774 = vrsqrt.f32 %v4293_v35  ;;  %v4282_v0 = vmul.f32 0.03125, %v4270_v11  ;;  %v4327_v43 = vmul.f32 %v12826_v29, %v4311_v26 }
0x101c   : > { %v10767_v57 = vpop.eup %10766  ;;  %10776 = vrsqrt.f32 %v4292_v47 }
0x101d   : > { %v10769_v52 = vpop.eup %10768  ;;  %v4294_v46 = vadd.f32 1e-06, %v4282_v0  ;;  %v4313_v21 = vmul.f32 %v10767_v57, %v12777_v22  ;;  %v4343_v58 = vadd.f32 %v12834_v4, %v4327_v43 }
0x101e   : > { %v4312_v36 = vmul.f32 %v10769_v52, %v12780_v23 }
0x101f   : > { %10778 = vrsqrt.f32 %v4294_v46  ;;  %v4329_v50 = vmul.f32 %v12826_v29, %v4313_v21 }
0x1020   : > { %v10771_v31 = vpop.eup %10770  ;;  %v4328_v63 = vmul.f32 %v12826_v29, %v4312_v36 }
0x1021   : > { %v4314_v19 = vmul.f32 %v10771_v31, %v12788_v1  ;;  %v4345_v23 = vadd.f32 %v12834_v4, %v4329_v50 }
0x1022   : > { %v4344_v16 = vadd.f32 %v12834_v4, %v4328_v63 }
0x1023   : > { %v4330_v18 = vmul.f32 %v12826_v29, %v4314_v19 }
0x1024   : > { %v10773_v13 = vpop.eup %10772  ;;  %v4353_v22 = vpack.c.bf16 %v4344_v16, %v4343_v58 }
0x1025   : > { %v4346_v6 = vadd.f32 %v12834_v4, %v4330_v18  ;;  %v4315_v37 = vmul.f32 %v10773_v13, %v12795_v53 }
0x1026   : > { %9794 = vmatprep.mubr.msk.bf16.mxu0 %vm773_vm1, %v4353_v22 }
0x1027   : > { %v4354_v38 = vpack.c.bf16 %v4346_v6, %v4345_v23  ;;  %v4331_v7 = vmul.f32 %v12826_v29, %v4315_v37 }
0x1028   : > { %v10775_v1 = vpop.eup %10774 }
0x1029   : > { %v10777_v17 = vpop.eup %10776  ;;  %9795 = vmatmul.mubr.msk.bf16.gmra.mxu0 %vm773_vm1, %v4354_v38  ;;  %v4317_v14 = vmul.f32 %v10775_v1, %v12801_v25  ;;  %v4347_v53 = vadd.f32 %v12834_v4, %v4331_v7 }
0x102a   : > { %v4316_v59 = vmul.f32 %v10777_v17, %v12804_v8 }
0x102b   : > { %v4333_v3 = vmul.f32 %v12826_v29, %v4317_v14 }
0x102c   : > { %v10779_v45 = vpop.eup %10778  ;;  %v4332_v42 = vmul.f32 %v12826_v29, %v4316_v59 }
0x102d   : > { %v4318_v55 = vmul.f32 %v10779_v45, %v12812_v12  ;;  %v4349_v25 = vadd.f32 %v12834_v4, %v4333_v3  ;;  %v10524_v12 = vld [vmem:[%s14614_s10 + $0x18] sm:$0xff]  }
0x102e   : > { %v4348_v60 = vadd.f32 %v12834_v4, %v4332_v42  ;;  %9802 = vmatprep.subr.bf16.mxu1 %v10524_v12 }
0x102f   : > { %v4334_v32 = vmul.f32 %v12826_v29, %v4318_v55  ;;  %9803 = vmatpush3.bf16.msra.mxu1 %v10524_v12  ;;  %v10525_v29 = vld [vmem:[%s14614_s10 + $0x10] sm:$0xff]  }
0x1030   : > { %v4355_v33 = vpack.c.bf16 %v4348_v60, %v4347_v53  ;;  %9804 = vmatprep.subr.bf16.mxu1 %v10525_v29 }
0x1031   : > { %v4350_v8 = vadd.f32 %v12834_v4, %v4334_v32  ;;  %v10526_v4 = vld [vmem:[%s14614_s10 + $0x8] sm:$0xff]  }
0x1032   : > { %9798 = vmatprep.mubr.msk.bf16.mxu0 %vm773_vm1, %v4355_v33 }
0x1033   : > { %v4356_v9 = vpack.c.bf16 %v4350_v8, %v4349_v25  ;;  %9805 = vmatpush3.bf16.msra.mxu1 %v10525_v29 }
0x1034   : > { %9806 = vmatprep.subr.bf16.mxu1 %v10526_v4 }
0x1035   : > { %9799 = vmatmul.mubr.msk.bf16.gmra.mxu0 %vm773_vm1, %v4356_v9 }
0x1037   : > { %9807 = vmatpush3.bf16.msra.mxu1 %v10526_v4 }
0x1038   : > { %9808 = vmatprep.subr.bf16.mxu1 %v10527_v28 }
0x103b   : > { %9809 = vmatpush3.bf16.msra.mxu1 %v10527_v28 }
0x10b6   : > { %v9792_v56 = vpop.f32.mrf.mxu0 }
0x10b7   : > { %v4441_v10 = vadd.f32 %v9792_v56, %v12889_v39 }
0x10b8   : > { %v4432_v44 = vpop.f32.mrf.mxu0 }
0x10b9   : > { %v4493_v62 = vmul.f32 0.044715, %v4441_v10  ;;  %v4433_v35 = vadd.f32 %v12889_v39, %v4432_v44  ;;  %v4481_v32 = vmul.f32 0.5, %v4441_v10 }
0x10ba   : > { %v9793_v47 = vpop.f32.mrf.mxu0 }
0x10bb   : > { %v4505_v11 = vmul.f32 %v4493_v62, %v4441_v10  ;;  %v4491_v26 = vmul.f32 0.044715, %v4433_v35  ;;  %v4444_v0 = vadd.f32 %v9793_v47, %v12889_v39  ;;  %v4479_v3 = vmul.f32 0.5, %v4433_v35 }
0x10bc   : > { %v4435_v57 = vpop.f32.mrf.mxu0 }
0x10bd   : > { %v4517_v52 = vmul.f32 %v4505_v11, %v4441_v10  ;;  %v4503_v46 = vmul.f32 %v4491_v26, %v4433_v35  ;;  %v4494_v21 = vmul.f32 0.044715, %v4444_v0  ;;  %v4436_v36 = vadd.f32 %v12889_v39, %v4435_v57 }
0x10be   : > { %v4482_v55 = vmul.f32 0.5, %v4444_v0 }
0x10bf   : > { %v4529_v43 = vadd.f32 %v4517_v52, %v4441_v10  ;;  %v4515_v31 = vmul.f32 %v4503_v46, %v4433_v35  ;;  %v4506_v63 = vmul.f32 %v4494_v21, %v4444_v0  ;;  %v4492_v19 = vmul.f32 0.044715, %v4436_v36 }
0x10c0   : > { %v4480_v53 = vmul.f32 0.5, %v4436_v36 }
0x10c1   : > { %v4541_v50 = vmul.f32 0.7978846, %v4529_v43  ;;  %v4527_v58 = vadd.f32 %v4515_v31, %v4433_v35  ;;  %v4518_v16 = vmul.f32 %v4506_v63, %v4444_v0  ;;  %v4504_v18 = vmul.f32 %v4492_v19, %v4436_v36 }
0x10c3   : > { %v4539_v13 = vmul.f32 0.7978846, %v4527_v58  ;;  %v4530_v22 = vadd.f32 %v4518_v16, %v4444_v0  ;;  %v4516_v23 = vmul.f32 %v4504_v18, %v4436_v36  ;;  %10780 = vtanh.f32 %v4541_v50 }
0x10c5   : > { %v4542_v6 = vmul.f32 0.7978846, %v4530_v22  ;;  %10782 = vtanh.f32 %v4539_v13  ;;  %v4528_v37 = vadd.f32 %v4516_v23, %v4436_v36 }
0x10c7   : > { %10784 = vtanh.f32 %v4542_v6  ;;  %v4540_v38 = vmul.f32 0.7978846, %v4528_v37 }
0x10c9   : > { %10786 = vtanh.f32 %v4540_v38 }
0x10d0   : > { %v10781_v1 = vpop.eup %10780 }
0x10d1   : > { %v4565_v42 = vadd.f32 1.0, %v10781_v1 }
0x10d2   : > { %v10783_v17 = vpop.eup %10782 }
0x10d3   : > { %v4563_v7 = vadd.f32 1.0, %v10783_v17  ;;  %v4577_v9 = vmul.f32 %v4565_v42, %v4481_v32 }
0x10d4   : > { %v10785_v14 = vpop.eup %10784 }
0x10d5   : > { %v4566_v59 = vadd.f32 1.0, %v10785_v14  ;;  %v4575_v25 = vmul.f32 %v4563_v7, %v4479_v3 }
0x10d6   : > { %v10787_v45 = vpop.eup %10786 }
0x10d7   : > { %v4564_v60 = vadd.f32 1.0, %v10787_v45  ;;  %v4578_v33 = vmul.f32 %v4566_v59, %v4482_v55 }
0x10d9   : > { %v4576_v8 = vmul.f32 %v4564_v60, %v4480_v53  ;;  %v4588_v29 = vpack.c.bf16 %v4578_v33, %v4577_v9 }
0x10db   : > { %v4587_v12 = vpack.c.bf16 %v4576_v8, %v4575_v25 }
0x10dd   : > { %9810 = vmatprep.mubr.msk.bf16.mxu1 %vm672_vm0, %v4587_v12 }
0x10de   : > { %9811 = vmatmul.mubr.msk.bf16.vlgmr.msra.gmra.mxu1 %vm672_vm0, %v4588_v29 }
0x10e9   : > { %v9796_v4 = vpop.f32.mrf.mxu0 }
0x10ea   : > { %v12898_v28 = vadd.f32 %v9796_v4, %v12889_v39 }
0x10eb   : > { %v4448_v56 = vpop.f32.mrf.mxu0 }
0x10ec   : > { %v4497_v44 = vmul.f32 0.044715, %v12898_v28  ;;  %v12902_v62 = vadd.f32 %v12889_v39, %v4448_v56 }
0x10ed   : > { %v9797_v10 = vpop.f32.mrf.mxu0 }
0x10ee   : > { %v4509_v35 = vmul.f32 %v4497_v44, %v12898_v28  ;;  %v4495_v47 = vmul.f32 0.044715, %v12902_v62  ;;  %v4460_v11 = vadd.f32 %v9797_v10, %v12889_v39 }
0x10ef   : > { %v4451_v26 = vpop.f32.mrf.mxu0 }
0x10f0   : > { %v4521_v0 = vmul.f32 %v4509_v35, %v12898_v28  ;;  %v4507_v57 = vmul.f32 %v4495_v47, %v12902_v62  ;;  %v4498_v52 = vmul.f32 0.044715, %v4460_v11  ;;  %v4452_v46 = vadd.f32 %v12889_v39, %v4451_v26 }
0x10f2   : > { %v4533_v21 = vadd.f32 %v4521_v0, %v12898_v28  ;;  %v4519_v36 = vmul.f32 %v4507_v57, %v12902_v62  ;;  %v4510_v43 = vmul.f32 %v4498_v52, %v4460_v11  ;;  %v4496_v31 = vmul.f32 0.044715, %v4452_v46 }
0x10f4   : > { %v4531_v63 = vadd.f32 %v4519_v36, %v12902_v62  ;;  %v4522_v19 = vmul.f32 %v4510_v43, %v4460_v11  ;;  %v4508_v50 = vmul.f32 %v4496_v31, %v4452_v46  ;;  %v4545_v58 = vmul.f32 0.7978846, %v4533_v21 }
0x10f5   : > { %v9800_v16 = vpop.f32.mrf.mxu0  ;;  %v4486_v31 = vmul.f32 0.5, %v4460_v11 }
0x10f6   : > { %v4543_v18 = vmul.f32 0.7978846, %v4531_v63  ;;  %v4534_v13 = vadd.f32 %v4522_v19, %v4460_v11  ;;  %v4520_v22 = vmul.f32 %v4508_v50, %v4452_v46  ;;  %v12914_v23 = vadd.f32 %v9800_v16, %v12889_v39 }
0x10f7   : > { %v4464_v6 = vpop.f32.mrf.mxu0  ;;  %v4483_v19 = vmul.f32 0.5, %v12902_v62  ;;  %v4484_v50 = vmul.f32 0.5, %v4452_v46  ;;  %v4485_v16 = vmul.f32 0.5, %v12898_v28 }
0x10f8   : > { %10788 = vtanh.f32 %v4543_v18  ;;  %v4546_v37 = vmul.f32 0.7978846, %v4534_v13  ;;  %v4532_v38 = vadd.f32 %v4520_v22, %v4452_v46  ;;  %v4465_v1 = vadd.f32 %v12889_v39, %v4464_v6 }
0x10f9   : > { %10790 = vtanh.f32 %v4545_v58  ;;  %v4501_v17 = vmul.f32 0.044715, %v12914_v23  ;;  %v9801_v14 = vpop.f32.mrf.mxu0 }
0x10fa   : > { %10792 = vtanh.f32 %v4546_v37  ;;  %v4544_v59 = vmul.f32 0.7978846, %v4532_v38  ;;  %v4499_v7 = vmul.f32 0.044715, %v4465_v1  ;;  %v4476_v45 = vadd.f32 %v9801_v14, %v12889_v39 }
0x10fb   : > { %v4513_v42 = vmul.f32 %v4501_v17, %v12914_v23  ;;  %v4467_v55 = vpop.f32.mrf.mxu0 }
0x10fc   : > { %10794 = vtanh.f32 %v4544_v59  ;;  %v4511_v3 = vmul.f32 %v4499_v7, %v4465_v1  ;;  %v4502_v53 = vmul.f32 0.044715, %v4476_v45  ;;  %v4468_v60 = vadd.f32 %v12889_v39, %v4467_v55 }
0x10fd   : > { %v4525_v32 = vmul.f32 %v4513_v42, %v12914_v23  ;;  %v4490_v46 = vmul.f32 0.5, %v4476_v45  ;;  %v4487_v55 = vmul.f32 0.5, %v4465_v1 }
0x10fe   : > { %v4523_v33 = vmul.f32 %v4511_v3, %v4465_v1  ;;  %v4514_v25 = vmul.f32 %v4502_v53, %v4476_v45  ;;  %v4500_v8 = vmul.f32 0.044715, %v4468_v60  ;;  %v4488_v28 = vmul.f32 0.5, %v4468_v60 }
0x10ff   : > { %v4537_v9 = vadd.f32 %v4525_v32, %v12914_v23  ;;  %v4489_v53 = vmul.f32 0.5, %v12914_v23  ;;  %v9035_v23 = vld [vmem:[%s14615_s11] ss:$0 sm:$0xff] }
0x1100   : > { %v4535_v12 = vadd.f32 %v4523_v33, %v4465_v1  ;;  %v4526_v29 = vmul.f32 %v4514_v25, %v4476_v45  ;;  %v4512_v4 = vmul.f32 %v4500_v8, %v4468_v60 }
0x1101   : > { %v4549_v56 = vmul.f32 0.7978846, %v4537_v9 }
0x1102   : > { %v4547_v44 = vmul.f32 0.7978846, %v4535_v12  ;;  %v4538_v10 = vadd.f32 %v4526_v29, %v4476_v45  ;;  %v4524_v35 = vmul.f32 %v4512_v4, %v4468_v60 }
0x1104   : > { %10796 = vtanh.f32 %v4547_v44  ;;  %v4550_v47 = vmul.f32 0.7978846, %v4538_v10  ;;  %v4536_v26 = vadd.f32 %v4524_v35, %v4468_v60 }
0x1105   : > { %v10789_v0 = vpop.eup %10788  ;;  %10798 = vtanh.f32 %v4549_v56 }
0x1106   : > { %v10791_v39 = vpop.eup %10790  ;;  %10800 = vtanh.f32 %v4550_v47  ;;  %v4548_v57 = vmul.f32 0.7978846, %v4536_v26  ;;  %v4567_v21 = vadd.f32 1.0, %v10789_v0 }
0x1107   : > { %v10793_v52 = vpop.eup %10792  ;;  %v4569_v63 = vadd.f32 1.0, %v10791_v39 }
0x1108   : > { %10802 = vtanh.f32 %v4548_v57  ;;  %v4570_v36 = vadd.f32 1.0, %v10793_v52  ;;  %v4579_v13 = vmul.f32 %v4567_v21, %v4483_v19 }
0x1109   : > { %v10795_v43 = vpop.eup %10794  ;;  %v4581_v6 = vmul.f32 %v4569_v63, %v4485_v16 }
0x110a   : > { %v4568_v58 = vadd.f32 1.0, %v10795_v43  ;;  %v4582_v18 = vmul.f32 %v4570_v36, %v4486_v31 }
0x110c   : > { %v4580_v22 = vmul.f32 %v4568_v58, %v4484_v50  ;;  %v4590_v38 = vpack.c.bf16 %v4582_v18, %v4581_v6 }
0x110e   : > { %v4589_v37 = vpack.c.bf16 %v4580_v22, %v4579_v13 }
0x1110   : > { %9814 = vmatprep.mubr.msk.bf16.mxu1 %vm672_vm0, %v4589_v37 }
0x1111   : > { %v10797_v17 = vpop.eup %10796  ;;  %9815 = vmatmul.mubr.msk.bf16.gmra.mxu1 %vm672_vm0, %v4590_v38 }
0x1112   : > { %v10799_v14 = vpop.eup %10798  ;;  %v4571_v59 = vadd.f32 1.0, %v10797_v17 }
0x1113   : > { %v10801_v11 = vpop.eup %10800  ;;  %v4573_v42 = vadd.f32 1.0, %v10799_v14 }
0x1114   : > { %v4574_v7 = vadd.f32 1.0, %v10801_v11  ;;  %v4583_v33 = vmul.f32 %v4571_v59, %v4487_v55 }
0x1115   : > { %v10803_v62 = vpop.eup %10802  ;;  %v4585_v8 = vmul.f32 %v4573_v42, %v4489_v53 }
0x1116   : > { %v4572_v3 = vadd.f32 1.0, %v10803_v62  ;;  %v4586_v32 = vmul.f32 %v4574_v7, %v4490_v46 }
0x1118   : > { %v4584_v25 = vmul.f32 %v4572_v3, %v4488_v28  ;;  %v4592_v12 = vpack.c.bf16 %v4586_v32, %v4585_v8 }
0x111a   : > { %v4591_v9 = vpack.c.bf16 %v4584_v25, %v4583_v33 }
0x111c   : > { %9818 = vmatprep.mubr.msk.bf16.mxu1 %vm672_vm0, %v4591_v9 }
0x111d   : > { %9819 = vmatmul.mubr.msk.bf16.gmra.mxu1 %vm672_vm0, %v4592_v12 }
0x119e   : > { %v9812_v29 = vpop.f32.mrf.mxu1 }
0x119f   : > { %v4726_v45 = vadd.f32 %v9812_v29, %v12685_v49 }
0x11a0   : > { %v4677_v4 = vpop.f32.mrf.mxu1 }
0x11a1   : > { %v4724_v1 = vadd.f32 %v4677_v4, %v12683_v27  ;;  %v12937_v10 = vadd.f32 %v9035_v23, %v4726_v45 }
0x11a2   : > { %v9813_v60 = vpop.f32.mrf.mxu1 }
0x11a3   : > { %v12935_v56 = vadd.f32 %v9035_v23, %v4724_v1  ;;  %14723 = vst [vmem:[#allocation12_spill] sm:$0xff] %v12937_v10  ;;  %v4727_v35 = vadd.f32 %v9813_v60, %v12693_v54  ;;  %v4763_v0 = vsel %vm773_vm1, %v12937_v10, 0.0 }
0x11a4   : > { %v4680_v44 = vpop.f32.mrf.mxu1 }
0x11a5   : > { %14722 = vst [vmem:[#allocation26_spill] sm:$0xff] %v12935_v56  ;;  %v4725_v47 = vadd.f32 %v4680_v44, %v12691_v41  ;;  %v4757_v26 = vsel %vm773_vm1, %v12935_v56, 0.0  ;;  %v12945_v27 = vadd.f32 %v9035_v23, %v4727_v35 }
0x11a6   : > { %4758 = vadd.xlane.f32.xlu0 %v4757_v26  ;;  %v10529_v26 = vld [vmem:[%s14608_s4 + $0x10] sm:$0xff]  }
0x11a7   : > { %v12943_v49 = vadd.f32 %v9035_v23, %v4725_v47  ;;  %14725 = vst [vmem:[#allocation13_spill] sm:$0xff] %v12945_v27  ;;  %v4766_v54 = vsel %vm773_vm1, %v12945_v27, 0.0  ;;  %v10528_v47 = vld [vmem:[%s14608_s4 + $0x18] sm:$0xff]  }
0x11a8   : > { %9822 = vmatprep.subr.bf16.mxu0 %v10528_v47 }
0x11a9   : > { %14724 = vst [vmem:[#allocation10_spill] sm:$0xff] %v12943_v49  ;;  %v4760_v39 = vsel %vm773_vm1, %v12943_v49, 0.0  ;;  %9823 = vmatpush3.bf16.msra.mxu0 %v10528_v47 }
0x11aa   : > { %4764 = vadd.xlane.f32.xlu0 %v4763_v0  ;;  %4761 = vadd.xlane.f32.xlu1 %v4760_v39 }
0x11ab   : > { %9824 = vmatprep.subr.bf16.mxu0 %v10529_v26 }
0x11ad   : > { %9825 = vmatpush3.bf16.msra.mxu0 %v10529_v26 }
0x11ae   : > { %4767 = vadd.xlane.f32.xlu1 %v4766_v54 }
0x11d1   : > { %v9816_v41 = vpop.f32.mrf.mxu1 }
0x11d2   : > { %v4730_v52 = vadd.f32 %v9816_v41, %v12705_v5 }
0x11d3   : > { %v4693_v57 = vpop.f32.mrf.mxu1 }
0x11d4   : > { %v4728_v21 = vadd.f32 %v4693_v57, %v12703_v15  ;;  %v12957_v63 = vadd.f32 %v9035_v23, %v4730_v52 }
0x11d5   : > { %v9817_v36 = vpop.f32.mrf.mxu1 }
0x11d6   : > { %v12955_v43 = vadd.f32 %v9035_v23, %v4728_v21  ;;  %14727 = vst [vmem:[#allocation16_spill] sm:$0xff] %v12957_v63  ;;  %v4731_v19 = vadd.f32 %v9817_v36, %v12713_v34  ;;  %v4775_v15 = vsel %vm773_vm1, %v12957_v63, 0.0 }
0x11d7   : > { %v4696_v31 = vpop.f32.mrf.mxu1 }
0x11d8   : > { %14726 = vst [vmem:[#allocation11_spill] sm:$0xff] %v12955_v43  ;;  %v4729_v50 = vadd.f32 %v4696_v31, %v12711_v2  ;;  %v4769_v58 = vsel %vm773_vm1, %v12955_v43, 0.0  ;;  %v12965_v18 = vadd.f32 %v9035_v23, %v4731_v19 }
0x11d9   : > { %4770 = vadd.xlane.f32.xlu0 %v4769_v58 }
0x11da   : > { %v12963_v16 = vadd.f32 %v9035_v23, %v4729_v50  ;;  %14729 = vst [vmem:[#allocation17_spill] sm:$0xff] %v12965_v18  ;;  %v4778_v6 = vsel %vm773_vm1, %v12965_v18, 0.0 }
0x11dc   : > { %14728 = vst [vmem:[#allocation14_spill] sm:$0xff] %v12963_v16  ;;  %v4772_v5 = vsel %vm773_vm1, %v12963_v16, 0.0 }
0x11dd   : > { %4776 = vadd.xlane.f32.xlu0 %v4775_v15  ;;  %4773 = vadd.xlane.f32.xlu1 %v4772_v5  ;;  %v9820_v13 = vpop.f32.mrf.mxu1 }
0x11de   : > { %v4734_v2 = vadd.f32 %v9820_v13, %v12725_v24 }
0x11df   : > { %v4709_v34 = vpop.f32.mrf.mxu1 }
0x11e0   : > { %v4732_v22 = vadd.f32 %v4709_v34, %v12723_v48  ;;  %v12977_v14 = vadd.f32 %v9035_v23, %v4734_v2 }
0x11e1   : > { %4779 = vadd.xlane.f32.xlu1 %v4778_v6  ;;  %v9821_v37 = vpop.f32.mrf.mxu1 }
0x11e2   : > { %v12975_v38 = vadd.f32 %v9035_v23, %v4732_v22  ;;  %14731 = vst [vmem:[#allocation20_spill] sm:$0xff] %v12977_v14  ;;  %v4735_v11 = vadd.f32 %v9821_v37, %v12733_v40  ;;  %v4787_v62 = vsel %vm773_vm1, %v12977_v14, 0.0 }
0x11e3   : > { %v4712_v17 = vpop.f32.mrf.mxu1 }
0x11e4   : > { %14730 = vst [vmem:[#allocation15_spill] sm:$0xff] %v12975_v38  ;;  %v4733_v59 = vadd.f32 %v4712_v17, %v12731_v20  ;;  %v4781_v7 = vsel %vm773_vm1, %v12975_v38, 0.0  ;;  %v12985_v48 = vadd.f32 %v9035_v23, %v4735_v11 }
0x11e5   : > { %4782 = vadd.xlane.f32.xlu0 %v4781_v7 }
0x11e6   : > { %v12983_v24 = vadd.f32 %v9035_v23, %v4733_v59  ;;  %14733 = vst [vmem:[#allocation21_spill] sm:$0xff] %v12985_v48  ;;  %v4790_v40 = vsel %vm773_vm1, %v12985_v48, 0.0 }
0x11e8   : > { %14732 = vst [vmem:[#allocation18_spill] sm:$0xff] %v12983_v24  ;;  %v4784_v46 = vsel %vm773_vm1, %v12983_v24, 0.0 }
0x11e9   : > { %4788 = vadd.xlane.f32.xlu0 %v4787_v62  ;;  %4785 = vadd.xlane.f32.xlu1 %v4784_v46 }
0x11ed   : > { %4791 = vadd.xlane.f32.xlu1 %v4790_v40 }
0x122f   : > { %v4759_v20 = vpop.xlane.xlu0 %4758 }
0x1230   : > { %v4793_v42 = vmul.f32 0.03125, %v4759_v20 }
0x1232   : > { %v12994_v55 = vsub.f32 %v12935_v56, %v4793_v42 }
0x1233   : > { %v4765_v28 = vpop.xlane.xlu0 %4764  ;;  %v4762_v3 = vpop.xlane.xlu1 %4761 }
0x1234   : > { %v4795_v53 = vmul.f32 0.03125, %v4765_v28  ;;  %v4794_v32 = vmul.f32 0.03125, %v4762_v3  ;;  %v4817_v33 = vmul.f32 %v12994_v55, %v12994_v55 }
0x1236   : > { %v12999_v25 = vsub.f32 %v12937_v10, %v4795_v53  ;;  %v13002_v8 = vsub.f32 %v12943_v49, %v4794_v32  ;;  %v4829_v9 = vsel %vm773_vm1, %v4817_v33, 0.0 }
0x1237   : > { %4830 = vadd.xlane.f32.xlu0 %v4829_v9  ;;  %v4768_v12 = vpop.xlane.xlu1 %4767 }
0x1238   : > { %v4796_v29 = vmul.f32 0.03125, %v4768_v12  ;;  %v4819_v4 = vmul.f32 %v12999_v25, %v12999_v25  ;;  %v4818_v45 = vmul.f32 %v13002_v8, %v13002_v8 }
0x123a   : > { %v13010_v1 = vsub.f32 %v12945_v27, %v4796_v29  ;;  %v4835_v23 = vsel %vm773_vm1, %v4819_v4, 0.0  ;;  %v4832_v60 = vsel %vm773_vm1, %v4818_v45, 0.0 }
0x123b   : > { %4836 = vadd.xlane.f32.xlu0 %v4835_v23  ;;  %4833 = vadd.xlane.f32.xlu1 %v4832_v60 }
0x123c   : > { %v4820_v44 = vmul.f32 %v13010_v1, %v13010_v1 }
0x123e   : > { %v4838_v35 = vsel %vm773_vm1, %v4820_v44, 0.0 }
0x123f   : > { %4839 = vadd.xlane.f32.xlu1 %v4838_v35 }
0x1262   : > { %v4771_v0 = vpop.xlane.xlu0 %4770 }
0x1263   : > { %v4797_v39 = vmul.f32 0.03125, %v4771_v0 }
0x1265   : > { %v13024_v54 = vsub.f32 %v12955_v43, %v4797_v39 }
0x1266   : > { %v4777_v41 = vpop.xlane.xlu0 %4776  ;;  %v4774_v57 = vpop.xlane.xlu1 %4773 }
0x1267   : > { %v4799_v52 = vmul.f32 0.03125, %v4777_v41  ;;  %v4798_v21 = vmul.f32 0.03125, %v4774_v57  ;;  %v4821_v36 = vmul.f32 %v13024_v54, %v13024_v54 }
0x1269   : > { %v13029_v31 = vsub.f32 %v12957_v63, %v4799_v52  ;;  %v13032_v19 = vsub.f32 %v12963_v16, %v4798_v21  ;;  %v4841_v50 = vsel %vm773_vm1, %v4821_v36, 0.0 }
0x126a   : > { %4842 = vadd.xlane.f32.xlu0 %v4841_v50  ;;  %v4780_v58 = vpop.xlane.xlu1 %4779  ;;  %v9036_v50 = vld [vmem:[%s14607_s3 + $0x4] sm:$0xf] }
0x126b   : > { %v4800_v15 = vmul.f32 0.03125, %v4780_v58  ;;  %v4823_v5 = vmul.f32 %v13029_v31, %v13029_v31  ;;  %v4822_v13 = vmul.f32 %v13032_v19, %v13032_v19 }
0x126d   : > { %v13040_v34 = vsub.f32 %v12965_v18, %v4800_v15  ;;  %v4847_v2 = vsel %vm773_vm1, %v4823_v5, 0.0  ;;  %v4844_v22 = vsel %vm773_vm1, %v4822_v13, 0.0  ;;  %v14734_v15 = vld [vmem:[#allocation23_spill] sm:$0xff] }
0x126e   : > { %4848 = vadd.xlane.f32.xlu0 %v4847_v2  ;;  %v4783_v6 = vpop.xlane.xlu0 %4782  ;;  %4845 = vadd.xlane.f32.xlu1 %v4844_v22  ;;  %v13075_v5 = vrot.slane %v9036_v50, %v14734_v15 }
0x126f   : > { %v4801_v37 = vmul.f32 0.03125, %v4783_v6  ;;  %v4824_v17 = vmul.f32 %v13040_v34, %v13040_v34 }
0x1271   : > { %v13047_v11 = vsub.f32 %v12975_v38, %v4801_v37  ;;  %v4850_v59 = vsel %vm773_vm1, %v4824_v17, 0.0 }
0x1272   : > { %v4789_v7 = vpop.xlane.xlu0 %4788  ;;  %4851 = vadd.xlane.f32.xlu1 %v4850_v59  ;;  %v4786_v62 = vpop.xlane.xlu1 %4785  ;;  %v14735_v59 = vld [vmem:[#allocation24_spill] sm:$0xff] }
0x1273   : > { %v4803_v46 = vmul.f32 0.03125, %v4789_v7  ;;  %v4802_v40 = vmul.f32 0.03125, %v4786_v62  ;;  %v4825_v20 = vmul.f32 %v13047_v11, %v13047_v11  ;;  %v13082_v7 = vrot.slane %v9036_v50, %v14735_v59 }
0x1275   : > { %v13053_v42 = vsub.f32 %v12977_v14, %v4803_v46  ;;  %v13056_v28 = vsub.f32 %v12983_v24, %v4802_v40  ;;  %v4853_v3 = vsel %vm773_vm1, %v4825_v20, 0.0 }
0x1276   : > { %4854 = vadd.xlane.f32.xlu0 %v4853_v3  ;;  %v4792_v53 = vpop.xlane.xlu1 %4791 }
0x1277   : > { %v4804_v32 = vmul.f32 0.03125, %v4792_v53  ;;  %v4827_v33 = vmul.f32 %v13053_v42, %v13053_v42  ;;  %v4826_v9 = vmul.f32 %v13056_v28, %v13056_v28 }
0x1279   : > { %v13064_v12 = vsub.f32 %v12985_v48, %v4804_v32  ;;  %v4859_v29 = vsel %vm773_vm1, %v4827_v33, 0.0  ;;  %v4856_v4 = vsel %vm773_vm1, %v4826_v9, 0.0 }
0x127a   : > { %4860 = vadd.xlane.f32.xlu0 %v4859_v29  ;;  %4857 = vadd.xlane.f32.xlu1 %v4856_v4 }
0x127b   : > { %v4828_v45 = vmul.f32 %v13064_v12, %v13064_v12 }
0x127d   : > { %v4862_v23 = vsel %vm773_vm1, %v4828_v45, 0.0 }
0x127e   : > { %4863 = vadd.xlane.f32.xlu1 %v4862_v23 }
0x12c0   : > { %v4831_v60 = vpop.xlane.xlu0 %4830 }
0x12c1   : > { %v4865_v44 = vmul.f32 0.03125, %v4831_v60 }
0x12c3   : > { %v4877_v35 = vadd.f32 1e-06, %v4865_v44 }
0x12c4   : > { %v4837_v47 = vpop.xlane.xlu0 %4836  ;;  %v4834_v26 = vpop.xlane.xlu1 %4833 }
0x12c5   : > { %10804 = vrsqrt.f32 %v4877_v35  ;;  %v4867_v0 = vmul.f32 0.03125, %v4837_v47  ;;  %v4866_v39 = vmul.f32 0.03125, %v4834_v26 }
0x12c7   : > { %v4879_v41 = vadd.f32 1e-06, %v4867_v0  ;;  %v4878_v57 = vadd.f32 1e-06, %v4866_v39 }
0x12c8   : > { %v4840_v52 = vpop.xlane.xlu1 %4839 }
0x12c9   : > { %10806 = vrsqrt.f32 %v4879_v41  ;;  %v4868_v21 = vmul.f32 0.03125, %v4840_v52 }
0x12ca   : > { %10808 = vrsqrt.f32 %v4878_v57 }
0x12cb   : > { %v4880_v36 = vadd.f32 1e-06, %v4868_v21 }
0x12cd   : > { %10810 = vrsqrt.f32 %v4880_v36 }
0x12d2   : > { %v10805_v58 = vpop.eup %10804 }
0x12d3   : > { %v4901_v13 = vmul.f32 %v10805_v58, %v12994_v55 }
0x12d5   : > { %v4917_v17 = vmul.f32 %v13075_v5, %v4901_v13 }
0x12d6   : > { %v10807_v2 = vpop.eup %10806 }
0x12d7   : > { %v10809_v22 = vpop.eup %10808  ;;  %v4903_v6 = vmul.f32 %v10807_v2, %v12999_v25  ;;  %v4933_v55 = vadd.f32 %v13082_v7, %v4917_v17 }
0x12d8   : > { %v4902_v37 = vmul.f32 %v10809_v22, %v13002_v8 }
0x12d9   : > { %v4919_v40 = vmul.f32 %v13075_v5, %v4903_v6 }
0x12da   : > { %v10811_v62 = vpop.eup %10810  ;;  %v4918_v46 = vmul.f32 %v13075_v5, %v4902_v37 }
0x12db   : > { %v4904_v20 = vmul.f32 %v10811_v62, %v13010_v1  ;;  %v4935_v8 = vadd.f32 %v13082_v7, %v4919_v40 }
0x12dc   : > { %v4934_v3 = vadd.f32 %v13082_v7, %v4918_v46 }
0x12dd   : > { %v4920_v25 = vmul.f32 %v13075_v5, %v4904_v20 }
0x12de   : > { %v4945_v53 = vpack.c.bf16 %v4934_v3, %v4933_v55 }
0x12df   : > { %v4936_v32 = vadd.f32 %v13082_v7, %v4920_v25 }
0x12e0   : > { %9826 = vmatprep.mubr.msk.bf16.mxu0 %vm773_vm1, %v4945_v53 }
0x12e1   : > { %v4946_v33 = vpack.c.bf16 %v4936_v32, %v4935_v8 }
0x12e3   : > { %9827 = vmatmul.mubr.msk.bf16.vlgmr.msra.gmra.mxu0 %vm773_vm1, %v4946_v33 }
0x12f3   : > { %v4843_v9 = vpop.xlane.xlu0 %4842 }
0x12f4   : > { %v4869_v29 = vmul.f32 0.03125, %v4843_v9 }
0x12f6   : > { %v4881_v4 = vadd.f32 1e-06, %v4869_v29 }
0x12f7   : > { %v4849_v1 = vpop.xlane.xlu0 %4848  ;;  %v4846_v45 = vpop.xlane.xlu1 %4845 }
0x12f8   : > { %10812 = vrsqrt.f32 %v4881_v4  ;;  %v4871_v23 = vmul.f32 0.03125, %v4849_v1  ;;  %v4870_v60 = vmul.f32 0.03125, %v4846_v45 }
0x12fa   : > { %v4883_v44 = vadd.f32 1e-06, %v4871_v23  ;;  %v4882_v35 = vadd.f32 1e-06, %v4870_v60 }
0x12fb   : > { %v4852_v47 = vpop.xlane.xlu1 %4851 }
0x12fc   : > { %10814 = vrsqrt.f32 %v4883_v44  ;;  %v4872_v26 = vmul.f32 0.03125, %v4852_v47 }
0x12fd   : > { %10816 = vrsqrt.f32 %v4882_v35 }
0x12fe   : > { %v4884_v0 = vadd.f32 1e-06, %v4872_v26 }
0x12ff   : > { %v4855_v39 = vpop.xlane.xlu0 %4854 }
0x1300   : > { %10818 = vrsqrt.f32 %v4884_v0  ;;  %v4873_v41 = vmul.f32 0.03125, %v4855_v39 }
0x1302   : > { %v4885_v57 = vadd.f32 1e-06, %v4873_v41 }
0x1303   : > { %v4861_v52 = vpop.xlane.xlu0 %4860  ;;  %v4858_v21 = vpop.xlane.xlu1 %4857 }
0x1304   : > { %10820 = vrsqrt.f32 %v4885_v57  ;;  %v4875_v36 = vmul.f32 0.03125, %v4861_v52  ;;  %v4874_v50 = vmul.f32 0.03125, %v4858_v21 }
0x1305   : > { %v10813_v58 = vpop.eup %10812 }
0x1306   : > { %v4887_v13 = vadd.f32 1e-06, %v4875_v36  ;;  %v4886_v2 = vadd.f32 1e-06, %v4874_v50  ;;  %v4905_v6 = vmul.f32 %v10813_v58, %v13024_v54 }
0x1307   : > { %v4864_v22 = vpop.xlane.xlu1 %4863 }
0x1308   : > { %10822 = vrsqrt.f32 %v4887_v13  ;;  %v4876_v37 = vmul.f32 0.03125, %v4864_v22  ;;  %v4921_v55 = vmul.f32 %v13075_v5, %v4905_v6 }
0x1309   : > { %v10815_v17 = vpop.eup %10814  ;;  %10824 = vrsqrt.f32 %v4886_v2 }
0x130a   : > { %v10817_v62 = vpop.eup %10816  ;;  %v4888_v46 = vadd.f32 1e-06, %v4876_v37  ;;  %v4907_v40 = vmul.f32 %v10815_v17, %v13029_v31  ;;  %v4937_v8 = vadd.f32 %v13082_v7, %v4921_v55 }
0x130b   : > { %v4906_v20 = vmul.f32 %v10817_v62, %v13032_v19 }
0x130c   : > { %10826 = vrsqrt.f32 %v4888_v46  ;;  %v4923_v54 = vmul.f32 %v13075_v5, %v4907_v40 }
0x130d   : > { %v10819_v3 = vpop.eup %10818  ;;  %v4922_v25 = vmul.f32 %v13075_v5, %v4906_v20 }
0x130e   : > { %v4908_v53 = vmul.f32 %v10819_v3, %v13040_v34  ;;  %v4939_v19 = vadd.f32 %v13082_v7, %v4923_v54 }
0x130f   : > { %v4938_v32 = vadd.f32 %v13082_v7, %v4922_v25 }
0x1310   : > { %v4924_v33 = vmul.f32 %v13075_v5, %v4908_v53 }
0x1311   : > { %v10821_v9 = vpop.eup %10820  ;;  %v4947_v31 = vpack.c.bf16 %v4938_v32, %v4937_v8 }
0x1312   : > { %v4940_v29 = vadd.f32 %v13082_v7, %v4924_v33  ;;  %v4909_v4 = vmul.f32 %v10821_v9, %v13047_v11 }
0x1313   : > { %9830 = vmatprep.mubr.msk.bf16.mxu0 %vm773_vm1, %v4947_v31 }
0x1314   : > { %v4948_v1 = vpack.c.bf16 %v4940_v29, %v4939_v19  ;;  %v4925_v44 = vmul.f32 %v13075_v5, %v4909_v4 }
0x1315   : > { %v10823_v34 = vpop.eup %10822 }
0x1316   : > { %v10825_v45 = vpop.eup %10824  ;;  %9831 = vmatmul.mubr.msk.bf16.gmra.mxu0 %vm773_vm1, %v4948_v1  ;;  %v4911_v23 = vmul.f32 %v10823_v34, %v13053_v42  ;;  %v4941_v11 = vadd.f32 %v13082_v7, %v4925_v44 }
0x1317   : > { %v4910_v60 = vmul.f32 %v10825_v45, %v13056_v28 }
0x1318   : > { %v4927_v0 = vmul.f32 %v13075_v5, %v4911_v23 }
0x1319   : > { %v10827_v35 = vpop.eup %10826  ;;  %v4926_v47 = vmul.f32 %v13075_v5, %v4910_v60 }
0x131a   : > { %v4912_v26 = vmul.f32 %v10827_v35, %v13064_v12  ;;  %v4943_v42 = vadd.f32 %v13082_v7, %v4927_v0  ;;  %v9042_v12 = vld [vmem:[%s14609_s5 + $0x1] ss:$0 sm:$0xff] }
0x131b   : > { %v4942_v39 = vadd.f32 %v13082_v7, %v4926_v47 }
0x131c   : > { %v4928_v41 = vmul.f32 %v13075_v5, %v4912_v26 }
0x131d   : > { %v4949_v57 = vpack.c.bf16 %v4942_v39, %v4941_v11 }
0x131e   : > { %v4944_v28 = vadd.f32 %v13082_v7, %v4928_v41 }
0x131f   : > { %9834 = vmatprep.mubr.msk.bf16.mxu0 %vm773_vm1, %v4949_v57 }
0x1320   : > { %v4950_v52 = vpack.c.bf16 %v4944_v28, %v4943_v42 }
0x1322   : > { %9835 = vmatmul.mubr.msk.bf16.gmra.mxu0 %vm773_vm1, %v4950_v52 }
0x13a3   : > { %v9828_v21 = vpop.f32.mrf.mxu0 }
0x13a4   : > { %v5037_v36 = vadd.f32 %v9828_v21, %v9042_v12 }
0x13a5   : > { %v5028_v50 = vpop.f32.mrf.mxu0 }
0x13a6   : > { %v13125_v58 = vpack.c.bf16 %v5037_v36, %v5037_v36  ;;  %v5029_v7 = vadd.f32 %v9042_v12, %v5028_v50 }
0x13a7   : > { %v9829_v5 = vpop.f32.mrf.mxu0 }
0x13a8   : > { %5087 = vrot.lane.b32.xlu0 %v13125_v58, %s11135_s24  ;;  %v5040_v17 = vadd.f32 %v9829_v5, %v9042_v12 }
0x13a9   : > { %v5031_v13 = vpop.f32.mrf.mxu0 }
0x13aa   : > { %v5032_v2 = vadd.f32 %v9042_v12, %v5031_v13 }
0x13ac   : > { %v13129_v22 = vpack.c.bf16 %v5032_v2, %v5029_v7 }
0x13ae   : > { %5085 = vrot.lane.b32.xlu1 %v13129_v22, %s11135_s24  ;;  %9842 = vmatprep.mubr.msk.bf16.mxu1 %vm1105_vm2, %v13129_v22 }
0x13d6   : > { %v9832_v6 = vpop.f32.mrf.mxu0 }
0x13d7   : > { %v5053_v8 = vadd.f32 %v9832_v6, %v9042_v12 }
0x13d8   : > { %v5044_v37 = vpop.f32.mrf.mxu0 }
0x13d9   : > { %v5045_v62 = vadd.f32 %v9042_v12, %v5044_v37 }
0x13da   : > { %v9833_v46 = vpop.f32.mrf.mxu0 }
0x13db   : > { %v13135_v40 = vpack.c.bf16 %v5045_v62, %v5040_v17  ;;  %v5056_v53 = vadd.f32 %v9833_v46, %v9042_v12  ;;  %v14736_v46 = vld [vmem:[#allocation25_spill] sm:$0xff] }
0x13dc   : > { %v5047_v20 = vpop.f32.mrf.mxu0 }
0x13dd   : > { %v5048_v55 = vadd.f32 %v9042_v12, %v5047_v20  ;;  %9850 = vmatprep.mubr.msk.bf16.mxu0 %vm1105_vm2, %v13135_v40  ;;  %v13145_v9 = vpack.c.bf16 %v5056_v53, %v5053_v8 }
0x13df   : > { %v13139_v3 = vpack.c.bf16 %v5048_v55, %v5048_v55 }
0x13e1   : > { %5153 = vrot.lane.b32.xlu1 %v13139_v3, %s11135_s24 }
0x13e2   : > { %v9836_v25 = vpop.f32.mrf.mxu0 }
0x13e3   : > { %v5069_v4 = vadd.f32 %v9836_v25, %v9042_v12 }
0x13e4   : > { %v5060_v54 = vpop.f32.mrf.mxu0 }
0x13e5   : > { %v5061_v32 = vadd.f32 %v9042_v12, %v5060_v54  ;;  %5151 = vrot.lane.b32.xlu1 %v13135_v40, %s11135_s24 }
0x13e6   : > { %v9837_v33 = vpop.f32.mrf.mxu0 }
0x13e7   : > { %v13147_v31 = vpack.c.bf16 %v5061_v32, %v5061_v32  ;;  %v5072_v19 = vadd.f32 %v9837_v33, %v9042_v12 }
0x13e8   : > { %v5063_v29 = vpop.f32.mrf.mxu0 }
0x13e9   : > { %v5064_v1 = vadd.f32 %v9042_v12, %v5063_v29  ;;  %5217 = vrot.lane.b32.xlu1 %v13145_v9, %s11135_s24  ;;  %5219 = vrot.lane.b32.xlu0 %v13147_v31, %s11135_s24  ;;  %v13153_v34 = vpack.c.bf16 %v5072_v19, %v5072_v19 }
0x13eb   : > { %v13155_v45 = vpack.c.bf16 %v5069_v4, %v5064_v1 }
0x13ed   : > { %5283 = vrot.lane.b32.xlu1 %v13155_v45, %s11135_s24  ;;  %5285 = vrot.lane.b32.xlu0 %v13153_v34, %s11135_s24  ;;  %s14737_s24 = smov 120  }
0x13f1   : > { %5511 = vrot.lane.b32.xlu1 %v13129_v22, %s11136_s29  ;;  %5513 = vrot.lane.b32.xlu0 %v13125_v58, %s11136_s29 }
0x13f5   : > { %5575 = vrot.lane.b32.xlu1 %v13139_v3, %s11136_s29  ;;  %5573 = vrot.lane.b32.xlu0 %v13135_v40, %s11136_s29 }
0x13f9   : > { %5637 = vrot.lane.b32.xlu1 %v13147_v31, %s11136_s29 }
0x13fd   : > { %5635 = vrot.lane.b32.xlu1 %v13145_v9, %s11136_s29 }
0x141a   : > { %v5088_v23 = vpop.permute.xlu0 %5087 }
0x141b   : > { %10202 = vmatprep.subr.msk.bf16.mxu1 %vm1105_vm2, %v5088_v23  ;;  %v5099_v60 = vsel %vm1105_vm2, %v5088_v23, 0 }
0x141c   : > { %9839 = vmatpush3.bf16.xpose.msra.mxu1 %v5099_v60 }
0x1420   : > { %v5086_v44 = vpop.permute.xlu1 %5085 }
0x1421   : > { %10203 = vmatprep.subr.msk.bf16.mxu1 %vm1105_vm2, %v5086_v44  ;;  %v5096_v35 = vsel %vm1105_vm2, %v5086_v44, 0 }
0x1424   : > { %9841 = vmatpush3.bf16.xpose.msra.mxu1 %v5096_v35 }
0x142b   : > { %9843 = vmatmul.mubr.msk.bf16.vlgmr.msra.gmra.mxu1 %vm1105_vm2, %v13125_v58 }
0x142c   : > { %9858 = vmatprep.mubr.msk.bf16.mxu1 %vm1105_vm2, %v13145_v9 }
0x1453   : > { %v5154_v47 = vpop.permute.xlu1 %5153 }
0x1454   : > { %10204 = vmatprep.subr.msk.bf16.mxu0 %vm1105_vm2, %v5154_v47  ;;  %v5165_v26 = vsel %vm1105_vm2, %v5154_v47, 0 }
0x1455   : > { %9847 = vmatpush3.bf16.xpose.msra.mxu0 %v5165_v26 }
0x1457   : > { %v5152_v0 = vpop.permute.xlu1 %5151 }
0x1458   : > { %10205 = vmatprep.subr.msk.bf16.mxu0 %vm1105_vm2, %v5152_v0  ;;  %v5162_v41 = vsel %vm1105_vm2, %v5152_v0, 0 }
0x145b   : > { %v5220_v11 = vpop.permute.xlu0 %5219  ;;  %v5218_v39 = vpop.permute.xlu1 %5217 }
0x145c   : > { %10206 = vmatprep.subr.msk.bf16.mxu1 %vm1105_vm2, %v5220_v11  ;;  %v5231_v57 = vsel %vm1105_vm2, %v5220_v11, 0  ;;  %v5228_v52 = vsel %vm1105_vm2, %v5218_v39, 0 }
0x145d   : > { %9849 = vmatpush3.bf16.xpose.msra.mxu0 %v5162_v41  ;;  %9855 = vmatpush3.bf16.xpose.msra.mxu1 %v5231_v57 }
0x145e   : > { %10207 = vmatprep.subr.msk.bf16.mxu1 %vm1105_vm2, %v5218_v39 }
0x145f   : > { %v5286_v42 = vpop.permute.xlu0 %5285  ;;  %v5284_v28 = vpop.permute.xlu1 %5283 }
0x1460   : > { %10208 = vmatprep.subr.msk.bf16.mxu0 %vm1105_vm2, %v5286_v42  ;;  %v5297_v12 = vsel %vm1105_vm2, %v5286_v42, 0  ;;  %v5294_v5 = vsel %vm1105_vm2, %v5284_v28, 0 }
0x1463   : > { %v5512_v21 = vpop.permute.xlu1 %5511  ;;  %v5514_v36 = vpop.permute.xlu0 %5513 }
0x1464   : > { %9851 = vmatmul.mubr.msk.bf16.vlgmr.msra.gmra.mxu0 %vm1105_vm2, %v13139_v3  ;;  %v5523_v13 = vsel %vm1540_vm3, %v5514_v36, 0 }
0x1465   : > { %9857 = vmatpush3.bf16.xpose.msra.mxu1 %v5228_v52  ;;  %9863 = vmatpush3.bf16.xpose.msra.mxu0 %v5297_v12 }
0x1466   : > { %9866 = vmatprep.mubr.msk.bf16.mxu0 %vm1105_vm2, %v13155_v45  ;;  %10209 = vmatprep.subr.msk.bf16.mxu0 %vm1105_vm2, %v5284_v28 }
0x1467   : > { %10210 = vmatprep.subr.msk.bf16.mxu1 %vm1540_vm3, %v5514_v36  ;;  %v5576_v50 = vpop.permute.xlu1 %5575  ;;  %v5574_v6 = vpop.permute.xlu0 %5573 }
0x1468   : > { %v5585_v2 = vsel %vm1540_vm3, %v5576_v50, 0 }
0x146b   : > { %v13202_v7 = vpop.permute.xlu1 %5637 }
0x146c   : > { %9859 = vmatmul.mubr.msk.bf16.vlgmr.msra.gmra.mxu1 %vm1105_vm2, %v13147_v31 }
0x146d   : > { %9865 = vmatpush3.bf16.xpose.msra.mxu0 %v5294_v5  ;;  %9871 = vmatpush3.bf16.msra.mxu1 %v5523_v13 }
0x146e   : > { %9872 = vmatprep.subr.bf16.mxu1 %v5512_v21  ;;  %10211 = vmatprep.subr.msk.bf16.mxu0 %vm1540_vm3, %v5576_v50 }
0x1471   : > { %9873 = vmatpush3.bf16.msra.mxu1 %v5512_v21 }
0x1472   : > { %10212 = vmatprep.subr.msk.bf16.mxu1 %vm1540_vm3, %v13202_v7 }
0x1474   : > { %9867 = vmatmul.mubr.msk.bf16.vlgmr.msra.gmra.mxu0 %vm1105_vm2, %v13153_v34 }
0x1475   : > { %9879 = vmatpush3.bf16.msra.mxu0 %v5585_v2 }
0x1476   : > { %9880 = vmatprep.subr.bf16.mxu0 %v5574_v6 }
0x1479   : > { %9881 = vmatpush3.bf16.msra.mxu0 %v5574_v6 }
0x14eb   : > { %v9844_v37 = vpop.f32.mrf.mxu1 }
0x14ec   : > { %v5349_v17 = vmul.f32 0.35355338, %v9844_v37 }
0x14ed   : > { %v5135_v62 = vpop.f32.mrf.mxu1 }
0x14ee   : > { %v13210_v20 = vadd.f32 %v5349_v17, %v14736_v46  ;;  %v5347_v55 = vmul.f32 0.35355338, %v5135_v62 }
0x14ef   : > { %v9845_v25 = vpop.f32.mrf.mxu1 }
0x14f0   : > { %v13213_v53 = vadd.f32 %v5347_v55, %v14736_v46  ;;  %v5377_v54 = vsel %vm1388_vm5, %v13210_v20, -inf }
0x14f1   : > { %5378 = vmax.xlane.f32.xlu0 %v5377_v54  ;;  %v5138_v8 = vpop.f32.mrf.mxu1 }
0x14f2   : > { %v5348_v32 = vmul.f32 0.35355338, %v5138_v8  ;;  %v5371_v19 = vsel %vm1388_vm5, %v13213_v53, -inf }
0x14f4   : > { %v13218_v33 = vadd.f32 %v5348_v32, %v14736_v46 }
0x14f5   : > { %5372 = vmax.xlane.f32.xlu0 %v5371_v19 }
0x14f6   : > { %v5374_v29 = vsel %vm1388_vm5, %v13218_v33, -inf }
0x14f7   : > { %5375 = vmax.xlane.f32.xlu1 %v5374_v29 }
0x1524   : > { %v9852_v4 = vpop.f32.mrf.mxu0 }
0x1525   : > { %v5352_v1 = vmul.f32 0.35355338, %v9852_v4 }
0x1526   : > { %v5201_v23 = vpop.f32.mrf.mxu0 }
0x1527   : > { %v13225_v60 = vadd.f32 %v5352_v1, %v14736_v46  ;;  %v5350_v44 = vmul.f32 0.35355338, %v5201_v23 }
0x1528   : > { %v9853_v35 = vpop.f32.mrf.mxu0 }
0x1529   : > { %v13228_v47 = vadd.f32 %v5350_v44, %v14736_v46  ;;  %v5386_v26 = vsel %vm1388_vm5, %v13225_v60, -inf }
0x152a   : > { %5387 = vmax.xlane.f32.xlu1 %v5386_v26  ;;  %v5204_v0 = vpop.f32.mrf.mxu0 }
0x152b   : > { %v5351_v11 = vmul.f32 0.35355338, %v5204_v0  ;;  %v5380_v39 = vsel %vm1388_vm5, %v13228_v47, -inf }
0x152c   : > { %5381 = vmax.xlane.f32.xlu0 %v5380_v39  ;;  %v9860_v41 = vpop.f32.mrf.mxu1 }
0x152d   : > { %v13235_v57 = vadd.f32 %v5351_v11, %v14736_v46  ;;  %v5355_v42 = vmul.f32 0.35355338, %v9860_v41  ;;  %v13274_v11 = vpop.permute.xlu1 %5635 }
0x152e   : > { %v5267_v28 = vpop.f32.mrf.mxu1 }
0x152f   : > { %v13238_v52 = vadd.f32 %v5355_v42, %v14736_v46  ;;  %v5353_v12 = vmul.f32 0.35355338, %v5267_v28  ;;  %v5383_v21 = vsel %vm1388_vm5, %v13235_v57, -inf }
0x1530   : > { %5384 = vmax.xlane.f32.xlu0 %v5383_v21  ;;  %v9861_v36 = vpop.f32.mrf.mxu1 }
0x1531   : > { %v13243_v50 = vadd.f32 %v5353_v12, %v14736_v46  ;;  %v5395_v2 = vsel %vm1388_vm5, %v13238_v52, -inf }
0x1532   : > { %v5270_v5 = vpop.f32.mrf.mxu1 }
0x1533   : > { %v5354_v13 = vmul.f32 0.35355338, %v5270_v5  ;;  %v5389_v6 = vsel %vm1388_vm5, %v13243_v50, -inf }
0x1534   : > { %5396 = vmax.xlane.f32.xlu0 %v5395_v2  ;;  %5390 = vmax.xlane.f32.xlu1 %v5389_v6  ;;  %v9868_v37 = vpop.f32.mrf.mxu0 }
0x1535   : > { %v13250_v17 = vadd.f32 %v5354_v13, %v14736_v46  ;;  %v5358_v62 = vmul.f32 0.35355338, %v9868_v37 }
0x1536   : > { %v5333_v55 = vpop.f32.mrf.mxu0 }
0x1537   : > { %v13253_v25 = vadd.f32 %v5358_v62, %v14736_v46  ;;  %v5356_v54 = vmul.f32 0.35355338, %v5333_v55  ;;  %v5392_v8 = vsel %vm1388_vm5, %v13250_v17, -inf }
0x1538   : > { %5393 = vmax.xlane.f32.xlu0 %v5392_v8  ;;  %v9869_v32 = vpop.f32.mrf.mxu0 }
0x1539   : > { %v13258_v19 = vadd.f32 %v5356_v54, %v14736_v46  ;;  %v5404_v29 = vsel %vm1388_vm5, %v13253_v25, -inf }
0x153a   : > { %5405 = vmax.xlane.f32.xlu1 %v5404_v29  ;;  %v5336_v4 = vpop.f32.mrf.mxu0 }
0x153b   : > { %v5357_v1 = vmul.f32 0.35355338, %v5336_v4  ;;  %v5398_v44 = vsel %vm1388_vm5, %v13258_v19, -inf }
0x153d   : > { %v13263_v23 = vadd.f32 %v5357_v1, %v14736_v46 }
0x153e   : > { %5399 = vmax.xlane.f32.xlu1 %v5398_v44 }
0x153f   : > { %v5401_v35 = vsel %vm1388_vm5, %v13263_v23, -inf }
0x1540   : > { %5402 = vmax.xlane.f32.xlu0 %v5401_v35 }
0x154f   : > { %5765 = vrot.lane.b32.xlu1 %v13125_v58, %s11138_s26 }
0x1556   : > { %5699 = vrot.lane.b32.xlu0 %v13153_v34, %s11136_s29 }
0x157a   : > { %v5379_v26 = vpop.xlane.xlu0 %5378 }
0x157b   : > { %v5409_v0 = vsub.f32 %v13210_v20, %v5379_v26 }
0x157d   : > { %v5423_v39 = vmul.f32 1.442695, %v5409_v0 }
0x157e   : > { %v5373_v41 = vpop.xlane.xlu0 %5372 }
0x157f   : > { %10828 = vpow2.f32 %v5423_v39  ;;  %v5407_v42 = vsub.f32 %v13213_v53, %v5373_v41 }
0x1580   : > { %v5376_v28 = vpop.xlane.xlu1 %5375 }
0x1581   : > { %v5419_v12 = vmul.f32 1.442695, %v5407_v42  ;;  %v5408_v21 = vsub.f32 %v13218_v33, %v5376_v28 }
0x1583   : > { %10830 = vpow2.f32 %v5419_v12  ;;  %v5421_v36 = vmul.f32 1.442695, %v5408_v21 }
0x1585   : > { %10832 = vpow2.f32 %v5421_v36 }
0x158c   : > { %v13278_v5 = vpop.eup %10828 }
0x158d   : > { %v5449_v13 = vsel %vm1388_vm5, %v13278_v5, 0.0 }
0x158e   : > { %5450 = vadd.xlane.f32.xlu0 %v5449_v13 }
0x1590   : > { %v13282_v20 = vpop.eup %10830 }
0x1591   : > { %v5443_v2 = vsel %vm1388_vm5, %v13282_v20, 0.0 }
0x1592   : > { %v13286_v6 = vpop.eup %10832  ;;  %5444 = vadd.xlane.f32.xlu0 %v5443_v2 }
0x1593   : > { %v5446_v53 = vsel %vm1388_vm5, %v13286_v6, 0.0 }
0x1594   : > { %5447 = vadd.xlane.f32.xlu1 %v5446_v53 }
0x15b3   : > { %v5388_v33 = vpop.xlane.xlu1 %5387 }
0x15b4   : > { %v5412_v37 = vsub.f32 %v13225_v60, %v5388_v33 }
0x15b5   : > { %v5382_v62 = vpop.xlane.xlu0 %5381 }
0x15b6   : > { %v5429_v55 = vmul.f32 1.442695, %v5412_v37  ;;  %v5410_v54 = vsub.f32 %v13228_v47, %v5382_v62 }
0x15b8   : > { %10834 = vpow2.f32 %v5429_v55  ;;  %v5425_v8 = vmul.f32 1.442695, %v5410_v54 }
0x15b9   : > { %v5385_v32 = vpop.xlane.xlu0 %5384 }
0x15ba   : > { %10836 = vpow2.f32 %v5425_v8  ;;  %v5411_v29 = vsub.f32 %v13235_v57, %v5385_v32 }
0x15bc   : > { %v5427_v4 = vmul.f32 1.442695, %v5411_v29 }
0x15bd   : > { %v5397_v1 = vpop.xlane.xlu0 %5396  ;;  %v5391_v44 = vpop.xlane.xlu1 %5390 }
0x15be   : > { %10838 = vpow2.f32 %v5427_v4  ;;  %v5415_v35 = vsub.f32 %v13238_v52, %v5397_v1  ;;  %v5413_v26 = vsub.f32 %v13243_v50, %v5391_v44 }
0x15c0   : > { %v5435_v0 = vmul.f32 1.442695, %v5415_v35  ;;  %v5431_v60 = vmul.f32 1.442695, %v5413_v26 }
0x15c1   : > { %v5394_v39 = vpop.xlane.xlu0 %5393 }
0x15c2   : > { %10840 = vpow2.f32 %v5435_v0  ;;  %v5414_v47 = vsub.f32 %v13250_v17, %v5394_v39 }
0x15c3   : > { %10842 = vpow2.f32 %v5431_v60  ;;  %v5406_v62 = vpop.xlane.xlu1 %5405 }
0x15c4   : > { %v5433_v41 = vmul.f32 1.442695, %v5414_v47  ;;  %v5418_v55 = vsub.f32 %v13253_v25, %v5406_v62 }
0x15c5   : > { %v13296_v42 = vpop.eup %10834 }
0x15c6   : > { %10844 = vpow2.f32 %v5433_v41  ;;  %v5458_v57 = vsel %vm1388_vm5, %v13296_v42, 0.0  ;;  %v5441_v32 = vmul.f32 1.442695, %v5418_v55 }
0x15c7   : > { %v13300_v28 = vpop.eup %10836  ;;  %5459 = vadd.xlane.f32.xlu1 %v5458_v57  ;;  %v5400_v54 = vpop.xlane.xlu1 %5399 }
0x15c8   : > { %v5452_v50 = vsel %vm1388_vm5, %v13300_v28, 0.0  ;;  %v5416_v29 = vsub.f32 %v13258_v19, %v5400_v54  ;;  %10846 = vpow2.f32 %v5441_v32 }
0x15c9   : > { %v5403_v52 = vpop.xlane.xlu0 %5402 }
0x15ca   : > { %v5417_v8 = vsub.f32 %v13263_v23, %v5403_v52  ;;  %v5437_v1 = vmul.f32 1.442695, %v5416_v29 }
0x15cb   : > { %v13304_v12 = vpop.eup %10838  ;;  %5453 = vadd.xlane.f32.xlu1 %v5452_v50  ;;  %v13343_v60 = vpop.permute.xlu1 %5765 }
0x15cc   : > { %v5455_v17 = vsel %vm1388_vm5, %v13304_v12, 0.0  ;;  %v5439_v4 = vmul.f32 1.442695, %v5417_v8 }
0x15cd   : > { %5456 = vadd.xlane.f32.xlu0 %v5455_v17  ;;  %v13308_v21 = vpop.permute.xlu0 %5699 }
0x15ce   : > { %10213 = vmatprep.subr.msk.bf16.mxu0 %vm1540_vm3, %v13308_v21  ;;  %10848 = vpow2.f32 %v5439_v4 }
0x15cf   : > { %v13312_v36 = vpop.eup %10840  ;;  %10850 = vpow2.f32 %v5437_v1 }
0x15d0   : > { %v13314_v13 = vpop.eup %10842  ;;  %v5467_v2 = vsel %vm1388_vm5, %v13312_v36, 0.0 }
0x15d1   : > { %5468 = vadd.xlane.f32.xlu0 %v5467_v2  ;;  %v5461_v53 = vsel %vm1388_vm5, %v13314_v13, 0.0 }
0x15d2   : > { %5462 = vadd.xlane.f32.xlu1 %v5461_v53 }
0x15d3   : > { %v13320_v33 = vpop.eup %10844 }
0x15d4   : > { %v5464_v37 = vsel %vm1388_vm5, %v13320_v33, 0.0 }
0x15d5   : > { %5465 = vadd.xlane.f32.xlu0 %v5464_v37  ;;  %v13331_v44 = vpop.eup %10846 }
0x15d6   : > { %v5476_v26 = vsel %vm1388_vm5, %v13331_v44, 0.0 }
0x15db   : > { %v13333_v35 = vpop.eup %10848 }
0x15dc   : > { %v13337_v0 = vpop.eup %10850  ;;  %v5473_v25 = vsel %vm1388_vm5, %v13333_v35, 0.0 }
0x15dd   : > { %v5470_v19 = vsel %vm1388_vm5, %v13337_v0, 0.0 }
0x15e3   : > { %5763 = vrot.lane.b32.xlu1 %v13129_v22, %s11138_s26 }
0x15eb   : > { %5697 = vrot.lane.b32.xlu0 %v13155_v45, %s11136_s29  ;;  %s14738_s29 = smov 56  }
0x1607   : > { %5477 = vadd.xlane.f32.xlu1 %v5476_v26 }
0x160a   : > { %5474 = vadd.xlane.f32.xlu0 %v5473_v25 }
0x160b   : > { %5471 = vadd.xlane.f32.xlu1 %v5470_v19 }
0x1617   : > { %v5451_v23 = vpop.xlane.xlu0 %5450 }
0x1618   : > { %10852 = vrcp.f32 %v5451_v23 }
0x161b   : > { %v5445_v39 = vpop.xlane.xlu0 %5444 }
0x161c   : > { %10854 = vrcp.f32 %v5445_v39  ;;  %5759 = vrot.lane.b32.xlu1 %v13129_v22, %s14737_s24  ;;  %v5709_v39 = vsel %vm1540_vm3, %v13308_v21, 0  ;;  %v5777_v21 = vsel %vm1105_vm2, %v13343_v60, 0 }
0x161d   : > { %v5448_v47 = vpop.xlane.xlu1 %5447 }
0x161e   : > { %10856 = vrcp.f32 %v5448_v47 }
0x1620   : > { %5901 = vrot.lane.b32.xlu1 %v13147_v31, %s11138_s26  ;;  %5833 = vrot.lane.b32.xlu0 %v13139_v3, %s11138_s26 }
0x1624   : > { %5827 = vrot.lane.b32.xlu1 %v13135_v40, %s14737_s24  ;;  %5831 = vrot.lane.b32.xlu0 %v13135_v40, %s11138_s26 }
0x1625   : > { %v10853_v41 = vpop.eup %10852 }
0x1626   : > { %v5493_v50 = vmul.f32 %v10853_v41, %v13278_v5  ;;  %v5647_v5 = vsel %vm1540_vm3, %v13202_v7, 0 }
0x1628   : > { %5969 = vrot.lane.b32.xlu1 %v13153_v34, %s11138_s26  ;;  %5761 = vrot.lane.b32.xlu0 %v13125_v58, %s14737_s24  ;;  %v5504_v37 = vpack.c.bf16 %v5493_v50, %v5493_v50 }
0x1629   : > { %v10855_v57 = vpop.eup %10854 }
0x162a   : > { %v5491_v17 = vmul.f32 %v10855_v57, %v13282_v20 }
0x162b   : > { %v10857_v52 = vpop.eup %10856 }
0x162c   : > { %5895 = vrot.lane.b32.xlu1 %v13145_v9, %s14737_s24  ;;  %5899 = vrot.lane.b32.xlu0 %v13145_v9, %s11138_s26  ;;  %v5492_v2 = vmul.f32 %v10857_v52, %v13286_v6 }
0x162e   : > { %v5503_v53 = vpack.c.bf16 %v5492_v2, %v5491_v17 }
0x1630   : > { %5967 = vrot.lane.b32.xlu1 %v13155_v45, %s11138_s26  ;;  %5829 = vrot.lane.b32.xlu0 %v13139_v3, %s14737_s24  ;;  %s14740_s26 = smov 80  }
0x1631   : > { %9874 = vmatprep.mubr.msk.bf16.mxu1 %vm1388_vm5, %v5503_v53 }
0x1632   : > { %9875 = vmatmul.mubr.msk.bf16.vlgmr.msra.gmra.mxu1 %vm1388_vm5, %v5504_v37 }
0x1633   : > { %9887 = vmatpush3.bf16.msra.mxu1 %v5647_v5 }
0x1634   : > { %9888 = vmatprep.subr.bf16.mxu1 %v13274_v11  ;;  %5965 = vrot.lane.b32.xlu1 %v13153_v34, %s14737_s24 }
0x1635   : > { %5897 = vrot.lane.b32.xlu0 %v13147_v31, %s14737_s24 }
0x1637   : > { %9889 = vmatpush3.bf16.msra.mxu1 %v13274_v11 }
0x1638   : > { %10214 = vmatprep.subr.msk.bf16.mxu1 %vm1105_vm2, %v13343_v60  ;;  %6195 = vrot.lane.b32.xlu1 %v13129_v22, %s14738_s29 }
0x1639   : > { %5963 = vrot.lane.b32.xlu0 %v13155_v45, %s14737_s24 }
0x163c   : > { %6259 = vrot.lane.b32.xlu1 %v13139_v3, %s14738_s29 }
0x163d   : > { %6197 = vrot.lane.b32.xlu0 %v13125_v58, %s14738_s29 }
0x1640   : > { %6321 = vrot.lane.b32.xlu1 %v13147_v31, %s14738_s29 }
0x1641   : > { %6257 = vrot.lane.b32.xlu0 %v13135_v40, %s14738_s29 }
0x1644   : > { %6319 = vrot.lane.b32.xlu1 %v13145_v9, %s14738_s29 }
0x1650   : > { %v5460_v7 = vpop.xlane.xlu1 %5459 }
0x1651   : > { %10858 = vrcp.f32 %v5460_v7 }
0x1654   : > { %v5454_v11 = vpop.xlane.xlu1 %5453 }
0x1655   : > { %10860 = vrcp.f32 %v5454_v11 }
0x1656   : > { %v5457_v20 = vpop.xlane.xlu0 %5456 }
0x1657   : > { %10862 = vrcp.f32 %v5457_v20 }
0x165a   : > { %v5469_v6 = vpop.xlane.xlu0 %5468 }
0x165b   : > { %v5463_v62 = vpop.xlane.xlu1 %5462  ;;  %10864 = vrcp.f32 %v5469_v6 }
0x165c   : > { %10866 = vrcp.f32 %v5463_v62 }
0x165e   : > { %v5466_v55 = vpop.xlane.xlu0 %5465  ;;  %v10859_v54 = vpop.eup %10858 }
0x165f   : > { %10868 = vrcp.f32 %v5466_v55  ;;  %v5496_v29 = vmul.f32 %v10859_v54, %v13296_v42  ;;  %v5764_v50 = vpop.permute.xlu1 %5763 }
0x1661   : > { %v5506_v25 = vpack.c.bf16 %v5496_v29, %v5496_v29 }
0x1662   : > { %v10861_v8 = vpop.eup %10860  ;;  %v5698_v47 = vpop.permute.xlu0 %5697 }
0x1663   : > { %v5494_v4 = vmul.f32 %v10861_v8, %v13300_v28 }
0x1664   : > { %v10863_v32 = vpop.eup %10862 }
0x1665   : > { %v5495_v1 = vmul.f32 %v10863_v32, %v13304_v12 }
0x1667   : > { %v5505_v26 = vpack.c.bf16 %v5495_v1, %v5494_v4 }
0x1668   : > { %v10865_v19 = vpop.eup %10864 }
0x1669   : > { %9882 = vmatprep.mubr.msk.bf16.mxu0 %vm1388_vm5, %v5505_v26  ;;  %v10867_v23 = vpop.eup %10866  ;;  %v5499_v42 = vmul.f32 %v10865_v19, %v13312_v36  ;;  %v5774_v36 = vsel %vm1105_vm2, %v5764_v50, 0 }
0x166a   : > { %9883 = vmatmul.mubr.msk.bf16.vlgmr.msra.gmra.mxu0 %vm1388_vm5, %v5506_v25  ;;  %v5497_v28 = vmul.f32 %v10867_v23, %v13314_v13 }
0x166b   : > { %9895 = vmatpush3.bf16.msra.mxu0 %v5709_v39  ;;  %v5508_v52 = vpack.c.bf16 %v5499_v42, %v5499_v42 }
0x166c   : > { %v10869_v41 = vpop.eup %10868  ;;  %9896 = vmatprep.subr.bf16.mxu0 %v5698_v47 }
0x166d   : > { %v5498_v12 = vmul.f32 %v10869_v41, %v13320_v33 }
0x166f   : > { %9897 = vmatpush3.bf16.msra.mxu0 %v5698_v47  ;;  %v5507_v57 = vpack.c.bf16 %v5498_v12, %v5497_v28 }
0x1671   : > { %9890 = vmatprep.mubr.msk.bf16.mxu1 %vm1388_vm5, %v5507_v57 }
0x1672   : > { %9891 = vmatmul.mubr.msk.bf16.vlgmr.msra.gmra.mxu1 %vm1388_vm5, %v5508_v52 }
0x1673   : > { %9903 = vmatpush3.bf16.xpose.msra.mxu1 %v5777_v21 }
0x1674   : > { %10215 = vmatprep.subr.msk.bf16.mxu1 %vm1105_vm2, %v5764_v50 }
0x167b   : > { %9905 = vmatpush3.bf16.xpose.msra.mxu1 %v5774_v36 }
0x1690   : > { %v5478_v13 = vpop.xlane.xlu1 %5477 }
0x1691   : > { %10870 = vrcp.f32 %v5478_v13 }
0x1693   : > { %v5475_v33 = vpop.xlane.xlu0 %5474 }
0x1694   : > { %10872 = vrcp.f32 %v5475_v33  ;;  %v5472_v17 = vpop.xlane.xlu1 %5471 }
0x1695   : > { %10874 = vrcp.f32 %v5472_v17 }
0x1697   : > { %v5834_v2 = vpop.permute.xlu0 %5833 }
0x1698   : > { %v5760_v53 = vpop.permute.xlu1 %5759  ;;  %10216 = vmatprep.subr.msk.bf16.mxu0 %vm1105_vm2, %v5834_v2  ;;  %v5845_v25 = vsel %vm1105_vm2, %v5834_v2, 0 }
0x1699   : > { %9906 = vmatprep.mubr.msk.bf16.mxu1 %vm1105_vm2, %v5760_v53 }
0x169b   : > { %v5832_v60 = vpop.permute.xlu0 %5831 }
0x169c   : > { %v5902_v37 = vpop.permute.xlu1 %5901  ;;  %v5842_v39 = vsel %vm1105_vm2, %v5832_v60, 0 }
0x169d   : > { %10218 = vmatprep.subr.msk.bf16.mxu1 %vm1105_vm2, %v5902_v37  ;;  %v5913_v20 = vsel %vm1105_vm2, %v5902_v37, 0 }
0x169e   : > { %v10871_v5 = vpop.eup %10870 }
0x169f   : > { %v5762_v7 = vpop.permute.xlu0 %5761  ;;  %v5502_v55 = vmul.f32 %v10871_v5, %v13331_v44 }
0x16a0   : > { %v5828_v11 = vpop.permute.xlu1 %5827  ;;  %9907 = vmatmul.mubr.msk.bf16.vlgmr.msra.gmra.mxu1 %vm1105_vm2, %v5762_v7 }
0x16a1   : > { %v10873_v6 = vpop.eup %10872  ;;  %9919 = vmatpush3.bf16.xpose.msra.mxu1 %v5913_v20  ;;  %v5510_v1 = vpack.c.bf16 %v5502_v55, %v5502_v55 }
0x16a2   : > { %v10875_v62 = vpop.eup %10874  ;;  %v5501_v54 = vmul.f32 %v10873_v6, %v13333_v35 }
0x16a3   : > { %v5900_v8 = vpop.permute.xlu0 %5899  ;;  %v5500_v32 = vmul.f32 %v10875_v62, %v13337_v0 }
0x16a4   : > { %v5970_v29 = vpop.permute.xlu1 %5969  ;;  %10219 = vmatprep.subr.msk.bf16.mxu1 %vm1105_vm2, %v5900_v8  ;;  %v5910_v44 = vsel %vm1105_vm2, %v5900_v8, 0 }
0x16a5   : > { %v5509_v4 = vpack.c.bf16 %v5501_v54, %v5500_v32  ;;  %v5981_v12 = vsel %vm1105_vm2, %v5970_v29, 0 }
0x16a7   : > { %9898 = vmatprep.mubr.msk.bf16.mxu0 %vm1388_vm5, %v5509_v4  ;;  %v5830_v26 = vpop.permute.xlu0 %5829 }
0x16a8   : > { %9899 = vmatmul.mubr.msk.bf16.vlgmr.msra.gmra.mxu0 %vm1388_vm5, %v5510_v1  ;;  %v5896_v19 = vpop.permute.xlu1 %5895 }
0x16a9   : > { %9911 = vmatpush3.bf16.xpose.msra.mxu0 %v5845_v25  ;;  %9914 = vmatprep.mubr.msk.bf16.mxu0 %vm1105_vm2, %v5828_v11 }
0x16aa   : > { %10217 = vmatprep.subr.msk.bf16.mxu0 %vm1105_vm2, %v5832_v60  ;;  %9921 = vmatpush3.bf16.xpose.msra.mxu1 %v5910_v44 }
0x16ab   : > { %9922 = vmatprep.mubr.msk.bf16.mxu1 %vm1105_vm2, %v5896_v19  ;;  %v5898_v35 = vpop.permute.xlu0 %5897 }
0x16ac   : > { %v5968_v0 = vpop.permute.xlu1 %5967 }
0x16ad   : > { %v5978_v21 = vsel %vm1105_vm2, %v5968_v0, 0 }
0x16af   : > { %v5964_v23 = vpop.permute.xlu0 %5963 }
0x16b0   : > { %v5966_v47 = vpop.permute.xlu1 %5965 }
0x16b1   : > { %9913 = vmatpush3.bf16.xpose.msra.mxu0 %v5842_v39  ;;  %9923 = vmatmul.mubr.msk.bf16.vlgmr.msra.gmra.mxu1 %vm1105_vm2, %v5898_v35 }
0x16b2   : > { %10220 = vmatprep.subr.msk.bf16.mxu0 %vm1105_vm2, %v5970_v29 }
0x16b3   : > { %v6198_v41 = vpop.permute.xlu0 %6197 }
0x16b4   : > { %v6196_v42 = vpop.permute.xlu1 %6195  ;;  %10222 = vmatprep.subr.msk.bf16.mxu1 %vm1540_vm3, %v6198_v41  ;;  %v6207_v28 = vsel %vm1540_vm3, %v6198_v41, 0 }
0x16b5   : > { %9935 = vmatpush3.bf16.msra.mxu1 %v6207_v28 }
0x16b6   : > { %9936 = vmatprep.subr.bf16.mxu1 %v6196_v42 }
0x16b7   : > { %v6258_v36 = vpop.permute.xlu0 %6257 }
0x16b8   : > { %9915 = vmatmul.mubr.msk.bf16.vlgmr.msra.gmra.mxu0 %vm1105_vm2, %v5830_v26  ;;  %v6260_v57 = vpop.permute.xlu1 %6259 }
0x16b9   : > { %9927 = vmatpush3.bf16.xpose.msra.mxu0 %v5981_v12  ;;  %9930 = vmatprep.mubr.msk.bf16.mxu0 %vm1105_vm2, %v5964_v23  ;;  %v6269_v50 = vsel %vm1540_vm3, %v6260_v57, 0 }
0x16ba   : > { %10221 = vmatprep.subr.msk.bf16.mxu0 %vm1105_vm2, %v5968_v0  ;;  %9937 = vmatpush3.bf16.msra.mxu1 %v6196_v42 }
0x16bc   : > { %v13437_v52 = vpop.permute.xlu1 %6321 }
0x16bd   : > { %10224 = vmatprep.subr.msk.bf16.mxu1 %vm1540_vm3, %v13437_v52 }
0x16c1   : > { %9929 = vmatpush3.bf16.xpose.msra.mxu0 %v5978_v21 }
0x16c2   : > { %10223 = vmatprep.subr.msk.bf16.mxu0 %vm1540_vm3, %v6260_v57 }
0x16c8   : > { %9931 = vmatmul.mubr.msk.bf16.vlgmr.msra.gmra.mxu0 %vm1105_vm2, %v5966_v47 }
0x16c9   : > { %9943 = vmatpush3.bf16.msra.mxu0 %v6269_v50 }
0x16ca   : > { %9944 = vmatprep.subr.bf16.mxu0 %v6258_v36 }
0x16cd   : > { %9945 = vmatpush3.bf16.msra.mxu0 %v6258_v36 }
0x16f2   : > { %v13445_v13 = vpop.f32.mrf.mxu1 }
0x16f4   : > { %v13447_v33 = vpop.f32.mrf.mxu1 }
0x16f6   : > { %v9877_v17 = vpop.f32.mrf.mxu1 }
0x16f8   : > { %v13453_v37 = vpop.f32.mrf.mxu1 }
0x172a   : > { %v13449_v2 = vpop.f32.mrf.mxu0 }
0x172c   : > { %v13451_v53 = vpop.f32.mrf.mxu0 }
0x172e   : > { %v9885_v60 = vpop.f32.mrf.mxu0 }
0x1730   : > { %v13469_v1 = vpop.f32.mrf.mxu0 }
0x1732   : > { %v13455_v5 = vpop.f32.mrf.mxu1 }
0x1734   : > { %v13457_v7 = vpop.f32.mrf.mxu1 }
0x1736   : > { %v9893_v11 = vpop.f32.mrf.mxu1 }
0x1738   : > { %v13459_v20 = vpop.f32.mrf.mxu1 }
0x1760   : > { %v9908_v6 = vpop.f32.mrf.mxu1 }
0x1761   : > { %v6033_v62 = vmul.f32 0.35355338, %v9908_v6 }
0x1762   : > { %v5813_v55 = vpop.f32.mrf.mxu1 }
0x1763   : > { %v13462_v54 = vadd.f32 %v6033_v62, %v14736_v46  ;;  %v6031_v8 = vmul.f32 0.35355338, %v5813_v55 }
0x1764   : > { %v9909_v32 = vpop.f32.mrf.mxu1 }
0x1765   : > { %v13465_v29 = vadd.f32 %v6031_v8, %v14736_v46  ;;  %v6061_v4 = vsel %vm1388_vm5, %v13462_v54, -inf }
0x1766   : > { %6062 = vmax.xlane.f32.xlu0 %v6061_v4  ;;  %v5816_v26 = vpop.f32.mrf.mxu1 }
0x1767   : > { %v6032_v25 = vmul.f32 0.35355338, %v5816_v26  ;;  %v6055_v35 = vsel %vm1388_vm5, %v13465_v29, -inf }
0x1768   : > { %v13471_v19 = vpop.f32.mrf.mxu0 }
0x1769   : > { %v13474_v44 = vadd.f32 %v6032_v25, %v14736_v46 }
0x176a   : > { %v13478_v0 = vpop.f32.mrf.mxu0  ;;  %6056 = vmax.xlane.f32.xlu0 %v6055_v35 }
0x176b   : > { %v6058_v23 = vsel %vm1388_vm5, %v13474_v44, -inf }
0x176c   : > { %v9901_v39 = vpop.f32.mrf.mxu0  ;;  %6059 = vmax.xlane.f32.xlu1 %v6058_v23 }
0x176e   : > { %v13482_v28 = vpop.f32.mrf.mxu0 }
0x176f   : > { %14739 = vst [vmem:[#allocation19_spill] sm:$0xff] %v13482_v28 }
0x1771   : > { %v9924_v47 = vpop.f32.mrf.mxu1 }
0x1772   : > { %v6039_v8 = vmul.f32 0.35355338, %v9924_v47 }
0x1773   : > { %v5949_v41 = vpop.f32.mrf.mxu1 }
0x1774   : > { %v6037_v57 = vmul.f32 0.35355338, %v5949_v41  ;;  %v13503_v23 = vadd.f32 %v6039_v8, %v14736_v46 }
0x1775   : > { %v9925_v42 = vpop.f32.mrf.mxu1 }
0x1776   : > { %v13488_v11 = vadd.f32 %v6037_v57, %v14736_v46  ;;  %v6079_v42 = vsel %vm1388_vm5, %v13503_v23, -inf }
0x1777   : > { %v5952_v26 = vpop.f32.mrf.mxu1 }
0x1778   : > { %v9916_v12 = vpop.f32.mrf.mxu0  ;;  %v6073_v35 = vsel %vm1388_vm5, %v13488_v11, -inf  ;;  %v6038_v39 = vmul.f32 0.35355338, %v5952_v26 }
0x1779   : > { %v6036_v21 = vmul.f32 0.35355338, %v9916_v12 }
0x177a   : > { %v5881_v50 = vpop.f32.mrf.mxu0  ;;  %v13508_v41 = vadd.f32 %v6038_v39, %v14736_v46 }
0x177b   : > { %v13485_v36 = vadd.f32 %v6036_v21, %v14736_v46  ;;  %v6034_v17 = vmul.f32 0.35355338, %v5881_v50 }
0x177c   : > { %v9917_v60 = vpop.f32.mrf.mxu0 }
0x177d   : > { %v13491_v6 = vadd.f32 %v6034_v17, %v14736_v46  ;;  %v6070_v62 = vsel %vm1388_vm5, %v13485_v36, -inf  ;;  %v6076_v60 = vsel %vm1388_vm5, %v13508_v41, -inf }
0x177e   : > { %6071 = vmax.xlane.f32.xlu1 %v6070_v62  ;;  %v5884_v55 = vpop.f32.mrf.mxu0 }
0x177f   : > { %v6035_v32 = vmul.f32 0.35355338, %v5884_v55  ;;  %v6064_v4 = vsel %vm1388_vm5, %v13491_v6, -inf }
0x1780   : > { %6065 = vmax.xlane.f32.xlu0 %v6064_v4 }
0x1781   : > { %v13498_v25 = vadd.f32 %v6035_v32, %v14736_v46 }
0x1782   : > { %6074 = vmax.xlane.f32.xlu1 %v6073_v35 }
0x1783   : > { %v6067_v47 = vsel %vm1388_vm5, %v13498_v25, -inf }
0x1784   : > { %6068 = vmax.xlane.f32.xlu0 %v6067_v47 }
0x1788   : > { %6080 = vmax.xlane.f32.xlu0 %v6079_v42  ;;  %v9932_v12 = vpop.f32.mrf.mxu0 }
0x1789   : > { %v6042_v57 = vmul.f32 0.35355338, %v9932_v12  ;;  %v13534_v12 = vpop.permute.xlu1 %6319 }
0x178a   : > { %v6017_v21 = vpop.f32.mrf.mxu0 }
0x178b   : > { %v13513_v50 = vadd.f32 %v6042_v57, %v14736_v46  ;;  %v6040_v17 = vmul.f32 0.35355338, %v6017_v21 }
0x178c   : > { %6077 = vmax.xlane.f32.xlu0 %v6076_v60  ;;  %v9933_v62 = vpop.f32.mrf.mxu0 }
0x178d   : > { %v13518_v55 = vadd.f32 %v6040_v17, %v14736_v46  ;;  %v6088_v8 = vsel %vm1388_vm5, %v13513_v50, -inf }
0x178e   : > { %6089 = vmax.xlane.f32.xlu1 %v6088_v8  ;;  %v6020_v32 = vpop.f32.mrf.mxu0 }
0x178f   : > { %v6041_v4 = vmul.f32 0.35355338, %v6020_v32  ;;  %v6082_v35 = vsel %vm1388_vm5, %v13518_v55, -inf }
0x1791   : > { %v13523_v26 = vadd.f32 %v6041_v4, %v14736_v46 }
0x1792   : > { %6083 = vmax.xlane.f32.xlu1 %v6082_v35 }
0x1793   : > { %v6085_v39 = vsel %vm1388_vm5, %v13523_v26, -inf }
0x1794   : > { %6086 = vmax.xlane.f32.xlu0 %v6085_v39 }
0x17a3   : > { %6449 = vrot.lane.b32.xlu1 %v13125_v58, %s14740_s26 }
0x17aa   : > { %6383 = vrot.lane.b32.xlu0 %v13153_v34, %s14738_s29 }
0x17ef   : > { %v6063_v47 = vpop.xlane.xlu0 %6062 }
0x17f0   : > { %v6093_v42 = vsub.f32 %v13462_v54, %v6063_v47 }
0x17f2   : > { %v6107_v57 = vmul.f32 1.442695, %v6093_v42 }
0x17f3   : > { %v6057_v21 = vpop.xlane.xlu0 %6056 }
0x17f4   : > { %10876 = vpow2.f32 %v6107_v57  ;;  %v6091_v17 = vsub.f32 %v13465_v29, %v6057_v21 }
0x17f5   : > { %v6060_v60 = vpop.xlane.xlu1 %6059 }
0x17f6   : > { %v6103_v62 = vmul.f32 1.442695, %v6091_v17  ;;  %v6092_v8 = vsub.f32 %v13474_v44, %v6060_v60 }
0x17f8   : > { %10878 = vpow2.f32 %v6103_v62  ;;  %v6105_v32 = vmul.f32 1.442695, %v6092_v8 }
0x17fa   : > { %10880 = vpow2.f32 %v6105_v32 }
0x1801   : > { %v13538_v4 = vpop.eup %10876 }
0x1802   : > { %v6133_v35 = vsel %vm1388_vm5, %v13538_v4, 0.0 }
0x1803   : > { %6134 = vadd.xlane.f32.xlu0 %v6133_v35 }
0x1805   : > { %v13542_v54 = vpop.eup %10878 }
0x1806   : > { %v6127_v39 = vsel %vm1388_vm5, %v13542_v54, 0.0 }
0x1807   : > { %v13546_v47 = vpop.eup %10880  ;;  %v6072_v29 = vpop.xlane.xlu1 %6071  ;;  %6128 = vadd.xlane.f32.xlu0 %v6127_v39 }
0x1808   : > { %v6096_v44 = vsub.f32 %v13485_v36, %v6072_v29  ;;  %v6130_v42 = vsel %vm1388_vm5, %v13546_v47, 0.0 }
0x1809   : > { %v6066_v57 = vpop.xlane.xlu0 %6065  ;;  %6131 = vadd.xlane.f32.xlu1 %v6130_v42 }
0x180a   : > { %v6113_v21 = vmul.f32 1.442695, %v6096_v44  ;;  %v6094_v17 = vsub.f32 %v13491_v6, %v6066_v57 }
0x180b   : > { %v6075_v60 = vpop.xlane.xlu1 %6074 }
0x180c   : > { %10882 = vpow2.f32 %v6113_v21  ;;  %v6109_v62 = vmul.f32 1.442695, %v6094_v17  ;;  %v6097_v8 = vsub.f32 %v13488_v11, %v6075_v60 }
0x180d   : > { %v6069_v32 = vpop.xlane.xlu0 %6068 }
0x180e   : > { %10884 = vpow2.f32 %v6109_v62  ;;  %v6115_v35 = vmul.f32 1.442695, %v6097_v8  ;;  %v6095_v39 = vsub.f32 %v13498_v25, %v6069_v32 }
0x1810   : > { %v6111_v51 = vmul.f32 1.442695, %v6095_v39  ;;  %10886 = vpow2.f32 %v6115_v35 }
0x1811   : > { %v6081_v36 = vpop.xlane.xlu0 %6080 }
0x1812   : > { %10888 = vpow2.f32 %v6111_v51  ;;  %v6099_v29 = vsub.f32 %v13503_v23, %v6081_v36 }
0x1814   : > { %v6119_v42 = vmul.f32 1.442695, %v6099_v29 }
0x1815   : > { %v6078_v44 = vpop.xlane.xlu0 %6077 }
0x1816   : > { %10890 = vpow2.f32 %v6119_v42  ;;  %v6098_v6 = vsub.f32 %v13508_v41, %v6078_v44 }
0x1817   : > { %v6090_v29 = vpop.xlane.xlu1 %6089 }
0x1818   : > { %v6117_v57 = vmul.f32 1.442695, %v6098_v6  ;;  %v6102_v42 = vsub.f32 %v13513_v50, %v6090_v29 }
0x1819   : > { %v13556_v21 = vpop.eup %10882 }
0x181a   : > { %10892 = vpow2.f32 %v6117_v57  ;;  %v6142_v11 = vsel %vm1388_vm5, %v13556_v21, 0.0  ;;  %v6125_v6 = vmul.f32 1.442695, %v6102_v42 }
0x181b   : > { %v13560_v17 = vpop.eup %10884  ;;  %6143 = vadd.xlane.f32.xlu1 %v6142_v11  ;;  %v6084_v44 = vpop.xlane.xlu1 %6083 }
0x181c   : > { %v6136_v51 = vsel %vm1388_vm5, %v13560_v17, 0.0  ;;  %v6100_v57 = vsub.f32 %v13518_v55, %v6084_v44  ;;  %10894 = vpow2.f32 %v6125_v6 }
0x181d   : > { %v6087_v25 = vpop.xlane.xlu0 %6086  ;;  %v13562_v60 = vpop.eup %10886 }
0x181e   : > { %v6145_v8 = vsel %vm1388_vm5, %v13562_v60, 0.0  ;;  %v6101_v11 = vsub.f32 %v13523_v26, %v6087_v25 }
0x181f   : > { %v13566_v23 = vpop.eup %10888  ;;  %6137 = vadd.xlane.f32.xlu1 %v6136_v51  ;;  %v6121_v51 = vmul.f32 1.442695, %v6100_v57  ;;  %v6450_v29 = vpop.permute.xlu1 %6449 }
0x1820   : > { %v6139_v41 = vsel %vm1388_vm5, %v13566_v23, 0.0 }
0x1821   : > { %6140 = vadd.xlane.f32.xlu0 %v6139_v41  ;;  %v13570_v62 = vpop.permute.xlu0 %6383  ;;  %v6123_v41 = vmul.f32 1.442695, %v6101_v11  ;;  %10896 = vpow2.f32 %v6121_v51 }
0x1822   : > { %10225 = vmatprep.subr.msk.bf16.mxu0 %vm1540_vm3, %v13570_v62 }
0x1823   : > { %v13576_v32 = vpop.eup %10890  ;;  %6146 = vadd.xlane.f32.xlu1 %v6145_v8  ;;  %10898 = vpow2.f32 %v6123_v41 }
0x1824   : > { %v6151_v35 = vsel %vm1388_vm5, %v13576_v32, 0.0 }
0x1825   : > { %6152 = vadd.xlane.f32.xlu0 %v6151_v35 }
0x1827   : > { %v13580_v39 = vpop.eup %10892 }
0x1828   : > { %v6148_v36 = vsel %vm1388_vm5, %v13580_v39, 0.0 }
0x1829   : > { %6149 = vadd.xlane.f32.xlu0 %v6148_v36  ;;  %v13591_v8 = vpop.eup %10894 }
0x182a   : > { %v6160_v35 = vsel %vm1388_vm5, %v13591_v8, 0.0 }
0x182e   : > { %v13595_v50 = vpop.eup %10896 }
0x182f   : > { %v6154_v55 = vsel %vm1388_vm5, %v13595_v50, 0.0 }
0x1830   : > { %v13597_v36 = vpop.eup %10898 }
0x1831   : > { %v6157_v26 = vsel %vm1388_vm5, %v13597_v36, 0.0 }
0x1834   : > { %6447 = vrot.lane.b32.xlu1 %v13129_v22, %s14740_s26 }
0x183f   : > { %6381 = vrot.lane.b32.xlu0 %v13155_v45, %s14738_s29  ;;  %s14756_s29 = smov 24  }
0x1858   : > { %6161 = vadd.xlane.f32.xlu1 %v6160_v35 }
0x185c   : > { %6155 = vadd.xlane.f32.xlu1 %v6154_v55 }
0x185e   : > { %6158 = vadd.xlane.f32.xlu0 %v6157_v26 }
0x186d   : > { %6443 = vrot.lane.b32.xlu1 %v13129_v22, %s14741_s23 }
0x1871   : > { %6585 = vrot.lane.b32.xlu1 %v13147_v31, %s14740_s26 }
0x1874   : > { %6517 = vrot.lane.b32.xlu0 %v13139_v3, %s14740_s26 }
0x1875   : > { %6511 = vrot.lane.b32.xlu1 %v13135_v40, %s14741_s23 }
0x1878   : > { %6515 = vrot.lane.b32.xlu0 %v13135_v40, %s14740_s26 }
0x1879   : > { %6653 = vrot.lane.b32.xlu1 %v13153_v34, %s14740_s26 }
0x187c   : > { %6445 = vrot.lane.b32.xlu0 %v13125_v58, %s14741_s23 }
0x187d   : > { %6579 = vrot.lane.b32.xlu1 %v13145_v9, %s14741_s23 }
0x1880   : > { %6583 = vrot.lane.b32.xlu0 %v13145_v9, %s14740_s26 }
0x1881   : > { %6651 = vrot.lane.b32.xlu1 %v13155_v45, %s14740_s26 }
0x1884   : > { %6513 = vrot.lane.b32.xlu0 %v13139_v3, %s14741_s23 }
0x1885   : > { %6649 = vrot.lane.b32.xlu1 %v13153_v34, %s14741_s23 }
0x1888   : > { %6581 = vrot.lane.b32.xlu0 %v13147_v31, %s14741_s23 }
0x1889   : > { %6879 = vrot.lane.b32.xlu1 %v13129_v22, %s14742_s25 }
0x188c   : > { %6647 = vrot.lane.b32.xlu0 %v13155_v45, %s14741_s23  ;;  %v6135_v25 = vpop.xlane.xlu0 %6134 }
0x188d   : > { %6943 = vrot.lane.b32.xlu1 %v13139_v3, %s14742_s25  ;;  %10900 = vrcp.f32 %v6135_v25 }
0x1890   : > { %6881 = vrot.lane.b32.xlu0 %v13125_v58, %s14742_s25  ;;  %v6129_v42 = vpop.xlane.xlu0 %6128 }
0x1891   : > { %7005 = vrot.lane.b32.xlu1 %v13147_v31, %s14742_s25  ;;  %10902 = vrcp.f32 %v6129_v42  ;;  %v6331_v42 = vsel %vm1540_vm3, %v13437_v52, 0 }
0x1892   : > { %v6132_v44 = vpop.xlane.xlu1 %6131 }
0x1893   : > { %10904 = vrcp.f32 %v6132_v44 }
0x1894   : > { %6941 = vrot.lane.b32.xlu0 %v13135_v40, %s14742_s25 }
0x1895   : > { %7003 = vrot.lane.b32.xlu1 %v13145_v9, %s14742_s25 }
0x189a   : > { %v10901_v6 = vpop.eup %10900 }
0x189b   : > { %v6177_v51 = vmul.f32 %v10901_v6, %v13538_v4 }
0x189d   : > { %v6188_v26 = vpack.c.bf16 %v6177_v51, %v6177_v51 }
0x189e   : > { %v10903_v57 = vpop.eup %10902 }
0x189f   : > { %v6175_v41 = vmul.f32 %v10903_v57, %v13542_v54 }
0x18a0   : > { %v10905_v11 = vpop.eup %10904 }
0x18a1   : > { %v6176_v35 = vmul.f32 %v10905_v11, %v13546_v47 }
0x18a3   : > { %v6187_v55 = vpack.c.bf16 %v6176_v35, %v6175_v41 }
0x18a4   : > { %v6144_v25 = vpop.xlane.xlu1 %6143 }
0x18a5   : > { %9938 = vmatprep.mubr.msk.bf16.mxu1 %vm1388_vm5, %v6187_v55  ;;  %10906 = vrcp.f32 %v6144_v25 }
0x18a6   : > { %9939 = vmatmul.mubr.msk.bf16.vlgmr.msra.gmra.mxu1 %vm1388_vm5, %v6188_v26 }
0x18a7   : > { %9951 = vmatpush3.bf16.msra.mxu1 %v6331_v42  ;;  %v6393_v42 = vsel %vm1540_vm3, %v13570_v62, 0 }
0x18a8   : > { %v6138_v44 = vpop.xlane.xlu1 %6137  ;;  %9952 = vmatprep.subr.bf16.mxu1 %v13534_v12 }
0x18a9   : > { %10908 = vrcp.f32 %v6138_v44 }
0x18aa   : > { %v6141_v4 = vpop.xlane.xlu0 %6140 }
0x18ab   : > { %10910 = vrcp.f32 %v6141_v4  ;;  %9953 = vmatpush3.bf16.msra.mxu1 %v13534_v12 }
0x18ac   : > { %10226 = vmatprep.subr.msk.bf16.mxu1 %vm1105_vm2, %v6450_v29  ;;  %v6147_v54 = vpop.xlane.xlu1 %6146 }
0x18ae   : > { %v6153_v47 = vpop.xlane.xlu0 %6152 }
0x18af   : > { %10912 = vrcp.f32 %v6153_v47 }
0x18b0   : > { %10914 = vrcp.f32 %v6147_v54  ;;  %v6448_v62 = vpop.permute.xlu1 %6447 }
0x18b2   : > { %v6150_v6 = vpop.xlane.xlu0 %6149  ;;  %v10907_v57 = vpop.eup %10906 }
0x18b3   : > { %10916 = vrcp.f32 %v6150_v6  ;;  %v6180_v51 = vmul.f32 %v10907_v57, %v13556_v21  ;;  %v6461_v6 = vsel %vm1105_vm2, %v6450_v29, 0 }
0x18b5   : > { %v6190_v26 = vpack.c.bf16 %v6180_v51, %v6180_v51 }
0x18b6   : > { %v10909_v52 = vpop.eup %10908  ;;  %v6382_v44 = vpop.permute.xlu0 %6381 }
0x18b7   : > { %v6178_v41 = vmul.f32 %v10909_v52, %v13560_v17 }
0x18b8   : > { %v10911_v11 = vpop.eup %10910 }
0x18b9   : > { %v6179_v35 = vmul.f32 %v10911_v11, %v13566_v23 }
0x18bb   : > { %v6189_v55 = vpack.c.bf16 %v6179_v35, %v6178_v41 }
0x18bc   : > { %v10913_v12 = vpop.eup %10912 }
0x18bd   : > { %9946 = vmatprep.mubr.msk.bf16.mxu0 %vm1388_vm5, %v6189_v55  ;;  %v10915_v25 = vpop.eup %10914  ;;  %v6183_v21 = vmul.f32 %v10913_v12, %v13576_v32  ;;  %v6458_v32 = vsel %vm1105_vm2, %v6448_v62, 0 }
0x18be   : > { %9947 = vmatmul.mubr.msk.bf16.vlgmr.msra.gmra.mxu0 %vm1388_vm5, %v6190_v26  ;;  %v6181_v17 = vmul.f32 %v10915_v25, %v13562_v60 }
0x18bf   : > { %9959 = vmatpush3.bf16.msra.mxu0 %v6393_v42  ;;  %v6192_v47 = vpack.c.bf16 %v6183_v21, %v6183_v21 }
0x18c0   : > { %v10917_v4 = vpop.eup %10916  ;;  %9960 = vmatprep.subr.bf16.mxu0 %v6382_v44 }
0x18c1   : > { %v6182_v23 = vmul.f32 %v10917_v4, %v13580_v39 }
0x18c3   : > { %9961 = vmatpush3.bf16.msra.mxu0 %v6382_v44  ;;  %v6191_v54 = vpack.c.bf16 %v6182_v23, %v6181_v17 }
0x18c5   : > { %9954 = vmatprep.mubr.msk.bf16.mxu1 %vm1388_vm5, %v6191_v54 }
0x18c6   : > { %9955 = vmatmul.mubr.msk.bf16.vlgmr.msra.gmra.mxu1 %vm1388_vm5, %v6192_v47 }
0x18c7   : > { %9967 = vmatpush3.bf16.xpose.msra.mxu1 %v6461_v6 }
0x18c8   : > { %10227 = vmatprep.subr.msk.bf16.mxu1 %vm1105_vm2, %v6448_v62 }
0x18cf   : > { %9969 = vmatpush3.bf16.xpose.msra.mxu1 %v6458_v32 }
0x18e1   : > { %v6162_v57 = vpop.xlane.xlu1 %6161 }
0x18e2   : > { %10918 = vrcp.f32 %v6162_v57 }
0x18e5   : > { %v6156_v60 = vpop.xlane.xlu1 %6155 }
0x18e6   : > { %10920 = vrcp.f32 %v6156_v60 }
0x18e7   : > { %v6159_v39 = vpop.xlane.xlu0 %6158 }
0x18e8   : > { %10922 = vrcp.f32 %v6159_v39 }
0x18e9   : > { %v6444_v52 = vpop.permute.xlu1 %6443 }
0x18ea   : > { %9970 = vmatprep.mubr.msk.bf16.mxu1 %vm1105_vm2, %v6444_v52 }
0x18eb   : > { %v6518_v11 = vpop.permute.xlu0 %6517 }
0x18ec   : > { %10228 = vmatprep.subr.msk.bf16.mxu0 %vm1105_vm2, %v6518_v11 }
0x18ed   : > { %v6586_v29 = vpop.permute.xlu1 %6585 }
0x18ee   : > { %10230 = vmatprep.subr.msk.bf16.mxu1 %vm1105_vm2, %v6586_v29  ;;  %v6597_v12 = vsel %vm1105_vm2, %v6586_v29, 0 }
0x18ef   : > { %v6516_v51 = vpop.permute.xlu0 %6515  ;;  %v10919_v35 = vpop.eup %10918 }
0x18f0   : > { %v6186_v42 = vmul.f32 %v10919_v35, %v13591_v8  ;;  %v6529_v8 = vsel %vm1105_vm2, %v6518_v11, 0  ;;  %v6526_v60 = vsel %vm1105_vm2, %v6516_v51, 0 }
0x18f1   : > { %v6512_v41 = vpop.permute.xlu1 %6511 }
0x18f2   : > { %v6194_v54 = vpack.c.bf16 %v6186_v42, %v6186_v42 }
0x18f3   : > { %v10921_v55 = vpop.eup %10920  ;;  %v6446_v26 = vpop.permute.xlu0 %6445 }
0x18f4   : > { %9971 = vmatmul.mubr.msk.bf16.vlgmr.msra.gmra.mxu1 %vm1105_vm2, %v6446_v26  ;;  %v6184_v4 = vmul.f32 %v10921_v55, %v13595_v50 }
0x18f5   : > { %v10923_v25 = vpop.eup %10922  ;;  %9983 = vmatpush3.bf16.xpose.msra.mxu1 %v6597_v12  ;;  %v6654_v44 = vpop.permute.xlu1 %6653 }
0x18f6   : > { %v6185_v21 = vmul.f32 %v10923_v25, %v13597_v36 }
0x18f7   : > { %v6584_v17 = vpop.permute.xlu0 %6583 }
0x18f8   : > { %10231 = vmatprep.subr.msk.bf16.mxu1 %vm1105_vm2, %v6584_v17  ;;  %v6193_v23 = vpack.c.bf16 %v6185_v21, %v6184_v4  ;;  %v6594_v50 = vsel %vm1105_vm2, %v6584_v17, 0 }
0x18f9   : > { %v6580_v47 = vpop.permute.xlu1 %6579 }
0x18fa   : > { %9962 = vmatprep.mubr.msk.bf16.mxu0 %vm1388_vm5, %v6193_v23  ;;  %9986 = vmatprep.mubr.msk.bf16.mxu1 %vm1105_vm2, %v6580_v47 }
0x18fb   : > { %v6514_v6 = vpop.permute.xlu0 %6513  ;;  %9963 = vmatmul.mubr.msk.bf16.vlgmr.msra.gmra.mxu0 %vm1388_vm5, %v6194_v54 }
0x18fc   : > { %9975 = vmatpush3.bf16.xpose.msra.mxu0 %v6529_v8  ;;  %9978 = vmatprep.mubr.msk.bf16.mxu0 %vm1105_vm2, %v6512_v41  ;;  %v6665_v41 = vsel %vm1105_vm2, %v6654_v44, 0 }
0x18fd   : > { %10229 = vmatprep.subr.msk.bf16.mxu0 %vm1105_vm2, %v6516_v51  ;;  %9985 = vmatpush3.bf16.xpose.msra.mxu1 %v6594_v50  ;;  %v6652_v36 = vpop.permute.xlu1 %6651 }
0x18fe   : > { %v6662_v35 = vsel %vm1105_vm2, %v6652_v36, 0 }
0x18ff   : > { %v6582_v62 = vpop.permute.xlu0 %6581 }
0x1901   : > { %v6650_v32 = vpop.permute.xlu1 %6649 }
0x1903   : > { %v6648_v57 = vpop.permute.xlu0 %6647 }
0x1904   : > { %9977 = vmatpush3.bf16.xpose.msra.mxu0 %v6526_v60  ;;  %9987 = vmatmul.mubr.msk.bf16.vlgmr.msra.gmra.mxu1 %vm1105_vm2, %v6582_v62 }
0x1905   : > { %10232 = vmatprep.subr.msk.bf16.mxu0 %vm1105_vm2, %v6654_v44  ;;  %v6880_v39 = vpop.permute.xlu1 %6879 }
0x1907   : > { %v6882_v52 = vpop.permute.xlu0 %6881 }
0x1908   : > { %10234 = vmatprep.subr.msk.bf16.mxu1 %vm1540_vm3, %v6882_v52  ;;  %v6891_v11 = vsel %vm1540_vm3, %v6882_v52, 0 }
0x1909   : > { %9999 = vmatpush3.bf16.msra.mxu1 %v6891_v11  ;;  %v6944_v29 = vpop.permute.xlu1 %6943 }
0x190a   : > { %10000 = vmatprep.subr.bf16.mxu1 %v6880_v39  ;;  %v6953_v55 = vsel %vm1540_vm3, %v6944_v29, 0 }
0x190b   : > { %9979 = vmatmul.mubr.msk.bf16.vlgmr.msra.gmra.mxu0 %vm1105_vm2, %v6514_v6  ;;  %v6942_v26 = vpop.permute.xlu0 %6941 }
0x190c   : > { %9991 = vmatpush3.bf16.xpose.msra.mxu0 %v6665_v41  ;;  %9994 = vmatprep.mubr.msk.bf16.mxu0 %vm1105_vm2, %v6648_v57 }
0x190d   : > { %10233 = vmatprep.subr.msk.bf16.mxu0 %vm1105_vm2, %v6652_v36  ;;  %10001 = vmatpush3.bf16.msra.mxu1 %v6880_v39  ;;  %v13693_v51 = vpop.permute.xlu1 %7005 }
0x190e   : > { %10236 = vmatprep.subr.msk.bf16.mxu1 %vm1540_vm3, %v13693_v51 }
0x1914   : > { %9993 = vmatpush3.bf16.xpose.msra.mxu0 %v6662_v35 }
0x1915   : > { %10235 = vmatprep.subr.msk.bf16.mxu0 %vm1540_vm3, %v6944_v29 }
0x191b   : > { %9995 = vmatmul.mubr.msk.bf16.vlgmr.msra.gmra.mxu0 %vm1105_vm2, %v6650_v32 }
0x191c   : > { %10007 = vmatpush3.bf16.msra.mxu0 %v6953_v55 }
0x191d   : > { %10008 = vmatprep.subr.bf16.mxu0 %v6942_v26 }
0x1920   : > { %10009 = vmatpush3.bf16.msra.mxu0 %v6942_v26 }
0x1966   : > { %v13701_v12 = vpop.f32.mrf.mxu1 }
0x1968   : > { %v13703_v25 = vpop.f32.mrf.mxu1 }
0x196a   : > { %v9941_v42 = vpop.f32.mrf.mxu1 }
0x196c   : > { %v13705_v44 = vpop.f32.mrf.mxu1 }
0x197e   : > { %v13709_v21 = vpop.f32.mrf.mxu0 }
0x1980   : > { %v13711_v17 = vpop.f32.mrf.mxu0 }
0x1982   : > { %v9949_v54 = vpop.f32.mrf.mxu0 }
0x1984   : > { %v13715_v47 = vpop.f32.mrf.mxu0 }
0x1986   : > { %v13719_v8 = vpop.f32.mrf.mxu1 }
0x1988   : > { %v13721_v50 = vpop.f32.mrf.mxu1 }
0x198a   : > { %v9957_v36 = vpop.f32.mrf.mxu1 }
0x198c   : > { %v13723_v62 = vpop.f32.mrf.mxu1 }
0x19b4   : > { %v9972_v57 = vpop.f32.mrf.mxu1 }
0x19b5   : > { %v6717_v60 = vmul.f32 0.35355338, %v9972_v57 }
0x19b6   : > { %v6497_v39 = vpop.f32.mrf.mxu1 }
0x19b7   : > { %v13728_v52 = vadd.f32 %v6717_v60, %v14736_v46  ;;  %v6715_v11 = vmul.f32 0.35355338, %v6497_v39 }
0x19b8   : > { %v9973_v29 = vpop.f32.mrf.mxu1 }
0x19b9   : > { %v13731_v41 = vadd.f32 %v6715_v11, %v14736_v46  ;;  %v6745_v35 = vsel %vm1388_vm5, %v13728_v52, -inf }
0x19ba   : > { %6746 = vmax.xlane.f32.xlu0 %v6745_v35  ;;  %v6500_v55 = vpop.f32.mrf.mxu1 }
0x19bb   : > { %v6716_v26 = vmul.f32 0.35355338, %v6500_v55  ;;  %v13735_v42 = vpop.f32.mrf.mxu0  ;;  %v6739_v57 = vsel %vm1388_vm5, %v13731_v41, -inf }
0x19bd   : > { %v13738_v54 = vadd.f32 %v6716_v26, %v14736_v46  ;;  %v13740_v36 = vpop.f32.mrf.mxu0 }
0x19be   : > { %6740 = vmax.xlane.f32.xlu0 %v6739_v57 }
0x19bf   : > { %v9965_v39 = vpop.f32.mrf.mxu0  ;;  %v6742_v11 = vsel %vm1388_vm5, %v13738_v54, -inf }
0x19c0   : > { %6743 = vmax.xlane.f32.xlu1 %v6742_v11 }
0x19c1   : > { %v13748_v29 = vpop.f32.mrf.mxu0 }
0x19c4   : > { %v9988_v55 = vpop.f32.mrf.mxu1 }
0x19c5   : > { %v6723_v15 = vmul.f32 0.35355338, %v9988_v55 }
0x19c6   : > { %v6633_v26 = vpop.f32.mrf.mxu1 }
0x19c7   : > { %v6721_v32 = vmul.f32 0.35355338, %v6633_v26 }
0x19c8   : > { %v9989_v61 = vpop.f32.mrf.mxu1 }
0x19c9   : > { %v13756_v59 = vadd.f32 %v6721_v32, %v14736_v46 }
0x19cb   : > { %v9980_v6 = vpop.f32.mrf.mxu0  ;;  %v6757_v32 = vsel %vm1388_vm5, %v13756_v59, -inf }
0x19cc   : > { %v6720_v4 = vmul.f32 0.35355338, %v9980_v6 }
0x19cd   : > { %v6565_v23 = vpop.f32.mrf.mxu0 }
0x19ce   : > { %v13753_v60 = vadd.f32 %v6720_v4, %v14736_v46  ;;  %v6718_v57 = vmul.f32 0.35355338, %v6565_v23  ;;  %v6636_v4 = vpop.f32.mrf.mxu1 }
0x19cf   : > { %v9981_v39 = vpop.f32.mrf.mxu0 }
0x19d0   : > { %v13759_v11 = vadd.f32 %v6718_v57, %v14736_v46  ;;  %v6754_v35 = vsel %vm1388_vm5, %v13753_v60, -inf  ;;  %v13771_v57 = vadd.f32 %v6723_v15, %v14736_v46  ;;  %v6722_v39 = vmul.f32 0.35355338, %v6636_v4 }
0x19d1   : > { %6755 = vmax.xlane.f32.xlu1 %v6754_v35  ;;  %v6568_v61 = vpop.f32.mrf.mxu0 }
0x19d2   : > { %v6719_v26 = vmul.f32 0.35355338, %v6568_v61  ;;  %v6748_v6 = vsel %vm1388_vm5, %v13759_v11, -inf  ;;  %v13776_v55 = vadd.f32 %v6722_v39, %v14736_v46  ;;  %v6763_v61 = vsel %vm1388_vm5, %v13771_v57, -inf }
0x19d3   : > { %6749 = vmax.xlane.f32.xlu0 %v6748_v6 }
0x19d4   : > { %v13766_v23 = vadd.f32 %v6719_v26, %v14736_v46  ;;  %v6760_v4 = vsel %vm1388_vm5, %v13776_v55, -inf }
0x19d5   : > { %6758 = vmax.xlane.f32.xlu1 %v6757_v32 }
0x19d6   : > { %v6751_v35 = vsel %vm1388_vm5, %v13766_v23, -inf }
0x19d7   : > { %6752 = vmax.xlane.f32.xlu0 %v6751_v35 }
0x19db   : > { %6764 = vmax.xlane.f32.xlu0 %v6763_v61  ;;  %v9996_v26 = vpop.f32.mrf.mxu0 }
0x19dc   : > { %v6726_v6 = vmul.f32 0.35355338, %v9996_v26 }
0x19dd   : > { %v6701_v30 = vpop.f32.mrf.mxu0 }
0x19de   : > { %v13781_v32 = vadd.f32 %v6726_v6, %v14736_v46  ;;  %v6724_v15 = vmul.f32 0.35355338, %v6701_v30 }
0x19df   : > { %6761 = vmax.xlane.f32.xlu0 %v6760_v4  ;;  %v9997_v24 = vpop.f32.mrf.mxu0  ;;  %v13802_v4 = vpop.permute.xlu1 %7003 }
0x19e0   : > { %v13786_v35 = vadd.f32 %v6724_v15, %v14736_v46  ;;  %v6772_v39 = vsel %vm1388_vm5, %v13781_v32, -inf }
0x19e1   : > { %6773 = vmax.xlane.f32.xlu1 %v6772_v39  ;;  %v6704_v61 = vpop.f32.mrf.mxu0 }
0x19e2   : > { %v6725_v48 = vmul.f32 0.35355338, %v6704_v61  ;;  %v6766_v30 = vsel %vm1388_vm5, %v13786_v35, -inf }
0x19e4   : > { %v13791_v26 = vadd.f32 %v6725_v48, %v14736_v46 }
0x19e5   : > { %6767 = vmax.xlane.f32.xlu1 %v6766_v30 }
0x19e6   : > { %v6769_v6 = vsel %vm1388_vm5, %v13791_v26, -inf }
0x19e7   : > { %6770 = vmax.xlane.f32.xlu0 %v6769_v6 }
0x19f6   : > { %7133 = vrot.lane.b32.xlu1 %v13125_v58, %s14743_s27 }
0x19fd   : > { %7067 = vrot.lane.b32.xlu0 %v13153_v34, %s14742_s25 }
0x1a43   : > { %v6747_v24 = vpop.xlane.xlu0 %6746 }
0x1a44   : > { %v6777_v15 = vsub.f32 %v13728_v52, %v6747_v24 }
0x1a46   : > { %v6791_v48 = vmul.f32 1.442695, %v6777_v15 }
0x1a47   : > { %v6741_v39 = vpop.xlane.xlu0 %6740 }
0x1a48   : > { %10924 = vpow2.f32 %v6791_v48  ;;  %v6775_v61 = vsub.f32 %v13731_v41, %v6741_v39 }
0x1a49   : > { %v6744_v30 = vpop.xlane.xlu1 %6743 }
0x1a4a   : > { %v6787_v38 = vmul.f32 1.442695, %v6775_v61  ;;  %v6776_v6 = vsub.f32 %v13738_v54, %v6744_v30 }
0x1a4c   : > { %10926 = vpow2.f32 %v6787_v38  ;;  %v6789_v14 = vmul.f32 1.442695, %v6776_v6 }
0x1a4e   : > { %10928 = vpow2.f32 %v6789_v14 }
0x1a55   : > { %v13806_v16 = vpop.eup %10924 }
0x1a56   : > { %v6817_v18 = vsel %vm1388_vm5, %v13806_v16, 0.0 }
0x1a57   : > { %6818 = vadd.xlane.f32.xlu0 %v6817_v18 }
0x1a59   : > { %v13810_v52 = vpop.eup %10926 }
0x1a5a   : > { %v6756_v24 = vpop.xlane.xlu1 %6755  ;;  %v6811_v15 = vsel %vm1388_vm5, %v13810_v52, 0.0 }
0x1a5b   : > { %v13814_v41 = vpop.eup %10928  ;;  %v6780_v48 = vsub.f32 %v13753_v60, %v6756_v24  ;;  %6812 = vadd.xlane.f32.xlu0 %v6811_v15 }
0x1a5c   : > { %v6750_v38 = vpop.xlane.xlu0 %6749  ;;  %v6814_v14 = vsel %vm1388_vm5, %v13814_v41, 0.0 }
0x1a5d   : > { %v6797_v54 = vmul.f32 1.442695, %v6780_v48  ;;  %v6778_v39 = vsub.f32 %v13759_v11, %v6750_v38  ;;  %6815 = vadd.xlane.f32.xlu1 %v6814_v14 }
0x1a5e   : > { %v6759_v18 = vpop.xlane.xlu1 %6758 }
0x1a5f   : > { %10930 = vpow2.f32 %v6797_v54  ;;  %v6793_v61 = vmul.f32 1.442695, %v6778_v39  ;;  %v6781_v30 = vsub.f32 %v13756_v59, %v6759_v18 }
0x1a60   : > { %v6753_v6 = vpop.xlane.xlu0 %6752 }
0x1a61   : > { %10932 = vpow2.f32 %v6793_v61  ;;  %v6799_v43 = vmul.f32 1.442695, %v6781_v30  ;;  %v6779_v63 = vsub.f32 %v13766_v23, %v6753_v6 }
0x1a63   : > { %v6795_v60 = vmul.f32 1.442695, %v6779_v63  ;;  %10934 = vpow2.f32 %v6799_v43 }
0x1a64   : > { %v6765_v24 = vpop.xlane.xlu0 %6764 }
0x1a65   : > { %10936 = vpow2.f32 %v6795_v60  ;;  %v6783_v15 = vsub.f32 %v13771_v57, %v6765_v24 }
0x1a67   : > { %v6803_v48 = vmul.f32 1.442695, %v6783_v15 }
0x1a68   : > { %v6762_v49 = vpop.xlane.xlu0 %6761 }
0x1a69   : > { %10938 = vpow2.f32 %v6803_v48  ;;  %v6782_v11 = vsub.f32 %v13776_v55, %v6762_v49 }
0x1a6a   : > { %v6774_v60 = vpop.xlane.xlu1 %6773 }
0x1a6b   : > { %v6801_v38 = vmul.f32 1.442695, %v6782_v11  ;;  %v6786_v24 = vsub.f32 %v13781_v32, %v6774_v60 }
0x1a6c   : > { %v13824_v14 = vpop.eup %10930 }
0x1a6d   : > { %10940 = vpow2.f32 %v6801_v38  ;;  %v6826_v59 = vsel %vm1388_vm5, %v13824_v14, 0.0  ;;  %v6809_v48 = vmul.f32 1.442695, %v6786_v24 }
0x1a6e   : > { %v13828_v54 = vpop.eup %10932  ;;  %6827 = vadd.xlane.f32.xlu1 %v6826_v59  ;;  %v6768_v15 = vpop.xlane.xlu1 %6767 }
0x1a6f   : > { %v6820_v23 = vsel %vm1388_vm5, %v13828_v54, 0.0  ;;  %v6784_v11 = vsub.f32 %v13786_v35, %v6768_v15  ;;  %10942 = vpow2.f32 %v6809_v48 }
0x1a70   : > { %v6771_v43 = vpop.xlane.xlu0 %6770  ;;  %v13830_v63 = vpop.eup %10934 }
0x1a71   : > { %v6829_v39 = vsel %vm1388_vm5, %v13830_v63, 0.0  ;;  %v6785_v38 = vsub.f32 %v13791_v26, %v6771_v43  ;;  %v6805_v59 = vmul.f32 1.442695, %v6784_v11 }
0x1a72   : > { %v13834_v57 = vpop.eup %10936  ;;  %6821 = vadd.xlane.f32.xlu1 %v6820_v23 }
0x1a73   : > { %v6823_v49 = vsel %vm1388_vm5, %v13834_v57, 0.0  ;;  %v6807_v23 = vmul.f32 1.442695, %v6785_v38  ;;  %10944 = vpow2.f32 %v6805_v59 }
0x1a74   : > { %6824 = vadd.xlane.f32.xlu0 %v6823_v49  ;;  %v13838_v55 = vpop.permute.xlu0 %7067 }
0x1a75   : > { %10237 = vmatprep.subr.msk.bf16.mxu0 %vm1540_vm3, %v13838_v55  ;;  %10946 = vpow2.f32 %v6807_v23 }
0x1a76   : > { %v13844_v18 = vpop.eup %10938  ;;  %6830 = vadd.xlane.f32.xlu1 %v6829_v39 }
0x1a77   : > { %v6835_v61 = vsel %vm1388_vm5, %v13844_v18, 0.0 }
0x1a78   : > { %6836 = vadd.xlane.f32.xlu0 %v6835_v61 }
0x1a7a   : > { %v13848_v30 = vpop.eup %10940 }
0x1a7b   : > { %v6832_v6 = vsel %vm1388_vm5, %v13848_v30, 0.0 }
0x1a7c   : > { %6833 = vadd.xlane.f32.xlu0 %v6832_v6  ;;  %v13859_v49 = vpop.eup %10942  ;;  %v7134_v6 = vpop.permute.xlu1 %7133 }
0x1a7d   : > { %v6844_v39 = vsel %vm1388_vm5, %v13859_v49, 0.0 }
0x1a80   : > { %v13863_v32 = vpop.eup %10944 }
0x1a81   : > { %v6838_v35 = vsel %vm1388_vm5, %v13863_v32, 0.0 }
0x1a82   : > { %v13865_v61 = vpop.eup %10946 }
0x1a83   : > { %v6841_v26 = vsel %vm1388_vm5, %v13865_v61, 0.0 }
0x1a87   : > { %7131 = vrot.lane.b32.xlu1 %v13129_v22, %s14743_s27 }
0x1a92   : > { %7065 = vrot.lane.b32.xlu0 %v13155_v45, %s14742_s25 }
0x1aab   : > { %6845 = vadd.xlane.f32.xlu1 %v6844_v39 }
0x1aaf   : > { %6839 = vadd.xlane.f32.xlu1 %v6838_v35 }
0x1ab1   : > { %6842 = vadd.xlane.f32.xlu0 %v6841_v26 }
0x1ac0   : > { %7127 = vrot.lane.b32.xlu1 %v13129_v22, %s14744_s20 }
0x1ac4   : > { %7269 = vrot.lane.b32.xlu1 %v13147_v31, %s14743_s27 }
0x1ac7   : > { %7201 = vrot.lane.b32.xlu0 %v13139_v3, %s14743_s27 }
0x1ac8   : > { %7195 = vrot.lane.b32.xlu1 %v13135_v40, %s14744_s20 }
0x1acb   : > { %7199 = vrot.lane.b32.xlu0 %v13135_v40, %s14743_s27 }
0x1acc   : > { %7337 = vrot.lane.b32.xlu1 %v13153_v34, %s14743_s27 }
0x1acf   : > { %7129 = vrot.lane.b32.xlu0 %v13125_v58, %s14744_s20 }
0x1ad0   : > { %7263 = vrot.lane.b32.xlu1 %v13145_v9, %s14744_s20 }
0x1ad3   : > { %7267 = vrot.lane.b32.xlu0 %v13145_v9, %s14743_s27 }
0x1ad4   : > { %7335 = vrot.lane.b32.xlu1 %v13155_v45, %s14743_s27 }
0x1ad7   : > { %7197 = vrot.lane.b32.xlu0 %v13139_v3, %s14744_s20 }
0x1ad8   : > { %7333 = vrot.lane.b32.xlu1 %v13153_v34, %s14744_s20 }
0x1adb   : > { %7265 = vrot.lane.b32.xlu0 %v13147_v31, %s14744_s20 }
0x1adf   : > { %7331 = vrot.lane.b32.xlu0 %v13155_v45, %s14744_s20 }
0x1ae0   : > { %v6819_v43 = vpop.xlane.xlu0 %6818 }
0x1ae1   : > { %10948 = vrcp.f32 %v6819_v43  ;;  %v7015_v43 = vsel %vm1540_vm3, %v13693_v51, 0 }
0x1ae4   : > { %v6813_v60 = vpop.xlane.xlu0 %6812 }
0x1ae5   : > { %10950 = vrcp.f32 %v6813_v60 }
0x1ae6   : > { %v6816_v24 = vpop.xlane.xlu1 %6815 }
0x1ae7   : > { %10952 = vrcp.f32 %v6816_v24 }
0x1aee   : > { %v10949_v15 = vpop.eup %10948 }
0x1aef   : > { %v6861_v38 = vmul.f32 %v10949_v15, %v13806_v16 }
0x1af1   : > { %v6872_v26 = vpack.c.bf16 %v6861_v38, %v6861_v38 }
0x1af2   : > { %v10951_v48 = vpop.eup %10950 }
0x1af3   : > { %v6859_v59 = vmul.f32 %v10951_v48, %v13810_v52 }
0x1af4   : > { %v10953_v11 = vpop.eup %10952 }
0x1af5   : > { %v6860_v23 = vmul.f32 %v10953_v11, %v13814_v41 }
0x1af7   : > { %v6828_v39 = vpop.xlane.xlu1 %6827  ;;  %v6871_v35 = vpack.c.bf16 %v6860_v23, %v6859_v59 }
0x1af8   : > { %10954 = vrcp.f32 %v6828_v39 }
0x1af9   : > { %10002 = vmatprep.mubr.msk.bf16.mxu1 %vm1388_vm5, %v6871_v35 }
0x1afa   : > { %10003 = vmatmul.mubr.msk.bf16.vlgmr.msra.gmra.mxu1 %vm1388_vm5, %v6872_v26  ;;  %v7077_v26 = vsel %vm1540_vm3, %v13838_v55, 0 }
0x1afb   : > { %10015 = vmatpush3.bf16.msra.mxu1 %v7015_v43  ;;  %v6822_v60 = vpop.xlane.xlu1 %6821 }
0x1afc   : > { %10956 = vrcp.f32 %v6822_v60  ;;  %10016 = vmatprep.subr.bf16.mxu1 %v13802_v4 }
0x1afd   : > { %v6825_v16 = vpop.xlane.xlu0 %6824 }
0x1afe   : > { %10958 = vrcp.f32 %v6825_v16 }
0x1aff   : > { %10017 = vmatpush3.bf16.msra.mxu1 %v13802_v4  ;;  %v6831_v52 = vpop.xlane.xlu1 %6830 }
0x1b00   : > { %10238 = vmatprep.subr.msk.bf16.mxu1 %vm1105_vm2, %v7134_v6 }
0x1b01   : > { %v6837_v41 = vpop.xlane.xlu0 %6836 }
0x1b02   : > { %10960 = vrcp.f32 %v6837_v41  ;;  %v7145_v41 = vsel %vm1105_vm2, %v7134_v6, 0 }
0x1b03   : > { %10962 = vrcp.f32 %v6831_v52  ;;  %v7132_v55 = vpop.permute.xlu1 %7131 }
0x1b05   : > { %v6834_v24 = vpop.xlane.xlu0 %6833  ;;  %v10955_v15 = vpop.eup %10954 }
0x1b06   : > { %10964 = vrcp.f32 %v6834_v24  ;;  %v6864_v11 = vmul.f32 %v10955_v15, %v13824_v14 }
0x1b08   : > { %v6874_v39 = vpack.c.bf16 %v6864_v11, %v6864_v11 }
0x1b09   : > { %v10957_v51 = vpop.eup %10956  ;;  %v7066_v43 = vpop.permute.xlu0 %7065 }
0x1b0a   : > { %v6862_v38 = vmul.f32 %v10957_v51, %v13828_v54 }
0x1b0b   : > { %v10959_v48 = vpop.eup %10958 }
0x1b0c   : > { %v6863_v59 = vmul.f32 %v10959_v48, %v13834_v57 }
0x1b0e   : > { %v6873_v23 = vpack.c.bf16 %v6863_v59, %v6862_v38 }
0x1b0f   : > { %v10961_v4 = vpop.eup %10960 }
0x1b10   : > { %10010 = vmatprep.mubr.msk.bf16.mxu0 %vm1388_vm5, %v6873_v23  ;;  %v10963_v35 = vpop.eup %10962  ;;  %v6867_v14 = vmul.f32 %v10961_v4, %v13844_v18  ;;  %v7142_v18 = vsel %vm1105_vm2, %v7132_v55, 0 }
0x1b11   : > { %10011 = vmatmul.mubr.msk.bf16.vlgmr.msra.gmra.mxu0 %vm1388_vm5, %v6874_v39  ;;  %v6865_v54 = vmul.f32 %v10963_v35, %v13830_v63 }
0x1b12   : > { %10023 = vmatpush3.bf16.msra.mxu0 %v7077_v26  ;;  %v6876_v52 = vpack.c.bf16 %v6867_v14, %v6867_v14 }
0x1b13   : > { %v10965_v60 = vpop.eup %10964  ;;  %10024 = vmatprep.subr.bf16.mxu0 %v7066_v43 }
0x1b14   : > { %v6866_v57 = vmul.f32 %v10965_v60, %v13848_v30 }
0x1b16   : > { %10025 = vmatpush3.bf16.msra.mxu0 %v7066_v43  ;;  %v6875_v16 = vpack.c.bf16 %v6866_v57, %v6865_v54 }
0x1b18   : > { %10018 = vmatprep.mubr.msk.bf16.mxu1 %vm1388_vm5, %v6875_v16 }
0x1b19   : > { %10019 = vmatmul.mubr.msk.bf16.vlgmr.msra.gmra.mxu1 %vm1388_vm5, %v6876_v52 }
0x1b1a   : > { %10031 = vmatpush3.bf16.xpose.msra.mxu1 %v7145_v41 }
0x1b1b   : > { %10239 = vmatprep.subr.msk.bf16.mxu1 %vm1105_vm2, %v7132_v55 }
0x1b22   : > { %10033 = vmatpush3.bf16.xpose.msra.mxu1 %v7142_v18 }
0x1b34   : > { %v6846_v24 = vpop.xlane.xlu1 %6845 }
0x1b35   : > { %10966 = vrcp.f32 %v6846_v24 }
0x1b38   : > { %v6840_v63 = vpop.xlane.xlu1 %6839 }
0x1b39   : > { %10968 = vrcp.f32 %v6840_v63 }
0x1b3a   : > { %v6843_v30 = vpop.xlane.xlu0 %6842 }
0x1b3b   : > { %10970 = vrcp.f32 %v6843_v30 }
0x1b3c   : > { %v7128_v15 = vpop.permute.xlu1 %7127 }
0x1b3d   : > { %10034 = vmatprep.mubr.msk.bf16.mxu1 %vm1105_vm2, %v7128_v15 }
0x1b3e   : > { %v7202_v51 = vpop.permute.xlu0 %7201 }
0x1b3f   : > { %10240 = vmatprep.subr.msk.bf16.mxu0 %vm1105_vm2, %v7202_v51  ;;  %v7213_v52 = vsel %vm1105_vm2, %v7202_v51, 0 }
0x1b40   : > { %v7270_v6 = vpop.permute.xlu1 %7269 }
0x1b41   : > { %10242 = vmatprep.subr.msk.bf16.mxu1 %vm1105_vm2, %v7270_v6  ;;  %v7281_v39 = vsel %vm1105_vm2, %v7270_v6, 0 }
0x1b42   : > { %v7200_v48 = vpop.permute.xlu0 %7199  ;;  %v10967_v38 = vpop.eup %10966 }
0x1b43   : > { %v6870_v35 = vmul.f32 %v10967_v38, %v13859_v49 }
0x1b44   : > { %v7196_v11 = vpop.permute.xlu1 %7195 }
0x1b45   : > { %v6878_v57 = vpack.c.bf16 %v6870_v35, %v6870_v35 }
0x1b46   : > { %v10969_v59 = vpop.eup %10968  ;;  %v7130_v23 = vpop.permute.xlu0 %7129 }
0x1b47   : > { %10035 = vmatmul.mubr.msk.bf16.vlgmr.msra.gmra.mxu1 %vm1105_vm2, %v7130_v23  ;;  %v6868_v43 = vmul.f32 %v10969_v59, %v13863_v32 }
0x1b48   : > { %v10971_v4 = vpop.eup %10970  ;;  %10047 = vmatpush3.bf16.xpose.msra.mxu1 %v7281_v39  ;;  %v7338_v26 = vpop.permute.xlu1 %7337 }
0x1b49   : > { %v6869_v60 = vmul.f32 %v10971_v4, %v13865_v61  ;;  %v7210_v61 = vsel %vm1105_vm2, %v7200_v48, 0  ;;  %v7349_v55 = vsel %vm1105_vm2, %v7338_v26, 0 }
0x1b4a   : > { %v7268_v14 = vpop.permute.xlu0 %7267 }
0x1b4b   : > { %10243 = vmatprep.subr.msk.bf16.mxu1 %vm1105_vm2, %v7268_v14  ;;  %v6877_v54 = vpack.c.bf16 %v6869_v60, %v6868_v43  ;;  %v7278_v49 = vsel %vm1105_vm2, %v7268_v14, 0 }
0x1b4c   : > { %v7264_v16 = vpop.permute.xlu1 %7263 }
0x1b4d   : > { %10026 = vmatprep.mubr.msk.bf16.mxu0 %vm1388_vm5, %v6877_v54  ;;  %10050 = vmatprep.mubr.msk.bf16.mxu1 %vm1105_vm2, %v7264_v16 }
0x1b4e   : > { %10027 = vmatmul.mubr.msk.bf16.vlgmr.msra.gmra.mxu0 %vm1388_vm5, %v6878_v57  ;;  %v7198_v32 = vpop.permute.xlu0 %7197 }
0x1b4f   : > { %10039 = vmatpush3.bf16.xpose.msra.mxu0 %v7213_v52  ;;  %10042 = vmatprep.mubr.msk.bf16.mxu0 %vm1105_vm2, %v7196_v11 }
0x1b50   : > { %10241 = vmatprep.subr.msk.bf16.mxu0 %vm1105_vm2, %v7200_v48  ;;  %10049 = vmatpush3.bf16.xpose.msra.mxu1 %v7278_v49  ;;  %v7336_v24 = vpop.permute.xlu1 %7335 }
0x1b51   : > { %v7346_v63 = vsel %vm1105_vm2, %v7336_v24, 0 }
0x1b52   : > { %v7266_v41 = vpop.permute.xlu0 %7265 }
0x1b54   : > { %v7334_v30 = vpop.permute.xlu1 %7333 }
0x1b56   : > { %v7332_v18 = vpop.permute.xlu0 %7331 }
0x1b57   : > { %10041 = vmatpush3.bf16.xpose.msra.mxu0 %v7210_v61  ;;  %10051 = vmatmul.mubr.msk.bf16.vlgmr.msra.gmra.mxu1 %vm1105_vm2, %v7266_v41 }
0x1b58   : > { %10244 = vmatprep.subr.msk.bf16.mxu0 %vm1105_vm2, %v7338_v26 }
0x1b5e   : > { %10043 = vmatmul.mubr.msk.bf16.vlgmr.msra.gmra.mxu0 %vm1105_vm2, %v7198_v32 }
0x1b5f   : > { %10055 = vmatpush3.bf16.xpose.msra.mxu0 %v7349_v55  ;;  %10058 = vmatprep.mubr.msk.bf16.mxu0 %vm1105_vm2, %v7332_v18 }
0x1b60   : > { %10245 = vmatprep.subr.msk.bf16.mxu0 %vm1105_vm2, %v7336_v24 }
0x1b67   : > { %10057 = vmatpush3.bf16.xpose.msra.mxu0 %v7346_v63 }
0x1b6e   : > { %10059 = vmatmul.mubr.msk.bf16.vlgmr.msra.gmra.mxu0 %vm1105_vm2, %v7334_v30 }
0x1bba   : > { %v13949_v15 = vpop.f32.mrf.mxu1 }
0x1bbc   : > { %v13951_v51 = vpop.f32.mrf.mxu1 }
0x1bbe   : > { %v10005_v6 = vpop.f32.mrf.mxu1 }
0x1bc0   : > { %v13953_v48 = vpop.f32.mrf.mxu1 }
0x1bd1   : > { %v13957_v38 = vpop.f32.mrf.mxu0 }
0x1bd3   : > { %v13959_v59 = vpop.f32.mrf.mxu0 }
0x1bd5   : > { %v10013_v39 = vpop.f32.mrf.mxu0 }
0x1bd7   : > { %v13963_v4 = vpop.f32.mrf.mxu0 }
0x1bd9   : > { %v13967_v26 = vpop.f32.mrf.mxu1 }
0x1bdb   : > { %v13969_v43 = vpop.f32.mrf.mxu1 }
0x1bdd   : > { %v10021_v60 = vpop.f32.mrf.mxu1 }
0x1bdf   : > { %v13971_v14 = vpop.f32.mrf.mxu1 }
0x1c07   : > { %v10036_v57 = vpop.f32.mrf.mxu1 }
0x1c08   : > { %v7401_v16 = vmul.f32 0.35355338, %v10036_v57 }
0x1c09   : > { %v7181_v52 = vpop.f32.mrf.mxu1 }
0x1c0a   : > { %v13976_v49 = vadd.f32 %v7401_v16, %v14736_v46  ;;  %v7399_v32 = vmul.f32 0.35355338, %v7181_v52 }
0x1c0b   : > { %v10037_v61 = vpop.f32.mrf.mxu1 }
0x1c0c   : > { %v13979_v41 = vadd.f32 %v7399_v32, %v14736_v46  ;;  %v7429_v55 = vsel %vm1388_vm5, %v13976_v49, -inf }
0x1c0d   : > { %7430 = vmax.xlane.f32.xlu0 %v7429_v55  ;;  %v7184_v18 = vpop.f32.mrf.mxu1 }
0x1c0e   : > { %v7400_v24 = vmul.f32 0.35355338, %v7184_v18  ;;  %v13983_v63 = vpop.f32.mrf.mxu0  ;;  %v7423_v39 = vsel %vm1388_vm5, %v13979_v41, -inf }
0x1c10   : > { %v13986_v30 = vadd.f32 %v7400_v24, %v14736_v46  ;;  %v13988_v6 = vpop.f32.mrf.mxu0 }
0x1c11   : > { %7424 = vmax.xlane.f32.xlu0 %v7423_v39 }
0x1c12   : > { %v10029_v57 = vpop.f32.mrf.mxu0  ;;  %v7426_v16 = vsel %vm1388_vm5, %v13986_v30, -inf }
0x1c13   : > { %7427 = vmax.xlane.f32.xlu1 %v7426_v16 }
0x1c14   : > { %v13996_v52 = vpop.f32.mrf.mxu0 }
0x1c17   : > { %v10052_v61 = vpop.f32.mrf.mxu1 }
0x1c19   : > { %v7317_v55 = vpop.f32.mrf.mxu1 }
0x1c1a   : > { %v7405_v56 = vmul.f32 0.35355338, %v7317_v55 }
0x1c1b   : > { %v10053_v18 = vpop.f32.mrf.mxu1 }
0x1c1d   : > { %v7320_v24 = vpop.f32.mrf.mxu1 }
0x1c1e   : > { %v10044_v35 = vpop.f32.mrf.mxu0  ;;  %v7406_v54 = vmul.f32 0.35355338, %v7320_v24 }
0x1c1f   : > { %v7404_v11 = vmul.f32 0.35355338, %v10044_v35 }
0x1c20   : > { %v7249_v23 = vpop.f32.mrf.mxu0  ;;  %v14004_v16 = vadd.f32 %v7406_v54, %v14736_v46  ;;  %v7407_v54 = vmul.f32 0.35355338, %v10052_v61 }
0x1c21   : > { %v14001_v39 = vadd.f32 %v7404_v11, %v14736_v46  ;;  %v7402_v57 = vmul.f32 0.35355338, %v7249_v23 }
0x1c22   : > { %v10045_v60 = vpop.f32.mrf.mxu0  ;;  %v7444_v23 = vsel %vm1388_vm5, %v14004_v16, -inf  ;;  %v14024_v55 = vadd.f32 %v7407_v54, %v14736_v46 }
0x1c23   : > { %v14007_v27 = vadd.f32 %v7402_v57, %v14736_v46  ;;  %v7438_v32 = vsel %vm1388_vm5, %v14001_v39, -inf  ;;  %v14019_v60 = vadd.f32 %v7405_v56, %v14736_v46 }
0x1c24   : > { %7439 = vmax.xlane.f32.xlu1 %v7438_v32  ;;  %v7252_v18 = vpop.f32.mrf.mxu0  ;;  %v7447_v61 = vsel %vm1388_vm5, %v14024_v55, -inf }
0x1c25   : > { %v7403_v24 = vmul.f32 0.35355338, %v7252_v18  ;;  %v7432_v35 = vsel %vm1388_vm5, %v14007_v27, -inf  ;;  %v7441_v57 = vsel %vm1388_vm5, %v14019_v60, -inf }
0x1c26   : > { %7433 = vmax.xlane.f32.xlu0 %v7432_v35 }
0x1c27   : > { %v14014_v11 = vadd.f32 %v7403_v24, %v14736_v46 }
0x1c28   : > { %7445 = vmax.xlane.f32.xlu1 %v7444_v23 }
0x1c29   : > { %v7435_v32 = vsel %vm1388_vm5, %v14014_v11, -inf }
0x1c2a   : > { %7436 = vmax.xlane.f32.xlu0 %v7435_v32 }
0x1c2e   : > { %7442 = vmax.xlane.f32.xlu0 %v7441_v57  ;;  %v10060_v18 = vpop.f32.mrf.mxu0 }
0x1c2f   : > { %v7410_v35 = vmul.f32 0.35355338, %v10060_v18 }
0x1c30   : > { %v7385_v24 = vpop.f32.mrf.mxu0 }
0x1c31   : > { %v7408_v10 = vmul.f32 0.35355338, %v7385_v24  ;;  %v14034_v54 = vadd.f32 %v7410_v35, %v14736_v46 }
0x1c32   : > { %7448 = vmax.xlane.f32.xlu0 %v7447_v61  ;;  %v10061_v56 = vpop.f32.mrf.mxu0 }
0x1c33   : > { %v14031_v23 = vadd.f32 %v7408_v10, %v14736_v46  ;;  %v7456_v24 = vsel %vm1388_vm5, %v14034_v54, -inf }
0x1c34   : > { %v7388_v32 = vpop.f32.mrf.mxu0 }
0x1c35   : > { %v7409_v28 = vmul.f32 0.35355338, %v7388_v32  ;;  %v7450_v57 = vsel %vm1388_vm5, %v14031_v23, -inf }
0x1c36   : > { %7451 = vmax.xlane.f32.xlu1 %v7450_v57 }
0x1c37   : > { %v14039_v18 = vadd.f32 %v7409_v28, %v14736_v46 }
0x1c39   : > { %v7453_v61 = vsel %vm1388_vm5, %v14039_v18, -inf }
0x1c3a   : > { %7457 = vmax.xlane.f32.xlu1 %v7456_v24  ;;  %7454 = vmax.xlane.f32.xlu0 %v7453_v61 }
0x1c4b   : > { %7563 = vrot.lane.b32.xlu1 %v13129_v22, %s14745_s16 }
0x1c4f   : > { %7627 = vrot.lane.b32.xlu1 %v13139_v3, %s14745_s16 }
0x1c50   : > { %7565 = vrot.lane.b32.xlu0 %v13125_v58, %s14745_s16 }
0x1c53   : > { %7625 = vrot.lane.b32.xlu1 %v13135_v40, %s14745_s16 }
0x1c54   : > { %7689 = vrot.lane.b32.xlu0 %v13147_v31, %s14745_s16 }
0x1c57   : > { %7687 = vrot.lane.b32.xlu1 %v13145_v9, %s14745_s16 }
0x1c96   : > { %v7431_v10 = vpop.xlane.xlu0 %7430 }
0x1c97   : > { %v7461_v46 = vsub.f32 %v13976_v49, %v7431_v10 }
0x1c99   : > { %v7475_v28 = vmul.f32 1.442695, %v7461_v46 }
0x1c9a   : > { %v7425_v22 = vpop.xlane.xlu0 %7424 }
0x1c9b   : > { %10972 = vpow2.f32 %v7475_v28  ;;  %v7459_v3 = vsub.f32 %v13979_v41, %v7425_v22 }
0x1c9c   : > { %v7428_v35 = vpop.xlane.xlu1 %7427 }
0x1c9d   : > { %v7471_v56 = vmul.f32 1.442695, %v7459_v3  ;;  %v7460_v58 = vsub.f32 %v13986_v30, %v7428_v35 }
0x1c9f   : > { %10974 = vpow2.f32 %v7471_v56  ;;  %v7473_v40 = vmul.f32 1.442695, %v7460_v58 }
0x1ca1   : > { %10976 = vpow2.f32 %v7473_v40 }
0x1ca8   : > { %v14060_v32 = vpop.eup %10972 }
0x1ca9   : > { %v7501_v9 = vsel %vm1388_vm5, %v14060_v32, 0.0 }
0x1caa   : > { %7502 = vadd.xlane.f32.xlu0 %v7501_v9 }
0x1cac   : > { %v14064_v31 = vpop.eup %10974 }
0x1cad   : > { %v7440_v49 = vpop.xlane.xlu1 %7439  ;;  %v7495_v57 = vsel %vm1388_vm5, %v14064_v31, 0.0 }
0x1cae   : > { %v14068_v41 = vpop.eup %10976  ;;  %v7464_v24 = vsub.f32 %v14001_v39, %v7440_v49  ;;  %7496 = vadd.xlane.f32.xlu0 %v7495_v57 }
0x1caf   : > { %v7434_v30 = vpop.xlane.xlu0 %7433  ;;  %v7498_v61 = vsel %vm1388_vm5, %v14068_v41, 0.0 }
0x1cb0   : > { %v7481_v10 = vmul.f32 1.442695, %v7464_v24  ;;  %v7462_v46 = vsub.f32 %v14007_v27, %v7434_v30  ;;  %7499 = vadd.xlane.f32.xlu1 %v7498_v61 }
0x1cb1   : > { %v7446_v28 = vpop.xlane.xlu1 %7445 }
0x1cb2   : > { %10978 = vpow2.f32 %v7481_v10  ;;  %v7477_v22 = vmul.f32 1.442695, %v7462_v46  ;;  %v7466_v3 = vsub.f32 %v14004_v16, %v7446_v28 }
0x1cb3   : > { %v7437_v35 = vpop.xlane.xlu0 %7436 }
0x1cb4   : > { %10980 = vpow2.f32 %v7477_v22  ;;  %v7485_v56 = vmul.f32 1.442695, %v7466_v3  ;;  %v7463_v58 = vsub.f32 %v14014_v11, %v7437_v35 }
0x1cb6   : > { %v7479_v39 = vmul.f32 1.442695, %v7463_v58  ;;  %10982 = vpow2.f32 %v7485_v56 }
0x1cb7   : > { %v7443_v40 = vpop.xlane.xlu0 %7442 }
0x1cb8   : > { %10984 = vpow2.f32 %v7479_v39  ;;  %v7465_v9 = vsub.f32 %v14019_v60, %v7443_v40 }
0x1cba   : > { %v7483_v57 = vmul.f32 1.442695, %v7465_v9 }
0x1cbb   : > { %v7449_v49 = vpop.xlane.xlu0 %7448 }
0x1cbc   : > { %v7467_v27 = vsub.f32 %v14024_v55, %v7449_v49 }
0x1cbe   : > { %v7487_v24 = vmul.f32 1.442695, %v7467_v27 }
0x1cbf   : > { %v14078_v30 = vpop.eup %10978  ;;  %v7452_v61 = vpop.xlane.xlu1 %7451 }
0x1cc0   : > { %10986 = vpow2.f32 %v7487_v24  ;;  %v7510_v16 = vsel %vm1388_vm5, %v14078_v30, 0.0  ;;  %v7468_v11 = vsub.f32 %v14031_v23, %v7452_v61 }
0x1cc1   : > { %v14082_v10 = vpop.eup %10980  ;;  %7511 = vadd.xlane.f32.xlu1 %v7510_v16  ;;  %10988 = vpow2.f32 %v7483_v57 }
0x1cc2   : > { %v7504_v3 = vsel %vm1388_vm5, %v14082_v10, 0.0  ;;  %v7489_v23 = vmul.f32 1.442695, %v7468_v11 }
0x1cc3   : > { %v7455_v46 = vpop.xlane.xlu0 %7454  ;;  %v7458_v60 = vpop.xlane.xlu1 %7457 }
0x1cc4   : > { %v14085_v28 = vpop.eup %10982  ;;  %v7469_v55 = vsub.f32 %v14039_v18, %v7455_v46  ;;  %v7470_v22 = vsub.f32 %v14034_v54, %v7458_v60 }
0x1cc5   : > { %v14091_v35 = vpop.eup %10984  ;;  %7505 = vadd.xlane.f32.xlu1 %v7504_v3  ;;  %v7516_v54 = vsel %vm1388_vm5, %v14085_v28, 0.0 }
0x1cc6   : > { %v7491_v56 = vmul.f32 1.442695, %v7469_v55  ;;  %v7493_v58 = vmul.f32 1.442695, %v7470_v22  ;;  %v7507_v39 = vsel %vm1388_vm5, %v14091_v35, 0.0 }
0x1cc7   : > { %7508 = vadd.xlane.f32.xlu0 %v7507_v39  ;;  %v7566_v40 = vpop.permute.xlu0 %7565  ;;  %v7564_v9 = vpop.permute.xlu1 %7563  ;;  %v14747_v39 = vpack.i.bf16 %v13711_v17, %v13701_v12  ;;  %v14753_v12 = vpack.i.bf16 %v13709_v21, %v13715_v47 }
0x1cc8   : > { %10990 = vpow2.f32 %v7491_v56  ;;  %v7575_v18 = vsel %vm1540_vm3, %v7566_v40, 0  ;;  %10246 = vmatprep.subr.msk.bf16.mxu1 %vm1540_vm3, %v7566_v40  ;;  %v14750_v40 = vpack.i.bf16 %v13959_v59, %v13949_v15 }
0x1cc9   : > { %10992 = vpow2.f32 %v7493_v58  ;;  %10063 = vmatpush3.bf16.msra.mxu1 %v7575_v18  ;;  %7517 = vadd.xlane.f32.xlu1 %v7516_v54 }
0x1cca   : > { %10064 = vmatprep.subr.bf16.mxu1 %v7564_v9  ;;  %10994 = vpow2.f32 %v7489_v23  ;;  %v14748_v23 = vpack.i.bf16 %v13705_v44, %v13703_v25  ;;  %v14754_v25 = vpack.i.bf16 %v13971_v14, %v13969_v43  ;;  %v14755_v44 = vpack.i.bf16 %v13957_v38, %v13963_v4 }
0x1ccb   : > { %v7628_v49 = vpop.permute.xlu1 %7627  ;;  %v7690_v24 = vpop.permute.xlu0 %7689 }
0x1ccc   : > { %v7637_v27 = vsel %vm1540_vm3, %v7628_v49, 0  ;;  %10247 = vmatprep.subr.msk.bf16.mxu0 %vm1540_vm3, %v7628_v49  ;;  %v7699_v4 = vsel %vm1540_vm3, %v7690_v24, 0 }
0x1ccd   : > { %v14101_v57 = vpop.eup %10986  ;;  %10065 = vmatpush3.bf16.msra.mxu1 %v7564_v9  ;;  %10071 = vmatpush3.bf16.msra.mxu0 %v7637_v27 }
0x1cce   : > { %10248 = vmatprep.subr.msk.bf16.mxu1 %vm1540_vm3, %v7690_v24  ;;  %v7519_v61 = vsel %vm1388_vm5, %v14101_v57, 0.0  ;;  %v14106_v16 = vpop.eup %10988 }
0x1ccf   : > { %7520 = vadd.xlane.f32.xlu0 %v7519_v61  ;;  %v7626_v11 = vpop.permute.xlu1 %7625  ;;  %v7513_v46 = vsel %vm1388_vm5, %v14106_v16, 0.0 }
0x1cd0   : > { %10072 = vmatprep.subr.bf16.mxu0 %v7626_v11 }
0x1cd1   : > { %10073 = vmatpush3.bf16.msra.mxu0 %v7626_v11 }
0x1cd3   : > { %7514 = vadd.xlane.f32.xlu0 %v7513_v46  ;;  %v7688_v15 = vpop.permute.xlu1 %7687 }
0x1cd5   : > { %v14110_v60 = vpop.eup %10990 }
0x1cd6   : > { %v14112_v55 = vpop.eup %10992  ;;  %v7525_v22 = vsel %vm1388_vm5, %v14110_v60, 0.0 }
0x1cd7   : > { %7526 = vadd.xlane.f32.xlu0 %v7525_v22  ;;  %v7528_v3 = vsel %vm1388_vm5, %v14112_v55, 0.0  ;;  %v14118_v56 = vpop.eup %10994 }
0x1cd8   : > { %7529 = vadd.xlane.f32.xlu1 %v7528_v3  ;;  %v7522_v58 = vsel %vm1388_vm5, %v14118_v56, 0.0 }
0x1cdc   : > { %7523 = vadd.xlane.f32.xlu1 %v7522_v58 }
0x1ced   : > { %7749 = vrot.lane.b32.xlu1 %v13155_v45, %s14745_s16  ;;  %7751 = vrot.lane.b32.xlu0 %v13153_v34, %s14745_s16  ;;  %v14751_v45 = vpack.i.bf16 %v13953_v48, %v13951_v51  ;;  %v14752_v34 = vpack.i.bf16 %v13723_v62, %v13721_v50 }
0x1cf1   : > { %10404 = vrot.lane.b32.xlu1 %v14747_v39, %s14746_s18  ;;  %10399 = vrot.lane.b32.xlu0 %v14748_v23, %s14746_s18 }
0x1cf5   : > { %10414 = vrot.lane.b32.xlu1 %v14750_v40, %s14749_s30  ;;  %10409 = vrot.lane.b32.xlu0 %v14751_v45, %s14749_s30 }
0x1cf9   : > { %10424 = vrot.lane.b32.xlu1 %v14752_v34, %s14746_s18  ;;  %10419 = vrot.lane.b32.xlu0 %v14753_v12, %s14746_s18 }
0x1cfd   : > { %10434 = vrot.lane.b32.xlu1 %v14754_v25, %s14749_s30  ;;  %10429 = vrot.lane.b32.xlu0 %v14755_v44, %s14749_s30 }
0x1d33   : > { %v7503_v17 = vpop.xlane.xlu0 %7502 }
0x1d34   : > { %10996 = vrcp.f32 %v7503_v17 }
0x1d37   : > { %v7497_v50 = vpop.xlane.xlu0 %7496 }
0x1d38   : > { %10998 = vrcp.f32 %v7497_v50 }
0x1d39   : > { %v7500_v62 = vpop.xlane.xlu1 %7499 }
0x1d3a   : > { %11000 = vrcp.f32 %v7500_v62 }
0x1d41   : > { %v10997_v51 = vpop.eup %10996 }
0x1d42   : > { %v7545_v48 = vmul.f32 %v10997_v51, %v14060_v32 }
0x1d44   : > { %v7556_v38 = vpack.c.bf16 %v7545_v48, %v7545_v48 }
0x1d45   : > { %v10999_v21 = vpop.eup %10998 }
0x1d46   : > { %v7543_v59 = vmul.f32 %v10999_v21, %v14064_v31 }
0x1d47   : > { %v11001_v47 = vpop.eup %11000 }
0x1d48   : > { %v7544_v43 = vmul.f32 %v11001_v47, %v14068_v41 }
0x1d4a   : > { %v7512_v14 = vpop.xlane.xlu1 %7511  ;;  %v7555_v9 = vpack.c.bf16 %v7544_v43, %v7543_v59  ;;  %v10530_v43 = vld [vmem:[%s14610_s6 + $0x18] sm:$0xff]  }
0x1d4b   : > { %11002 = vrcp.f32 %v7512_v14 }
0x1d4c   : > { %10066 = vmatprep.mubr.msk.bf16.mxu1 %vm1388_vm5, %v7555_v9 }
0x1d4d   : > { %10067 = vmatmul.mubr.msk.bf16.vlgmr.msra.gmra.mxu1 %vm1388_vm5, %v7556_v38 }
0x1d4e   : > { %10079 = vmatpush3.bf16.msra.mxu1 %v7699_v4  ;;  %v7506_v18 = vpop.xlane.xlu1 %7505 }
0x1d4f   : > { %11004 = vrcp.f32 %v7506_v18  ;;  %10080 = vmatprep.subr.bf16.mxu1 %v7688_v15 }
0x1d50   : > { %v7509_v54 = vpop.xlane.xlu0 %7508 }
0x1d51   : > { %11006 = vrcp.f32 %v7509_v54 }
0x1d52   : > { %10081 = vmatpush3.bf16.msra.mxu1 %v7688_v15  ;;  %v7518_v32 = vpop.xlane.xlu1 %7517 }
0x1d53   : > { %10094 = vmatprep.subr.bf16.mxu1 %v10530_v43 }
0x1d58   : > { %v7521_v31 = vpop.xlane.xlu0 %7520  ;;  %v11003_v41 = vpop.eup %11002 }
0x1d59   : > { %11008 = vrcp.f32 %v7521_v31  ;;  %v7548_v24 = vmul.f32 %v11003_v41, %v14078_v30  ;;  %v14758_v41 = vpack.i.bf16 %v13735_v42, %v13748_v29  ;;  %v14760_v42 = vpack.i.bf16 %v13983_v63, %v13996_v52 }
0x1d5a   : > { %11010 = vrcp.f32 %v7518_v32 }
0x1d5b   : > { %v7558_v39 = vpack.c.bf16 %v7548_v24, %v7548_v24 }
0x1d5c   : > { %v11005_v49 = vpop.eup %11004  ;;  %v7515_v27 = vpop.xlane.xlu0 %7514 }
0x1d5d   : > { %11012 = vrcp.f32 %v7515_v27  ;;  %v7546_v11 = vmul.f32 %v11005_v49, %v14082_v10 }
0x1d5e   : > { %v11007_v61 = vpop.eup %11006 }
0x1d5f   : > { %v7547_v46 = vmul.f32 %v11007_v61, %v14091_v35 }
0x1d60   : > { %v7527_v22 = vpop.xlane.xlu0 %7526 }
0x1d61   : > { %v7530_v3 = vpop.xlane.xlu1 %7529  ;;  %v7557_v58 = vpack.c.bf16 %v7547_v46, %v7546_v11 }
0x1d62   : > { %11014 = vrcp.f32 %v7530_v3 }
0x1d63   : > { %10074 = vmatprep.mubr.msk.bf16.mxu0 %vm1388_vm5, %v7557_v58  ;;  %11016 = vrcp.f32 %v7527_v22 }
0x1d64   : > { %v7752_v23 = vpop.permute.xlu0 %7751  ;;  %10075 = vmatmul.mubr.msk.bf16.vlgmr.msra.gmra.mxu0 %vm1388_vm5, %v7558_v39 }
0x1d65   : > { %v7761_v40 = vsel %vm1540_vm3, %v7752_v23, 0  ;;  %v7524_v45 = vpop.xlane.xlu1 %7523  ;;  %10249 = vmatprep.subr.msk.bf16.mxu0 %vm1540_vm3, %v7752_v23 }
0x1d66   : > { %11018 = vrcp.f32 %v7524_v45  ;;  %10087 = vmatpush3.bf16.msra.mxu0 %v7761_v40  ;;  %v11009_v30 = vpop.eup %11008 }
0x1d67   : > { %v11011_v10 = vpop.eup %11010  ;;  %v7551_v12 = vmul.f32 %v11009_v30, %v14101_v57 }
0x1d68   : > { %v7550_v44 = vmul.f32 %v11011_v10, %v14085_v28 }
0x1d69   : > { %v7750_v35 = vpop.permute.xlu1 %7749  ;;  %v7560_v15 = vpack.c.bf16 %v7551_v12, %v7551_v12 }
0x1d6a   : > { %v11013_v34 = vpop.eup %11012  ;;  %10088 = vmatprep.subr.bf16.mxu0 %v7750_v35 }
0x1d6b   : > { %10089 = vmatpush3.bf16.msra.mxu0 %v7750_v35  ;;  %v7549_v25 = vmul.f32 %v11013_v34, %v14106_v16 }
0x1d6d   : > { %v7559_v17 = vpack.c.bf16 %v7550_v44, %v7549_v25  ;;  %v10405_v30 = vpop.permute.xlu1 %10404 }
0x1d6f   : > { %10082 = vmatprep.mubr.msk.bf16.mxu1 %vm1388_vm5, %v7559_v17  ;;  %v11015_v50 = vpop.eup %11014 }
0x1d70   : > { %10083 = vmatmul.mubr.msk.bf16.vlgmr.msra.gmra.mxu1 %vm1388_vm5, %v7560_v15  ;;  %v11017_v62 = vpop.eup %11016  ;;  %v7554_v21 = vmul.f32 %v11015_v50, %v14112_v55 }
0x1d71   : > { %v7553_v57 = vmul.f32 %v11017_v62, %v14110_v60  ;;  %10095 = vmatpush3.bf16.msra.mxu1 %v10530_v43  ;;  %v14757_v60 = vpack.i.bf16 %v13740_v36, %v13719_v8  ;;  %v14759_v36 = vpack.i.bf16 %v13988_v6, %v13967_v26  ;;  %v10400_v6 = vpop.permute.xlu0 %10399  ;;  %v10415_v15 = vpop.permute.xlu1 %10414 }
0x1d72   : > { %v7562_v59 = vpack.c.bf16 %v7554_v21, %v7554_v21  ;;  %v10402_v40 = vunpack.i.h.bf16 %v10400_v6  ;;  %v10401_v45 = vunpack.i.l.bf16 %v10400_v6 }
0x1d73   : > { %v11019_v51 = vpop.eup %11018 }
0x1d74   : > { %v7552_v47 = vmul.f32 %v11019_v51, %v14118_v56  ;;  %v10531_v56 = vld [vmem:[%s14610_s6 + $0x10] sm:$0xff]   ;;  %v7956_v63 = vsel %vm1105_vm2, %v13453_v37, %v10402_v40  ;;  %v7955_v52 = vsel %vm1105_vm2, %v13447_v33, %v10401_v45  ;;  %v10406_v37 = vunpack.i.l.bf16 %v10405_v30 }
0x1d75   : > { %10096 = vmatprep.subr.bf16.mxu1 %v10531_v56  ;;  %v10410_v58 = vpop.permute.xlu0 %10409  ;;  %v10425_v21 = vpop.permute.xlu1 %10424  ;;  %v10416_v33 = vunpack.i.l.bf16 %v10415_v15 }
0x1d76   : > { %v7561_v48 = vpack.c.bf16 %v7553_v57, %v7552_v47  ;;  %10097 = vmatpush3.bf16.msra.mxu1 %v10531_v56  ;;  %v10412_v10 = vunpack.i.h.bf16 %v10410_v58  ;;  %v10411_v35 = vunpack.i.l.bf16 %v10410_v58  ;;  %v10407_v47 = vunpack.i.h.bf16 %v10405_v30 }
0x1d78   : > { %10090 = vmatprep.mubr.msk.bf16.mxu0 %vm1388_vm5, %v7561_v48  ;;  %v7967_v44 = vsel %vm3986_vm6, %v7955_v52, %v10411_v35  ;;  %v7968_v17 = vsel %vm3986_vm6, %v7956_v63, %v10412_v10  ;;  %v10417_v48 = vunpack.i.h.bf16 %v10415_v15 }
0x1d79   : > { %10091 = vmatmul.mubr.msk.bf16.vlgmr.msra.gmra.mxu0 %vm1388_vm5, %v7562_v59  ;;  %v10420_v39 = vpop.permute.xlu0 %10419  ;;  %v10435_v57 = vpop.permute.xlu1 %10434  ;;  %v7958_v59 = vsel %vm1105_vm2, %v13451_v53, %v10407_v47 }
0x1d7d   : > { %v10430_v23 = vpop.permute.xlu0 %10429 }
0x1e0d   : > { %v10068_v28 = vpop.f32.mrf.mxu1 }
0x1e0f   : > { %v7611_v16 = vpop.f32.mrf.mxu1 }
0x1e11   : > { %v10069_v14 = vpop.f32.mrf.mxu1 }
0x1e12   : > { %v10422_v14 = vunpack.i.h.bf16 %v10420_v39 }
0x1e13   : > { %v7614_v55 = vpop.f32.mrf.mxu1 }
0x1e14   : > { %v10438_v9 = vpack.i.bf16 %v7614_v55, %v7611_v16  ;;  %v10421_v55 = vunpack.i.l.bf16 %v10420_v39 }
0x1e16   : > { %10439 = vrot.lane.b32.xlu0 %v10438_v9, %s14756_s29 }
0x1e1a   : > { %10444 = vrot.lane.b32.xlu0 %v14757_v60, %s14746_s18 }
0x1e24   : > { %v10076_v38 = vpop.f32.mrf.mxu0 }
0x1e26   : > { %v7673_v4 = vpop.f32.mrf.mxu0 }
0x1e27   : > { %v10448_v18 = vpack.i.bf16 %v7673_v4, %v10068_v28  ;;  %v7957_v28 = vsel %vm1105_vm2, %v13445_v13, %v10406_v37  ;;  %v10432_v4 = vunpack.i.h.bf16 %v10430_v23  ;;  %v7960_v13 = vsel %vm1105_vm2, %v13449_v2, %v10422_v14 }
0x1e28   : > { %v10077_v54 = vpop.f32.mrf.mxu0  ;;  %v7969_v56 = vsel %vm3986_vm6, %v7957_v28, %v10416_v33  ;;  %v10426_v2 = vunpack.i.l.bf16 %v10425_v21  ;;  %v14761_v33 = vld [vmem:[#allocation19_spill] sm:$0xff] }
0x1e29   : > { %10449 = vrot.lane.b32.xlu1 %v10448_v18, %s14756_s29  ;;  %v10431_v18 = vunpack.i.l.bf16 %v10430_v23 }
0x1e2a   : > { %v7676_v32 = vpop.f32.mrf.mxu0 }
0x1e2b   : > { %v10458_v31 = vpack.i.bf16 %v10076_v38, %v7676_v32  ;;  %v7970_v38 = vsel %vm3986_vm6, %v7958_v59, %v10417_v48 }
0x1e2d   : > { %10454 = vrot.lane.b32.xlu1 %v14758_v41, %s14746_s18  ;;  %10459 = vrot.lane.b32.xlu0 %v10458_v31, %s14756_s29  ;;  %v7959_v41 = vsel %vm1105_vm2, %v13469_v1, %v10421_v55  ;;  %v10436_v1 = vunpack.i.l.bf16 %v10435_v57  ;;  %s485_s18 = sand.u32 1, %s11124_s19  }
0x1e2e   : > { %s8826_s16 = scalar_lea.sflag [#allocation3], %s485_s18 }
0x1e30   : > { %v10084_v8 = vpop.f32.mrf.mxu1 }
0x1e31   : > { %10464 = vrot.lane.b32.xlu0 %v14759_v36, %s14749_s30 }
0x1e32   : > { %v7735_v49 = vpop.f32.mrf.mxu1 }
0x1e34   : > { %v10085_v27 = vpop.f32.mrf.mxu1 }
0x1e35   : > { %v7972_v27 = vsel %vm3986_vm6, %v7960_v13, %v10432_v4 }
0x1e36   : > { %v7738_v61 = vpop.f32.mrf.mxu1 }
0x1e37   : > { %v10468_v24 = vpack.i.bf16 %v7738_v61, %v7735_v49  ;;  %v7971_v49 = vsel %vm3986_vm6, %v7959_v41, %v10431_v18  ;;  %v14763_v18 = vld [vmem:[#allocation26_spill] sm:$0xff] }
0x1e39   : > { %v10092_v11 = vpop.f32.mrf.mxu0  ;;  %10469 = vrot.lane.b32.xlu1 %v10468_v24, %s14756_s29 }
0x1e3b   : > { %v7797_v46 = vpop.f32.mrf.mxu0 }
0x1e3c   : > { %v10478_v22 = vpack.i.bf16 %v7797_v46, %v10084_v8  ;;  %v10427_v46 = vunpack.i.h.bf16 %v10425_v21 }
0x1e3d   : > { %v10093_v3 = vpop.f32.mrf.mxu0  ;;  %10474 = vrot.lane.b32.xlu1 %v14760_v42, %s14749_s30  ;;  %s8902_s30 = sshll.u32 %s485_s18, 2 }
0x1e3e   : > { %10479 = vrot.lane.b32.xlu0 %v10478_v22, %s14756_s29  ;;  %v10437_v3 = vunpack.i.h.bf16 %v10435_v57  ;;  %v7962_v42 = vsel %vm1105_vm2, %v13459_v20, %v10427_v46  ;;  %s487_s26 = scalar_lea.vmem [#allocation2], %s8902_s30 }
0x1e3f   : > { %v7800_v29 = vpop.f32.mrf.mxu0  ;;  %s8839_s23 = sshll.u32 %s487_s26, 4  ;;  %s14565_s23 = int_to_ptr.vmem [resolvable:$true] %s8839_s23 }
0x1e40   : > { %v10483_v26 = vpack.i.bf16 %v10092_v11, %v7800_v29  ;;  %v7961_v29 = vsel %vm1105_vm2, %v13457_v7, %v10426_v2  ;;  %v7974_v30 = vsel %vm3986_vm6, %v7962_v42, %v10437_v3  ;;  %v14766_v42 = vld [vmem:[#allocation16_spill] sm:$0xff]  ;;  %s11072_s17 = scalar_lea.vmem %s14565_s23, 64 }
0x1e41   : > { %v7973_v45 = vsel %vm3986_vm6, %v7961_v29, %v10436_v1  ;;  %p11073_p11 = scmp.ne.s32.totalorder %s14565_s23, %s11072_s17 }
0x1e42   : > { %10484 = vrot.lane.b32.xlu1 %v10483_v26, %s14756_s29  ;;  %s9168_s29 = sshll.u32 %s11254_s22, 6  ;;  %s11152_s22 = smov [#allocation2]  }
0x1e43   : > { %s14563_s20 = scalar_lea.hbm %s14619_s15, %s9168_s29  ;;  %p11074_p12 = pnand %p11073_p11, %p11271_p5 }
0x1e44   : > { %s11076_s30 = sshll.u32 %s11152_s22, 4  ;;  %s11077_s30 = int_to_ptr.vmem [resolvable:$false] %s11076_s30 }
0x1e45   : > { %p11075_p13 = pneg %p11074_p12  ;;  %s11078_s24 = scalar_lea.vmem %s11077_s30, 128 }
0x1e46   : > { %p11079_p0 = scmp.lt.s32.totalorder %s14565_s23, %s11077_s30  ;;  %p11080_p1 = scmp.lt.s32.totalorder %s11078_s24, %s11072_s17 }
0x1e48   : > { %p11081_p2 = por %p11080_p1, %p11079_p0 }
0x1e4a   : > { %p11082_p3 = pnand %p11081_p2, %p11075_p13 }
0x1e88   : > { %v10440_v34 = vpop.permute.xlu0 %10439 }
0x1e89   : > { %v10442_v12 = vunpack.i.h.bf16 %v10440_v34  ;;  %v10441_v25 = vunpack.i.l.bf16 %v10440_v34 }
0x1e8b   : > { %v7980_v50 = vsel %vm1388_vm5, %v7968_v17, %v10442_v12  ;;  %v7979_v62 = vsel %vm1388_vm5, %v7967_v44, %v10441_v25 }
0x1e8c   : > { %v7991_v51 = vpack.c.bf16 %v7980_v50, %v7979_v62  ;;  %v10445_v16 = vpop.permute.xlu0 %10444 }
0x1e8d   : > { %v10447_v58 = vunpack.i.h.bf16 %v10445_v16  ;;  %v10446_v39 = vunpack.i.l.bf16 %v10445_v16 }
0x1e8e   : > { %10098 = vmatprep.mubr.msk.bf16.mxu1 %vm773_vm1, %v7991_v51 }
0x1e8f   : > { %v7964_v7 = vsel %vm1105_vm2, %v13478_v0, %v10447_v58  ;;  %v7963_v12 = vsel %vm1105_vm2, %v13455_v5, %v10446_v39 }
0x1e9b   : > { %v10450_v43 = vpop.permute.xlu1 %10449 }
0x1e9c   : > { %v10452_v9 = vunpack.i.h.bf16 %v10450_v43  ;;  %v10451_v60 = vunpack.i.l.bf16 %v10450_v43 }
0x1e9e   : > { %v7981_v54 = vsel %vm1388_vm5, %v7969_v56, %v10451_v60  ;;  %v7982_v32 = vsel %vm1388_vm5, %v7970_v38, %v10452_v9  ;;  %v14762_v38 = vld [vmem:[#allocation12_spill] sm:$0xff] }
0x1e9f   : > { %v7992_v53 = vpack.c.bf16 %v7982_v32, %v7981_v54  ;;  %v10460_v31 = vpop.permute.xlu0 %10459  ;;  %v10455_v22 = vpop.permute.xlu1 %10454  ;;  %v9128_v32 = vld [vmem:[%s14611_s7 + $0x1] ss:$0 sm:$0xff] }
0x1ea0   : > { %v10462_v8 = vunpack.i.h.bf16 %v10460_v31  ;;  %v10461_v36 = vunpack.i.l.bf16 %v10460_v31  ;;  %v10457_v44 = vunpack.i.h.bf16 %v10455_v22  ;;  %v10456_v17 = vunpack.i.l.bf16 %v10455_v22 }
0x1ea1   : > { %10099 = vmatmul.mubr.msk.bf16.vlgmr.msra.gmra.mxu1 %vm773_vm1, %v7992_v53 }
0x1ea2   : > { %v7984_v61 = vsel %vm1388_vm5, %v7972_v27, %v10462_v8  ;;  %v7983_v24 = vsel %vm1388_vm5, %v7971_v49, %v10461_v36  ;;  %v7966_v5 = vsel %vm1105_vm2, %v13471_v19, %v10457_v44  ;;  %v7965_v59 = vsel %vm1105_vm2, %v14761_v33, %v10456_v17  ;;  %v14764_v8 = vld [vmem:[#allocation13_spill] sm:$0xff]  ;;  %v14765_v49 = vld [vmem:[#allocation10_spill] sm:$0xff]  ;;  %v14770_v44 = vld [vmem:[#allocation20_spill] sm:$0xff] }
0x1ea3   : > { %v7993_v11 = vpack.c.bf16 %v7984_v61, %v7983_v24  ;;  %v10465_v26 = vpop.permute.xlu0 %10464 }
0x1ea4   : > { %v10467_v10 = vunpack.i.h.bf16 %v10465_v26  ;;  %v10466_v35 = vunpack.i.l.bf16 %v10465_v26  ;;  %v14767_v26 = vld [vmem:[#allocation11_spill] sm:$0xff] }
0x1ea5   : > { %10102 = vmatprep.mubr.msk.bf16.mxu1 %vm773_vm1, %v7993_v11 }
0x1ea6   : > { %v7976_v62 = vsel %vm3986_vm6, %v7964_v7, %v10467_v10  ;;  %v7975_v51 = vsel %vm3986_vm6, %v7963_v12, %v10466_v35  ;;  %v14769_v10 = vld [vmem:[#allocation14_spill] sm:$0xff] }
0x1eab   : > { %v10470_v6 = vpop.permute.xlu1 %10469 }
0x1eac   : > { %v10472_v23 = vunpack.i.h.bf16 %v10470_v6  ;;  %v10471_v40 = vunpack.i.l.bf16 %v10470_v6 }
0x1eae   : > { %v7985_v34 = vsel %vm1388_vm5, %v7973_v45, %v10471_v40  ;;  %v7986_v63 = vsel %vm1388_vm5, %v7974_v30, %v10472_v23  ;;  %v14768_v45 = vld [vmem:[#allocation17_spill] sm:$0xff] }
0x1eaf   : > { %v7994_v20 = vpack.c.bf16 %v7986_v63, %v7985_v34  ;;  %v10475_v52 = vpop.permute.xlu1 %10474 }
0x1eb0   : > { %v10480_v25 = vpop.permute.xlu0 %10479  ;;  %v10477_v21 = vunpack.i.h.bf16 %v10475_v52  ;;  %v10476_v47 = vunpack.i.l.bf16 %v10475_v52 }
0x1eb1   : > { %v10482_v15 = vunpack.i.h.bf16 %v10480_v25  ;;  %v10481_v50 = vunpack.i.l.bf16 %v10480_v25  ;;  %10103 = vmatmul.mubr.msk.bf16.gmra.mxu1 %vm773_vm1, %v7994_v20 }
0x1eb2   : > { %v7977_v43 = vsel %vm3986_vm6, %v7965_v59, %v10476_v47  ;;  %v7978_v14 = vsel %vm3986_vm6, %v7966_v5, %v10477_v21 }
0x1eb3   : > { %v7988_v37 = vsel %vm1388_vm5, %v7976_v62, %v10482_v15  ;;  %v7987_v0 = vsel %vm1388_vm5, %v7975_v51, %v10481_v50  ;;  %v14771_v15 = vld [vmem:[#allocation15_spill] sm:$0xff] }
0x1eb4   : > { %v7995_v57 = vpack.c.bf16 %v7988_v37, %v7987_v0  ;;  %v10485_v48 = vpop.permute.xlu1 %10484  ;;  %v14772_v0 = vld [vmem:[#allocation21_spill] sm:$0xff] }
0x1eb5   : > { %v10487_v28 = vunpack.i.h.bf16 %v10485_v48  ;;  %v10486_v16 = vunpack.i.l.bf16 %v10485_v48  ;;  %v14773_v48 = vld [vmem:[#allocation18_spill] sm:$0xff] }
0x1eb6   : > { %10106 = vmatprep.mubr.msk.bf16.mxu1 %vm773_vm1, %v7995_v57 }
0x1eb7   : > { %v7989_v55 = vsel %vm1388_vm5, %v7977_v43, %v10486_v16  ;;  %v7990_v9 = vsel %vm1388_vm5, %v7978_v14, %v10487_v28 }
0x1eb8   : > { %v7996_v60 = vpack.c.bf16 %v7990_v9, %v7989_v55 }
0x1eba   : > { %10107 = vmatmul.mubr.msk.bf16.gmra.mxu1 %vm773_vm1, %v7996_v60 }
0x1f61   : > { %v10100_v56 = vpop.f32.mrf.mxu1 }
0x1f62   : > { %v8115_v4 = vadd.f32 %v10100_v56, %v14762_v38 }
0x1f63   : > { %v8066_v19 = vpop.f32.mrf.mxu1 }
0x1f64   : > { %v8113_v54 = vadd.f32 %v8066_v19, %v14763_v18  ;;  %v14268_v41 = vadd.f32 %v9128_v32, %v8115_v4 }
0x1f65   : > { %v10101_v53 = vpop.f32.mrf.mxu1 }
0x1f66   : > { %v8133_v31 = vadd.f32 %v9128_v32, %v8113_v54  ;;  %v8116_v36 = vadd.f32 %v10101_v53, %v14764_v8  ;;  %v8151_v46 = vsel %vm773_vm1, %v14268_v41, 0.0 }
0x1f67   : > { %v8069_v13 = vpop.f32.mrf.mxu1 }
0x1f68   : > { %v8114_v27 = vadd.f32 %v8069_v13, %v14765_v49  ;;  %v8145_v61 = vsel %vm773_vm1, %v8133_v31, 0.0  ;;  %v14273_v11 = vadd.f32 %v9128_v32, %v8116_v36 }
0x1f69   : > { %8146 = vadd.xlane.f32.xlu0 %v8145_v61 }
0x1f6a   : > { %v8134_v24 = vadd.f32 %v9128_v32, %v8114_v27  ;;  %v8154_v22 = vsel %vm773_vm1, %v14273_v11, 0.0 }
0x1f6c   : > { %v8148_v2 = vsel %vm773_vm1, %v8134_v24, 0.0 }
0x1f6d   : > { %8152 = vadd.xlane.f32.xlu0 %v8151_v46  ;;  %8149 = vadd.xlane.f32.xlu1 %v8148_v2 }
0x1f71   : > { %8155 = vadd.xlane.f32.xlu0 %v8154_v22  ;;  %v10104_v3 = vpop.f32.mrf.mxu1 }
0x1f72   : > { %v8119_v29 = vadd.f32 %v10104_v3, %v14766_v42 }
0x1f73   : > { %v8082_v1 = vpop.f32.mrf.mxu1 }
0x1f74   : > { %v8117_v6 = vadd.f32 %v8082_v1, %v14767_v26  ;;  %v14282_v40 = vadd.f32 %v9128_v32, %v8119_v29 }
0x1f75   : > { %v10105_v58 = vpop.f32.mrf.mxu1 }
0x1f76   : > { %v8137_v39 = vadd.f32 %v9128_v32, %v8117_v6  ;;  %v8120_v30 = vadd.f32 %v10105_v58, %v14768_v45  ;;  %v8163_v12 = vsel %vm773_vm1, %v14282_v40, 0.0 }
0x1f77   : > { %v8085_v23 = vpop.f32.mrf.mxu1 }
0x1f78   : > { %v8118_v35 = vadd.f32 %v8085_v23, %v14769_v10  ;;  %v8157_v34 = vsel %vm773_vm1, %v8137_v39, 0.0  ;;  %v14289_v52 = vadd.f32 %v9128_v32, %v8120_v30 }
0x1f79   : > { %8158 = vadd.xlane.f32.xlu0 %v8157_v34 }
0x1f7a   : > { %v14287_v63 = vadd.f32 %v9128_v32, %v8118_v35  ;;  %v10108_v20 = vpop.f32.mrf.mxu1  ;;  %v8166_v47 = vsel %vm773_vm1, %v14289_v52, 0.0 }
0x1f7b   : > { %v8123_v17 = vadd.f32 %v10108_v20, %v14770_v44 }
0x1f7c   : > { %v8098_v7 = vpop.f32.mrf.mxu1  ;;  %v8160_v25 = vsel %vm773_vm1, %v14287_v63, 0.0 }
0x1f7d   : > { %v8121_v50 = vadd.f32 %v8098_v7, %v14771_v15  ;;  %8164 = vadd.xlane.f32.xlu0 %v8163_v12  ;;  %8161 = vadd.xlane.f32.xlu1 %v8160_v25  ;;  %v14301_v37 = vadd.f32 %v9128_v32, %v8123_v17 }
0x1f7e   : > { %v10109_v62 = vpop.f32.mrf.mxu1 }
0x1f7f   : > { %v14297_v51 = vadd.f32 %v9128_v32, %v8121_v50  ;;  %v8124_v57 = vadd.f32 %v10109_v62, %v14772_v0  ;;  %v8175_v16 = vsel %vm773_vm1, %v14301_v37, 0.0 }
0x1f80   : > { %v8101_v21 = vpop.f32.mrf.mxu1 }
0x1f81   : > { %v8122_v5 = vadd.f32 %v8101_v21, %v14773_v48  ;;  %8167 = vadd.xlane.f32.xlu1 %v8166_v47  ;;  %v8169_v33 = vsel %vm773_vm1, %v14297_v51, 0.0  ;;  %v14309_v28 = vadd.f32 %v9128_v32, %v8124_v57 }
0x1f82   : > { %8170 = vadd.xlane.f32.xlu0 %v8169_v33 }
0x1f83   : > { %v14307_v59 = vadd.f32 %v9128_v32, %v8122_v5  ;;  %v8178_v14 = vsel %vm773_vm1, %v14309_v28, 0.0 }
0x1f85   : > { %v8172_v43 = vsel %vm773_vm1, %v14307_v59, 0.0 }
0x1f86   : > { %8176 = vadd.xlane.f32.xlu0 %v8175_v16  ;;  %8173 = vadd.xlane.f32.xlu1 %v8172_v43 }
0x1f8a   : > { %8179 = vadd.xlane.f32.xlu1 %v8178_v14 }
0x1ff2   : > { %v8147_v55 = vpop.xlane.xlu0 %8146 }
0x1ff3   : > { %v8181_v9 = vmul.f32 0.03125, %v8147_v55  ;;  %v10532_v55 = vld [vmem:[%s14612_s8 + $0x18] sm:$0xff]  }
0x1ff4   : > { %10110 = vmatprep.subr.bf16.mxu0 %v10532_v55 }
0x1ff5   : > { %v14317_v60 = vsub.f32 %v8133_v31, %v8181_v9  ;;  %10111 = vmatpush3.bf16.msra.mxu0 %v10532_v55  ;;  %v10533_v9 = vld [vmem:[%s14612_s8 + $0x10] sm:$0xff]  }
0x1ff6   : > { %v8153_v56 = vpop.xlane.xlu0 %8152  ;;  %v8150_v19 = vpop.xlane.xlu1 %8149  ;;  %10112 = vmatprep.subr.bf16.mxu0 %v10533_v9 }
0x1ff7   : > { %v8183_v38 = vmul.f32 0.03125, %v8153_v56  ;;  %v8182_v4 = vmul.f32 0.03125, %v8150_v19  ;;  %v8205_v18 = vmul.f32 %v14317_v60, %v14317_v60 }
0x1ff9   : > { %v14322_v54 = vsub.f32 %v14268_v41, %v8183_v38  ;;  %v14324_v32 = vsub.f32 %v8134_v24, %v8182_v4  ;;  %v8217_v53 = vsel %vm773_vm1, %v8205_v18, 0.0  ;;  %10113 = vmatpush3.bf16.msra.mxu0 %v10533_v9 }
0x1ffa   : > { %v8156_v13 = vpop.xlane.xlu0 %8155  ;;  %8218 = vadd.xlane.f32.xlu0 %v8217_v53 }
0x1ffb   : > { %v8184_v8 = vmul.f32 0.03125, %v8156_v13  ;;  %v8207_v31 = vmul.f32 %v14322_v54, %v14322_v54  ;;  %v8206_v36 = vmul.f32 %v14324_v32, %v14324_v32 }
0x1ffd   : > { %v14332_v49 = vsub.f32 %v14273_v11, %v8184_v8  ;;  %v8223_v27 = vsel %vm773_vm1, %v8207_v31, 0.0  ;;  %v8220_v61 = vsel %vm773_vm1, %v8206_v36, 0.0 }
0x1ffe   : > { %8224 = vadd.xlane.f32.xlu0 %v8223_v27  ;;  %8221 = vadd.xlane.f32.xlu1 %v8220_v61 }
0x1fff   : > { %v8208_v24 = vmul.f32 %v14332_v49, %v14332_v49 }
0x2001   : > { %v8226_v46 = vsel %vm773_vm1, %v8208_v24, 0.0 }
0x2002   : > { %v8159_v2 = vpop.xlane.xlu0 %8158  ;;  %8227 = vadd.xlane.f32.xlu1 %v8226_v46 }
0x2003   : > { %v8185_v22 = vmul.f32 0.03125, %v8159_v2 }
0x2005   : > { %v14339_v3 = vsub.f32 %v8137_v39, %v8185_v22 }
0x2006   : > { %v8165_v1 = vpop.xlane.xlu0 %8164  ;;  %v8162_v42 = vpop.xlane.xlu1 %8161 }
0x2007   : > { %v8187_v11 = vmul.f32 0.03125, %v8165_v1  ;;  %v8186_v29 = vmul.f32 0.03125, %v8162_v42  ;;  %v8209_v26 = vmul.f32 %v14339_v3, %v14339_v3  ;;  %v11071_v1 = vld [vmem:[%s14607_s3 + $0x4] sm:$0xf]  ;;  %v14774_v42 = vld [vmem:[#allocation22_spill] sm:$0xff] }
0x2009   : > { %v14344_v6 = vsub.f32 %v14282_v40, %v8187_v11  ;;  %v14347_v58 = vsub.f32 %v14287_v63, %v8186_v29  ;;  %v8229_v23 = vsel %vm773_vm1, %v8209_v26, 0.0  ;;  %v14775_v11 = vsub.s32 2, %v14774_v42 }
0x200a   : > { %v8168_v45 = vpop.xlane.xlu1 %8167  ;;  %8230 = vadd.xlane.f32.xlu0 %v8229_v23 }
0x200b   : > { %v8188_v30 = vmul.f32 0.03125, %v8168_v45  ;;  %v8171_v39 = vpop.xlane.xlu0 %8170  ;;  %v8211_v10 = vmul.f32 %v14344_v6, %v14344_v6  ;;  %v8210_v35 = vmul.f32 %v14347_v58, %v14347_v58  ;;  %v14397_v29 = vrot.slane %v11071_v1, %v14775_v11 }
0x200c   : > { %v8189_v34 = vmul.f32 0.03125, %v8171_v39 }
0x200d   : > { %v14355_v20 = vsub.f32 %v14289_v52, %v8188_v30  ;;  %v8235_v40 = vsel %vm773_vm1, %v8211_v10, 0.0  ;;  %v8232_v7 = vsel %vm773_vm1, %v8210_v35, 0.0 }
0x200e   : > { %v14360_v12 = vsub.f32 %v14297_v51, %v8189_v34  ;;  %8236 = vadd.xlane.f32.xlu0 %v8235_v40  ;;  %8233 = vadd.xlane.f32.xlu1 %v8232_v7 }
0x200f   : > { %v8177_v25 = vpop.xlane.xlu0 %8176  ;;  %v8174_v44 = vpop.xlane.xlu1 %8173  ;;  %v8212_v17 = vmul.f32 %v14355_v20, %v14355_v20 }
0x2010   : > { %v8191_v15 = vmul.f32 0.03125, %v8177_v25  ;;  %v8190_v50 = vmul.f32 0.03125, %v8174_v44  ;;  %v8213_v52 = vmul.f32 %v14360_v12, %v14360_v12 }
0x2011   : > { %v8238_v62 = vsel %vm773_vm1, %v8212_v17, 0.0 }
0x2012   : > { %v14368_v21 = vsub.f32 %v14301_v37, %v8191_v15  ;;  %v14371_v47 = vsub.f32 %v14307_v59, %v8190_v50  ;;  %v8241_v0 = vsel %vm773_vm1, %v8213_v52, 0.0  ;;  %8239 = vadd.xlane.f32.xlu1 %v8238_v62  ;;  %v14776_v15 = vsub.s32 3, %v14774_v42 }
0x2013   : > { %8242 = vadd.xlane.f32.xlu0 %v8241_v0  ;;  %v8180_v57 = vpop.xlane.xlu1 %8179 }
0x2014   : > { %v8192_v48 = vmul.f32 0.03125, %v8180_v57  ;;  %v8215_v5 = vmul.f32 %v14368_v21, %v14368_v21  ;;  %v8214_v33 = vmul.f32 %v14371_v47, %v14371_v47  ;;  %v14405_v50 = vrot.slane %v11071_v1, %v14776_v15 }
0x2016   : > { %v14379_v16 = vsub.f32 %v14309_v28, %v8192_v48  ;;  %v8247_v37 = vsel %vm773_vm1, %v8215_v5, 0.0  ;;  %v8244_v59 = vsel %vm773_vm1, %v8214_v33, 0.0 }
0x2017   : > { %8248 = vadd.xlane.f32.xlu0 %v8247_v37  ;;  %8245 = vadd.xlane.f32.xlu1 %v8244_v59 }
0x2018   : > { %v8216_v43 = vmul.f32 %v14379_v16, %v14379_v16 }
0x201a   : > { %v8250_v14 = vsel %vm773_vm1, %v8216_v43, 0.0 }
0x201b   : > { %8251 = vadd.xlane.f32.xlu1 %v8250_v14 }
0x2083   : > { %v8219_v56 = vpop.xlane.xlu0 %8218 }
0x2084   : > { %v8253_v19 = vmul.f32 0.03125, %v8219_v56 }
0x2086   : > { %v8265_v38 = vadd.f32 1e-06, %v8253_v19 }
0x2087   : > { %v8225_v4 = vpop.xlane.xlu0 %8224  ;;  %v8222_v18 = vpop.xlane.xlu1 %8221 }
0x2088   : > { %11020 = vrsqrt.f32 %v8265_v38  ;;  %v8255_v53 = vmul.f32 0.03125, %v8225_v4  ;;  %v8254_v13 = vmul.f32 0.03125, %v8222_v18 }
0x208a   : > { %v8267_v8 = vadd.f32 1e-06, %v8255_v53  ;;  %v8266_v31 = vadd.f32 1e-06, %v8254_v13 }
0x208b   : > { %v8228_v36 = vpop.xlane.xlu1 %8227 }
0x208c   : > { %11022 = vrsqrt.f32 %v8267_v8  ;;  %v8256_v27 = vmul.f32 0.03125, %v8228_v36 }
0x208d   : > { %11024 = vrsqrt.f32 %v8266_v31 }
0x208e   : > { %v8268_v61 = vadd.f32 1e-06, %v8256_v27 }
0x2090   : > { %11026 = vrsqrt.f32 %v8268_v61 }
0x2093   : > { %v8231_v24 = vpop.xlane.xlu0 %8230 }
0x2094   : > { %v8257_v46 = vmul.f32 0.03125, %v8231_v24 }
0x2095   : > { %v11021_v2 = vpop.eup %11020 }
0x2096   : > { %v8269_v22 = vadd.f32 1e-06, %v8257_v46  ;;  %v8289_v45 = vmul.f32 %v11021_v2, %v14317_v60 }
0x2097   : > { %v8237_v26 = vpop.xlane.xlu0 %8236  ;;  %v8234_v23 = vpop.xlane.xlu1 %8233 }
0x2098   : > { %11028 = vrsqrt.f32 %v8269_v22  ;;  %v8259_v30 = vmul.f32 0.03125, %v8237_v26  ;;  %v8258_v39 = vmul.f32 0.03125, %v8234_v23  ;;  %v8305_v17 = vmul.f32 %v14397_v29, %v8289_v45 }
0x2099   : > { %v11023_v10 = vpop.eup %11022 }
0x209a   : > { %v11025_v35 = vpop.eup %11024  ;;  %v8291_v34 = vmul.f32 %v11023_v10, %v14322_v54  ;;  %v8271_v40 = vadd.f32 1e-06, %v8259_v30  ;;  %v8270_v7 = vadd.f32 1e-06, %v8258_v39  ;;  %v8321_v33 = vadd.f32 %v14405_v50, %v8305_v17 }
0x209b   : > { %v8240_v25 = vpop.xlane.xlu1 %8239  ;;  %v8290_v44 = vmul.f32 %v11025_v35, %v14324_v32 }
0x209c   : > { %11030 = vrsqrt.f32 %v8271_v40  ;;  %v8243_v60 = vpop.xlane.xlu0 %8242  ;;  %v8260_v52 = vmul.f32 0.03125, %v8240_v25  ;;  %v8307_v54 = vmul.f32 %v14397_v29, %v8291_v34 }
0x209d   : > { %v11027_v62 = vpop.eup %11026  ;;  %11032 = vrsqrt.f32 %v8270_v7  ;;  %v8261_v0 = vmul.f32 0.03125, %v8243_v60  ;;  %v8306_v57 = vmul.f32 %v14397_v29, %v8290_v44 }
0x209e   : > { %v8292_v48 = vmul.f32 %v11027_v62, %v14332_v49  ;;  %v8272_v5 = vadd.f32 1e-06, %v8260_v52  ;;  %v8323_v19 = vadd.f32 %v14405_v50, %v8307_v54  ;;  %v14460_v54 = vld [vmem:[%s14613_s9 + $0x1] ss:$0 sm:$0xff] }
0x209f   : > { %v8273_v32 = vadd.f32 1e-06, %v8261_v0  ;;  %v8322_v37 = vadd.f32 %v14405_v50, %v8306_v57  ;;  %v10537_v57 = vld [vmem:[%s14614_s10 + $0x20] sm:$0xff]  }
0x20a0   : > { %v8308_v59 = vmul.f32 %v14397_v29, %v8292_v48  ;;  %11034 = vrsqrt.f32 %v8272_v5  ;;  %v8249_v43 = vpop.xlane.xlu0 %8248  ;;  %v8246_v14 = vpop.xlane.xlu1 %8245 }
0x20a1   : > { %11036 = vrsqrt.f32 %v8273_v32  ;;  %v8263_v55 = vmul.f32 0.03125, %v8249_v43  ;;  %v8262_v9 = vmul.f32 0.03125, %v8246_v14  ;;  %v8333_v56 = vpack.c.bf16 %v8322_v37, %v8321_v33 }
0x20a2   : > { %v8324_v38 = vadd.f32 %v14405_v50, %v8308_v59 }
0x20a3   : > { %v8275_v49 = vadd.f32 1e-06, %v8263_v55  ;;  %v8274_v4 = vadd.f32 1e-06, %v8262_v9  ;;  %10114 = vmatprep.mubr.msk.bf16.mxu0 %vm773_vm1, %v8333_v56 }
0x20a4   : > { %v8252_v18 = vpop.xlane.xlu1 %8251  ;;  %v8334_v53 = vpack.c.bf16 %v8324_v38, %v8323_v19 }
0x20a5   : > { %v11029_v13 = vpop.eup %11028  ;;  %11038 = vrsqrt.f32 %v8275_v49  ;;  %v8264_v8 = vmul.f32 0.03125, %v8252_v18 }
0x20a6   : > { %11040 = vrsqrt.f32 %v8274_v4  ;;  %10115 = vmatmul.mubr.msk.bf16.vlgmr.msra.gmra.mxu0 %vm773_vm1, %v8334_v53  ;;  %v8293_v36 = vmul.f32 %v11029_v13, %v14339_v3 }
0x20a7   : > { %v8276_v31 = vadd.f32 1e-06, %v8264_v8 }
0x20a8   : > { %v8309_v2 = vmul.f32 %v14397_v29, %v8293_v36 }
0x20a9   : > { %v11031_v27 = vpop.eup %11030  ;;  %11042 = vrsqrt.f32 %v8276_v31 }
0x20aa   : > { %v11033_v61 = vpop.eup %11032  ;;  %v8295_v24 = vmul.f32 %v11031_v27, %v14344_v6  ;;  %v8325_v23 = vadd.f32 %v14405_v50, %v8309_v2 }
0x20ab   : > { %v8294_v46 = vmul.f32 %v11033_v61, %v14347_v58 }
0x20ac   : > { %v8311_v26 = vmul.f32 %v14397_v29, %v8295_v24 }
0x20ad   : > { %v11035_v22 = vpop.eup %11034  ;;  %v8310_v1 = vmul.f32 %v14397_v29, %v8294_v46 }
0x20ae   : > { %v11037_v42 = vpop.eup %11036  ;;  %v8296_v11 = vmul.f32 %v11035_v22, %v14355_v20  ;;  %v8327_v39 = vadd.f32 %v14405_v50, %v8311_v26 }
0x20af   : > { %v8326_v3 = vadd.f32 %v14405_v50, %v8310_v1  ;;  %v8297_v6 = vmul.f32 %v11037_v42, %v14360_v12 }
0x20b0   : > { %v8312_v45 = vmul.f32 %v14397_v29, %v8296_v11 }
0x20b1   : > { %v8335_v30 = vpack.c.bf16 %v8326_v3, %v8325_v23  ;;  %v8313_v7 = vmul.f32 %v14397_v29, %v8297_v6 }
0x20b2   : > { %v11039_v58 = vpop.eup %11038  ;;  %v8328_v10 = vadd.f32 %v14405_v50, %v8312_v45 }
0x20b3   : > { %v11041_v35 = vpop.eup %11040  ;;  %v8299_v34 = vmul.f32 %v11039_v58, %v14368_v21  ;;  %10118 = vmatprep.mubr.msk.bf16.mxu0 %vm773_vm1, %v8335_v30  ;;  %v8329_v15 = vadd.f32 %v14405_v50, %v8313_v7 }
0x20b4   : > { %v8336_v20 = vpack.c.bf16 %v8328_v10, %v8327_v39  ;;  %v8298_v40 = vmul.f32 %v11041_v35, %v14371_v47 }
0x20b5   : > { %v8315_v17 = vmul.f32 %v14397_v29, %v8299_v34 }
0x20b6   : > { %v11043_v25 = vpop.eup %11042  ;;  %10119 = vmatmul.mubr.msk.bf16.gmra.mxu0 %vm773_vm1, %v8336_v20  ;;  %v8314_v12 = vmul.f32 %v14397_v29, %v8298_v40 }
0x20b7   : > { %v8300_v44 = vmul.f32 %v11043_v25, %v14379_v16  ;;  %v8331_v47 = vadd.f32 %v14405_v50, %v8315_v17  ;;  %v10534_v16 = vld [vmem:[%s14614_s10 + $0x38] sm:$0xff]  }
0x20b8   : > { %v8330_v21 = vadd.f32 %v14405_v50, %v8314_v12  ;;  %10126 = vmatprep.subr.bf16.mxu1 %v10534_v16 }
0x20b9   : > { %v8316_v60 = vmul.f32 %v14397_v29, %v8300_v44  ;;  %10127 = vmatpush3.bf16.msra.mxu1 %v10534_v16  ;;  %v10535_v29 = vld [vmem:[%s14614_s10 + $0x30] sm:$0xff]  }
0x20ba   : > { %v8337_v52 = vpack.c.bf16 %v8330_v21, %v8329_v15  ;;  %10128 = vmatprep.subr.bf16.mxu1 %v10535_v29 }
0x20bb   : > { %v8332_v62 = vadd.f32 %v14405_v50, %v8316_v60  ;;  %v10536_v50 = vld [vmem:[%s14614_s10 + $0x28] sm:$0xff]  }
0x20bc   : > { %10122 = vmatprep.mubr.msk.bf16.mxu0 %vm773_vm1, %v8337_v52 }
0x20bd   : > { %v8338_v0 = vpack.c.bf16 %v8332_v62, %v8331_v47  ;;  %10129 = vmatpush3.bf16.msra.mxu1 %v10535_v29 }
0x20be   : > { %10130 = vmatprep.subr.bf16.mxu1 %v10536_v50 }
0x20bf   : > { %10123 = vmatmul.mubr.msk.bf16.gmra.mxu0 %vm773_vm1, %v8338_v0 }
0x20c1   : > { %10131 = vmatpush3.bf16.msra.mxu1 %v10536_v50 }
0x20c2   : > { %10132 = vmatprep.subr.bf16.mxu1 %v10537_v57 }
0x20c5   : > { %10133 = vmatpush3.bf16.msra.mxu1 %v10537_v57 }
0x2166   : > { %v10116_v48 = vpop.f32.mrf.mxu0 }
0x2167   : > { %v14463_v5 = vadd.f32 %v10116_v48, %v14460_v54 }
0x2168   : > { %v8416_v32 = vpop.f32.mrf.mxu0 }
0x2169   : > { %v8477_v33 = vmul.f32 0.044715, %v14463_v5  ;;  %v8417_v37 = vadd.f32 %v14460_v54, %v8416_v32 }
0x216a   : > { %v10117_v59 = vpop.f32.mrf.mxu0 }
0x216b   : > { %v8489_v43 = vmul.f32 %v8477_v33, %v14463_v5  ;;  %v8475_v14 = vmul.f32 0.044715, %v8417_v37  ;;  %v8428_v55 = vadd.f32 %v10117_v59, %v14460_v54  ;;  %v8463_v29 = vmul.f32 0.5, %v8417_v37 }
0x216c   : > { %v8419_v9 = vpop.f32.mrf.mxu0 }
0x216d   : > { %v8501_v56 = vmul.f32 %v8489_v43, %v14463_v5  ;;  %v8487_v19 = vmul.f32 %v8475_v14, %v8417_v37  ;;  %v8478_v38 = vmul.f32 0.044715, %v8428_v55  ;;  %v8420_v49 = vadd.f32 %v14460_v54, %v8419_v9 }
0x216e   : > { %v8466_v57 = vmul.f32 0.5, %v8428_v55 }
0x216f   : > { %v8513_v4 = vadd.f32 %v8501_v56, %v14463_v5  ;;  %v8499_v18 = vmul.f32 %v8487_v19, %v8417_v37  ;;  %v8490_v53 = vmul.f32 %v8478_v38, %v8428_v55  ;;  %v8476_v13 = vmul.f32 0.044715, %v8420_v49 }
0x2171   : > { %v8525_v8 = vmul.f32 0.7978846, %v8513_v4  ;;  %v8511_v31 = vadd.f32 %v8499_v18, %v8417_v37  ;;  %v8502_v36 = vmul.f32 %v8490_v53, %v8428_v55  ;;  %v8488_v27 = vmul.f32 %v8476_v13, %v8420_v49 }
0x2173   : > { %v8523_v61 = vmul.f32 0.7978846, %v8511_v31  ;;  %v8514_v24 = vadd.f32 %v8502_v36, %v8428_v55  ;;  %v8500_v46 = vmul.f32 %v8488_v27, %v8420_v49  ;;  %11044 = vtanh.f32 %v8525_v8 }
0x2174   : > { %v8464_v55 = vmul.f32 0.5, %v8420_v49 }
0x2175   : > { %v8526_v2 = vmul.f32 0.7978846, %v8514_v24  ;;  %11046 = vtanh.f32 %v8523_v61  ;;  %v8512_v22 = vadd.f32 %v8500_v46, %v8420_v49 }
0x2176   : > { %v10120_v1 = vpop.f32.mrf.mxu0 }
0x2177   : > { %11048 = vtanh.f32 %v8526_v2  ;;  %v14473_v42 = vadd.f32 %v10120_v1, %v14460_v54  ;;  %v8524_v11 = vmul.f32 0.7978846, %v8512_v22  ;;  %v8465_v2 = vmul.f32 0.5, %v14463_v5 }
0x2178   : > { %v8432_v26 = vpop.f32.mrf.mxu0 }
0x2179   : > { %v8481_v23 = vmul.f32 0.044715, %v14473_v42  ;;  %v14477_v3 = vadd.f32 %v14460_v54, %v8432_v26  ;;  %11050 = vtanh.f32 %v8524_v11 }
0x217a   : > { %v10121_v45 = vpop.f32.mrf.mxu0 }
0x217b   : > { %v8493_v6 = vmul.f32 %v8481_v23, %v14473_v42  ;;  %v8479_v30 = vmul.f32 0.044715, %v14477_v3  ;;  %v14482_v58 = vadd.f32 %v10121_v45, %v14460_v54 }
0x217c   : > { %v8435_v39 = vpop.f32.mrf.mxu0 }
0x217d   : > { %v8505_v10 = vmul.f32 %v8493_v6, %v14473_v42  ;;  %v8491_v35 = vmul.f32 %v8479_v30, %v14477_v3  ;;  %v8482_v34 = vmul.f32 0.044715, %v14482_v58  ;;  %v14488_v20 = vadd.f32 %v14460_v54, %v8435_v39 }
0x217f   : > { %v8517_v40 = vadd.f32 %v8505_v10, %v14473_v42  ;;  %v8503_v7 = vmul.f32 %v8491_v35, %v14477_v3  ;;  %v8494_v25 = vmul.f32 %v8482_v34, %v14482_v58  ;;  %v10124_v12 = vpop.f32.mrf.mxu0  ;;  %v8480_v44 = vmul.f32 0.044715, %v14488_v20 }
0x2180   : > { %v14495_v17 = vadd.f32 %v10124_v12, %v14460_v54  ;;  %v11045_v47 = vpop.eup %11044 }
0x2181   : > { %v8529_v15 = vmul.f32 0.7978846, %v8517_v40  ;;  %v8515_v21 = vadd.f32 %v8503_v7, %v14477_v3  ;;  %v8506_v60 = vmul.f32 %v8494_v25, %v14482_v58  ;;  %v8448_v52 = vpop.f32.mrf.mxu0  ;;  %v8492_v62 = vmul.f32 %v8480_v44, %v14488_v20 }
0x2182   : > { %v8485_v0 = vmul.f32 0.044715, %v14495_v17  ;;  %v14502_v16 = vadd.f32 %v14460_v54, %v8448_v52  ;;  %v11047_v50 = vpop.eup %11046  ;;  %v8549_v31 = vadd.f32 1.0, %v11045_v47 }
0x2183   : > { %11052 = vtanh.f32 %v8529_v15  ;;  %v8527_v48 = vmul.f32 0.7978846, %v8515_v21  ;;  %v8518_v32 = vadd.f32 %v8506_v60, %v14482_v58  ;;  %v10125_v33 = vpop.f32.mrf.mxu0  ;;  %v8504_v43 = vmul.f32 %v8492_v62, %v14488_v20 }
0x2184   : > { %v11049_v59 = vpop.eup %11048  ;;  %v8497_v14 = vmul.f32 %v8485_v0, %v14495_v17  ;;  %v8483_v9 = vmul.f32 0.044715, %v14502_v16  ;;  %v14509_v56 = vadd.f32 %v10125_v33, %v14460_v54  ;;  %v8547_v13 = vadd.f32 1.0, %v11047_v50 }
0x2185   : > { %v8550_v19 = vadd.f32 1.0, %v11049_v59  ;;  %11054 = vtanh.f32 %v8527_v48  ;;  %v8530_v37 = vmul.f32 0.7978846, %v8518_v32  ;;  %v8451_v38 = vpop.f32.mrf.mxu0  ;;  %v8516_v4 = vadd.f32 %v8504_v43, %v14488_v20 }
0x2186   : > { %v8509_v18 = vmul.f32 %v8497_v14, %v14495_v17  ;;  %v8495_v53 = vmul.f32 %v8483_v9, %v14502_v16  ;;  %v11051_v8 = vpop.eup %11050  ;;  %v8486_v36 = vmul.f32 0.044715, %v14509_v56  ;;  %v8452_v27 = vadd.f32 %v14460_v54, %v8451_v38 }
0x2187   : > { %11056 = vtanh.f32 %v8530_v37  ;;  %v8528_v61 = vmul.f32 0.7978846, %v8516_v4  ;;  %v8548_v49 = vadd.f32 1.0, %v11051_v8  ;;  %v8562_v22 = vmul.f32 %v8550_v19, %v8466_v57 }
0x2188   : > { %v8521_v24 = vadd.f32 %v8509_v18, %v14495_v17  ;;  %v8507_v46 = vmul.f32 %v8495_v53, %v14502_v16  ;;  %v8498_v1 = vmul.f32 %v8486_v36, %v14509_v56  ;;  %v8484_v11 = vmul.f32 0.044715, %v8452_v27 }
0x2189   : > { %11058 = vtanh.f32 %v8528_v61  ;;  %v8559_v23 = vmul.f32 %v8547_v13, %v8463_v29  ;;  %v8560_v45 = vmul.f32 %v8548_v49, %v8464_v55  ;;  %v8561_v6 = vmul.f32 %v8549_v31, %v8465_v2 }
0x218a   : > { %v8519_v26 = vadd.f32 %v8507_v46, %v14502_v16  ;;  %v8510_v54 = vmul.f32 %v8498_v1, %v14509_v56  ;;  %v8496_v30 = vmul.f32 %v8484_v11, %v8452_v27  ;;  %v8533_v39 = vmul.f32 0.7978846, %v8521_v24 }
0x218b   : > { %v8571_v35 = vpack.c.bf16 %v8560_v45, %v8559_v23  ;;  %v8572_v34 = vpack.c.bf16 %v8562_v22, %v8561_v6  ;;  %v8470_v62 = vmul.f32 0.5, %v14482_v58  ;;  %v8467_v29 = vmul.f32 0.5, %v14477_v3 }
0x218c   : > { %v8531_v10 = vmul.f32 0.7978846, %v8519_v26  ;;  %v8522_v40 = vadd.f32 %v8510_v54, %v14509_v56  ;;  %v8508_v5 = vmul.f32 %v8496_v30, %v8452_v27  ;;  %v8468_v50 = vmul.f32 0.5, %v14488_v20  ;;  %v9162_v26 = vld [vmem:[%s14615_s11 + $0x1] ss:$0 sm:$0xff] }
0x218d   : > { %10134 = vmatprep.mubr.msk.bf16.mxu1 %vm672_vm0, %v8571_v35  ;;  %v8469_v48 = vmul.f32 0.5, %v14473_v42  ;;  %v8474_v20 = vmul.f32 0.5, %v14509_v56  ;;  %v8471_v42 = vmul.f32 0.5, %v14502_v16  ;;  %v8472_v18 = vmul.f32 0.5, %v8452_v27 }
0x218e   : > { %11060 = vtanh.f32 %v8531_v10  ;;  %v8534_v7 = vmul.f32 0.7978846, %v8522_v40  ;;  %v8520_v25 = vadd.f32 %v8508_v5, %v8452_v27  ;;  %10135 = vmatmul.mubr.msk.bf16.vlgmr.msra.gmra.mxu1 %vm672_vm0, %v8572_v34  ;;  %v8473_v13 = vmul.f32 0.5, %v14495_v17 }
0x218f   : > { %11062 = vtanh.f32 %v8533_v39 }
0x2190   : > { %v11053_v12 = vpop.eup %11052  ;;  %11064 = vtanh.f32 %v8534_v7  ;;  %v8532_v44 = vmul.f32 0.7978846, %v8520_v25 }
0x2191   : > { %v8553_v0 = vadd.f32 1.0, %v11053_v12 }
0x2192   : > { %v11055_v15 = vpop.eup %11054  ;;  %11066 = vtanh.f32 %v8532_v44 }
0x2193   : > { %v8551_v52 = vadd.f32 1.0, %v11055_v15  ;;  %v8565_v43 = vmul.f32 %v8553_v0, %v8469_v48  ;;  %v10539_v0 = vld [vmem:[%s14617_s13] sm:$0xff]  }
0x2194   : > { %v11057_v21 = vpop.eup %11056  ;;  %v8732_v48 = vld [vmem:[%s14616_s12] sm:$0x3] }
0x2195   : > { %v8554_v60 = vadd.f32 1.0, %v11057_v21  ;;  %v8563_v33 = vmul.f32 %v8551_v52, %v8467_v29 }
0x2196   : > { %v11059_v47 = vpop.eup %11058 }
0x2197   : > { %v8552_v57 = vadd.f32 1.0, %v11059_v47  ;;  %v8566_v32 = vmul.f32 %v8554_v60, %v8470_v62  ;;  %v11150_v62 = vmov 0.0  }
0x2198   : > { %10146 = vmatprep.subr.bf16.mxu0 %v11150_v62  ;;  %10150 = vmatprep.mubr.msk.bf16.mxu0 %vm11151_vm11, %v11150_v62 }
0x2199   : > { %v8564_v59 = vmul.f32 %v8552_v57, %v8468_v50  ;;  %v8574_v37 = vpack.c.bf16 %v8566_v32, %v8565_v43  ;;  %v14777_v32 = vld [vmem:[#allocation23_spill] sm:$0xff]  ;;  %v14778_v43 = vld [vmem:[#allocation24_spill] sm:$0xff] }
0x219b   : > { %v11061_v14 = vpop.eup %11060  ;;  %v8573_v9 = vpack.c.bf16 %v8564_v59, %v8563_v33  ;;  %v8750_v33 = vrot.slane %v8732_v48, %v14777_v32 }
0x219c   : > { %v11063_v19 = vpop.eup %11062  ;;  %v8555_v58 = vadd.f32 1.0, %v11061_v14  ;;  %v8755_v14 = vrot.slane %v8732_v48, %v14778_v43 }
0x219d   : > { %v11065_v38 = vpop.eup %11064  ;;  %10138 = vmatprep.mubr.msk.bf16.mxu1 %vm672_vm0, %v8573_v9  ;;  %v8557_v4 = vadd.f32 1.0, %v11063_v19 }
0x219e   : > { %10139 = vmatmul.mubr.msk.bf16.gmra.mxu1 %vm672_vm0, %v8574_v37  ;;  %v8558_v3 = vadd.f32 1.0, %v11065_v38  ;;  %v8567_v31 = vmul.f32 %v8555_v58, %v8471_v42  ;;  %v9163_v58 = vld [vmem:[%s14618_s14] ss:$0 sm:$0xff] }
0x219f   : > { %v11067_v55 = vpop.eup %11066  ;;  %v8569_v61 = vmul.f32 %v8557_v4, %v8473_v13 }
0x21a0   : > { %v8556_v53 = vadd.f32 1.0, %v11067_v55  ;;  %v8570_v8 = vmul.f32 %v8558_v3, %v8474_v20 }
0x21a2   : > { %v8568_v36 = vmul.f32 %v8556_v53, %v8472_v18  ;;  %v8576_v46 = vpack.c.bf16 %v8570_v8, %v8569_v61 }
0x21a4   : > { %v8575_v24 = vpack.c.bf16 %v8568_v36, %v8567_v31 }
0x21a6   : > { %10142 = vmatprep.mubr.msk.bf16.mxu1 %vm672_vm0, %v8575_v24 }
0x21a7   : > { %10143 = vmatmul.mubr.msk.bf16.gmra.mxu1 %vm672_vm0, %v8576_v46 }
0x224e   : > { %v10136_v49 = vpop.f32.mrf.mxu1 }
0x224f   : > { %v8701_v6 = vadd.f32 %v10136_v49, %v14268_v41 }
0x2250   : > { %v8662_v2 = vpop.f32.mrf.mxu1 }
0x2251   : > { %v8713_v40 = vadd.f32 %v9162_v26, %v8701_v6 }
0x2252   : > { %v10137_v56 = vpop.f32.mrf.mxu1 }
0x2254   : > { %v8664_v22 = vpop.f32.mrf.mxu1 }
0x225e   : > { %v10140_v1 = vpop.f32.mrf.mxu1 }
0x2260   : > { %v8675_v16 = vpop.f32.mrf.mxu1 }
0x2262   : > { %v10141_v27 = vpop.f32.mrf.mxu1 }
0x2264   : > { %v8677_v11 = vpop.f32.mrf.mxu1 }
0x2265   : > { %v8702_v17 = vadd.f32 %v8677_v11, %v14287_v63 }
0x2267   : > { %v8714_v23 = vadd.f32 %v9162_v26, %v8702_v17  ;;  %v10144_v45 = vpop.f32.mrf.mxu1 }
0x2269   : > { %v8688_v54 = vpop.f32.mrf.mxu1  ;;  %v8718_v39 = vrot.slane %v8714_v23, 7 }
0x226a   : > { %v8703_v30 = vadd.f32 %v8688_v54, %v14297_v51 }
0x226b   : > { %v10145_v10 = vpop.f32.mrf.mxu1  ;;  %v8727_v25 = vsel %vm8726_vm7, %v8713_v40, %v8718_v39 }
0x226c   : > { %v8715_v35 = vadd.f32 %v9162_v26, %v8703_v30  ;;  %v8704_v34 = vadd.f32 %v10145_v10, %v14309_v28  ;;  %v10538_v28 = vld [vmem:[%s14617_s13 + $0x8] sm:$0xff]  }
0x226d   : > { %v8691_v5 = vpop.f32.mrf.mxu1  ;;  %10147 = vmatpush3.bf16.msra.mxu0 %v10538_v28 }
0x226e   : > { %v8721_v63 = vrot.slane %v8715_v35, 6  ;;  %v8716_v7 = vadd.f32 %v9162_v26, %v8704_v34  ;;  %10148 = vmatprep.subr.bf16.mxu0 %v11150_v62 }
0x2270   : > { %v8724_v12 = vrot.slane %v8716_v7, 5  ;;  %v8729_v44 = vsel %vm8728_vm8, %v8727_v25, %v8721_v63 }
0x2271   : > { %10149 = vmatpush3.bf16.msra.mxu0 %v10539_v0 }
0x2272   : > { %v8731_v41 = vsel %vm8730_vm9, %v8729_v44, %v8724_v12 }
0x2273   : > { %v8734_v15 = vsel %vm8733_vm10, %v8731_v41, 0.0 }
0x2274   : > { %8735 = vadd.xlane.f32.xlu0 %v8734_v15 }
0x22fd   : > { %v8736_v51 = vpop.xlane.xlu0 %8735 }
0x22fe   : > { %v8737_v21 = vmul.f32 0.03125, %v8736_v51 }
0x2300   : > { %v8738_v60 = vsub.f32 %v8731_v41, %v8737_v21 }
0x2302   : > { %v8739_v52 = vmul.f32 %v8738_v60, %v8738_v60 }
0x2304   : > { %v8740_v47 = vsel %vm8733_vm10, %v8739_v52, 0.0 }
0x2305   : > { %8741 = vadd.xlane.f32.xlu1 %v8740_v47 }
0x238e   : > { %v8742_v29 = vpop.xlane.xlu1 %8741 }
0x238f   : > { %v8743_v50 = vmul.f32 0.03125, %v8742_v29 }
0x2391   : > { %v8744_v57 = vadd.f32 1e-06, %v8743_v50 }
0x2393   : > { %11068 = vrsqrt.f32 %v8744_v57 }
0x23a0   : > { %v11069_v59 = vpop.eup %11068 }
0x23a1   : > { %v8746_v9 = vmul.f32 %v11069_v59, %v8738_v60 }
0x23a3   : > { %v8751_v19 = vmul.f32 %v8750_v33, %v8746_v9 }
0x23a5   : > { %v8756_v37 = vadd.f32 %v8755_v14, %v8751_v19 }
0x23a7   : > { %v8757_v38 = vpack.c.bf16 %v8756_v37, %v8756_v37 }
0x23a9   : > { %10151 = vmatmul.mubr.msk.bf16.vlgmr.msra.gmra.mxu0 %vm773_vm1, %v8757_v38 }
0x2469   : > { %v8818_v3 = vpop.f32.mrf.mxu0 }
0x246a   : > { %v8819_v55 = vadd.f32 %v9163_v58, %v8818_v3 }
0x246b   : > { %v10152_v20 = vpop.f32.mrf.mxu0 }
0x246c   : > { %8824 = vst [vmem:[%s487_s26] sm:$0xf] %v8819_v55 }
0x246d   : > { %v8821_v4 = vpop.f32.mrf.mxu0 }
0x246e   : > { %11085 = shalt.err (!%p11082_p3)
}
0x246f   : > { %s11086_s29 = scalar_lea.hbm %s14563_s20, 64  ;;  %s11090_s25 = scalar_lea.hbm %s14619_s15, 128 }
0x2470   : > { %p11087_p4 = scmp.ne.s32.totalorder %s14563_s20, %s11086_s29  ;;  %p11091_p9 = scmp.lt.s32.totalorder %s14563_s20, %s14619_s15 }
0x2471   : > { %p11092_p10 = scmp.lt.s32.totalorder %s11090_s25, %s11086_s29 }
0x2472   : > { %p11088_p7 = pnand %p11087_p4, %p11271_p5 }
0x2473   : > { %p11093_p11 = por %p11092_p10, %p11091_p9 }
0x2474   : > { %p11089_p8 = pneg %p11088_p7 }
0x2476   : > { %p11094_p12 = pnand %p11093_p11, %p11089_p8 }
0x2478   : > { %11097 = shalt.err (!%p11094_p12)
}
0x2479   : > { %10251 = dma.vmem_to_hbm [thread:$0]  (%p11271_p5), %s14565_s23, 64, %s14563_s20, %s8826_s16   ;;  %v10153_v42 = vpop.f32.mrf.mxu0 }
0x247a PF: > { %s14779_s17 = sld [smem:[#allocation5_spill]]  ;;  %p10257_p13 = scmp.ge.s32.totalorder %s11132_s21, 2 }
0x247c   : > { %p10254_p0 = pnand %p10257_p13, %p11275_p6 }
0x247e   : > { %p10255_p1 = pneg %p10254_p0 }
0x2480   : > { %s8851_s24 = sand.u32 1, %s14779_s17  }
0x2481   : > { %s8852_s18 = scalar_lea.sflag [#allocation3], %s8851_s24 }
0x2482   : > { %11115 = dma.done.wait (%p10255_p1), %s8852_s18, 64  }
0x2483   : > { %11117 = vsyncadd (%p10255_p1), %s8852_s18, 4294967232  ;;  %s14781_s21 = sld [smem:[#allocation7_spill]]  ;;  %s14784_s18 = smov %s11124_s19 }
0x2484   : > { %s14782_s29 = sld [smem:[#allocation6_spill]] }
0x2485   : > { %s14783_s20 = sld [smem:[#allocation8_spill]] }
0x2489   : > { %p25_p2 = scmp.ge.s32.totalorder %s14781_s21, 4  }
0x248a   : > { %s14785_s19 = smov %s14782_s29 }
0x248b   :  { %27 = sbr.rel (!%p25_p2) target bundleno = 3 (0x3), region = 124 }
0x2490   :  { %8857 = vsyncpa [#allocation3], 1 }
0x2491   :  { %8859 = vsyncpa [#allocation3 + $0x1], 1 }

</bundles_post_ra>
